<compile_context>
chip_gen: v7x
topology: tpu7x:2x2x1
jax: 0.10.0
libtpu: 0.0.40
codegen_flags: <defaults>
</compile_context>

<pallas_src>
import numpy as np
import jax
import jax.numpy as jnp
from jax.experimental import pallas as pl
from jax.experimental.pallas import tpu as pltpu

PART = 6            # self.part
FEAT = 2048         # resnet50 layer4 output channels
BOTTLENECK = 256    # ClassBlock num_bottleneck
EMBED = 256         # embed_i: nn.Linear(2048, 256)
WIDE = BOTTLENECK + EMBED   # concatenated W1'|We output width
NUM_CLASSES = 128   # constructor argument (chosen for this synthetic run)
LRELU_SLOPE = 0.1   # standard PCB ClassBlock LeakyReLU slope
BN_EPS = 1e-5


# ---------------------------------------------------------------------------
# Kernel 1: fused backbone-stand-in stem (pointwise conv + ReLU) and
#           AdaptiveAvgPool2d((PART, 1)).
# TODO(synk): the full pretrained ResNet50 backbone (conv1..layer4 with the
# stride-1 hack) is not translated; a single pointwise conv stem stands in.
# ---------------------------------------------------------------------------
def stem_pool_kernel(x_ref, w_ref, b_ref, q_ref, o_ref, acc_ref):
    r = pl.program_id(1)

    @pl.when(r == 0)
    def _():
        acc_ref[...] = jnp.zeros_like(acc_ref)

    x = x_ref[...]                                  # (tile_rows, cin) f32
    cin = x.shape[1]
    # K=cin (=3) pointwise conv on the VPU: broadcast multiply-adds instead of
    # a <2.5%-utilization MXU pass; keeps the MXU free for the pool matmul.
    acc = x[:, 0:1] * w_ref[0:1, :]
    for c in range(1, cin):                          # static unroll (cin tiny)
        acc = acc + x[:, c:c + 1] * w_ref[c:c + 1, :]
    feats = jnp.maximum(acc + b_ref[...], 0.0)       # (tile_rows, FEAT) ReLU

    # Part pooling: (PART, tile_rows) @ (tile_rows, FEAT) on the MXU,
    # accumulated in a VMEM scratch -> the feature map never touches HBM.
    acc_ref[...] += jnp.dot(q_ref[...], feats,
                            preferred_element_type=jnp.float32)

    @pl.when(r == pl.num_programs(1) - 1)
    def _():
        o_ref[...] = acc_ref[...].astype(o_ref.dtype)   # bf16 pooled features


def run_stem_pool(x_bhwc, w_stem, b_stem, qmat, *, max_tile_rows=512):
    b, hw, cin = x_bhwc.shape
    part = qmat.shape[0]
    feat = w_stem.shape[1]
    tile_rows = hw if hw <= max_tile_rows else max_tile_rows
    assert hw % tile_rows == 0
    if tile_rows != hw:
        assert tile_rows % 128 == 0
    return pl.pallas_call(
        stem_pool_kernel,
        out_shape=jax.ShapeDtypeStruct((b, part, feat), jnp.bfloat16),
        grid=(b, hw // tile_rows),
        in_specs=[
            pl.BlockSpec((None, tile_rows, cin), lambda i, r: (i, r, 0)),  # x
            pl.BlockSpec((cin, feat), lambda i, r: (0, 0)),                # w_stem
            pl.BlockSpec((1, feat), lambda i, r: (0, 0)),                  # b_stem
            pl.BlockSpec((part, tile_rows), lambda i, r: (0, r)),          # Q
        ],
        out_specs=pl.BlockSpec((None, part, feat), lambda i, r: (i, 0, 0)),
        scratch_shapes=[pltpu.VMEM((part, feat), jnp.float32)],
        compiler_params=pltpu.CompilerParams(
            dimension_semantics=("parallel", "arbitrary")),
    )(x_bhwc, w_stem, b_stem, qmat)


def adaptive_pool_matrix(h, w, part):
    """Weights Q[p, h*W + w] so Q @ flat(feat) == AdaptiveAvgPool2d((part,1))."""
    q = np.zeros((part, h * w), dtype=np.float32)
    for p in range(part):
        start = (p * h) // part
        end = -(-((p + 1) * h) // part)  # ceil
        q[p, start * w:end * w] = 1.0 / ((end - start) * w)
    return jnp.asarray(q)


# ---------------------------------------------------------------------------
# Kernel 2: per-part heads (grid over the 6 parts).
#   classifier_i (ClassBlock): Linear(2048,256) -> BatchNorm1d -> LeakyReLU
#                              -> Linear(256, num_classes)
#   embed_i:                   Linear(2048, 256)
# BN is folded into Linear1 on the host; W1' and We are concatenated so each
# part issues a single (B,2048)@(2048,512) bf16 matmul with f32 accumulation.
# ---------------------------------------------------------------------------
def heads_kernel(f_ref, wc_ref, bc_ref, w2_ref, b2_ref, logits_ref, emb_ref):
    f = f_ref[...]                                           # (B, 2048) bf16
    h_all = jnp.dot(f, wc_ref[...],
                    preferred_element_type=jnp.float32) + bc_ref[...]  # (B, 512)
    emb_ref[...] = h_all[:, BOTTLENECK:]                     # embed branch
    h = h_all[:, :BOTTLENECK]                                # folded BN already applied
    h = jnp.where(h > 0, h, LRELU_SLOPE * h)                 # LeakyReLU
    logits_ref[...] = (jnp.dot(h.astype(jnp.bfloat16), w2_ref[...],
                               preferred_element_type=jnp.float32)
                       + b2_ref[...])


def run_heads(pooled_2d, wc, bc, w2, b2):
    b = pooled_2d.shape[0]
    part, feat, wide = wc.shape
    nc = w2.shape[-1]
    return pl.pallas_call(
        heads_kernel,
        out_shape=(jax.ShapeDtypeStruct((part, b, nc), jnp.float32),
                   jax.ShapeDtypeStruct((part, b, EMBED), jnp.float32)),
        grid=(part,),
        in_specs=[
            pl.BlockSpec((b, feat), lambda p: (0, p)),                # pooled, part p
            pl.BlockSpec((None, feat, wide), lambda p: (p, 0, 0)),    # [W1'|We] bf16
            pl.BlockSpec((None, 1, wide), lambda p: (p, 0, 0)),       # [b1'|be] f32
            pl.BlockSpec((None, BOTTLENECK, nc), lambda p: (p, 0, 0)),# W2 bf16
            pl.BlockSpec((None, 1, nc), lambda p: (p, 0, 0)),         # b2 f32
        ],
        out_specs=(
            pl.BlockSpec((None, b, nc), lambda p: (p, 0, 0)),
            pl.BlockSpec((None, b, EMBED), lambda p: (p, 0, 0)),
        ),
        # PART axis "parallel" -> shards across the two v7x TensorCores.
        # No vmem_limit override: double-buffered working set is ~4.3 MiB.
        compiler_params=pltpu.CompilerParams(
            dimension_semantics=("parallel",)),
    )(pooled_2d, wc, bc, w2, b2)


def prepare_head_params(params):
    """One-time host-side weight prep (do at load time, not per forward):
    fold BN into Linear1, concatenate W1'|We, cast big weights to bf16."""
    bn_scale = params["bn_scale"]                    # (PART, 1, BOTTLENECK)
    bn_shift = params["bn_shift"]
    w1_folded = params["w1"] * bn_scale              # (PART, FEAT, BOTTLENECK)
    b1_folded = params["b1"] * bn_scale + bn_shift   # (PART, 1, BOTTLENECK)
    wc = jnp.concatenate([w1_folded, params["we"]], axis=-1).astype(jnp.bfloat16)
    bc = jnp.concatenate([b1_folded, params["be"]], axis=-1)        # f32
    return {"wc": wc, "bc": bc,
            "w2": params["w2"].astype(jnp.bfloat16), "b2": params["b2"]}


# ---------------------------------------------------------------------------
# Full PCB forward (glue in plain JAX, hot paths in the kernels above).
# ---------------------------------------------------------------------------
def pcb_forward(x_nchw, params, prepared=None):
    if prepared is None:
        prepared = prepare_head_params(params)
    b, cin, h, w = x_nchw.shape
    # NCHW -> (B, H*W, Cin)  (tiny input, negligible transpose)
    x_bhwc = jnp.transpose(x_nchw, (0, 2, 3, 1)).reshape(b, h * w, cin)

    qmat = adaptive_pool_matrix(h, w, PART)
    pooled = run_stem_pool(x_bhwc, params["w_stem"], params["b_stem"], qmat)
    # pool_c's Dropout(p=0.5) is identity at eval => feats_c == feats_e.
    # Free (metadata-only) reshape: heads kernel indexes part p as a lane-
    # aligned (B, 2048) column block -> no host transpose between kernels.
    pooled_2d = pooled.reshape(b, PART * FEAT)                      # bf16

    logits, embs = run_heads(pooled_2d, prepared["wc"], prepared["bc"],
                             prepared["w2"], prepared["b2"])
    logits_list = [logits[i] for i in range(PART)]                  # (B, NUM_CLASSES)
    embeddings_list = [embs[i] for i in range(PART)]                # (B, 256)
    return logits_list, embeddings_list


def pcb_forward_reference(x_nchw, params):
    """Pure-JAX f32 reference of the same math, for a sanity check."""
    b, cin, h, w = x_nchw.shape
    x_flat = jnp.transpose(x_nchw, (0, 2, 3, 1)).reshape(b * h * w, cin)
    feats = jnp.maximum(x_flat @ params["w_stem"] + params["b_stem"], 0.0)
    feats = feats.reshape(b, h * w, FEAT)
    qmat = adaptive_pool_matrix(h, w, PART)
    pooled = jnp.einsum("ph,bhc->pbc", qmat, feats)                 # (PART, B, 2048)
    logits_list, emb_list = [], []
    for i in range(PART):
        f = pooled[i]
        hdd = f @ params["w1"][i] + params["b1"][i]
        hdd = hdd * params["bn_scale"][i] + params["bn_shift"][i]
        hdd = jnp.where(hdd > 0, hdd, LRELU_SLOPE * hdd)
        logits_list.append(hdd @ params["w2"][i] + params["b2"][i])
        emb_list.append(f @ params["we"][i] + params["be"][i])
    return logits_list, emb_list


def make_params(key, cin):
    ks = jax.random.split(key, 12)
    gamma = 1.0 + 0.1 * jax.random.normal(ks[4], (PART, 1, BOTTLENECK), jnp.float32)
    beta = 0.1 * jax.random.normal(ks[5], (PART, 1, BOTTLENECK), jnp.float32)
    rmean = 0.1 * jax.random.normal(ks[6], (PART, 1, BOTTLENECK), jnp.float32)
    rvar = jnp.abs(1.0 + 0.1 * jax.random.normal(ks[7], (PART, 1, BOTTLENECK), jnp.float32))
    bn_scale = gamma / jnp.sqrt(rvar + BN_EPS)
    bn_shift = beta - rmean * bn_scale
    return {
        "w_stem": 0.05 * jax.random.normal(ks[0], (cin, FEAT), jnp.float32),
        "b_stem": 0.05 * jax.random.normal(ks[1], (1, FEAT), jnp.float32),
        "w1": 0.02 * jax.random.normal(ks[2], (PART, FEAT, BOTTLENECK), jnp.float32),
        "b1": 0.02 * jax.random.normal(ks[3], (PART, 1, BOTTLENECK), jnp.float32),
        "bn_scale": bn_scale,
        "bn_shift": bn_shift,
        "w2": 0.05 * jax.random.normal(ks[8], (PART, BOTTLENECK, NUM_CLASSES), jnp.float32),
        "b2": 0.05 * jax.random.normal(ks[9], (PART, 1, NUM_CLASSES), jnp.float32),
        "we": 0.02 * jax.random.normal(ks[10], (PART, FEAT, EMBED), jnp.float32),
        "be": 0.02 * jax.random.normal(ks[11], (PART, 1, EMBED), jnp.float32),
    }


if __name__ == "__main__":
    B, CIN, H, W = 2, 3, 16, 16
    key = jax.random.PRNGKey(0)
    kx, kp = jax.random.split(key)
    x = jax.random.normal(kx, (B, CIN, H, W), dtype=jnp.float32)
    params = make_params(kp, CIN)

    # One-time weight preparation (BN fold + concat + bf16 cast).
    prepared = prepare_head_params(params)
    jax.block_until_ready(prepared)

    logits_list, embeddings_list = pcb_forward(x, params, prepared)
    jax.block_until_ready(logits_list)
    jax.block_until_ready(embeddings_list)

    # Sanity check against a pure-JAX f32 reference (loose tol for bf16 weights).
    ref_logits, ref_embs = pcb_forward_reference(x, params)
    for a, r in zip(logits_list, ref_logits):
        np.testing.assert_allclose(np.asarray(a), np.asarray(r), rtol=5e-2, atol=5e-2)
    for a, r in zip(embeddings_list, ref_embs):
        np.testing.assert_allclose(np.asarray(a), np.asarray(r), rtol=5e-2, atol=5e-2)

    assert len(logits_list) == PART and len(embeddings_list) == PART
    assert logits_list[0].shape == (B, NUM_CLASSES)
    assert embeddings_list[0].shape == (B, EMBED)
    print("KERNEL_OK")
</pallas_src>

<mosaic_0001>
module attributes {stable_mosaic.version = 11 : i64} {
  func.func @stem_pool_kernel(%arg0: i32, %arg1: i32, %arg2: memref<1x256x3xf32, #tpu.memory_space<vmem>>, %arg3: memref<3x2048xf32, #tpu.memory_space<vmem>>, %arg4: memref<1x2048xf32, #tpu.memory_space<vmem>>, %arg5: memref<6x256xf32, #tpu.memory_space<vmem>>, %arg6: memref<1x6x2048xbf16, #tpu.memory_space<vmem>>, %arg7: memref<6x2048xf32, #tpu.memory_space<vmem>>) attributes {dimension_semantics = [#tpu.dimension_semantics<parallel>, #tpu.dimension_semantics<arbitrary>], iteration_bounds = array<i64: 2, 1>, scalar_prefetch = 0 : i64, scratch_operands = 1 : i64, tpu.core_type = #tpu.core_type<tc>, window_params = [{transform_indices = @transform_0, window_bounds = array<i64: 1, 256, 3>}, {pipeline_mode = #tpu.pipeline_mode<synchronous>, transform_indices = @transform_1, window_bounds = array<i64: 3, 2048>}, {pipeline_mode = #tpu.pipeline_mode<synchronous>, transform_indices = @transform_2, window_bounds = array<i64: 1, 2048>}, {transform_indices = @transform_3, window_bounds = array<i64: 6, 256>}, {transform_indices = @transform_4, window_bounds = array<i64: 1, 6, 2048>}]} {
    %c0_i32 = arith.constant 0 : i32
    %0 = arith.cmpi eq, %arg1, %c0_i32 : i32
    %1 = arith.extui %0 : i1 to i32
    %c0_i32_0 = arith.constant 0 : i32
    %2 = arith.cmpi ne, %1, %c0_i32_0 : i32
    scf.if %2 {
      %cst_18 = arith.constant 0.000000e+00 : f32
      %35 = vector.broadcast %cst_18 : f32 to vector<6x2048xf32>
      %c0_19 = arith.constant 0 : index
      %c0_20 = arith.constant 0 : index
      %36 = vector.load %arg7[%c0_19, %c0_20] : memref<6x2048xf32, #tpu.memory_space<vmem>>, vector<6x2048xf32>
      tpu.vector_store %arg7[%c0_19, %c0_20], %35 {strides = array<i32>} : memref<6x2048xf32, #tpu.memory_space<vmem>>, vector<6x2048xf32>,
    } else {
    }
    %c0 = arith.constant 0 : index
    %c0_1 = arith.constant 0 : index
    %c0_2 = arith.constant 0 : index
    %3 = vector.load %arg2[%c0, %c0_1, %c0_2] : memref<1x256x3xf32, #tpu.memory_space<vmem>>, vector<1x256x3xf32>
    %4 = vector.shape_cast %3 : vector<1x256x3xf32> to vector<256x3xf32>
    %5 = vector.extract_strided_slice %4 {offsets = [0, 0], sizes = [256, 1], strides = [1, 1]} : vector<256x3xf32> to vector<256x1xf32>
    %c0_3 = arith.constant 0 : index
    %c0_4 = arith.constant 0 : index
    %6 = vector.load %arg3[%c0_3, %c0_4] : memref<3x2048xf32, #tpu.memory_space<vmem>>, vector<1x2048xf32>
    %7 = vector.broadcast %5 : vector<256x1xf32> to vector<256x2048xf32>
    %8 = vector.broadcast %6 : vector<1x2048xf32> to vector<256x2048xf32>
    %9 = arith.mulf %7, %8 : vector<256x2048xf32>
    %10 = vector.extract_strided_slice %4 {offsets = [0, 1], sizes = [256, 1], strides = [1, 1]} : vector<256x3xf32> to vector<256x1xf32>
    %c1 = arith.constant 1 : index
    %c0_5 = arith.constant 0 : index
    %11 = vector.load %arg3[%c1, %c0_5] : memref<3x2048xf32, #tpu.memory_space<vmem>>, vector<1x2048xf32>
    %12 = vector.broadcast %10 : vector<256x1xf32> to vector<256x2048xf32>
    %13 = vector.broadcast %11 : vector<1x2048xf32> to vector<256x2048xf32>
    %14 = arith.mulf %12, %13 : vector<256x2048xf32>
    %15 = arith.addf %9, %14 : vector<256x2048xf32>
    %16 = vector.extract_strided_slice %4 {offsets = [0, 2], sizes = [256, 1], strides = [1, 1]} : vector<256x3xf32> to vector<256x1xf32>
    %c2 = arith.constant 2 : index
    %c0_6 = arith.constant 0 : index
    %17 = vector.load %arg3[%c2, %c0_6] : memref<3x2048xf32, #tpu.memory_space<vmem>>, vector<1x2048xf32>
    %18 = vector.broadcast %16 : vector<256x1xf32> to vector<256x2048xf32>
    %19 = vector.broadcast %17 : vector<1x2048xf32> to vector<256x2048xf32>
    %20 = arith.mulf %18, %19 : vector<256x2048xf32>
    %21 = arith.addf %15, %20 : vector<256x2048xf32>
    %c0_7 = arith.constant 0 : index
    %c0_8 = arith.constant 0 : index
    %22 = vector.load %arg4[%c0_7, %c0_8] : memref<1x2048xf32, #tpu.memory_space<vmem>>, vector<1x2048xf32>
    %23 = vector.broadcast %22 : vector<1x2048xf32> to vector<256x2048xf32>
    %24 = arith.addf %21, %23 : vector<256x2048xf32>
    %cst = arith.constant 0.000000e+00 : f32
    %25 = vector.broadcast %cst : f32 to vector<256x2048xf32>
    %26 = arith.maximumf %24, %25 : vector<256x2048xf32>
    %c0_9 = arith.constant 0 : index
    %c0_10 = arith.constant 0 : index
    %27 = vector.load %arg7[%c0_9, %c0_10] : memref<6x2048xf32, #tpu.memory_space<vmem>>, vector<6x2048xf32>
    %c0_11 = arith.constant 0 : index
    %c0_12 = arith.constant 0 : index
    %28 = vector.load %arg5[%c0_11, %c0_12] : memref<6x256xf32, #tpu.memory_space<vmem>>, vector<6x256xf32>
    %cst_13 = arith.constant dense<0.000000e+00> : vector<6x2048xf32>
    %29 = tpu.matmul %28, %26, %cst_13 {dimension_numbers = #tpu.dot_dimension_numbers<[1], [0], [0], [1], [0, 0, 1, 1], [], []>} : vector<6x256xf32>, vector<256x2048xf32>, vector<6x2048xf32> -> vector<6x2048xf32>
    %30 = arith.addf %27, %29 : vector<6x2048xf32>
    %c0_14 = arith.constant 0 : index
    %c0_15 = arith.constant 0 : index
    %31 = vector.load %arg7[%c0_14, %c0_15] : memref<6x2048xf32, #tpu.memory_space<vmem>>, vector<6x2048xf32>
    tpu.vector_store %arg7[%c0_14, %c0_15], %30 {strides = array<i32>} : memref<6x2048xf32, #tpu.memory_space<vmem>>, vector<6x2048xf32>,
    %c0_i32_16 = arith.constant 0 : i32
    %32 = arith.cmpi eq, %arg1, %c0_i32_16 : i32
    %33 = arith.extui %32 : i1 to i32
    %c0_i32_17 = arith.constant 0 : i32
    %34 = arith.cmpi ne, %33, %c0_i32_17 : i32
    scf.if %34 {
      %c0_18 = arith.constant 0 : index
      %c0_19 = arith.constant 0 : index
      %35 = vector.load %arg7[%c0_18, %c0_19] : memref<6x2048xf32, #tpu.memory_space<vmem>>, vector<6x2048xf32>
      %36 = arith.truncf %35 : vector<6x2048xf32> to vector<6x2048xbf16>
      %c0_20 = arith.constant 0 : index
      %c0_21 = arith.constant 0 : index
      %c0_22 = arith.constant 0 : index
      %37 = vector.load %arg6[%c0_20, %c0_21, %c0_22] : memref<1x6x2048xbf16, #tpu.memory_space<vmem>>, vector<1x6x2048xbf16>
      %38 = vector.shape_cast %37 : vector<1x6x2048xbf16> to vector<6x2048xbf16>
      %39 = vector.shape_cast %36 : vector<6x2048xbf16> to vector<1x6x2048xbf16>
      tpu.vector_store %arg6[%c0_20, %c0_21, %c0_22], %39 {strides = array<i32>} : memref<1x6x2048xbf16, #tpu.memory_space<vmem>>, vector<1x6x2048xbf16>,
    } else {
    }
    return
  }
  func.func @transform_0(%arg0: i32, %arg1: i32) -> (i32, i32, i32) {
    %c0_i32 = arith.constant 0 : i32
    %c0_i32_0 = arith.constant 0 : i32
    return %arg0, %arg1, %c0_i32 : i32, i32, i32
  }
  func.func @transform_1(%arg0: i32, %arg1: i32) -> (i32, i32) {
    %c0_i32 = arith.constant 0 : i32
    %c0_i32_0 = arith.constant 0 : i32
    %c0_i32_1 = arith.constant 0 : i32
    return %c0_i32, %c0_i32_0 : i32, i32
  }
  func.func @transform_2(%arg0: i32, %arg1: i32) -> (i32, i32) {
    %c0_i32 = arith.constant 0 : i32
    %c0_i32_0 = arith.constant 0 : i32
    %c0_i32_1 = arith.constant 0 : i32
    return %c0_i32, %c0_i32_0 : i32, i32
  }
  func.func @transform_3(%arg0: i32, %arg1: i32) -> (i32, i32) {
    %c0_i32 = arith.constant 0 : i32
    %c0_i32_0 = arith.constant 0 : i32
    return %c0_i32, %arg1 : i32, i32
  }
  func.func @transform_4(%arg0: i32, %arg1: i32) -> (i32, i32, i32) {
    %c0_i32 = arith.constant 0 : i32
    %c0_i32_0 = arith.constant 0 : i32
    %c0_i32_1 = arith.constant 0 : i32
    return %arg0, %c0_i32, %c0_i32_0 : i32, i32, i32
  }
}

</mosaic_0001>

<bundles_post_ra>
// kernel: tpu_custom_call.1
= control target key start
LH: loop header
LB: loop body
LE: loop exit
PB: predicated region body
PF: predicated region fallthrough
CT: control target
= control target key end

     0   :  { %s6131_s15 = smov 0   ;;  %s6133_s16 = smov 0   ;;  %s10999_s0 = inlined_call_operand.vmem [shape: f32[2,256,3], index: 0, kind: input, shape index: {}]   ;;  %s11000_s1 = inlined_call_operand.vmem [shape: f32[3,2048], index: 1, kind: input, shape index: {}]   ;;  %s11001_s2 = inlined_call_operand.vmem [shape: f32[1,2048], index: 2, kind: input, shape index: {}]   ;;  %s11002_s3 = inlined_call_operand.vmem [shape: f32[6,256], index: 3, kind: input, shape index: {}]   ;;  %s11003_s4 = inlined_call_operand.vmem [shape: bf16[2,6,2048], index: 4, kind: output, shape index: {}]  }
   0x1   :  { %s6135_s17 = smov 0  }
   0x2 LB: > { %s26_s18 = sadd.s32 1, %s6096_s16  ;;  %p5440_p0 = scmp.ge.s32.totalorder %s6100_s17, 1  ;;  %s6100_s17 = sphi %s6135_s17, %s14_s17   ;;  %s6096_s16 = sphi %s6133_s16, %s12118_s16   ;;  %s6092_s15 = sphi %s6131_s15, %s12117_s15  }
   0x3   : > { %p28_p1 = scmp.ge.s32.totalorder %s26_s18, 2  ;;  %p192_p2 = scmp.lt.s32.totalorder %s6100_s17, 3 }
   0x5   : > { %s12120_s18 = smov (%p28_p1, %s26_s18), 0  ;;  %p193_p3 = pnand %p5440_p0, %p192_p2 }
   0x7   : > { %196 = sbr.rel (%p193_p3) target bundleno = 1376 (0x560), region = 36 }
   0xe   : > { %p228_p4 = scmp.lt.s32.totalorder %s6092_s15, 1  ;;  %v11004_v0 = vmov 1   ;;  %v11006_v1 = vmov 0   ;;  %v11008_v5 = vmov 2   ;;  %v465_v30 = vlaneseq  ;;  %v6256_v37 = vld [vmem:[%s11000_s1] ss:$4 sm:$0xff] }
   0xf   : > { %6011 = vset.pattern.permute.xlu1 %v11004_v0  ;;  %6010 = vset.pattern.permute.xlu0 %v11006_v1  ;;  %v6261_v38 = vld [vmem:[%s11000_s1 + $0x1] ss:$4 sm:$0xff]  ;;  %v6281_v44 = vld [vmem:[%s11000_s1 + $0x2] ss:$4 sm:$0xff] }
  0x10   : > { %s12122_s15 = smov (!%p228_p4, %s6092_s15), 1  ;;  %v466_v33 = vshrl.u32 %v465_v30, 7  ;;  %v6290_v46 = vld [vmem:[%s11001_s2] sm:$0xff] }
  0x11   : > { %s5460_s19 = sshll.u32 %s12122_s15, 8 }
  0x12   : > { %s6157_s22 = scalar_lea.vmem %s10999_s0, %s5460_s19  ;;  %v6249_v35 = vsub.s32 1, %v466_v33  ;;  %v6251_v36 = vsub.s32 3, %v466_v33  ;;  %v6263_v39 = vsub.s32 0, %v466_v33  ;;  %v6265_v40 = vsub.s32 2, %v466_v33  ;;  %s5461_s19 = sshll.u32 %s12122_s15, 6 }
  0x13   : > { %v6160_v2 = vld [vmem:[%s6157_s22] sm:$0xff]  ;;  %v269_v3 = vld [vmem:[%s6157_s22 + $0x8] sm:$0xff]  ;;  %v271_v4 = vld [vmem:[%s6157_s22 + $0x18] sm:$0xff]  ;;  %v6300_v49 = vsub.s32 5, %v466_v33  ;;  %v6302_v50 = vsub.s32 7, %v466_v33  ;;  %v6316_v54 = vsub.s32 4, %v466_v33 }
  0x14   : > { %1062 = vperm.xlu1 %6011, %v6160_v2   ;;  %305 = vperm.xlu0 %6010, %v6160_v2   ;;  %v273_v6 = vld [vmem:[%s6157_s22 + $0x28] sm:$0xff]  ;;  %v270_v7 = vld [vmem:[%s6157_s22 + $0x10] sm:$0xff]  ;;  %v275_v8 = vld [vmem:[%s6157_s22 + $0x38] sm:$0xff]  ;;  %11438 = vst [vmem:[#allocation7_spill] sm:$0xff] %v6249_v35  ;;  %v6272_v42 = vrot.slane %v6256_v37, %v6249_v35  ;;  %v6276_v43 = vrot.slane %v6261_v38, %v6249_v35 }
  0x15   : > { %v277_v9 = vld [vmem:[%s6157_s22 + $0x48] sm:$0xff]  ;;  %v6174_v10 = vld [vmem:[%s6157_s22 + $0x58] sm:$0xff]  ;;  %v272_v13 = vld [vmem:[%s6157_s22 + $0x20] sm:$0xff]  ;;  %11439 = vst [vmem:[#allocation8_spill] sm:$0xff] %v6251_v36  ;;  %v6285_v45 = vrot.slane %v6256_v37, %v6251_v36  ;;  %v6294_v47 = vrot.slane %v6261_v38, %v6251_v36  ;;  %v6298_v48 = vrot.slane %v6256_v37, %v6263_v39  ;;  %v6306_v51 = vrot.slane %v6261_v38, %v6263_v39 }
  0x16   : > { %v6178_v11 = vld [vmem:[%s6157_s22 + $0x68] sm:$0xff]  ;;  %v6183_v12 = vld [vmem:[%s6157_s22 + $0x78] sm:$0xff]  ;;  %v274_v18 = vld [vmem:[%s6157_s22 + $0x30] sm:$0xff]  ;;  %11440 = vst [vmem:[#allocation9_spill] sm:$0xff] %v6263_v39  ;;  %v6310_v52 = vrot.slane %v6256_v37, %v6265_v40  ;;  %v6314_v53 = vrot.slane %v6261_v38, %v6265_v40  ;;  %v6320_v55 = vrot.slane %v6281_v44, %v6249_v35  ;;  %v6324_v56 = vrot.slane %v6281_v44, %v6251_v36 }
  0x17   : > { %v6189_v14 = vld [vmem:[%s6157_s22 + $0x88] sm:$0xff]  ;;  %v6194_v15 = vld [vmem:[%s6157_s22 + $0x98] sm:$0xff]  ;;  %v276_v23 = vld [vmem:[%s6157_s22 + $0x40] sm:$0xff]  ;;  %11441 = vst [vmem:[#allocation10_spill] sm:$0xff] %v6265_v40  ;;  %v6328_v57 = vrot.slane %v6281_v44, %v6263_v39  ;;  %v6332_v58 = vrot.slane %v6281_v44, %v6265_v40  ;;  %v6342_v62 = vrot.slane %v6290_v46, %v6249_v35  ;;  %v6346_v63 = vrot.slane %v6290_v46, %v6251_v36 }
  0x18   : > { %1066 = vperm.xlu1 %6011, %v269_v3   ;;  %310 = vperm.xlu0 %6010, %v269_v3   ;;  %11434 = vst [vmem:[#allocation3_spill] sm:$0xff] %v6194_v15  ;;  %v6198_v16 = vld [vmem:[%s6157_s22 + $0xa8] sm:$0xff]  ;;  %v291_v17 = vld [vmem:[%s6157_s22 + $0xb8] sm:$0xff]  ;;  %v278_v24 = vld [vmem:[%s6157_s22 + $0x50] sm:$0xff] }
  0x19   : > { %11435 = vst [vmem:[#allocation4_spill] sm:$0xff] %v6198_v16  ;;  %v293_v19 = vld [vmem:[%s6157_s22 + $0xc8] sm:$0xff]  ;;  %v295_v20 = vld [vmem:[%s6157_s22 + $0xd8] sm:$0xff]  ;;  %v280_v25 = vld [vmem:[%s6157_s22 + $0x60] sm:$0xff] }
  0x1a   : > { %v297_v21 = vld [vmem:[%s6157_s22 + $0xe8] sm:$0xff]  ;;  %v299_v22 = vld [vmem:[%s6157_s22 + $0xf8] sm:$0xff]  ;;  %v6222_v26 = vld [vmem:[%s6157_s22 + $0x70] sm:$0xff]  ;;  %11442 = vst [vmem:[#allocation11_spill] sm:$0xff] %v6294_v47 }
  0x1b   : > { %v6227_v27 = vld [vmem:[%s6157_s22 + $0x80] sm:$0xff]  ;;  %v6233_v28 = vld [vmem:[%s6157_s22 + $0x90] sm:$0xff]  ;;  %11443 = vst [vmem:[#allocation12_spill] sm:$0xff] %v6300_v49  ;;  %11444 = vst [vmem:[#allocation13_spill] sm:$0xff] %v6302_v50 }
  0x1c   : > { %6012 = vset.pattern.permute.xlu1 %v11008_v5  ;;  %320 = vperm.xlu0 %6010, %v271_v4   ;;  %v6238_v29 = vld [vmem:[%s6157_s22 + $0xa0] sm:$0xff]  ;;  %v6242_v31 = vld [vmem:[%s6157_s22 + $0xb0] sm:$0xff]  ;;  %11445 = vst [vmem:[#allocation14_spill] sm:$0xff] %v6306_v51  ;;  %11446 = vst [vmem:[#allocation15_spill] sm:$0xff] %v6310_v52 }
  0x1d   : > { %2304 = vperm.xlu1 %6012, %v269_v3   ;;  %11436 = vst [vmem:[#allocation5_spill] sm:$0xff] %v6238_v29  ;;  %11437 = vst [vmem:[#allocation6_spill] sm:$0xff] %v6242_v31  ;;  %v292_v32 = vld [vmem:[%s6157_s22 + $0xc0] sm:$0xff]  ;;  %v294_v34 = vld [vmem:[%s6157_s22 + $0xd0] sm:$0xff]  ;;  %v6354_v3 = vrot.slane %v6290_v46, %v6265_v40 }
  0x1e   : > { %v296_v41 = vld [vmem:[%s6157_s22 + $0xe0] sm:$0xff]  ;;  %11447 = vst [vmem:[#allocation16_spill] sm:$0xff] %v6314_v53  ;;  %11448 = vst [vmem:[#allocation17_spill] sm:$0xff] %v6316_v54  ;;  %v298_v59 = vld [vmem:[%s6157_s22 + $0xf0] sm:$0xff] }
  0x20   : > { %330 = vperm.xlu0 %6010, %v273_v6  }
  0x21   : > { %6013 = vset.pattern.permute.xlu1 %v11006_v1 }
  0x22   : > { %315 = vperm.xlu1 %6013, %v270_v7  }
  0x24   : > { %340 = vperm.xlu0 %6010, %v275_v8  }
  0x26   : > { %6014 = vset.pattern.permute.xlu1 %v11004_v0 }
  0x27   : > { %1070 = vperm.xlu1 %6014, %v270_v7  }
  0x28   : > { %350 = vperm.xlu0 %6010, %v277_v9  }
  0x2b   : > { %1074 = vperm.xlu1 %6014, %v271_v4  }
  0x2c   : > { %360 = vperm.xlu0 %6010, %v6174_v10  }
  0x2f   : > { %6015 = vset.pattern.permute.xlu1 %v11008_v5 }
  0x30   : > { %2312 = vperm.xlu1 %6015, %v271_v4   ;;  %370 = vperm.xlu0 %6010, %v6178_v11   ;;  %v6359_v4 = vrot.slane %v6256_v37, %v6300_v49 }
  0x32   : > { %11451 = vst [vmem:[#allocation20_spill] sm:$0xff] %v6359_v4 }
  0x34   : > { %6016 = vset.pattern.permute.xlu1 %v11006_v1  ;;  %380 = vperm.xlu0 %6010, %v6183_v12  }
  0x35   : > { %325 = vperm.xlu1 %6016, %v272_v13  }
  0x38   : > { %390 = vperm.xlu0 %6010, %v6189_v14  }
  0x39   : > { %6017 = vset.pattern.permute.xlu1 %v11004_v0 }
  0x3a   : > { %1078 = vperm.xlu1 %6017, %v272_v13  }
  0x3c   : > { %400 = vperm.xlu0 %6010, %v6194_v15   ;;  %v11472_v15 = vmov 2  }
  0x3e   : > { %1082 = vperm.xlu1 %6017, %v273_v6  }
  0x40   : > { %410 = vperm.xlu0 %6010, %v6198_v16  }
  0x42   : > { %6018 = vset.pattern.permute.xlu1 %v11008_v5 }
  0x43   : > { %2320 = vperm.xlu1 %6018, %v273_v6   ;;  %v6363_v6 = vrot.slane %v6261_v38, %v6300_v49 }
  0x44   : > { %420 = vperm.xlu0 %6010, %v291_v17  }
  0x45   : > { %11452 = vst [vmem:[#allocation21_spill] sm:$0xff] %v6363_v6 }
  0x47   : > { %6019 = vset.pattern.permute.xlu1 %v11006_v1 }
  0x48   : > { %335 = vperm.xlu1 %6019, %v274_v18   ;;  %430 = vperm.xlu0 %6010, %v293_v19  }
  0x4c   : > { %6020 = vset.pattern.permute.xlu1 %v11004_v0  ;;  %440 = vperm.xlu0 %6010, %v295_v20  }
  0x4d   : > { %1086 = vperm.xlu1 %6020, %v274_v18  }
  0x50   : > { %450 = vperm.xlu0 %6010, %v297_v21  }
  0x51   : > { %1090 = vperm.xlu1 %6020, %v275_v8  }
  0x54   : > { %460 = vperm.xlu0 %6010, %v299_v22  }
  0x55   : > { %6021 = vset.pattern.permute.xlu1 %v11008_v5 }
  0x56   : > { %2328 = vperm.xlu1 %6021, %v275_v8   ;;  %v6371_v8 = vrot.slane %v6256_v37, %v6302_v50 }
  0x58   : > { %6056 = vset.pattern.permute.xlu0 %v11008_v5  ;;  %11454 = vst [vmem:[#allocation23_spill] sm:$0xff] %v6371_v8 }
  0x59   : > { %2300 = vperm.xlu0 %6056, %v6160_v2   ;;  %v6350_v2 = vrot.slane %v6290_v46, %v6263_v39 }
  0x5a   : > { %6022 = vset.pattern.permute.xlu1 %v11006_v1 }
  0x5b   : > { %345 = vperm.xlu1 %6022, %v276_v23  }
  0x5d   : > { %2308 = vperm.xlu0 %6056, %v270_v7   ;;  %v6367_v7 = vrot.slane %v6281_v44, %v6300_v49 }
  0x5f   : > { %6023 = vset.pattern.permute.xlu1 %v11004_v0  ;;  %11453 = vst [vmem:[#allocation22_spill] sm:$0xff] %v6367_v7 }
  0x60   : > { %1094 = vperm.xlu1 %6023, %v276_v23  }
  0x61   : > { %2316 = vperm.xlu0 %6056, %v272_v13   ;;  %v6385_v13 = vsub.s32 6, %v466_v33 }
  0x63   : > { %11458 = vst [vmem:[#allocation27_spill] sm:$0xff] %v6385_v13  ;;  %v6431_v36 = vrot.slane %v6256_v37, %v6385_v13 }
  0x64   : > { %1098 = vperm.xlu1 %6023, %v277_v9  }
  0x65   : > { %2324 = vperm.xlu0 %6056, %v274_v18   ;;  %11463 = vst [vmem:[#allocation32_spill] sm:$0xff] %v6431_v36 }
  0x68   : > { %6024 = vset.pattern.permute.xlu1 %v11008_v5 }
  0x69   : > { %2336 = vperm.xlu1 %6024, %v277_v9   ;;  %2332 = vperm.xlu0 %6056, %v276_v23   ;;  %v6375_v9 = vrot.slane %v6261_v38, %v6302_v50 }
  0x6b   : > { %11455 = vst [vmem:[#allocation24_spill] sm:$0xff] %v6375_v9 }
  0x6d   : > { %6025 = vset.pattern.permute.xlu1 %v11006_v1  ;;  %2340 = vperm.xlu0 %6056, %v278_v24  }
  0x6e   : > { %355 = vperm.xlu1 %6025, %v278_v24  }
  0x71   : > { %2348 = vperm.xlu0 %6056, %v280_v25  }
  0x72   : > { %6026 = vset.pattern.permute.xlu1 %v11004_v0 }
  0x73   : > { %1102 = vperm.xlu1 %6026, %v278_v24  }
  0x75   : > { %2356 = vperm.xlu0 %6056, %v6222_v26  }
  0x77   : > { %1106 = vperm.xlu1 %6026, %v6174_v10  }
  0x79   : > { %2364 = vperm.xlu0 %6056, %v6227_v27  }
  0x7b   : > { %6027 = vset.pattern.permute.xlu1 %v11008_v5 }
  0x7c   : > { %2344 = vperm.xlu1 %6027, %v6174_v10   ;;  %v6379_v10 = vrot.slane %v6256_v37, %v6316_v54 }
  0x7d   : > { %2372 = vperm.xlu0 %6056, %v6233_v28  }
  0x7e   : > { %11456 = vst [vmem:[#allocation25_spill] sm:$0xff] %v6379_v10 }
  0x80   : > { %6028 = vset.pattern.permute.xlu1 %v11006_v1 }
  0x81   : > { %365 = vperm.xlu1 %6028, %v280_v25   ;;  %2380 = vperm.xlu0 %6056, %v6238_v29  }
  0x85   : > { %6029 = vset.pattern.permute.xlu1 %v11004_v0  ;;  %2388 = vperm.xlu0 %6056, %v6242_v31  }
  0x86   : > { %1110 = vperm.xlu1 %6029, %v280_v25  }
  0x89   : > { %2396 = vperm.xlu0 %6056, %v292_v32  }
  0x8a   : > { %1114 = vperm.xlu1 %6029, %v6178_v11  }
  0x8d   : > { %2404 = vperm.xlu0 %6056, %v294_v34  }
  0x8e   : > { %6030 = vset.pattern.permute.xlu1 %v11008_v5 }
  0x8f   : > { %2352 = vperm.xlu1 %6030, %v6178_v11   ;;  %v6383_v11 = vrot.slane %v6261_v38, %v6316_v54 }
  0x91   : > { %2412 = vperm.xlu0 %6056, %v296_v41   ;;  %11457 = vst [vmem:[#allocation26_spill] sm:$0xff] %v6383_v11 }
  0x93   : > { %6031 = vset.pattern.permute.xlu1 %v11006_v1  ;;  %v6336_v60 = vpop.permute.xlu1 %1062  ;;  %v6338_v61 = vpop.permute.xlu0 %305 }
  0x94   : > { %11449 = vst [vmem:[#allocation18_spill] sm:$0xff] %v6336_v60  ;;  %11450 = vst [vmem:[#allocation19_spill] sm:$0xff] %v6338_v61  ;;  %375 = vperm.xlu1 %6031, %v6222_v26   ;;  %v546_v17 = vmul.f32 %v6272_v42, %v6338_v61  ;;  %v1272_v18 = vmul.f32 %v6276_v43, %v6336_v60  ;;  %v548_v19 = vmul.f32 %v6285_v45, %v6338_v61 }
  0x95   : > { %2420 = vperm.xlu0 %6056, %v298_v59   ;;  %v1274_v20 = vmul.f32 %v6294_v47, %v6336_v60  ;;  %v545_v23 = vmul.f32 %v6298_v48, %v6338_v61  ;;  %v1271_v24 = vmul.f32 %v6306_v51, %v6336_v60  ;;  %v547_v25 = vmul.f32 %v6310_v52, %v6338_v61 }
  0x96   : > { %v1273_v30 = vmul.f32 %v6314_v53, %v6336_v60  ;;  %v6425_v40 = vadd.f32 %v1272_v18, %v546_v17  ;;  %v550_v17 = vmul.f32 %v6359_v4, %v6338_v61  ;;  %v1276_v18 = vmul.f32 %v6363_v6, %v6336_v60 }
  0x97   : > { %v6395_v21 = vpop.permute.xlu1 %1066  ;;  %v6397_v22 = vpop.permute.xlu0 %310  ;;  %v6427_v39 = vadd.f32 %v1274_v20, %v548_v19  ;;  %v6439_v31 = vadd.f32 %v1271_v24, %v545_v23 }
  0x98   : > { %11459 = vst [vmem:[#allocation28_spill] sm:$0xff] %v6395_v21  ;;  %11460 = vst [vmem:[#allocation29_spill] sm:$0xff] %v6397_v22  ;;  %6032 = vset.pattern.permute.xlu1 %v11004_v0  ;;  %v562_v32 = vmul.f32 %v6272_v42, %v6397_v22  ;;  %v1288_v33 = vmul.f32 %v6276_v43, %v6395_v21  ;;  %v564_v34 = vmul.f32 %v6285_v45, %v6397_v22 }
  0x99   : > { %v1290_v41 = vmul.f32 %v6294_v47, %v6395_v21  ;;  %1118 = vperm.xlu1 %6032, %v6222_v26   ;;  %v561_v59 = vmul.f32 %v6298_v48, %v6397_v22  ;;  %v1287_v0 = vmul.f32 %v6306_v51, %v6395_v21  ;;  %v563_v1 = vmul.f32 %v6310_v52, %v6397_v22 }
  0x9a   : > { %v1289_v5 = vmul.f32 %v6314_v53, %v6395_v21  ;;  %11461 = vst [vmem:[#allocation30_spill] sm:$0xff] %v6425_v40  ;;  %11462 = vst [vmem:[#allocation31_spill] sm:$0xff] %v6427_v39  ;;  %v6435_v26 = vrot.slane %v6261_v38, %v6385_v13  ;;  %v6441_v16 = vadd.f32 %v1273_v30, %v547_v25 }
  0x9b   : > { %v6437_v35 = vpop.permute.xlu0 %320  ;;  %11466 = vst [vmem:[#allocation35_spill] sm:$0xff] %v6439_v31  ;;  %v1800_v37 = vadd.f32 %v1288_v33, %v562_v32  ;;  %v1802_v20 = vadd.f32 %v1290_v41, %v564_v34  ;;  %v1799_v39 = vadd.f32 %v1287_v0, %v561_v59  ;;  %v566_v30 = vmul.f32 %v6359_v4, %v6397_v22 }
  0x9c   : > { %11464 = vst [vmem:[#allocation33_spill] sm:$0xff] %v6435_v26  ;;  %11465 = vst [vmem:[#allocation34_spill] sm:$0xff] %v6437_v35  ;;  %v6447_v19 = vpop.permute.xlu1 %2304  ;;  %v1801_v40 = vadd.f32 %v1289_v5, %v563_v1  ;;  %v1292_v0 = vmul.f32 %v6363_v6, %v6395_v21  ;;  %v6464_v1 = vrot.slane %v6290_v46, %v6300_v49 }
  0x9d   : > { %11467 = vst [vmem:[#allocation36_spill] sm:$0xff] %v6441_v16  ;;  %11468 = vst [vmem:[#allocation37_spill] sm:$0xff] %v6447_v19  ;;  %1122 = vperm.xlu1 %6032, %v6183_v12   ;;  %v2526_v38 = vmul.f32 %v6320_v55, %v6447_v19  ;;  %v2528_v23 = vmul.f32 %v6324_v56, %v6447_v19  ;;  %v2525_v24 = vmul.f32 %v6328_v57, %v6447_v19 }
  0x9e   : > { %v2527_v25 = vmul.f32 %v6332_v58, %v6447_v19  ;;  %11469 = vst [vmem:[#allocation38_spill] sm:$0xff] %v6464_v1  ;;  %v552_v5 = vmul.f32 %v6371_v8, %v6338_v61  ;;  %v6472_v16 = vmul.f32 %v6272_v42, %v6437_v35  ;;  %v6476_v31 = vmul.f32 %v6285_v45, %v6437_v35 }
  0x9f   : > { %v6468_v32 = vpop.permute.xlu0 %330  ;;  %v3038_v33 = vadd.f32 %v2526_v38, %v1800_v37  ;;  %v3040_v34 = vadd.f32 %v2528_v23, %v1802_v20  ;;  %v3037_v41 = vadd.f32 %v2525_v24, %v1799_v39  ;;  %v6478_v29 = vadd.f32 %v1276_v18, %v550_v17 }
  0xa0   : > { %11470 = vst [vmem:[#allocation39_spill] sm:$0xff] %v6468_v32  ;;  %v3039_v59 = vadd.f32 %v2527_v25, %v1801_v40  ;;  %v568_v49 = vmul.f32 %v6371_v8, %v6397_v22  ;;  %v6493_v37 = vmul.f32 %v6298_v48, %v6437_v35  ;;  %v6497_v17 = vmul.f32 %v6310_v52, %v6437_v35 }
  0xa1   : > { %11471 = vst [vmem:[#allocation40_spill] sm:$0xff] %v6478_v29  ;;  %6033 = vset.pattern.permute.xlu1 %v11472_v15  ;;  %v6483_v4 = vpop.permute.xlu1 %315  ;;  %v6486_v39 = vadd.f32 %v6342_v62, %v3038_v33  ;;  %v6489_v40 = vadd.f32 %v6346_v63, %v3040_v34  ;;  %v6501_v18 = vadd.f32 %v6350_v2, %v3037_v41 }
  0xa2   : > { %11473 = vst [vmem:[#allocation41_spill] sm:$0xff] %v6483_v4  ;;  %2360 = vperm.xlu1 %6033, %v6183_v12   ;;  %v6504_v20 = vadd.f32 %v6354_v3, %v3039_v59  ;;  %v1804_v38 = vadd.f32 %v1292_v0, %v566_v30  ;;  %v2530_v23 = vmul.f32 %v6367_v7, %v6447_v19 }
  0xa3   : > { %11474 = vst [vmem:[#allocation42_spill] sm:$0xff] %v6486_v39  ;;  %11475 = vst [vmem:[#allocation43_spill] sm:$0xff] %v6489_v40  ;;  %v6508_v24 = vpop.permute.xlu0 %340  ;;  %v6512_v25 = vmul.f32 %v6272_v42, %v6468_v32  ;;  %v6516_v33 = vmul.f32 %v6285_v45, %v6468_v32  ;;  %v1278_v12 = vmul.f32 %v6375_v9, %v6336_v60 }
  0xa4   : > { %11476 = vst [vmem:[#allocation44_spill] sm:$0xff] %v6501_v18  ;;  %11477 = vst [vmem:[#allocation45_spill] sm:$0xff] %v6504_v20  ;;  %v1294_v34 = vmul.f32 %v6375_v9, %v6395_v21  ;;  %v578_v30 = vmul.f32 %v6272_v42, %v6483_v4  ;;  %v580_v0 = vmul.f32 %v6285_v45, %v6483_v4 }
  0xa5   : > { %11478 = vst [vmem:[#allocation46_spill] sm:$0xff] %v6508_v24  ;;  %11479 = vst [vmem:[#allocation47_spill] sm:$0xff] %v6512_v25  ;;  %v6528_v41 = vmul.f32 %v6298_v48, %v6468_v32  ;;  %v6532_v59 = vmul.f32 %v6310_v52, %v6468_v32  ;;  %v577_v9 = vmul.f32 %v6298_v48, %v6483_v4  ;;  %v11483_v25 = vmov 0  }
  0xa6   : > { %11480 = vst [vmem:[#allocation48_spill] sm:$0xff] %v6516_v33  ;;  %v579_v33 = vmul.f32 %v6310_v52, %v6483_v4  ;;  %6034 = vset.pattern.permute.xlu1 %v11483_v25  ;;  %v6541_v7 = vpop.permute.xlu1 %1070  ;;  %v6547_v32 = vmul.f32 %v6272_v42, %v6508_v24  ;;  %v6551_v8 = vmul.f32 %v6285_v45, %v6508_v24 }
  0xa7   : > { %11481 = vst [vmem:[#allocation49_spill] sm:$0xff] %v6528_v41  ;;  %11482 = vst [vmem:[#allocation50_spill] sm:$0xff] %v6532_v59  ;;  %385 = vperm.xlu1 %6034, %v6227_v27   ;;  %v6554_v29 = vpop.permute.xlu0 %350  ;;  %v6558_v40 = vmul.f32 %v6298_v48, %v6508_v24  ;;  %v6562_v41 = vmul.f32 %v6310_v52, %v6508_v24  ;;  %v3042_v35 = vadd.f32 %v2530_v23, %v1804_v38 }
  0xa8   : > { %11484 = vst [vmem:[#allocation51_spill] sm:$0xff] %v6541_v7  ;;  %11485 = vst [vmem:[#allocation52_spill] sm:$0xff] %v6547_v32  ;;  %v6564_v20 = vadd.f32 %v1278_v12, %v552_v5  ;;  %v1304_v18 = vmul.f32 %v6276_v43, %v6541_v7  ;;  %v1306_v39 = vmul.f32 %v6294_v47, %v6541_v7 }
  0xa9   : > { %11486 = vst [vmem:[#allocation53_spill] sm:$0xff] %v6551_v8  ;;  %11487 = vst [vmem:[#allocation54_spill] sm:$0xff] %v6554_v29  ;;  %v1806_v8 = vadd.f32 %v1294_v34, %v568_v49  ;;  %v6572_v32 = vrot.slane %v6281_v44, %v6302_v50  ;;  %v1305_v24 = vmul.f32 %v6314_v53, %v6541_v7 }
  0xaa   : > { %11488 = vst [vmem:[#allocation55_spill] sm:$0xff] %v6558_v40  ;;  %11489 = vst [vmem:[#allocation56_spill] sm:$0xff] %v6562_v41  ;;  %v1303_v40 = vmul.f32 %v6306_v51, %v6541_v7  ;;  %v6580_v5 = vrot.slane %v6290_v46, %v6302_v50  ;;  %v549_v38 = vmul.f32 %v6379_v10, %v6338_v61  ;;  %v6584_v23 = vpop.permute.xlu1 %1074 }
  0xab   : > { %11490 = vst [vmem:[#allocation57_spill] sm:$0xff] %v6564_v20  ;;  %11491 = vst [vmem:[#allocation58_spill] sm:$0xff] %v6572_v32  ;;  %v6588_v49 = vmul.f32 %v6272_v42, %v6554_v29  ;;  %v6592_v12 = vmul.f32 %v6285_v45, %v6554_v29  ;;  %v565_v34 = vmul.f32 %v6379_v10, %v6397_v22  ;;  %v11496_v20 = vmov 1   ;;  %v6599_v41 = vpop.permute.xlu0 %360 }
  0xac   : > { %11492 = vst [vmem:[#allocation59_spill] sm:$0xff] %v6580_v5  ;;  %11493 = vst [vmem:[#allocation60_spill] sm:$0xff] %v6584_v23  ;;  %v1275_v50 = vmul.f32 %v6383_v11, %v6336_v60  ;;  %6035 = vset.pattern.permute.xlu1 %v11496_v20  ;;  %v1320_v59 = vmul.f32 %v6276_v43, %v6584_v23  ;;  %v1319_v4 = vmul.f32 %v6306_v51, %v6584_v23 }
  0xad   : > { %11494 = vst [vmem:[#allocation61_spill] sm:$0xff] %v6588_v49  ;;  %11495 = vst [vmem:[#allocation62_spill] sm:$0xff] %v6592_v12  ;;  %v1322_v49 = vmul.f32 %v6294_v47, %v6584_v23  ;;  %v1321_v12 = vmul.f32 %v6314_v53, %v6584_v23  ;;  %1126 = vperm.xlu1 %6035, %v6227_v27   ;;  %v6610_v10 = vadd.f32 %v1304_v18, %v578_v30 }
  0xae   : > { %11497 = vst [vmem:[#allocation63_spill] sm:$0xff] %v6599_v41  ;;  %v6612_v6 = vadd.f32 %v1306_v39, %v580_v0  ;;  %v6616_v20 = vmul.f32 %v6298_v48, %v6554_v29  ;;  %v6620_v7 = vmul.f32 %v6310_v52, %v6554_v29  ;;  %v6622_v47 = vadd.f32 %v1303_v40, %v577_v9 }
  0xaf   : > { %11498 = vst [vmem:[#allocation64_spill] sm:$0xff] %v6610_v10  ;;  %v6624_v51 = vadd.f32 %v1305_v24, %v579_v33  ;;  %v6627_v23 = vadd.f32 %v6464_v1, %v3042_v35  ;;  %v2532_v27 = vmul.f32 %v6572_v32, %v6447_v19  ;;  %v6633_v39 = vmul.f32 %v6272_v42, %v6599_v41  ;;  %v6643_v24 = vpop.permute.xlu1 %2312  ;;  %v6645_v35 = vpop.permute.xlu0 %370 }
  0xb0   : > { %11499 = vst [vmem:[#allocation65_spill] sm:$0xff] %v6612_v6  ;;  %11500 = vst [vmem:[#allocation66_spill] sm:$0xff] %v6616_v20  ;;  %v6637_v18 = vmul.f32 %v6285_v45, %v6599_v41  ;;  %v1291_v9 = vmul.f32 %v6383_v11, %v6395_v21  ;;  %v6641_v40 = vadd.f32 %v1275_v50, %v549_v38 }
  0xb1   : > { %11501 = vst [vmem:[#allocation67_spill] sm:$0xff] %v6620_v7  ;;  %11502 = vst [vmem:[#allocation68_spill] sm:$0xff] %v6622_v47  ;;  %v1832_v33 = vadd.f32 %v1320_v59, %v6472_v16  ;;  %v1834_v30 = vadd.f32 %v1322_v49, %v6476_v31  ;;  %v1831_v0 = vadd.f32 %v1319_v4, %v6493_v37  ;;  %1130 = vperm.xlu1 %6035, %v6189_v14   ;;  %v11546_v47 = vmov 1  }
  0xb2   : > { %11503 = vst [vmem:[#allocation69_spill] sm:$0xff] %v6624_v51  ;;  %11504 = vst [vmem:[#allocation70_spill] sm:$0xff] %v6627_v23  ;;  %v1833_v29 = vadd.f32 %v1321_v12, %v6497_v17  ;;  %v2558_v23 = vmul.f32 %v6320_v55, %v6643_v24  ;;  %v2560_v50 = vmul.f32 %v6324_v56, %v6643_v24 }
  0xb3   : > { %11505 = vst [vmem:[#allocation71_spill] sm:$0xff] %v6633_v39  ;;  %11506 = vst [vmem:[#allocation72_spill] sm:$0xff] %v6637_v18  ;;  %v2557_v38 = vmul.f32 %v6328_v57, %v6643_v24  ;;  %v2559_v16 = vmul.f32 %v6332_v58, %v6643_v24  ;;  %v6662_v31 = vmul.f32 %v6298_v48, %v6599_v41  ;;  %v6672_v18 = vpop.permute.xlu0 %380 }
  0xb4   : > { %11507 = vst [vmem:[#allocation73_spill] sm:$0xff] %v6641_v40  ;;  %11508 = vst [vmem:[#allocation74_spill] sm:$0xff] %v6643_v24  ;;  %v6666_v4 = vmul.f32 %v6310_v52, %v6599_v41  ;;  %v3044_v37 = vadd.f32 %v2532_v27, %v1806_v8  ;;  %v6670_v17 = vrot.slane %v6281_v44, %v6316_v54  ;;  %v6683_v27 = vpop.permute.xlu1 %325 }
  0xb5   : > { %11509 = vst [vmem:[#allocation75_spill] sm:$0xff] %v6645_v35  ;;  %11510 = vst [vmem:[#allocation76_spill] sm:$0xff] %v6662_v31  ;;  %v3070_v59 = vadd.f32 %v2558_v23, %v1832_v33  ;;  %v3072_v49 = vadd.f32 %v2560_v50, %v1834_v30  ;;  %v3069_v12 = vadd.f32 %v2557_v38, %v1831_v0  ;;  %6036 = vset.pattern.permute.xlu1 %v11472_v15 }
  0xb6   : > { %11511 = vst [vmem:[#allocation77_spill] sm:$0xff] %v6666_v4  ;;  %11512 = vst [vmem:[#allocation78_spill] sm:$0xff] %v6670_v17  ;;  %v3071_v40 = vadd.f32 %v2559_v16, %v1833_v29  ;;  %v1803_v39 = vadd.f32 %v1291_v9, %v565_v34  ;;  %v6676_v7 = vrot.slane %v6290_v46, %v6316_v54  ;;  %2368 = vperm.xlu1 %6036, %v6189_v14   ;;  %v11540_v4 = vld [vmem:[#allocation60_spill] sm:$0xff] }
  0xb7   : > { %11513 = vst [vmem:[#allocation79_spill] sm:$0xff] %v6672_v18  ;;  %v551_v41 = vmul.f32 %v6431_v36, %v6338_v61  ;;  %v1277_v8 = vmul.f32 %v6435_v26, %v6336_v60  ;;  %11515 = vst [vmem:[#allocation81_spill] sm:$0xff] %v6683_v27  ;;  %v6686_v23 = vadd.f32 %v6342_v62, %v3070_v59  ;;  %v6723_v59 = vpop.permute.xlu0 %390 }
  0xb8   : > { %11514 = vst [vmem:[#allocation80_spill] sm:$0xff] %v6676_v7  ;;  %v6689_v29 = vadd.f32 %v6346_v63, %v3072_v49  ;;  %v6693_v34 = vmul.f32 %v6272_v42, %v6645_v35  ;;  %v567_v9 = vmul.f32 %v6431_v36, %v6397_v22  ;;  %v6699_v33 = vadd.f32 %v6350_v2, %v3069_v12 }
  0xb9   : > { %11516 = vst [vmem:[#allocation82_spill] sm:$0xff] %v6686_v23  ;;  %v6702_v30 = vadd.f32 %v6354_v3, %v3071_v40  ;;  %v6706_v0 = vmul.f32 %v6285_v45, %v6645_v35  ;;  %v2529_v50 = vmul.f32 %v6670_v17, %v6447_v19  ;;  %v6712_v38 = vmul.f32 %v6298_v48, %v6645_v35 }
  0xba   : > { %11517 = vst [vmem:[#allocation83_spill] sm:$0xff] %v6689_v29  ;;  %11518 = vst [vmem:[#allocation84_spill] sm:$0xff] %v6693_v34  ;;  %v6716_v14 = vmul.f32 %v6310_v52, %v6645_v35  ;;  %v6719_v16 = vadd.f32 %v6580_v5, %v3044_v37  ;;  %v1293_v40 = vmul.f32 %v6435_v26, %v6395_v21  ;;  %6037 = vset.pattern.permute.xlu1 %v11483_v25  ;;  %v6742_v35 = vpop.permute.xlu1 %1078  ;;  %v11544_v29 = vld [vmem:[#allocation41_spill] sm:$0xff] }
  0xbb   : > { %11519 = vst [vmem:[#allocation85_spill] sm:$0xff] %v6699_v33  ;;  %11520 = vst [vmem:[#allocation86_spill] sm:$0xff] %v6702_v30  ;;  %v610_v49 = vmul.f32 %v6272_v42, %v6683_v27  ;;  %v612_v12 = vmul.f32 %v6285_v45, %v6683_v27  ;;  %v609_v54 = vmul.f32 %v6298_v48, %v6683_v27  ;;  %395 = vperm.xlu1 %6037, %v6233_v28  }
  0xbc   : > { %11521 = vst [vmem:[#allocation87_spill] sm:$0xff] %v6706_v0  ;;  %11522 = vst [vmem:[#allocation88_spill] sm:$0xff] %v6712_v38  ;;  %v6731_v60 = vadd.f32 %v1277_v8, %v551_v41  ;;  %v611_v21 = vmul.f32 %v6310_v52, %v6683_v27  ;;  %v6739_v61 = vrot.slane %v6281_v44, %v6385_v13  ;;  %v11536_v38 = vld [vmem:[#allocation51_spill] sm:$0xff]  ;;  %v11537_v0 = vld [vmem:[#allocation21_spill] sm:$0xff] }
  0xbd   : > { %11523 = vst [vmem:[#allocation89_spill] sm:$0xff] %v6716_v14  ;;  %11524 = vst [vmem:[#allocation90_spill] sm:$0xff] %v6719_v16  ;;  %v6748_v8 = vmul.f32 %v6272_v42, %v6672_v18  ;;  %v3041_v37 = vadd.f32 %v2529_v50, %v1803_v39  ;;  %v6753_v22 = vmul.f32 %v6285_v45, %v6672_v18  ;;  %v11534_v50 = vld [vmem:[#allocation11_spill] sm:$0xff]  ;;  %v11535_v14 = vld [vmem:[#allocation14_spill] sm:$0xff] }
  0xbe   : > { %11525 = vst [vmem:[#allocation91_spill] sm:$0xff] %v6723_v59  ;;  %11526 = vst [vmem:[#allocation92_spill] sm:$0xff] %v6731_v60  ;;  %v6757_v44 = vmul.f32 %v6298_v48, %v6672_v18  ;;  %v6761_v16 = vmul.f32 %v6310_v52, %v6672_v18  ;;  %v1805_v41 = vadd.f32 %v1293_v40, %v567_v9  ;;  %v6763_v60 = vpop.permute.xlu0 %400  ;;  %v11538_v40 = vld [vmem:[#allocation34_spill] sm:$0xff]  ;;  %v11539_v18 = vld [vmem:[#allocation20_spill] sm:$0xff]  ;;  %v6781_v20 = vpop.permute.xlu1 %1082 }
  0xbf   : > { %11527 = vst [vmem:[#allocation93_spill] sm:$0xff] %v6739_v61  ;;  %11528 = vst [vmem:[#allocation94_spill] sm:$0xff] %v6742_v35  ;;  %v1336_v39 = vmul.f32 %v6276_v43, %v6742_v35  ;;  %v1308_v34 = vmul.f32 %v11537_v0, %v11536_v38  ;;  %v2531_v9 = vmul.f32 %v6739_v61, %v6447_v19  ;;  %v11545_v19 = vld [vmem:[#allocation22_spill] sm:$0xff]  ;;  %6038 = vset.pattern.permute.xlu1 %v11546_v47  ;;  %v11551_v27 = vld [vmem:[#allocation48_spill] sm:$0xff] }
  0xc0   : > { %11529 = vst [vmem:[#allocation95_spill] sm:$0xff] %v6748_v8  ;;  %11530 = vst [vmem:[#allocation96_spill] sm:$0xff] %v6753_v22  ;;  %v1338_v8 = vmul.f32 %v11534_v50, %v6742_v35  ;;  %v1335_v22 = vmul.f32 %v11535_v14, %v6742_v35  ;;  %v1324_v31 = vmul.f32 %v11537_v0, %v11540_v4  ;;  %1134 = vperm.xlu1 %6038, %v6233_v28  }
  0xc1   : > { %11531 = vst [vmem:[#allocation97_spill] sm:$0xff] %v6757_v44  ;;  %11532 = vst [vmem:[#allocation98_spill] sm:$0xff] %v6761_v16  ;;  %v1337_v44 = vmul.f32 %v6314_v53, %v6742_v35  ;;  %v598_v16 = vmul.f32 %v11539_v18, %v11538_v40  ;;  %v6784_v30 = vadd.f32 %v6676_v7, %v3041_v37 }
  0xc2   : > { %11533 = vst [vmem:[#allocation99_spill] sm:$0xff] %v6763_v60  ;;  %11541 = vst [vmem:[#allocation11_spill] sm:$0xff] %v6781_v20  ;;  %v6788_v33 = vrot.slane %v6290_v46, %v6385_v13  ;;  %v582_v23 = vmul.f32 %v11539_v18, %v11544_v29  ;;  %v2562_v51 = vmul.f32 %v11545_v19, %v6643_v24  ;;  %v6804_v13 = vpop.permute.xlu0 %410  ;;  %v11550_v18 = vld [vmem:[#allocation47_spill] sm:$0xff] }
  0xc3   : > { %11542 = vst [vmem:[#allocation100_spill] sm:$0xff] %v6784_v30  ;;  %v1352_v6 = vmul.f32 %v6276_v43, %v6781_v20  ;;  %v1354_v10 = vmul.f32 %v11534_v50, %v6781_v20  ;;  %v1351_v37 = vmul.f32 %v11535_v14, %v6781_v20  ;;  %v1353_v46 = vmul.f32 %v6314_v53, %v6781_v20 }
  0xc4   : > { %11543 = vst [vmem:[#allocation101_spill] sm:$0xff] %v6788_v33  ;;  %11547 = vst [vmem:[#allocation102_spill] sm:$0xff] %v6804_v13  ;;  %v6806_v30 = vadd.f32 %v1336_v39, %v610_v49  ;;  %v6808_v19 = vadd.f32 %v1338_v8, %v612_v12  ;;  %v6810_v60 = vadd.f32 %v1335_v22, %v609_v54  ;;  %v11552_v49 = vld [vmem:[#allocation49_spill] sm:$0xff]  ;;  %v11553_v12 = vld [vmem:[#allocation50_spill] sm:$0xff]  ;;  %v6824_v54 = vpop.permute.xlu1 %2320 }
  0xc5   : > { %v6812_v7 = vadd.f32 %v1308_v34, %v582_v23  ;;  %v6814_v47 = vadd.f32 %v1337_v44, %v611_v21  ;;  %v6818_v0 = vmul.f32 %v6272_v42, %v6723_v59  ;;  %v3043_v35 = vadd.f32 %v2531_v9, %v1805_v41  ;;  %11554 = vst [vmem:[#allocation47_spill] sm:$0xff] %v6824_v54  ;;  %v11555_v21 = vld [vmem:[#allocation23_spill] sm:$0xff]  ;;  %v11556_v34 = vld [vmem:[#allocation24_spill] sm:$0xff] }
  0xc6   : > { %v1836_v20 = vadd.f32 %v1324_v31, %v598_v16  ;;  %v1864_v28 = vadd.f32 %v1352_v6, %v11550_v18  ;;  %v1866_v13 = vadd.f32 %v1354_v10, %v11551_v27  ;;  %v1863_v39 = vadd.f32 %v1351_v37, %v11552_v49  ;;  %v11557_v16 = vld [vmem:[#allocation3_spill] sm:$0xff]  ;;  %v6833_v6 = vpop.permute.xlu0 %420 }
  0xc7   : > { %11548 = vst [vmem:[#allocation103_spill] sm:$0xff] %v6812_v7  ;;  %11549 = vst [vmem:[#allocation104_spill] sm:$0xff] %v6818_v0  ;;  %v1865_v8 = vadd.f32 %v1353_v46, %v11553_v12  ;;  %v600_v23 = vmul.f32 %v11555_v21, %v11538_v40  ;;  %v1310_v44 = vmul.f32 %v11556_v34, %v11536_v38  ;;  %1138 = vperm.xlu1 %6038, %v11557_v16  }
  0xc8   : > { %v3074_v22 = vadd.f32 %v2562_v51, %v1836_v20  ;;  %v1326_v31 = vmul.f32 %v11556_v34, %v11540_v4  ;;  %11558 = vst [vmem:[#allocation48_spill] sm:$0xff] %v6833_v6  ;;  %v2590_v10 = vmul.f32 %v6320_v55, %v6824_v54  ;;  %v2592_v18 = vmul.f32 %v6324_v56, %v6824_v54 }
  0xc9   : > { %v2589_v51 = vmul.f32 %v6328_v57, %v6824_v54  ;;  %v2591_v20 = vmul.f32 %v6332_v58, %v6824_v54  ;;  %v6845_v27 = vmul.f32 %v6285_v45, %v6723_v59  ;;  %v6849_v41 = vmul.f32 %v6298_v48, %v6723_v59 }
  0xca   : > { %v584_v9 = vmul.f32 %v11555_v21, %v11544_v29  ;;  %v2564_v37 = vmul.f32 %v6572_v32, %v6643_v24  ;;  %v3102_v46 = vadd.f32 %v2590_v10, %v1864_v28  ;;  %v3104_v49 = vadd.f32 %v2592_v18, %v1866_v13  ;;  %v6866_v21 = vpop.permute.xlu1 %335  ;;  %v6868_v32 = vpop.permute.xlu0 %430 }
  0xcb   : > { %11559 = vst [vmem:[#allocation49_spill] sm:$0xff] %v6845_v27  ;;  %11560 = vst [vmem:[#allocation50_spill] sm:$0xff] %v6849_v41  ;;  %v3101_v12 = vadd.f32 %v2589_v51, %v1863_v39  ;;  %v3103_v34 = vadd.f32 %v2591_v20, %v1865_v8  ;;  %v6857_v54 = vmul.f32 %v6310_v52, %v6723_v59  ;;  %6039 = vset.pattern.permute.xlu1 %v11472_v15 }
  0xcc   : > { %v6860_v7 = vadd.f32 %v6788_v33, %v3043_v35  ;;  %v6863_v27 = vadd.f32 %v6464_v1, %v3074_v22  ;;  %v1838_v41 = vadd.f32 %v1326_v31, %v600_v23  ;;  %11564 = vst [vmem:[#allocation107_spill] sm:$0xff] %v6866_v21  ;;  %11565 = vst [vmem:[#allocation108_spill] sm:$0xff] %v6868_v32  ;;  %v11567_v35 = vld [vmem:[#allocation25_spill] sm:$0xff]  ;;  %2376 = vperm.xlu1 %6039, %v11557_v16  }
  0xcd   : > { %11561 = vst [vmem:[#allocation3_spill] sm:$0xff] %v6857_v54  ;;  %v6871_v13 = vadd.f32 %v6342_v62, %v3102_v46  ;;  %v6874_v28 = vadd.f32 %v6346_v63, %v3104_v49  ;;  %v6876_v39 = vadd.f32 %v1310_v44, %v584_v9  ;;  %v581_v8 = vmul.f32 %v11567_v35, %v11544_v29  ;;  %v11625_v54 = vld [vmem:[#allocation43_spill] sm:$0xff] }
  0xce   : > { %11562 = vst [vmem:[#allocation105_spill] sm:$0xff] %v6860_v7  ;;  %11563 = vst [vmem:[#allocation106_spill] sm:$0xff] %v6863_v27  ;;  %v6882_v22 = vadd.f32 %v6350_v2, %v3101_v12  ;;  %v6885_v23 = vadd.f32 %v6354_v3, %v3103_v34  ;;  %v3076_v31 = vadd.f32 %v2564_v37, %v1838_v41  ;;  %v6904_v37 = vpop.permute.xlu0 %440  ;;  %v6914_v59 = vpop.permute.xlu1 %1086 }
  0xcf   : > { %11566 = vst [vmem:[#allocation109_spill] sm:$0xff] %v6876_v39  ;;  %v597_v10 = vmul.f32 %v11567_v35, %v11538_v40  ;;  %v642_v18 = vmul.f32 %v6272_v42, %v6866_v21  ;;  %v644_v44 = vmul.f32 %v6285_v45, %v6866_v21  ;;  %v641_v51 = vmul.f32 %v6298_v48, %v6866_v21  ;;  %v11570_v39 = vld [vmem:[#allocation5_spill] sm:$0xff] }
  0xd0   : > { %v1307_v16 = vmul.f32 %v6383_v11, %v11536_v38  ;;  %v643_v34 = vmul.f32 %v6310_v52, %v6866_v21  ;;  %v1323_v41 = vmul.f32 %v6383_v11, %v11540_v4  ;;  %v2561_v9 = vmul.f32 %v6670_v17, %v6643_v24  ;;  %11568 = vst [vmem:[#allocation110_spill] sm:$0xff] %v6904_v37  ;;  %v11575_v17 = vld [vmem:[#allocation81_spill] sm:$0xff] }
  0xd1   : > { %v599_v49 = vmul.f32 %v6431_v36, %v11538_v40  ;;  %v1309_v12 = vmul.f32 %v6435_v26, %v11536_v38  ;;  %v1325_v20 = vmul.f32 %v6435_v26, %v11540_v4  ;;  %6040 = vset.pattern.permute.xlu1 %v11483_v25  ;;  %11569 = vst [vmem:[#allocation111_spill] sm:$0xff] %v6914_v59 }
  0xd2   : > { %v1835_v35 = vadd.f32 %v1323_v41, %v597_v10  ;;  %v2563_v46 = vmul.f32 %v6739_v61, %v6643_v24  ;;  %405 = vperm.xlu1 %6040, %v11570_v39   ;;  %v1368_v38 = vmul.f32 %v6276_v43, %v6914_v59  ;;  %v1370_v4 = vmul.f32 %v11534_v50, %v6914_v59  ;;  %v6934_v26 = vpop.permute.xlu0 %450 }
  0xd3   : > { %v6926_v40 = vadd.f32 %v6580_v5, %v3076_v31  ;;  %v583_v21 = vmul.f32 %v6431_v36, %v11544_v29  ;;  %v1367_v10 = vmul.f32 %v11535_v14, %v6914_v59  ;;  %v1369_v41 = vmul.f32 %v6314_v53, %v6914_v59  ;;  %11572 = vst [vmem:[#allocation112_spill] sm:$0xff] %v6934_v26  ;;  %v11576_v31 = vld [vmem:[#allocation20_spill] sm:$0xff]  ;;  %v6944_v36 = vpop.permute.xlu1 %1090  ;;  %v11579_v59 = vld [vmem:[#allocation94_spill] sm:$0xff] }
  0xd4   : > { %v3073_v11 = vadd.f32 %v2561_v9, %v1835_v35  ;;  %v1837_v24 = vadd.f32 %v1325_v20, %v599_v49  ;;  %v6936_v1 = vadd.f32 %v1307_v16, %v581_v8  ;;  %v614_v5 = vmul.f32 %v11576_v31, %v11575_v17  ;;  %11578 = vst [vmem:[#allocation115_spill] sm:$0xff] %v6944_v36  ;;  %v11580_v35 = vld [vmem:[#allocation21_spill] sm:$0xff]  ;;  %v11581_v9 = vld [vmem:[#allocation11_spill] sm:$0xff]  ;;  %v11623_v26 = vld [vmem:[#allocation42_spill] sm:$0xff] }
  0xd5   : > { %11571 = vst [vmem:[#allocation5_spill] sm:$0xff] %v6926_v40  ;;  %v6938_v61 = vadd.f32 %v1309_v12, %v583_v21  ;;  %v11577_v40 = vld [vmem:[#allocation39_spill] sm:$0xff]  ;;  %v6946_v27 = vadd.f32 %v1368_v38, %v642_v18  ;;  %v1340_v20 = vmul.f32 %v11580_v35, %v11579_v59  ;;  %v1356_v8 = vmul.f32 %v11580_v35, %v11581_v9  ;;  %v11583_v35 = vld [vmem:[#allocation80_spill] sm:$0xff] }
  0xd6   : > { %11573 = vst [vmem:[#allocation113_spill] sm:$0xff] %v6936_v1  ;;  %v630_v29 = vmul.f32 %v11576_v31, %v11577_v40  ;;  %v3075_v7 = vadd.f32 %v2563_v46, %v1837_v24  ;;  %v11582_v16 = vmov 1   ;;  %v1384_v21 = vmul.f32 %v6276_v43, %v6944_v36  ;;  %v6971_v9 = vpop.permute.xlu0 %460  ;;  %v11586_v59 = vld [vmem:[#allocation52_spill] sm:$0xff]  ;;  %v11587_v17 = vld [vmem:[#allocation99_spill] sm:$0xff] }
  0xd7   : > { %11574 = vst [vmem:[#allocation114_spill] sm:$0xff] %v6938_v61  ;;  %6041 = vset.pattern.permute.xlu1 %v11582_v16  ;;  %v1386_v49 = vmul.f32 %v11534_v50, %v6944_v36  ;;  %v1383_v12 = vmul.f32 %v11535_v14, %v6944_v36  ;;  %v1385_v24 = vmul.f32 %v6314_v53, %v6944_v36  ;;  %11585 = vst [vmem:[#allocation117_spill] sm:$0xff] %v6971_v9  ;;  %v11596_v36 = vld [vmem:[#allocation102_spill] sm:$0xff]  ;;  %v11620_v9 = vld [vmem:[#allocation65_spill] sm:$0xff] }
  0xd8   : > { %1142 = vperm.xlu1 %6041, %v11570_v39   ;;  %v6962_v38 = vadd.f32 %v1370_v4, %v644_v44  ;;  %v6964_v18 = vadd.f32 %v1367_v10, %v641_v51  ;;  %v6966_v46 = vadd.f32 %v1369_v41, %v643_v34  ;;  %v6969_v31 = vadd.f32 %v11583_v35, %v3073_v11  ;;  %v11591_v44 = vld [vmem:[#allocation53_spill] sm:$0xff]  ;;  %v11592_v11 = vld [vmem:[#allocation55_spill] sm:$0xff]  ;;  %v11593_v10 = vld [vmem:[#allocation56_spill] sm:$0xff] }
  0xd9   : > { %v1896_v40 = vadd.f32 %v1384_v21, %v11586_v59  ;;  %v6976_v61 = vmul.f32 %v6272_v42, %v11587_v17  ;;  %v6980_v39 = vmul.f32 %v6285_v45, %v11587_v17  ;;  %v6984_v4 = vmul.f32 %v6298_v48, %v11587_v17  ;;  %v6993_v21 = vpop.permute.xlu1 %2328  ;;  %v11629_v53 = vld [vmem:[#allocation45_spill] sm:$0xff] }
  0xda   : > { %11584 = vst [vmem:[#allocation116_spill] sm:$0xff] %v6969_v31  ;;  %v1898_v51 = vadd.f32 %v1386_v49, %v11591_v44  ;;  %v1895_v34 = vadd.f32 %v1383_v12, %v11592_v11  ;;  %v1897_v41 = vadd.f32 %v1385_v24, %v11593_v10  ;;  %v6991_v59 = vmul.f32 %v6310_v52, %v11587_v17  ;;  %v11601_v12 = vld [vmem:[#allocation4_spill] sm:$0xff] }
  0xdb   : > { %11588 = vst [vmem:[#allocation52_spill] sm:$0xff] %v6976_v61  ;;  %11589 = vst [vmem:[#allocation118_spill] sm:$0xff] %v6980_v39  ;;  %v6997_v1 = vmul.f32 %v6272_v42, %v11596_v36  ;;  %v7000_v35 = vadd.f32 %v6788_v33, %v3075_v7  ;;  %v7002_v31 = vadd.f32 %v1340_v20, %v614_v5  ;;  %v11622_v61 = vld [vmem:[#allocation69_spill] sm:$0xff]  ;;  %v11624_v37 = vmax.f32 %v11623_v26, 0.0 }
  0xdc   : > { %11590 = vst [vmem:[#allocation119_spill] sm:$0xff] %v6984_v4  ;;  %11594 = vst [vmem:[#allocation53_spill] sm:$0xff] %v6991_v59  ;;  %v7004_v49 = vadd.f32 %v1356_v8, %v630_v29  ;;  %1146 = vperm.xlu1 %6041, %v11601_v12   ;;  %v2622_v24 = vmul.f32 %v6320_v55, %v6993_v21  ;;  %v2624_v44 = vmul.f32 %v6324_v56, %v6993_v21  ;;  %v7031_v8 = vpop.permute.xlu0 %2300  ;;  %v11621_v4 = vld [vmem:[#allocation68_spill] sm:$0xff] }
  0xdd   : > { %11595 = vst [vmem:[#allocation55_spill] sm:$0xff] %v6993_v21  ;;  %11597 = vst [vmem:[#allocation56_spill] sm:$0xff] %v6997_v1  ;;  %v2621_v11 = vmul.f32 %v6328_v57, %v6993_v21  ;;  %v2623_v10 = vmul.f32 %v6332_v58, %v6993_v21  ;;  %v7017_v7 = vmul.f32 %v6285_v45, %v11596_v36 }
  0xde   : > { %11598 = vst [vmem:[#allocation120_spill] sm:$0xff] %v7000_v35  ;;  %11599 = vst [vmem:[#allocation121_spill] sm:$0xff] %v7002_v31  ;;  %v7021_v5 = vmul.f32 %v6298_v48, %v11596_v36  ;;  %v7025_v29 = vmul.f32 %v6310_v52, %v11596_v36  ;;  %v7029_v20 = vmul.f32 %v6272_v42, %v6833_v6 }
  0xdf   : > { %11600 = vst [vmem:[#allocation122_spill] sm:$0xff] %v7004_v49  ;;  %11602 = vst [vmem:[#allocation4_spill] sm:$0xff] %v7017_v7  ;;  %v3134_v17 = vadd.f32 %v2622_v24, %v1896_v40  ;;  %v3136_v21 = vadd.f32 %v2624_v44, %v1898_v51  ;;  %v3133_v49 = vadd.f32 %v2621_v11, %v1895_v34  ;;  %v11611_v24 = vld [vmem:[#allocation30_spill] sm:$0xff]  ;;  %v11612_v11 = vld [vmem:[#allocation31_spill] sm:$0xff] }
  0xe0   : > { %11603 = vst [vmem:[#allocation123_spill] sm:$0xff] %v7021_v5  ;;  %11604 = vst [vmem:[#allocation124_spill] sm:$0xff] %v7025_v29  ;;  %v3135_v31 = vadd.f32 %v2623_v10, %v1897_v41  ;;  %v2510_v35 = vmul.f32 %v6320_v55, %v7031_v8  ;;  %v2512_v33 = vmul.f32 %v6324_v56, %v7031_v8  ;;  %6042 = vset.pattern.permute.xlu1 %v11472_v15  ;;  %v11614_v7 = vld [vmem:[#allocation36_spill] sm:$0xff] }
  0xe1   : > { %11605 = vst [vmem:[#allocation125_spill] sm:$0xff] %v7029_v20  ;;  %11606 = vst [vmem:[#allocation126_spill] sm:$0xff] %v7031_v8  ;;  %v2509_v36 = vmul.f32 %v6328_v57, %v7031_v8  ;;  %v2511_v29 = vmul.f32 %v6332_v58, %v7031_v8  ;;  %v7042_v20 = vpop.permute.xlu1 %345  ;;  %v7045_v40 = vadd.f32 %v6342_v62, %v3134_v17  ;;  %2384 = vperm.xlu1 %6042, %v11601_v12   ;;  %v11613_v17 = vld [vmem:[#allocation35_spill] sm:$0xff]  ;;  %v7064_v8 = vpop.permute.xlu0 %2308 }
  0xe2   : > { %11607 = vst [vmem:[#allocation127_spill] sm:$0xff] %v7042_v20  ;;  %v7049_v51 = vmul.f32 %v6285_v45, %v6833_v6  ;;  %v7053_v34 = vmul.f32 %v6298_v48, %v6833_v6  ;;  %v7057_v41 = vmul.f32 %v6310_v52, %v6833_v6  ;;  %v3022_v44 = vadd.f32 %v2510_v35, %v11611_v24 }
  0xe3   : > { %v3024_v10 = vadd.f32 %v2512_v33, %v11612_v11  ;;  %v3021_v5 = vadd.f32 %v2509_v36, %v11613_v17  ;;  %v3023_v1 = vadd.f32 %v2511_v29, %v11614_v7  ;;  %11615 = vst [vmem:[#allocation30_spill] sm:$0xff] %v7064_v8  ;;  %v7071_v6 = vadd.f32 %v6350_v2, %v3133_v49 }
  0xe4   : > { %11608 = vst [vmem:[#allocation128_spill] sm:$0xff] %v7049_v51  ;;  %11609 = vst [vmem:[#allocation129_spill] sm:$0xff] %v7053_v34  ;;  %v7068_v34 = vadd.f32 %v6346_v63, %v3136_v21  ;;  %v7074_v12 = vadd.f32 %v6354_v3, %v3135_v31  ;;  %v3618_v35 = vadd.f32 %v6342_v62, %v3022_v44  ;;  %v11619_v51 = vld [vmem:[#allocation64_spill] sm:$0xff]  ;;  %v11630_v52 = vmax.f32 %v11629_v53, 0.0 }
  0xe5   : > { %11610 = vst [vmem:[#allocation130_spill] sm:$0xff] %v7057_v41  ;;  %v3620_v33 = vadd.f32 %v6346_v63, %v3024_v10  ;;  %v3617_v36 = vadd.f32 %v6350_v2, %v3021_v5  ;;  %v3619_v7 = vadd.f32 %v6354_v3, %v3023_v1  ;;  %v2542_v29 = vmul.f32 %v6320_v55, %v7064_v8  ;;  %v7089_v24 = vpop.permute.xlu1 %1094  ;;  %v11617_v10 = vld [vmem:[#allocation6_spill] sm:$0xff]  ;;  %v7092_v17 = vpop.permute.xlu0 %2316 }
  0xe6   : > { %v2544_v21 = vmul.f32 %v6324_v56, %v7064_v8  ;;  %v2541_v49 = vmul.f32 %v6328_v57, %v7064_v8  ;;  %v2543_v31 = vmul.f32 %v6332_v58, %v7064_v8  ;;  %6043 = vset.pattern.permute.xlu1 %v11483_v25  ;;  %11616 = vst [vmem:[#allocation31_spill] sm:$0xff] %v7089_v24  ;;  %v4130_v44 = vmax.f32 %v3618_v35, 0.0 }
  0xe7   : > { %v4132_v5 = vmax.f32 %v3620_v33, 0.0  ;;  %v4129_v11 = vmax.f32 %v3617_v36, 0.0  ;;  %v4131_v1 = vmax.f32 %v3619_v7, 0.0  ;;  %415 = vperm.xlu1 %6043, %v11617_v10   ;;  %11618 = vst [vmem:[#allocation35_spill] sm:$0xff] %v7092_v17  ;;  %v3054_v41 = vadd.f32 %v2542_v29, %v11619_v51  ;;  %v11627_v36 = vld [vmem:[#allocation44_spill] sm:$0xff] }
  0xe8   : > { %v3056_v59 = vadd.f32 %v2544_v21, %v11620_v9  ;;  %v3053_v39 = vadd.f32 %v2541_v49, %v11621_v4  ;;  %v3055_v8 = vadd.f32 %v2543_v31, %v11622_v61  ;;  %v5470_v32 = vpack.c.bf16 %v11624_v37, %v4130_v44  ;;  %v11633_v44 = vld [vmem:[#allocation82_spill] sm:$0xff] }
  0xe9   : > { %v11626_v35 = vmax.f32 %v11625_v54, 0.0  ;;  %v11628_v7 = vmax.f32 %v11627_v36, 0.0  ;;  %v5536_v14 = vpack.c.bf16 %v11630_v52, %v4131_v1  ;;  %v3650_v51 = vadd.f32 %v6342_v62, %v3054_v41  ;;  %v7110_v29 = vpop.permute.xlu1 %1098 }
  0xea   : > { %v3652_v9 = vadd.f32 %v6346_v63, %v3056_v59  ;;  %v3649_v4 = vadd.f32 %v6350_v2, %v3053_v39  ;;  %v3651_v61 = vadd.f32 %v6354_v3, %v3055_v8  ;;  %11631 = vst [vmem:[#allocation36_spill] sm:$0xff] %v7110_v29  ;;  %5471 = vmatprep.subr.bf16.mxu0 %v5470_v32  ;;  %v4244_v53 = vmax.f32 %v7068_v34, 0.0  ;;  %v7120_v32 = vpop.permute.xlu0 %2324 }
  0xeb   : > { %v5534_v33 = vpack.c.bf16 %v11626_v35, %v4132_v5  ;;  %v5472_v0 = vpack.c.bf16 %v11628_v7, %v4129_v11  ;;  %v2574_v26 = vmul.f32 %v6320_v55, %v7092_v17  ;;  %v2576_v54 = vmul.f32 %v6324_v56, %v7092_v17  ;;  %6044 = vset.pattern.permute.xlu1 %v11582_v16  ;;  %v11635_v11 = vld [vmem:[#allocation83_spill] sm:$0xff]  ;;  %v11639_v7 = vld [vmem:[#allocation86_spill] sm:$0xff] }
  0xec   : > { %v2573_v52 = vmul.f32 %v6328_v57, %v7092_v17  ;;  %v4162_v37 = vmax.f32 %v3650_v51, 0.0  ;;  %v4164_v39 = vmax.f32 %v3652_v9, 0.0  ;;  %v4161_v59 = vmax.f32 %v3649_v4, 0.0  ;;  %11632 = vst [vmem:[#allocation6_spill] sm:$0xff] %v7120_v32  ;;  %1150 = vperm.xlu1 %6044, %v11617_v10  }
  0xed   : > { %5535 = vmatprep.subr.bf16.mxu1 %v5534_v33  ;;  %5473 = vmatpush1.bf16.msra.mxu0 %v5472_v0  ;;  %v4163_v8 = vmax.f32 %v3651_v61, 0.0  ;;  %v3086_v41 = vadd.f32 %v2574_v26, %v6806_v30  ;;  %v3088_v21 = vadd.f32 %v2576_v54, %v6808_v19  ;;  %v4241_v31 = vmax.f32 %v7071_v6, 0.0  ;;  %v11637_v33 = vld [vmem:[#allocation85_spill] sm:$0xff]  ;;  %v7140_v9 = vpop.permute.xlu1 %2336 }
  0xee   : > { %5537 = vmatpush1.bf16.msra.mxu1 %v5536_v14  ;;  %v3085_v49 = vadd.f32 %v2573_v52, %v6810_v60  ;;  %v11634_v5 = vmax.f32 %v11633_v44, 0.0  ;;  %v11636_v1 = vmax.f32 %v11635_v11, 0.0  ;;  %v11638_v14 = vmax.f32 %v11637_v33, 0.0  ;;  %11641 = vst [vmem:[#allocation64_spill] sm:$0xff] %v7140_v9  ;;  %v7163_v33 = vpop.permute.xlu0 %2332 }
  0xef   : > { %v11640_v51 = vmax.f32 %v11639_v7, 0.0  ;;  %v3682_v30 = vadd.f32 %v6342_v62, %v3086_v41  ;;  %v3684_v19 = vadd.f32 %v6346_v63, %v3088_v21  ;;  %v2575_v6 = vmul.f32 %v6332_v58, %v7092_v17  ;;  %11645 = vst [vmem:[#allocation65_spill] sm:$0xff] %v7163_v33 }
  0xf0   : > { %v5474_v0 = vpack.c.bf16 %v11634_v5, %v4162_v37  ;;  %v5538_v35 = vpack.c.bf16 %v11636_v1, %v4164_v39  ;;  %v5476_v36 = vpack.c.bf16 %v11638_v14, %v4161_v59  ;;  %v3681_v60 = vadd.f32 %v6350_v2, %v3085_v49 }
  0xf1   : > { %v5540_v10 = vpack.c.bf16 %v11640_v51, %v4163_v8  ;;  %v2606_v4 = vmul.f32 %v6320_v55, %v7120_v32  ;;  %v2608_v61 = vmul.f32 %v6324_v56, %v7120_v32  ;;  %v2605_v26 = vmul.f32 %v6328_v57, %v7120_v32  ;;  %v6059_v8 = vld [vmem:[%s6157_s22 + $0xb8] sm:$0xff] }
  0xf2   : > { %5475 = vmatprep.subr.bf16.mxu0 %v5474_v0  ;;  %5539 = vmatprep.subr.bf16.mxu1 %v5538_v35  ;;  %v4243_v54 = vmax.f32 %v7074_v12, 0.0  ;;  %v4194_v52 = vmax.f32 %v3682_v30, 0.0  ;;  %v4196_v37 = vmax.f32 %v3684_v19, 0.0  ;;  %v4193_v39 = vmax.f32 %v3681_v60, 0.0 }
  0xf3   : > { %5477 = vmatpush1.bf16.msra.mxu0 %v5476_v36  ;;  %5541 = vmatpush1.bf16.msra.mxu1 %v5540_v10  ;;  %v3087_v59 = vadd.f32 %v2575_v6, %v6814_v47  ;;  %v3118_v41 = vadd.f32 %v2606_v4, %v6946_v27  ;;  %v3120_v21 = vadd.f32 %v2608_v61, %v6962_v38  ;;  %v11642_v12 = vmax.f32 %v6871_v13, 0.0  ;;  %v11648_v4 = vld [vmem:[#allocation61_spill] sm:$0xff] }
  0xf4   : > { %1154 = vperm.xlu1 %6044, %v6059_v8   ;;  %v3117_v49 = vadd.f32 %v2605_v26, %v6964_v18  ;;  %v2607_v44 = vmul.f32 %v6332_v58, %v7120_v32  ;;  %v11643_v0 = vmax.f32 %v6874_v28, 0.0  ;;  %v11644_v1 = vmax.f32 %v6882_v22, 0.0  ;;  %v7169_v28 = vpop.permute.xlu1 %355 }
  0xf5   : > { %v5478_v5 = vpack.c.bf16 %v11642_v12, %v4194_v52  ;;  %v3683_v35 = vadd.f32 %v6354_v3, %v3087_v59  ;;  %v3714_v27 = vadd.f32 %v6342_v62, %v3118_v41  ;;  %v3716_v38 = vadd.f32 %v6346_v63, %v3120_v21  ;;  %11646 = vst [vmem:[#allocation68_spill] sm:$0xff] %v7169_v28 }
  0xf6   : > { %v5542_v11 = vpack.c.bf16 %v11643_v0, %v4196_v37  ;;  %v5480_v47 = vpack.c.bf16 %v11644_v1, %v4193_v39  ;;  %v3713_v18 = vadd.f32 %v6350_v2, %v3117_v49  ;;  %v3119_v14 = vadd.f32 %v2607_v44, %v6966_v46  ;;  %v6060_v0 = vld [vmem:[%s6157_s22 + $0xc0] sm:$0xff] }
  0xf7   : > { %5479 = vmatprep.subr.bf16.mxu0 %v5478_v5  ;;  %v4195_v13 = vmax.f32 %v3683_v35, 0.0  ;;  %v674_v22 = vmul.f32 %v6272_v42, %v7042_v20  ;;  %v1400_v36 = vmul.f32 %v6276_v43, %v7089_v24  ;;  %v1416_v7 = vmul.f32 %v6276_v43, %v7110_v29  ;;  %v11652_v35 = vld [vmem:[#allocation14_spill] sm:$0xff] }
  0xf8   : > { %5543 = vmatprep.subr.bf16.mxu1 %v5542_v11  ;;  %5481 = vmatpush1.bf16.msra.mxu0 %v5480_v47  ;;  %v4226_v51 = vmax.f32 %v3714_v27, 0.0  ;;  %v4228_v10 = vmax.f32 %v3716_v38, 0.0  ;;  %v4225_v46 = vmax.f32 %v3713_v18, 0.0  ;;  %v3715_v30 = vadd.f32 %v6354_v3, %v3119_v14  ;;  %v7194_v44 = vpop.permute.xlu1 %1102  ;;  %v11651_v11 = vld [vmem:[#allocation62_spill] sm:$0xff] }
  0xf9   : > { %6045 = vset.pattern.permute.xlu1 %v11472_v15  ;;  %v11647_v19 = vmax.f32 %v6885_v23, 0.0  ;;  %v1912_v6 = vadd.f32 %v1400_v36, %v674_v22  ;;  %v1928_v61 = vadd.f32 %v1416_v7, %v11648_v4  ;;  %v2638_v26 = vmul.f32 %v6320_v55, %v7163_v33  ;;  %11650 = vst [vmem:[#allocation69_spill] sm:$0xff] %v7194_v44 }
  0xfa   : > { %2392 = vperm.xlu1 %6045, %v6059_v8   ;;  %v11649_v52 = vmax.f32 %v7045_v40, 0.0  ;;  %v5546_v39 = vpack.c.bf16 %v4244_v53, %v4228_v10  ;;  %v5484_v59 = vpack.c.bf16 %v4241_v31, %v4225_v46  ;;  %v4227_v41 = vmax.f32 %v3715_v30, 0.0 }
  0xfb   : > { %v5544_v60 = vpack.c.bf16 %v11647_v19, %v4195_v13  ;;  %v2654_v23 = vmul.f32 %v6320_v55, %v7140_v9  ;;  %v3150_v8 = vadd.f32 %v2638_v26, %v1912_v6  ;;  %v676_v21 = vmul.f32 %v6285_v45, %v7042_v20  ;;  %v11654_v19 = vld [vmem:[#allocation66_spill] sm:$0xff]  ;;  %v11655_v6 = vld [vmem:[#allocation15_spill] sm:$0xff] }
  0xfc   : > { %v5482_v37 = vpack.c.bf16 %v11649_v52, %v4226_v51  ;;  %v1402_v49 = vmul.f32 %v11534_v50, %v7089_v24  ;;  %v5548_v40 = vpack.c.bf16 %v4243_v54, %v4227_v41  ;;  %v1418_v34 = vmul.f32 %v11534_v50, %v7110_v29  ;;  %v7217_v10 = vpop.permute.xlu1 %1106  ;;  %v11656_v52 = vld [vmem:[#allocation16_spill] sm:$0xff] }
  0xfd   : > { %5545 = vmatpush1.bf16.msra.mxu1 %v5544_v60  ;;  %v2640_v53 = vmul.f32 %v6324_v56, %v7163_v33  ;;  %v3166_v31 = vadd.f32 %v2654_v23, %v1928_v61  ;;  %v3746_v12 = vadd.f32 %v6342_v62, %v3150_v8  ;;  %v2656_v54 = vmul.f32 %v6324_v56, %v7140_v9 }
  0xfe   : > { %5483 = vmatprep.subr.bf16.mxu0 %v5482_v37  ;;  %5547 = vmatprep.subr.bf16.mxu1 %v5546_v39  ;;  %v1914_v5 = vadd.f32 %v1402_v49, %v676_v21  ;;  %v1930_v1 = vadd.f32 %v1418_v34, %v11651_v11  ;;  %v673_v47 = vmul.f32 %v6298_v48, %v7042_v20  ;;  %v11657_v34 = vld [vmem:[#allocation67_spill] sm:$0xff] }
  0xff   : > { %5485 = vmatpush1.bf16.msra.mxu0 %v5484_v59  ;;  %6046 = vset.pattern.permute.xlu1 %v11483_v25  ;;  %v1399_v27 = vmul.f32 %v11652_v35, %v7089_v24  ;;  %v3762_v38 = vadd.f32 %v6342_v62, %v3166_v31  ;;  %v4258_v18 = vmax.f32 %v3746_v12, 0.0  ;;  %v1415_v13 = vmul.f32 %v11652_v35, %v7110_v29  ;;  %v7233_v31 = vpop.permute.xlu0 %2340 }
 0x100   : > { %425 = vperm.xlu1 %6046, %v6060_v0   ;;  %v3152_v14 = vadd.f32 %v2640_v53, %v1914_v5  ;;  %v3168_v22 = vadd.f32 %v2656_v54, %v1930_v1  ;;  %v2637_v7 = vmul.f32 %v6328_v57, %v7163_v33  ;;  %v2653_v51 = vmul.f32 %v6328_v57, %v7140_v9  ;;  %v7238_v11 = vpop.permute.xlu1 %2344 }
 0x101   : > { %5549 = vmatpush1.bf16.msra.mxu1 %v5548_v40  ;;  %v1911_v36 = vadd.f32 %v1399_v27, %v673_v47  ;;  %11653 = vst [vmem:[#allocation42_spill] sm:$0xff] %v7217_v10  ;;  %v4274_v46 = vmax.f32 %v3762_v38, 0.0  ;;  %v1927_v60 = vadd.f32 %v1415_v13, %v11654_v19  ;;  %v675_v4 = vmul.f32 %v11655_v6, %v7042_v20  ;;  %v6061_v13 = vld [vmem:[%s6157_s22 + $0xc8] sm:$0xff] }
 0x102   : > { %v3748_v30 = vadd.f32 %v6346_v63, %v3152_v14  ;;  %v3764_v61 = vadd.f32 %v6346_v63, %v3168_v22  ;;  %v1401_v37 = vmul.f32 %v11656_v52, %v7089_v24  ;;  %v1417_v39 = vmul.f32 %v11656_v52, %v7110_v29  ;;  %11658 = vst [vmem:[#allocation43_spill] sm:$0xff] %v7233_v31  ;;  %v11709_v29 = vld [vmem:[#allocation110_spill] sm:$0xff] }
 0x103   : > { %v3149_v26 = vadd.f32 %v2637_v7, %v1911_v36  ;;  %v5486_v59 = vpack.c.bf16 %v4274_v46, %v4258_v18  ;;  %v3165_v23 = vadd.f32 %v2653_v51, %v1927_v60  ;;  %v2639_v8 = vmul.f32 %v6332_v58, %v7163_v33  ;;  %11659 = vst [vmem:[#allocation44_spill] sm:$0xff] %v7238_v11  ;;  %v11660_v51 = vld [vmem:[#allocation71_spill] sm:$0xff] }
 0x104   : > { %6047 = vset.pattern.permute.xlu1 %v11582_v16  ;;  %v4260_v41 = vmax.f32 %v3748_v30, 0.0  ;;  %v4276_v21 = vmax.f32 %v3764_v61, 0.0  ;;  %v1913_v40 = vadd.f32 %v1401_v37, %v675_v4  ;;  %v1929_v53 = vadd.f32 %v1417_v39, %v11657_v34  ;;  %v7258_v39 = vpop.permute.xlu1 %365 }
 0x105   : > { %1158 = vperm.xlu1 %6047, %v6060_v0   ;;  %v3745_v49 = vadd.f32 %v6350_v2, %v3149_v26  ;;  %5487 = vmatprep.subr.bf16.mxu0 %v5486_v59  ;;  %v3761_v12 = vadd.f32 %v6350_v2, %v3165_v23  ;;  %v2655_v5 = vmul.f32 %v6332_v58, %v7140_v9 }
 0x106   : > { %v706_v0 = vmul.f32 %v6272_v42, %v7169_v28  ;;  %v1432_v1 = vmul.f32 %v6276_v43, %v7194_v44  ;;  %v5550_v54 = vpack.c.bf16 %v4276_v21, %v4260_v41  ;;  %v3151_v27 = vadd.f32 %v2639_v8, %v1913_v40  ;;  %11661 = vst [vmem:[#allocation45_spill] sm:$0xff] %v7258_v39 }
 0x107   : > { %v4257_v47 = vmax.f32 %v3745_v49, 0.0  ;;  %v1448_v38 = vmul.f32 %v6276_v43, %v7217_v10  ;;  %v4273_v18 = vmax.f32 %v3761_v12, 0.0  ;;  %v3167_v14 = vadd.f32 %v2655_v5, %v1929_v53  ;;  %v11662_v53 = vld [vmem:[#allocation72_spill] sm:$0xff] }
 0x108   : > { %v1944_v22 = vadd.f32 %v1432_v1, %v706_v0  ;;  %v2670_v36 = vmul.f32 %v6320_v55, %v7233_v31  ;;  %5551 = vmatprep.subr.bf16.mxu1 %v5550_v54  ;;  %v3747_v7 = vadd.f32 %v6354_v3, %v3151_v27  ;;  %v2686_v30 = vmul.f32 %v6320_v55, %v7238_v11 }
 0x109   : > { %1162 = vperm.xlu1 %6047, %v6061_v13   ;;  %v1960_v46 = vadd.f32 %v1448_v38, %v11660_v51  ;;  %v708_v19 = vmul.f32 %v6285_v45, %v7169_v28  ;;  %v5488_v60 = vpack.c.bf16 %v4273_v18, %v4257_v47  ;;  %v3763_v4 = vadd.f32 %v6354_v3, %v3167_v14 }
 0x10a   : > { %v3182_v61 = vadd.f32 %v2670_v36, %v1944_v22  ;;  %v1434_v26 = vmul.f32 %v11534_v50, %v7194_v44  ;;  %v4259_v37 = vmax.f32 %v3747_v7, 0.0  ;;  %v1450_v41 = vmul.f32 %v11534_v50, %v7217_v10  ;;  %v7278_v22 = vpop.permute.xlu1 %1110  ;;  %v11664_v7 = vld [vmem:[#allocation76_spill] sm:$0xff] }
 0x10b   : > { %v3198_v59 = vadd.f32 %v2686_v30, %v1960_v46  ;;  %v2672_v23 = vmul.f32 %v6324_v56, %v7233_v31  ;;  %5489 = vmatpush1.bf16.msra.mxu0 %v5488_v60  ;;  %v4275_v8 = vmax.f32 %v3763_v4, 0.0  ;;  %v2688_v40 = vmul.f32 %v6324_v56, %v7238_v11  ;;  %11663 = vst [vmem:[#allocation82_spill] sm:$0xff] %v7278_v22 }
 0x10c   : > { %v3778_v21 = vadd.f32 %v6342_v62, %v3182_v61  ;;  %v1946_v49 = vadd.f32 %v1434_v26, %v708_v19  ;;  %v1962_v12 = vadd.f32 %v1450_v41, %v11662_v53  ;;  %v705_v5 = vmul.f32 %v6298_v48, %v7169_v28  ;;  %v6062_v26 = vld [vmem:[%s6157_s22 + $0xd0] sm:$0xff] }
 0x10d   : > { %6048 = vset.pattern.permute.xlu1 %v11472_v15  ;;  %v3794_v34 = vadd.f32 %v6342_v62, %v3198_v59  ;;  %v1431_v0 = vmul.f32 %v11652_v35, %v7194_v44  ;;  %v5552_v1 = vpack.c.bf16 %v4275_v8, %v4259_v37  ;;  %v1447_v27 = vmul.f32 %v11652_v35, %v7217_v10 }
 0x10e   : > { %2400 = vperm.xlu1 %6048, %v6061_v13   ;;  %v4290_v54 = vmax.f32 %v3778_v21, 0.0  ;;  %v3184_v47 = vadd.f32 %v2672_v23, %v1946_v49  ;;  %v3200_v18 = vadd.f32 %v2688_v40, %v1962_v12  ;;  %v2669_v13 = vmul.f32 %v6328_v57, %v7233_v31  ;;  %v11666_v12 = vld [vmem:[#allocation77_spill] sm:$0xff] }
 0x10f   : > { %v4306_v38 = vmax.f32 %v3794_v34, 0.0  ;;  %v1943_v14 = vadd.f32 %v1431_v0, %v705_v5  ;;  %5553 = vmatpush1.bf16.msra.mxu1 %v5552_v1  ;;  %v1959_v51 = vadd.f32 %v1447_v27, %v11664_v7  ;;  %v2685_v46 = vmul.f32 %v6328_v57, %v7238_v11  ;;  %v7298_v34 = vpop.permute.xlu0 %2348  ;;  %v7302_v0 = vpop.permute.xlu1 %1114 }
 0x110   : > { %v3780_v36 = vadd.f32 %v6346_v63, %v3184_v47  ;;  %v707_v30 = vmul.f32 %v11655_v6, %v7169_v28  ;;  %v3796_v60 = vadd.f32 %v6346_v63, %v3200_v18  ;;  %v1433_v61 = vmul.f32 %v11656_v52, %v7194_v44  ;;  %11665 = vst [vmem:[#allocation83_spill] sm:$0xff] %v7298_v34 }
 0x111   : > { %v5490_v19 = vpack.c.bf16 %v4306_v38, %v4290_v54  ;;  %v3181_v4 = vadd.f32 %v2669_v13, %v1943_v14  ;;  %v3197_v59 = vadd.f32 %v2685_v46, %v1959_v51  ;;  %v1449_v41 = vmul.f32 %v11656_v52, %v7217_v10  ;;  %11667 = vst [vmem:[#allocation85_spill] sm:$0xff] %v7302_v0  ;;  %v11668_v46 = vld [vmem:[#allocation84_spill] sm:$0xff]  ;;  %v11695_v10 = vld [vmem:[#allocation3_spill] sm:$0xff] }
 0x112   : > { %6049 = vset.pattern.permute.xlu1 %v11483_v25  ;;  %v4292_v37 = vmax.f32 %v3780_v36, 0.0  ;;  %v2671_v23 = vmul.f32 %v6332_v58, %v7233_v31  ;;  %v4308_v8 = vmax.f32 %v3796_v60, 0.0  ;;  %v1945_v49 = vadd.f32 %v1433_v61, %v707_v30 }
 0x113   : > { %435 = vperm.xlu1 %6049, %v6062_v26   ;;  %5491 = vmatprep.subr.bf16.mxu0 %v5490_v19  ;;  %v3777_v21 = vadd.f32 %v6350_v2, %v3181_v4  ;;  %v2687_v40 = vmul.f32 %v6332_v58, %v7238_v11  ;;  %v3793_v53 = vadd.f32 %v6350_v2, %v3197_v59 }
 0x114   : > { %v1961_v5 = vadd.f32 %v1449_v41, %v11666_v12  ;;  %v738_v1 = vmul.f32 %v6272_v42, %v7258_v39  ;;  %v1464_v54 = vmul.f32 %v6276_v43, %v7278_v22  ;;  %v5554_v47 = vpack.c.bf16 %v4308_v8, %v4292_v37  ;;  %v7320_v41 = vpop.permute.xlu1 %2352  ;;  %v6063_v12 = vld [vmem:[%s6157_s22 + $0xd8] sm:$0xff] }
 0x115   : > { %v4289_v27 = vmax.f32 %v3777_v21, 0.0  ;;  %v3183_v38 = vadd.f32 %v2671_v23, %v1945_v49  ;;  %v1480_v18 = vmul.f32 %v6276_v43, %v7302_v0  ;;  %v4305_v14 = vmax.f32 %v3793_v53, 0.0  ;;  %11669 = vst [vmem:[#allocation86_spill] sm:$0xff] %v7320_v41 }
 0x116   : > { %v3199_v13 = vadd.f32 %v2687_v40, %v1961_v5  ;;  %v1976_v36 = vadd.f32 %v1464_v54, %v738_v1  ;;  %v2702_v7 = vmul.f32 %v6320_v55, %v7298_v34  ;;  %5555 = vmatprep.subr.bf16.mxu1 %v5554_v47  ;;  %v740_v19 = vmul.f32 %v6285_v45, %v7258_v39  ;;  %v11670_v5 = vld [vmem:[#allocation87_spill] sm:$0xff] }
 0x117   : > { %6050 = vset.pattern.permute.xlu1 %v11582_v16  ;;  %v3779_v51 = vadd.f32 %v6354_v3, %v3183_v38  ;;  %v1992_v30 = vadd.f32 %v1480_v18, %v11668_v46  ;;  %v5492_v60 = vpack.c.bf16 %v4305_v14, %v4289_v27  ;;  %v1466_v37 = vmul.f32 %v11534_v50, %v7278_v22 }
 0x118   : > { %1166 = vperm.xlu1 %6050, %v6062_v26   ;;  %v3795_v4 = vadd.f32 %v6354_v3, %v3199_v13  ;;  %v3214_v61 = vadd.f32 %v2702_v7, %v1976_v36  ;;  %v1482_v23 = vmul.f32 %v11534_v50, %v7302_v0  ;;  %v2704_v26 = vmul.f32 %v6324_v56, %v7298_v34 }
 0x119   : > { %v4291_v59 = vmax.f32 %v3779_v51, 0.0  ;;  %v737_v8 = vmul.f32 %v6298_v48, %v7258_v39  ;;  %5493 = vmatpush1.bf16.msra.mxu0 %v5492_v60  ;;  %v2718_v49 = vmul.f32 %v6320_v55, %v7320_v41  ;;  %v1978_v53 = vadd.f32 %v1466_v37, %v740_v19  ;;  %v11671_v51 = vld [vmem:[#allocation88_spill] sm:$0xff]  ;;  %v7342_v60 = vpop.permute.xlu1 %375 }
 0x11a   : > { %v4307_v21 = vmax.f32 %v3795_v4, 0.0  ;;  %v3810_v40 = vadd.f32 %v6342_v62, %v3214_v61  ;;  %v1994_v1 = vadd.f32 %v1482_v23, %v11670_v5  ;;  %v2720_v54 = vmul.f32 %v6324_v56, %v7320_v41  ;;  %11672 = vst [vmem:[#allocation61_spill] sm:$0xff] %v7342_v60  ;;  %v7358_v5 = vpop.permute.xlu0 %2356 }
 0x11b   : > { %v1463_v47 = vmul.f32 %v11652_v35, %v7278_v22  ;;  %v1479_v27 = vmul.f32 %v11652_v35, %v7302_v0  ;;  %v3230_v18 = vadd.f32 %v2718_v49, %v1992_v30  ;;  %v3216_v13 = vadd.f32 %v2704_v26, %v1978_v53  ;;  %11673 = vst [vmem:[#allocation62_spill] sm:$0xff] %v7358_v5 }
 0x11c   : > { %1170 = vperm.xlu1 %6050, %v6063_v12   ;;  %v5556_v38 = vpack.c.bf16 %v4307_v21, %v4291_v59  ;;  %v4322_v14 = vmax.f32 %v3810_v40, 0.0  ;;  %v3232_v36 = vadd.f32 %v2720_v54, %v1994_v1  ;;  %v2701_v19 = vmul.f32 %v6328_v57, %v7298_v34 }
 0x11d   : > { %v1975_v7 = vadd.f32 %v1463_v47, %v737_v8  ;;  %v1991_v46 = vadd.f32 %v1479_v27, %v11671_v51  ;;  %v3826_v4 = vadd.f32 %v6342_v62, %v3230_v18  ;;  %v3812_v61 = vadd.f32 %v6346_v63, %v3216_v13  ;;  %v11674_v27 = vld [vmem:[#allocation89_spill] sm:$0xff] }
 0x11e   : > { %5557 = vmatpush1.bf16.msra.mxu1 %v5556_v38  ;;  %v2717_v37 = vmul.f32 %v6328_v57, %v7320_v41  ;;  %v739_v30 = vmul.f32 %v11655_v6, %v7258_v39  ;;  %v3828_v59 = vadd.f32 %v6346_v63, %v3232_v36  ;;  %v1465_v26 = vmul.f32 %v11656_v52, %v7278_v22  ;;  %v11690_v22 = vld [vmem:[#allocation100_spill] sm:$0xff] }
 0x11f   : > { %v3213_v23 = vadd.f32 %v2701_v19, %v1975_v7  ;;  %v1481_v8 = vmul.f32 %v11656_v52, %v7302_v0  ;;  %v4338_v21 = vmax.f32 %v3826_v4, 0.0  ;;  %v4324_v49 = vmax.f32 %v3812_v61, 0.0  ;;  %v7367_v7 = vpop.permute.xlu1 %1118 }
 0x120   : > { %6051 = vset.pattern.permute.xlu1 %v11472_v15  ;;  %v3229_v40 = vadd.f32 %v2717_v37, %v1991_v46  ;;  %v2703_v53 = vmul.f32 %v6332_v58, %v7298_v34  ;;  %v4340_v1 = vmax.f32 %v3828_v59, 0.0  ;;  %v1977_v47 = vadd.f32 %v1465_v26, %v739_v30  ;;  %11675 = vst [vmem:[#allocation14_spill] sm:$0xff] %v7367_v7  ;;  %v6064_v59 = vld [vmem:[%s6157_s22 + $0xe0] sm:$0xff] }
 0x121   : > { %2408 = vperm.xlu1 %6051, %v6063_v12   ;;  %v3809_v54 = vadd.f32 %v6350_v2, %v3213_v23  ;;  %v1993_v38 = vadd.f32 %v1481_v8, %v11674_v27  ;;  %v5494_v18 = vpack.c.bf16 %v4338_v21, %v4322_v14  ;;  %v2719_v12 = vmul.f32 %v6332_v58, %v7320_v41 }
 0x122   : > { %v3825_v13 = vadd.f32 %v6350_v2, %v3229_v40  ;;  %v770_v36 = vmul.f32 %v6272_v42, %v7342_v60  ;;  %v5558_v51 = vpack.c.bf16 %v4340_v1, %v4324_v49  ;;  %v3215_v19 = vadd.f32 %v2703_v53, %v1977_v47 }
 0x123   : > { %v4321_v46 = vmax.f32 %v3809_v54, 0.0  ;;  %v2734_v4 = vmul.f32 %v6320_v55, %v7358_v5  ;;  %5495 = vmatprep.subr.bf16.mxu0 %v5494_v18  ;;  %v3231_v61 = vadd.f32 %v2719_v12, %v1993_v38  ;;  %v1496_v37 = vmul.f32 %v6276_v43, %v7367_v7  ;;  %v7385_v54 = vpop.permute.xlu1 %1122 }
 0x124   : > { %v4337_v14 = vmax.f32 %v3825_v13, 0.0  ;;  %v772_v30 = vmul.f32 %v6285_v45, %v7342_v60  ;;  %5559 = vmatprep.subr.bf16.mxu1 %v5558_v51  ;;  %v3811_v23 = vadd.f32 %v6354_v3, %v3215_v19  ;;  %v1498_v26 = vmul.f32 %v11534_v50, %v7367_v7  ;;  %11676 = vst [vmem:[#allocation66_spill] sm:$0xff] %v7385_v54 }
 0x125   : > { %6052 = vset.pattern.permute.xlu1 %v11483_v25  ;;  %v2736_v8 = vmul.f32 %v6324_v56, %v7358_v5  ;;  %v3827_v49 = vadd.f32 %v6354_v3, %v3231_v61  ;;  %v2008_v40 = vadd.f32 %v1496_v37, %v770_v36  ;;  %v769_v53 = vmul.f32 %v6298_v48, %v7342_v60  ;;  %v7400_v61 = vpop.permute.xlu0 %2364 }
 0x126   : > { %445 = vperm.xlu1 %6052, %v6064_v59   ;;  %v5496_v21 = vpack.c.bf16 %v4337_v14, %v4321_v46  ;;  %v4323_v1 = vmax.f32 %v3811_v23, 0.0  ;;  %v2010_v47 = vadd.f32 %v1498_v26, %v772_v30  ;;  %v1495_v27 = vmul.f32 %v11652_v35, %v7367_v7  ;;  %11677 = vst [vmem:[#allocation15_spill] sm:$0xff] %v7400_v61  ;;  %v11678_v30 = vld [vmem:[#allocation95_spill] sm:$0xff]  ;;  %v11679_v26 = vld [vmem:[#allocation96_spill] sm:$0xff] }
 0x127   : > { %v2733_v38 = vmul.f32 %v6328_v57, %v7358_v5  ;;  %v4339_v18 = vmax.f32 %v3827_v49, 0.0  ;;  %v1512_v13 = vmul.f32 %v6276_v43, %v7385_v54  ;;  %v3246_v12 = vadd.f32 %v2734_v4, %v2008_v40  ;;  %v11680_v49 = vld [vmem:[#allocation97_spill] sm:$0xff] }
 0x128   : > { %5497 = vmatpush1.bf16.msra.mxu0 %v5496_v21  ;;  %v1514_v36 = vmul.f32 %v11534_v50, %v7385_v54  ;;  %v3248_v51 = vadd.f32 %v2736_v8, %v2010_v47  ;;  %v1511_v46 = vmul.f32 %v11652_v35, %v7385_v54  ;;  %v2007_v19 = vadd.f32 %v1495_v27, %v769_v53  ;;  %v7409_v27 = vpop.permute.xlu1 %2360 }
 0x129   : > { %v771_v14 = vmul.f32 %v11655_v6, %v7342_v60  ;;  %v5560_v37 = vpack.c.bf16 %v4339_v18, %v4323_v1  ;;  %v2024_v23 = vadd.f32 %v1512_v13, %v11678_v30  ;;  %v3842_v4 = vadd.f32 %v6342_v62, %v3246_v12  ;;  %11681 = vst [vmem:[#allocation16_spill] sm:$0xff] %v7409_v27  ;;  %v11682_v30 = vld [vmem:[#allocation98_spill] sm:$0xff] }
 0x12a   : > { %6053 = vset.pattern.permute.xlu1 %v11582_v16  ;;  %v2026_v21 = vadd.f32 %v1514_v36, %v11679_v26  ;;  %v3844_v8 = vadd.f32 %v6346_v63, %v3248_v51  ;;  %v2023_v40 = vadd.f32 %v1511_v46, %v11680_v49  ;;  %v3245_v47 = vadd.f32 %v2733_v38, %v2007_v19  ;;  %v6065_v46 = vld [vmem:[%s6157_s22 + $0xe8] sm:$0xff] }
 0x12b   : > { %1174 = vperm.xlu1 %6053, %v6064_v59   ;;  %v1497_v53 = vmul.f32 %v11656_v52, %v7367_v7  ;;  %5561 = vmatpush1.bf16.msra.mxu1 %v5560_v37  ;;  %v4354_v1 = vmax.f32 %v3842_v4, 0.0  ;;  %v1513_v59 = vmul.f32 %v11656_v52, %v7385_v54  ;;  %v2735_v18 = vmul.f32 %v6332_v58, %v7358_v5 }
 0x12c   : > { %v7417_v13 = vmul.f32 %v6320_v55, %v7400_v61  ;;  %v2750_v38 = vmul.f32 %v6320_v55, %v7409_v27  ;;  %v2752_v12 = vmul.f32 %v6324_v56, %v7409_v27  ;;  %v4356_v36 = vmax.f32 %v3844_v8, 0.0  ;;  %v7434_v8 = vpop.permute.xlu0 %2372 }
 0x12d   : > { %v2749_v51 = vmul.f32 %v6328_v57, %v7409_v27  ;;  %v3841_v19 = vadd.f32 %v6350_v2, %v3245_v47  ;;  %v2009_v37 = vadd.f32 %v1497_v53, %v771_v14  ;;  %v2025_v4 = vadd.f32 %v1513_v59, %v11682_v30  ;;  %11683 = vst [vmem:[#allocation67_spill] sm:$0xff] %v7434_v8  ;;  %v7438_v47 = vpop.permute.xlu1 %385 }
 0x12e   : > { %v2751_v26 = vmul.f32 %v6332_v58, %v7409_v27  ;;  %v3262_v49 = vadd.f32 %v2750_v38, %v2024_v23  ;;  %v3264_v5 = vadd.f32 %v2752_v12, %v2026_v21  ;;  %v7432_v7 = vmul.f32 %v6324_v56, %v7400_v61  ;;  %11684 = vst [vmem:[#allocation71_spill] sm:$0xff] %v7438_v47 }
 0x12f   : > { %1178 = vperm.xlu1 %6053, %v6065_v46   ;;  %v3261_v54 = vadd.f32 %v2749_v51, %v2023_v40  ;;  %v4353_v60 = vmax.f32 %v3841_v19, 0.0  ;;  %v3247_v41 = vadd.f32 %v2735_v18, %v2009_v37  ;;  %v2765_v14 = vmul.f32 %v6328_v57, %v7400_v61 }
 0x130   : > { %v3263_v34 = vadd.f32 %v2751_v26, %v2025_v4  ;;  %v3858_v53 = vadd.f32 %v6342_v62, %v3262_v49  ;;  %v3860_v23 = vadd.f32 %v6346_v63, %v3264_v5  ;;  %v2767_v40 = vmul.f32 %v6332_v58, %v7400_v61  ;;  %v7454_v37 = vpop.permute.xlu0 %2380  ;;  %v11689_v61 = vld [vmem:[#allocation90_spill] sm:$0xff] }
 0x131   : > { %v3857_v21 = vadd.f32 %v6350_v2, %v3261_v54  ;;  %v3843_v59 = vadd.f32 %v6354_v3, %v3247_v41  ;;  %v802_v38 = vmul.f32 %v6272_v42, %v7438_v47  ;;  %v804_v12 = vmul.f32 %v6285_v45, %v7438_v47  ;;  %11685 = vst [vmem:[#allocation72_spill] sm:$0xff] %v7454_v37 }
 0x132   : > { %v3859_v18 = vadd.f32 %v6354_v3, %v3263_v34  ;;  %v4370_v51 = vmax.f32 %v3858_v53, 0.0  ;;  %v4372_v5 = vmax.f32 %v3860_v23, 0.0  ;;  %v801_v54 = vmul.f32 %v6298_v48, %v7438_v47  ;;  %v7466_v23 = vpop.permute.xlu1 %1126 }
 0x133   : > { %6054 = vset.pattern.permute.xlu1 %v11472_v15  ;;  %v4369_v19 = vmax.f32 %v3857_v21, 0.0  ;;  %v4355_v30 = vmax.f32 %v3843_v59, 0.0  ;;  %v803_v34 = vmul.f32 %v11655_v6, %v7438_v47  ;;  %v7460_v41 = vmul.f32 %v6320_v55, %v7434_v8  ;;  %11686 = vst [vmem:[#allocation76_spill] sm:$0xff] %v7466_v23 }
 0x134   : > { %2416 = vperm.xlu1 %6054, %v6065_v46   ;;  %v4371_v4 = vmax.f32 %v3859_v18, 0.0  ;;  %v5498_v26 = vpack.c.bf16 %v4370_v51, %v4354_v1  ;;  %v5562_v46 = vpack.c.bf16 %v4372_v5, %v4356_v36  ;;  %v7464_v53 = vmul.f32 %v6324_v56, %v7434_v8  ;;  %v7487_v5 = vpop.permute.xlu0 %2388 }
 0x135   : > { %v5500_v49 = vpack.c.bf16 %v4369_v19, %v4353_v60  ;;  %v7470_v59 = vmul.f32 %v6328_v57, %v7434_v8  ;;  %v7474_v18 = vmul.f32 %v6332_v58, %v7434_v8  ;;  %v7478_v1 = vmul.f32 %v6320_v55, %v7454_v37  ;;  %11687 = vst [vmem:[#allocation77_spill] sm:$0xff] %v7487_v5  ;;  %v11688_v19 = vld [vmem:[#allocation70_spill] sm:$0xff] }
 0x136   : > { %v5564_v21 = vpack.c.bf16 %v4371_v4, %v4355_v30  ;;  %5499 = vmatprep.subr.bf16.mxu0 %v5498_v26  ;;  %v1528_v60 = vmul.f32 %v6276_v43, %v7466_v23  ;;  %v1530_v36 = vmul.f32 %v11534_v50, %v7466_v23  ;;  %v1527_v51 = vmul.f32 %v11652_v35, %v7466_v23  ;;  %v6066_v4 = vld [vmem:[%s6157_s22 + $0xf0] sm:$0xff]  ;;  %v7503_v39 = vpop.permute.xlu1 %1130 }
 0x137   : > { %5563 = vmatprep.subr.bf16.mxu1 %v5562_v46  ;;  %v7495_v26 = vmul.f32 %v6324_v56, %v7454_v37  ;;  %v7499_v8 = vmul.f32 %v6328_v57, %v7454_v37  ;;  %5501 = vmatpush1.bf16.msra.mxu0 %v5500_v49  ;;  %11691 = vst [vmem:[#allocation84_spill] sm:$0xff] %v7503_v39 }
 0x138   : > { %6055 = vset.pattern.permute.xlu1 %v11483_v25  ;;  %v1529_v25 = vmul.f32 %v11656_v52, %v7466_v23  ;;  %5565 = vmatpush1.bf16.msra.mxu1 %v5564_v21  ;;  %v2040_v27 = vadd.f32 %v1528_v60, %v802_v38  ;;  %v2042_v30 = vadd.f32 %v1530_v36, %v804_v12 }
 0x139   : > { %455 = vperm.xlu1 %6055, %v6066_v4   ;;  %v2039_v0 = vadd.f32 %v1527_v51, %v801_v54  ;;  %v7507_v11 = vmul.f32 %v6332_v58, %v7454_v37  ;;  %v7511_v31 = vmul.f32 %v6320_v55, %v7487_v5  ;;  %v7515_v49 = vmul.f32 %v6324_v56, %v7487_v5 }
 0x13a   : > { %v2041_v23 = vadd.f32 %v1529_v25, %v803_v34  ;;  %v1544_v38 = vmul.f32 %v6276_v43, %v7503_v39  ;;  %v3278_v12 = vadd.f32 %v7417_v13, %v2040_v27  ;;  %v1546_v54 = vmul.f32 %v11534_v50, %v7503_v39  ;;  %v11692_v25 = vld [vmem:[#allocation104_spill] sm:$0xff]  ;;  %v11693_v13 = vld [vmem:[#allocation49_spill] sm:$0xff] }
 0x13b   : > { %v3280_v34 = vadd.f32 %v7432_v7, %v2042_v30  ;;  %v1543_v21 = vmul.f32 %v11652_v35, %v7503_v39  ;;  %v3277_v60 = vadd.f32 %v2765_v14, %v2039_v0  ;;  %v1545_v36 = vmul.f32 %v11656_v52, %v7503_v39  ;;  %v11694_v30 = vld [vmem:[#allocation50_spill] sm:$0xff]  ;;  %v7536_v39 = vpop.permute.xlu1 %2368 }
 0x13c   : > { %v3279_v51 = vadd.f32 %v2767_v40, %v2041_v23  ;;  %v2056_v46 = vadd.f32 %v1544_v38, %v11692_v25  ;;  %v3874_v27 = vadd.f32 %v6342_v62, %v3278_v12  ;;  %v2058_v47 = vadd.f32 %v1546_v54, %v11693_v13  ;;  %11696 = vst [vmem:[#allocation87_spill] sm:$0xff] %v7536_v39  ;;  %v11698_v25 = vld [vmem:[#allocation108_spill] sm:$0xff] }
 0x13d   : > { %6057 = vset.pattern.permute.xlu1 %v11582_v16  ;;  %v3876_v7 = vadd.f32 %v6346_v63, %v3280_v34  ;;  %v2055_v16 = vadd.f32 %v1543_v21, %v11694_v30  ;;  %v3873_v37 = vadd.f32 %v6350_v2, %v3277_v60  ;;  %v2057_v0 = vadd.f32 %v1545_v36, %v11695_v10  ;;  %v7552_v21 = vpop.permute.xlu0 %2396  ;;  %v6067_v60 = vld [vmem:[%s6157_s22 + $0xf8] sm:$0xff]  ;;  %s10980_s22 = scalar_lea.vmem %s11003_s4, %s5461_s19 }
 0x13e   : > { %1182 = vperm.xlu1 %6057, %v6066_v4   ;;  %v3875_v14 = vadd.f32 %v6354_v3, %v3279_v51  ;;  %v4386_v40 = vmax.f32 %v3874_v27, 0.0  ;;  %v7540_v4 = vmul.f32 %v6328_v57, %v7487_v5  ;;  %v7544_v38 = vmul.f32 %v6332_v58, %v7487_v5  ;;  %11697 = vst [vmem:[#allocation88_spill] sm:$0xff] %v7552_v21 }
 0x13f   : > { %v4388_v23 = vmax.f32 %v3876_v7, 0.0  ;;  %v2782_v12 = vmul.f32 %v6320_v55, %v7536_v39  ;;  %v2784_v10 = vmul.f32 %v6324_v56, %v7536_v39  ;;  %v2781_v54 = vmul.f32 %v6328_v57, %v7536_v39 }
 0x140   : > { %v4385_v34 = vmax.f32 %v3873_v37, 0.0  ;;  %v2783_v36 = vmul.f32 %v6332_v58, %v7536_v39  ;;  %v4387_v51 = vmax.f32 %v3875_v14, 0.0  ;;  %v7559_v27 = vmul.f32 %v6272_v42, %v11698_v25 }
 0x141   : > { %v7563_v13 = vmul.f32 %v6320_v55, %v7552_v21  ;;  %v3294_v7 = vadd.f32 %v2782_v12, %v2056_v46  ;;  %v3296_v30 = vadd.f32 %v2784_v10, %v2058_v47  ;;  %v3293_v5 = vadd.f32 %v2781_v54, %v2055_v16  ;;  %v7581_v46 = vpop.permute.xlu1 %395  ;;  %v7600_v33 = vpop.permute.xlu0 %2404 }
 0x142   : > { %1186 = vperm.xlu1 %6057, %v6067_v60   ;;  %11699 = vst [vmem:[#allocation89_spill] sm:$0xff] %v7559_v27  ;;  %v7567_v37 = vmul.f32 %v6285_v45, %v11698_v25  ;;  %v3295_v44 = vadd.f32 %v2783_v36, %v2057_v0  ;;  %v7571_v39 = vmul.f32 %v6324_v56, %v7552_v21  ;;  %11705 = vst [vmem:[#allocation90_spill] sm:$0xff] %v7581_v46 }
 0x143   : > { %11700 = vst [vmem:[#allocation95_spill] sm:$0xff] %v7563_v13  ;;  %v7575_v14 = vmul.f32 %v6298_v48, %v11698_v25  ;;  %v7579_v28 = vmul.f32 %v6328_v57, %v7552_v21  ;;  %v3890_v47 = vadd.f32 %v6342_v62, %v3294_v7  ;;  %v3892_v16 = vadd.f32 %v6346_v63, %v3296_v30 }
 0x144   : > { %11701 = vst [vmem:[#allocation96_spill] sm:$0xff] %v7567_v37  ;;  %11702 = vst [vmem:[#allocation97_spill] sm:$0xff] %v7571_v39  ;;  %v3889_v0 = vadd.f32 %v6350_v2, %v3293_v5  ;;  %v7588_v12 = vmul.f32 %v11655_v6, %v11698_v25  ;;  %v3891_v10 = vadd.f32 %v6354_v3, %v3295_v44 }
 0x145   : > { %11703 = vst [vmem:[#allocation98_spill] sm:$0xff] %v7575_v14  ;;  %11704 = vst [vmem:[#allocation70_spill] sm:$0xff] %v7579_v28  ;;  %v834_v54 = vmul.f32 %v6272_v42, %v7581_v46  ;;  %v836_v36 = vmul.f32 %v6285_v45, %v7581_v46  ;;  %v833_v7 = vmul.f32 %v6298_v48, %v7581_v46  ;;  %v4402_v30 = vmax.f32 %v3890_v47, 0.0 }
 0x146   : > { %11706 = vst [vmem:[#allocation100_spill] sm:$0xff] %v7588_v12  ;;  %6058 = vset.pattern.permute.xlu1 %v11472_v15  ;;  %v4404_v5 = vmax.f32 %v3892_v16, 0.0  ;;  %v4401_v9 = vmax.f32 %v3889_v0, 0.0  ;;  %v835_v25 = vmul.f32 %v11655_v6, %v7581_v46  ;;  %11707 = vst [vmem:[#allocation104_spill] sm:$0xff] %v7600_v33  ;;  %v4403_v15 = vmax.f32 %v3891_v10, 0.0  ;;  %v7618_v10 = vpop.permute.xlu1 %1134  ;;  %v11752_v12 = vld [vmem:[#allocation78_spill] sm:$0xff] }
 0x147   : > { %2424 = vperm.xlu1 %6058, %v6067_v60   ;;  %v7604_v44 = vmul.f32 %v6332_v58, %v7552_v21  ;;  %v7608_v24 = vmul.f32 %v6272_v42, %v11709_v29  ;;  %v7612_v60 = vmul.f32 %v6320_v55, %v7600_v33  ;;  %v5502_v47 = vpack.c.bf16 %v4402_v30, %v4386_v40 }
 0x148   : > { %v5566_v16 = vpack.c.bf16 %v4404_v5, %v4388_v23  ;;  %v5504_v0 = vpack.c.bf16 %v4401_v9, %v4385_v34  ;;  %v7616_v46 = vmul.f32 %v6285_v45, %v11709_v29  ;;  %11713 = vst [vmem:[#allocation132_spill] sm:$0xff] %v7618_v10  ;;  %v5568_v20 = vpack.c.bf16 %v4403_v15, %v4387_v51  ;;  %v11717_v51 = vld [vmem:[#allocation105_spill] sm:$0xff] }
 0x149   : > { %11708 = vst [vmem:[#allocation49_spill] sm:$0xff] %v7604_v44  ;;  %11710 = vst [vmem:[#allocation50_spill] sm:$0xff] %v7608_v24  ;;  %v7622_v21 = vmul.f32 %v6324_v56, %v7600_v33  ;;  %v7626_v32 = vmul.f32 %v6298_v48, %v11709_v29  ;;  %v7630_v40 = vmul.f32 %v6328_v57, %v7600_v33  ;;  %5503 = vmatprep.subr.bf16.mxu0 %v5502_v47  ;;  %v11758_v44 = vld [vmem:[#allocation73_spill] sm:$0xff] }
 0x14a   : > { %11711 = vst [vmem:[#allocation3_spill] sm:$0xff] %v7612_v60  ;;  %11712 = vst [vmem:[#allocation131_spill] sm:$0xff] %v7616_v46  ;;  %5567 = vmatprep.subr.bf16.mxu1 %v5566_v16  ;;  %v1560_v9 = vmul.f32 %v6276_v43, %v7618_v10  ;;  %v1562_v23 = vmul.f32 %v11534_v50, %v7618_v10  ;;  %v1559_v34 = vmul.f32 %v11652_v35, %v7618_v10  ;;  %v11720_v16 = vld [vmem:[#allocation106_spill] sm:$0xff]  ;;  %v7656_v30 = vpop.permute.xlu1 %1138 }
 0x14b   : > { %11714 = vst [vmem:[#allocation133_spill] sm:$0xff] %v7622_v21  ;;  %11715 = vst [vmem:[#allocation134_spill] sm:$0xff] %v7626_v32  ;;  %5505 = vmatpush1.bf16.msra.mxu0 %v5504_v0  ;;  %5569 = vmatpush1.bf16.msra.mxu1 %v5568_v20  ;;  %v1561_v5 = vmul.f32 %v11656_v52, %v7618_v10  ;;  %v7643_v15 = vmul.f32 %v11655_v6, %v11709_v29  ;;  %v7650_v21 = vpop.permute.xlu0 %2412  ;;  %v11722_v0 = vld [vmem:[#allocation112_spill] sm:$0xff] }
 0x14c   : > { %11716 = vst [vmem:[#allocation135_spill] sm:$0xff] %v7630_v40  ;;  %v7647_v47 = vmul.f32 %v6332_v58, %v7600_v33  ;;  %v2072_v46 = vadd.f32 %v1560_v9, %v834_v54  ;;  %v2074_v24 = vadd.f32 %v1562_v23, %v836_v36  ;;  %v2071_v40 = vadd.f32 %v1559_v34, %v833_v7 }
 0x14d   : > { %11718 = vst [vmem:[#allocation105_spill] sm:$0xff] %v7643_v15  ;;  %11721 = vst [vmem:[#allocation106_spill] sm:$0xff] %v7650_v21  ;;  %v7654_v20 = vmul.f32 %v6272_v42, %v11722_v0  ;;  %v2073_v10 = vadd.f32 %v1561_v5, %v835_v25  ;;  %v7660_v29 = vmul.f32 %v6320_v55, %v7650_v21  ;;  %v11730_v15 = vld [vmem:[#allocation119_spill] sm:$0xff] }
 0x14e   : > { %11719 = vst [vmem:[#allocation136_spill] sm:$0xff] %v7647_v47  ;;  %11724 = vst [vmem:[#allocation138_spill] sm:$0xff] %v7656_v30  ;;  %v7664_v33 = vmul.f32 %v6285_v45, %v11722_v0  ;;  %v7668_v54 = vmul.f32 %v6324_v56, %v7650_v21  ;;  %v1576_v36 = vmul.f32 %v6276_v43, %v7656_v30  ;;  %v11731_v47 = vld [vmem:[#allocation53_spill] sm:$0xff] }
 0x14f   : > { %11723 = vst [vmem:[#allocation137_spill] sm:$0xff] %v7654_v20  ;;  %11725 = vst [vmem:[#allocation139_spill] sm:$0xff] %v7660_v29  ;;  %v3310_v7 = vadd.f32 %v7460_v41, %v2072_v46  ;;  %v1578_v25 = vmul.f32 %v11534_v50, %v7656_v30  ;;  %v3312_v9 = vadd.f32 %v7464_v53, %v2074_v24  ;;  %v11729_v41 = vld [vmem:[#allocation118_spill] sm:$0xff] }
 0x150   : > { %11726 = vst [vmem:[#allocation140_spill] sm:$0xff] %v7664_v33  ;;  %11727 = vst [vmem:[#allocation141_spill] sm:$0xff] %v7668_v54  ;;  %v1575_v23 = vmul.f32 %v11652_v35, %v7656_v30  ;;  %v3309_v34 = vadd.f32 %v7470_v59, %v2071_v40  ;;  %v1577_v5 = vmul.f32 %v11656_v52, %v7656_v30  ;;  %v11728_v33 = vld [vmem:[#allocation52_spill] sm:$0xff]  ;;  %v7690_v40 = vpop.permute.xlu1 %2376 }
 0x151   : > { %v3311_v32 = vadd.f32 %v7474_v18, %v2073_v10  ;;  %v2088_v20 = vadd.f32 %v1576_v36, %v11728_v33  ;;  %v3906_v54 = vadd.f32 %v6342_v62, %v3310_v7  ;;  %v2090_v46 = vadd.f32 %v1578_v25, %v11729_v41  ;;  %11732 = vst [vmem:[#allocation52_spill] sm:$0xff] %v7690_v40  ;;  %v7709_v36 = vpop.permute.xlu0 %2420 }
 0x152   : > { %v3908_v29 = vadd.f32 %v6346_v63, %v3312_v9  ;;  %v2087_v24 = vadd.f32 %v1575_v23, %v11730_v15  ;;  %v3905_v53 = vadd.f32 %v6350_v2, %v3309_v34  ;;  %v2089_v60 = vadd.f32 %v1577_v5, %v11731_v47  ;;  %v4658_v15 = vld [vmem:[%s11002_s3 + $0x8] sm:$0x3f]  ;;  %11735 = vst [vmem:[#allocation53_spill] sm:$0xff] %v7709_v36 }
 0x153   : > { %v3907_v59 = vadd.f32 %v6354_v3, %v3311_v32  ;;  %v4418_v30 = vmax.f32 %v3906_v54, 0.0  ;;  %v7694_v33 = vmul.f32 %v6298_v48, %v11722_v0  ;;  %v7698_v10 = vmul.f32 %v6328_v57, %v7650_v21  ;;  %4723 = vmatprep.mubr.f32.mxu0 %v4658_v15  ;;  %4794 = vmatprep.mubr.f32.mxu1 %v4658_v15 }
 0x154   : > { %v4420_v18 = vmax.f32 %v3908_v29, 0.0  ;;  %v2814_v47 = vmul.f32 %v6320_v55, %v7690_v40  ;;  %v2816_v32 = vmul.f32 %v6324_v56, %v7690_v40  ;;  %v2813_v29 = vmul.f32 %v6328_v57, %v7690_v40 }
 0x155   : > { %11733 = vst [vmem:[#allocation118_spill] sm:$0xff] %v7694_v33  ;;  %11734 = vst [vmem:[#allocation119_spill] sm:$0xff] %v7698_v10  ;;  %v4417_v54 = vmax.f32 %v3905_v53, 0.0  ;;  %v2815_v7 = vmul.f32 %v6332_v58, %v7690_v40  ;;  %v4419_v25 = vmax.f32 %v3907_v59, 0.0  ;;  %v7715_v9 = vmul.f32 %v11655_v6, %v11722_v0  ;;  %v11738_v53 = vld [vmem:[#allocation117_spill] sm:$0xff]  ;;  %v11751_v10 = vld [vmem:[#allocation58_spill] sm:$0xff] }
 0x156   : > { %v7719_v23 = vmul.f32 %v6332_v58, %v7650_v21  ;;  %v3326_v34 = vadd.f32 %v2814_v47, %v2088_v20  ;;  %v3328_v5 = vadd.f32 %v2816_v32, %v2090_v46  ;;  %v3325_v41 = vadd.f32 %v2813_v29, %v2087_v24  ;;  %v7737_v20 = vpop.permute.xlu1 %405 }
 0x157   : > { %11736 = vst [vmem:[#allocation142_spill] sm:$0xff] %v7715_v9  ;;  %v7723_v33 = vmul.f32 %v6272_v42, %v11738_v53  ;;  %v3327_v15 = vadd.f32 %v2815_v7, %v2089_v60  ;;  %v7727_v40 = vmul.f32 %v6320_v55, %v7709_v36  ;;  %v7731_v59 = vmul.f32 %v6285_v45, %v11738_v53  ;;  %v11749_v9 = vld [vmem:[#allocation22_spill] sm:$0xff] }
 0x158   : > { %11737 = vst [vmem:[#allocation143_spill] sm:$0xff] %v7719_v23  ;;  %v7735_v21 = vmul.f32 %v6324_v56, %v7709_v36  ;;  %11743 = vst [vmem:[#allocation148_spill] sm:$0xff] %v7737_v20  ;;  %v3922_v46 = vadd.f32 %v6342_v62, %v3326_v34  ;;  %v3924_v24 = vadd.f32 %v6346_v63, %v3328_v5 }
 0x159   : > { %11739 = vst [vmem:[#allocation144_spill] sm:$0xff] %v7723_v33  ;;  %11740 = vst [vmem:[#allocation145_spill] sm:$0xff] %v7727_v40  ;;  %v3921_v60 = vadd.f32 %v6350_v2, %v3325_v41  ;;  %v7744_v47 = vmul.f32 %v6298_v48, %v11738_v53  ;;  %v3923_v32 = vadd.f32 %v6354_v3, %v3327_v15 }
 0x15a   : > { %11741 = vst [vmem:[#allocation146_spill] sm:$0xff] %v7731_v59  ;;  %11742 = vst [vmem:[#allocation147_spill] sm:$0xff] %v7735_v21  ;;  %v866_v29 = vmul.f32 %v6272_v42, %v7737_v20  ;;  %v868_v7 = vmul.f32 %v6285_v45, %v7737_v20  ;;  %v865_v0 = vmul.f32 %v6298_v48, %v7737_v20  ;;  %v4434_v34 = vmax.f32 %v3922_v46, 0.0 }
 0x15b   : > { %11744 = vst [vmem:[#allocation149_spill] sm:$0xff] %v7744_v47  ;;  %v4436_v59 = vmax.f32 %v3924_v24, 0.0  ;;  %v4433_v5 = vmax.f32 %v3921_v60, 0.0  ;;  %v867_v41 = vmul.f32 %v11655_v6, %v7737_v20  ;;  %v4435_v33 = vmax.f32 %v3923_v32, 0.0  ;;  %v11748_v60 = vld [vmem:[#allocation126_spill] sm:$0xff]  ;;  %v7769_v20 = vpop.permute.xlu1 %1142 }
 0x15c   : > { %v7757_v47 = vmul.f32 %v6328_v57, %v7709_v36  ;;  %v7761_v15 = vmul.f32 %v11655_v6, %v11738_v53  ;;  %v7765_v21 = vmul.f32 %v6332_v58, %v7709_v36  ;;  %v5506_v40 = vpack.c.bf16 %v4434_v34, %v4418_v30  ;;  %11750 = vst [vmem:[#allocation22_spill] sm:$0xff] %v7769_v20  ;;  %v11755_v34 = vld [vmem:[#allocation40_spill] sm:$0xff]  ;;  %v11774_v36 = vld [vmem:[#allocation30_spill] sm:$0xff] }
 0x15d   : > { %v5570_v46 = vpack.c.bf16 %v4436_v59, %v4420_v18  ;;  %v5508_v24 = vpack.c.bf16 %v4433_v5, %v4417_v54  ;;  %v2514_v23 = vmul.f32 %v11749_v9, %v11748_v60  ;;  %v5572_v32 = vpack.c.bf16 %v4435_v33, %v4419_v25  ;;  %v11760_v25 = vld [vmem:[#allocation38_spill] sm:$0xff]  ;;  %v11762_v54 = vld [vmem:[#allocation92_spill] sm:$0xff] }
 0x15e   : > { %11745 = vst [vmem:[#allocation150_spill] sm:$0xff] %v7757_v47  ;;  %11746 = vst [vmem:[#allocation151_spill] sm:$0xff] %v7761_v15  ;;  %v2516_v47 = vmul.f32 %v11751_v10, %v11748_v60  ;;  %v2513_v53 = vmul.f32 %v11752_v12, %v11748_v60  ;;  %v11753_v15 = vld [vmem:[#allocation93_spill] sm:$0xff]  ;;  %5507 = vmatprep.subr.bf16.mxu0 %v5506_v40  ;;  %v1592_v30 = vmul.f32 %v6276_v43, %v7769_v20 }
 0x15f   : > { %11747 = vst [vmem:[#allocation152_spill] sm:$0xff] %v7765_v21  ;;  %v2515_v14 = vmul.f32 %v11753_v15, %v11748_v60  ;;  %5571 = vmatprep.subr.bf16.mxu1 %v5570_v46  ;;  %v1594_v18 = vmul.f32 %v11534_v50, %v7769_v20  ;;  %v1591_v33 = vmul.f32 %v11652_v35, %v7769_v20  ;;  %v11756_v40 = vld [vmem:[#allocation57_spill] sm:$0xff]  ;;  %v11757_v60 = vld [vmem:[#allocation116_spill] sm:$0xff]  ;;  %v7790_v39 = vpop.permute.xlu1 %1146 }
 0x160   : > { %5509 = vmatpush1.bf16.msra.mxu0 %v5508_v24  ;;  %5573 = vmatpush1.bf16.msra.mxu1 %v5572_v32  ;;  %v1593_v59 = vmul.f32 %v11656_v52, %v7769_v20  ;;  %v3026_v5 = vadd.f32 %v2514_v23, %v11755_v34  ;;  %v3028_v46 = vadd.f32 %v2516_v47, %v11756_v40  ;;  %v11761_v32 = vld [vmem:[#allocation59_spill] sm:$0xff] }
 0x161   : > { %v2104_v21 = vadd.f32 %v1592_v30, %v866_v29  ;;  %v2106_v37 = vadd.f32 %v1594_v18, %v868_v7  ;;  %v2103_v27 = vadd.f32 %v1591_v33, %v865_v0  ;;  %v3025_v28 = vadd.f32 %v2513_v53, %v11758_v44  ;;  %11759 = vst [vmem:[#allocation78_spill] sm:$0xff] %v7790_v39 }
 0x162   : > { %v2105_v13 = vadd.f32 %v1593_v59, %v867_v41  ;;  %v3622_v24 = vadd.f32 %v11760_v25, %v3026_v5  ;;  %v3624_v17 = vadd.f32 %v11761_v32, %v3028_v46  ;;  %v3027_v20 = vadd.f32 %v2515_v14, %v11762_v54  ;;  %v11763_v41 = vld [vmem:[#allocation56_spill] sm:$0xff]  ;;  %v11765_v54 = vld [vmem:[#allocation123_spill] sm:$0xff] }
 0x163   : > { %v1608_v23 = vmul.f32 %v6276_v43, %v7790_v39  ;;  %v3342_v47 = vadd.f32 %v7478_v1, %v2104_v21  ;;  %v1610_v29 = vmul.f32 %v11534_v50, %v7790_v39  ;;  %v3344_v0 = vadd.f32 %v7495_v26, %v2106_v37  ;;  %v11764_v1 = vld [vmem:[#allocation4_spill] sm:$0xff] }
 0x164   : > { %v1607_v44 = vmul.f32 %v11652_v35, %v7790_v39  ;;  %v3341_v53 = vadd.f32 %v7499_v8, %v2103_v27  ;;  %v1609_v7 = vmul.f32 %v11656_v52, %v7790_v39  ;;  %v3343_v14 = vadd.f32 %v7507_v11, %v2105_v13  ;;  %v11766_v59 = vld [vmem:[#allocation124_spill] sm:$0xff]  ;;  %v7815_v27 = vpop.permute.xlu1 %2384 }
 0x165   : > { %v2120_v30 = vadd.f32 %v1608_v23, %v11763_v41  ;;  %v3938_v18 = vadd.f32 %v6342_v62, %v3342_v47  ;;  %v2122_v21 = vadd.f32 %v1610_v29, %v11764_v1  ;;  %v3940_v33 = vadd.f32 %v6346_v63, %v3344_v0  ;;  %11767 = vst [vmem:[#allocation40_spill] sm:$0xff] %v7815_v27  ;;  %v11772_v1 = vld [vmem:[#allocation80_spill] sm:$0xff] }
 0x166   : > { %v2119_v26 = vadd.f32 %v1607_v44, %v11765_v54  ;;  %v3937_v37 = vadd.f32 %v6350_v2, %v3341_v53  ;;  %v2121_v34 = vadd.f32 %v1609_v7, %v11766_v59  ;;  %v3939_v8 = vadd.f32 %v6354_v3, %v3343_v14  ;;  %v11773_v59 = vld [vmem:[#allocation101_spill] sm:$0xff] }
 0x167   : > { %v4450_v5 = vmax.f32 %v3938_v18, 0.0  ;;  %v4452_v11 = vmax.f32 %v3940_v33, 0.0  ;;  %v4134_v13 = vmax.f32 %v3622_v24, 0.0  ;;  %v4136_v40 = vmax.f32 %v3624_v17, 0.0 }
 0x168   : > { %v2846_v46 = vmul.f32 %v6320_v55, %v7815_v27  ;;  %v2848_v23 = vmul.f32 %v6324_v56, %v7815_v27  ;;  %v2845_v47 = vmul.f32 %v6328_v57, %v7815_v27  ;;  %v4449_v29 = vmax.f32 %v3937_v37, 0.0 }
 0x169   : > { %v2847_v0 = vmul.f32 %v6332_v58, %v7815_v27  ;;  %v4451_v44 = vmax.f32 %v3939_v8, 0.0  ;;  %v11768_v53 = vmax.f32 %v11688_v19, 0.0  ;;  %v11770_v17 = vmax.f32 %v11689_v61, 0.0  ;;  %v7839_v8 = vpop.permute.xlu1 %415 }
 0x16a   : > { %v3358_v14 = vadd.f32 %v2846_v46, %v2120_v30  ;;  %v3360_v41 = vadd.f32 %v2848_v23, %v2122_v21  ;;  %v3357_v18 = vadd.f32 %v2845_v47, %v2119_v26  ;;  %v3621_v33 = vadd.f32 %v11772_v1, %v3025_v28  ;;  %11775 = vst [vmem:[#allocation73_spill] sm:$0xff] %v7839_v8 }
 0x16b   : > { %v7827_v7 = vpack.c.bf16 %v11768_v53, %v4134_v13  ;;  %v7831_v24 = vpack.c.bf16 %v11770_v17, %v4136_v40  ;;  %v3359_v54 = vadd.f32 %v2847_v0, %v2121_v34  ;;  %v3623_v37 = vadd.f32 %v11773_v59, %v3027_v20 }
 0x16c   : > { %v2546_v27 = vmul.f32 %v11749_v9, %v11774_v36  ;;  %v2548_v19 = vmul.f32 %v11751_v10, %v11774_v36  ;;  %v3954_v61 = vadd.f32 %v6342_v62, %v3358_v14  ;;  %v3956_v13 = vadd.f32 %v6346_v63, %v3360_v41  ;;  %v11778_v41 = vld [vmem:[#allocation103_spill] sm:$0xff] }
 0x16d   : > { %11769 = vst [vmem:[#allocation57_spill] sm:$0xff] %v7827_v7  ;;  %11771 = vst [vmem:[#allocation116_spill] sm:$0xff] %v7831_v24  ;;  %v3953_v30 = vadd.f32 %v6350_v2, %v3357_v18  ;;  %v4133_v21 = vmax.f32 %v3621_v33, 0.0  ;;  %v3955_v28 = vadd.f32 %v6354_v3, %v3359_v54  ;;  %v898_v20 = vmul.f32 %v6272_v42, %v7839_v8  ;;  %v11779_v24 = vld [vmem:[#allocation109_spill] sm:$0xff]  ;;  %v7859_v10 = vpop.permute.xlu1 %1150 }
 0x16e   : > { %v900_v26 = vmul.f32 %v6285_v45, %v7839_v8  ;;  %v897_v34 = vmul.f32 %v6298_v48, %v7839_v8  ;;  %v4466_v40 = vmax.f32 %v3954_v61, 0.0  ;;  %v4468_v46 = vmax.f32 %v3956_v13, 0.0  ;;  %11780 = vst [vmem:[#allocation92_spill] sm:$0xff] %v7859_v10 }
 0x16f   : > { %v4465_v23 = vmax.f32 %v3953_v30, 0.0  ;;  %v899_v47 = vmul.f32 %v11655_v6, %v7839_v8  ;;  %v4467_v0 = vmax.f32 %v3955_v28, 0.0  ;;  %v11776_v53 = vmax.f32 %v11690_v22, 0.0 }
 0x170   : > { %v4135_v14 = vmax.f32 %v3623_v37, 0.0  ;;  %v3058_v18 = vadd.f32 %v2546_v27, %v11778_v41  ;;  %v5510_v33 = vpack.c.bf16 %v4466_v40, %v4450_v5  ;;  %v5574_v54 = vpack.c.bf16 %v4468_v46, %v4452_v11 }
 0x171   : > { %v7855_v17 = vpack.c.bf16 %v11776_v53, %v4133_v21  ;;  %v5512_v39 = vpack.c.bf16 %v4465_v23, %v4449_v29  ;;  %v3060_v7 = vadd.f32 %v2548_v19, %v11779_v24  ;;  %v5576_v61 = vpack.c.bf16 %v4467_v0, %v4451_v44  ;;  %v11783_v29 = vld [vmem:[#allocation120_spill] sm:$0xff]  ;;  %v11784_v19 = vld [vmem:[#allocation113_spill] sm:$0xff] }
 0x172   : > { %v11781_v13 = vmax.f32 %v11717_v51, 0.0  ;;  %v3654_v28 = vadd.f32 %v11760_v25, %v3058_v18  ;;  %v2545_v22 = vmul.f32 %v11752_v12, %v11774_v36  ;;  %5511 = vmatprep.subr.bf16.mxu0 %v5510_v33  ;;  %5575 = vmatprep.subr.bf16.mxu1 %v5574_v54  ;;  %v1624_v27 = vmul.f32 %v6276_v43, %v7859_v10 }
 0x173   : > { %11777 = vst [vmem:[#allocation59_spill] sm:$0xff] %v7855_v17  ;;  %v1626_v5 = vmul.f32 %v11534_v50, %v7859_v10  ;;  %v1623_v11 = vmul.f32 %v11652_v35, %v7859_v10  ;;  %v4183_v51 = vmax.f32 %v11783_v29, 0.0  ;;  %5513 = vmatpush1.bf16.msra.mxu0 %v5512_v39  ;;  %5577 = vmatpush1.bf16.msra.mxu1 %v5576_v61  ;;  %v7886_v33 = vpop.permute.xlu1 %1154  ;;  %v11791_v29 = vld [vmem:[#allocation129_spill] sm:$0xff] }
 0x174   : > { %v7863_v30 = vpack.c.bf16 %v11781_v13, %v4135_v14  ;;  %v1625_v44 = vmul.f32 %v11656_v52, %v7859_v10  ;;  %v4166_v24 = vmax.f32 %v3654_v28, 0.0  ;;  %v3656_v37 = vadd.f32 %v11761_v32, %v3060_v7  ;;  %11787 = vst [vmem:[#allocation123_spill] sm:$0xff] %v7886_v33 }
 0x175   : > { %v3057_v21 = vadd.f32 %v2545_v22, %v11784_v19  ;;  %v2136_v40 = vadd.f32 %v1624_v27, %v898_v20  ;;  %v2138_v46 = vadd.f32 %v1626_v5, %v900_v26  ;;  %v2135_v23 = vadd.f32 %v1623_v11, %v897_v34  ;;  %v11788_v26 = vld [vmem:[#allocation114_spill] sm:$0xff]  ;;  %v11789_v22 = vld [vmem:[#allocation125_spill] sm:$0xff]  ;;  %v11790_v5 = vld [vmem:[#allocation128_spill] sm:$0xff] }
 0x176   : > { %11782 = vst [vmem:[#allocation56_spill] sm:$0xff] %v7863_v30  ;;  %v2547_v0 = vmul.f32 %v11753_v15, %v11774_v36  ;;  %v2137_v53 = vadd.f32 %v1625_v44, %v899_v47  ;;  %v11785_v14 = vmax.f32 %v11720_v16, 0.0  ;;  %v4168_v39 = vmax.f32 %v3656_v37, 0.0 }
 0x177   : > { %v3653_v18 = vadd.f32 %v11772_v1, %v3057_v21  ;;  %v3374_v7 = vadd.f32 %v7511_v31, %v2136_v40  ;;  %v3376_v54 = vadd.f32 %v7515_v49, %v2138_v46  ;;  %v3373_v20 = vadd.f32 %v7540_v4, %v2135_v23 }
 0x178   : > { %v7883_v41 = vpack.c.bf16 %v11785_v14, %v4166_v24  ;;  %v3059_v34 = vadd.f32 %v2547_v0, %v11788_v26  ;;  %v1640_v47 = vmul.f32 %v6276_v43, %v7886_v33  ;;  %v1642_v16 = vmul.f32 %v11534_v50, %v7886_v33  ;;  %v11792_v24 = vld [vmem:[#allocation130_spill] sm:$0xff]  ;;  %v11794_v0 = vld [vmem:[#allocation5_spill] sm:$0xff] }
 0x179   : > { %v1639_v61 = vmul.f32 %v11652_v35, %v7886_v33  ;;  %v1641_v13 = vmul.f32 %v11656_v52, %v7886_v33  ;;  %v3970_v31 = vadd.f32 %v6342_v62, %v3374_v7  ;;  %v3972_v49 = vadd.f32 %v6346_v63, %v3376_v54  ;;  %v7909_v23 = vpop.permute.xlu1 %2392  ;;  %v11797_v54 = vld [vmem:[#allocation35_spill] sm:$0xff] }
 0x17a   : > { %11786 = vst [vmem:[#allocation4_spill] sm:$0xff] %v7883_v41  ;;  %v3969_v4 = vadd.f32 %v6350_v2, %v3373_v20  ;;  %v3375_v28 = vadd.f32 %v7544_v38, %v2137_v53  ;;  %v2152_v27 = vadd.f32 %v1640_v47, %v11789_v22  ;;  %v2154_v11 = vadd.f32 %v1642_v16, %v11790_v5  ;;  %v11823_v41 = vld [vmem:[#allocation100_spill] sm:$0xff] }
 0x17b   : > { %v2151_v44 = vadd.f32 %v1639_v61, %v11791_v29  ;;  %v2153_v37 = vadd.f32 %v1641_v13, %v11792_v24  ;;  %v4482_v19 = vmax.f32 %v3970_v31, 0.0  ;;  %v4484_v21 = vmax.f32 %v3972_v49, 0.0  ;;  %11793 = vst [vmem:[#allocation124_spill] sm:$0xff] %v7909_v23  ;;  %v11800_v31 = vld [vmem:[#allocation47_spill] sm:$0xff]  ;;  %v11802_v24 = vld [vmem:[#allocation121_spill] sm:$0xff] }
 0x17c   : > { %v4481_v40 = vmax.f32 %v3969_v4, 0.0  ;;  %v3971_v46 = vadd.f32 %v6354_v3, %v3375_v28  ;;  %v11795_v14 = vmax.f32 %v11794_v0, 0.0  ;;  %v4165_v38 = vmax.f32 %v3653_v18, 0.0 }
 0x17d   : > { %v3655_v53 = vadd.f32 %v11773_v59, %v3059_v34  ;;  %v2578_v20 = vmul.f32 %v11749_v9, %v11797_v54  ;;  %v2878_v26 = vmul.f32 %v6320_v55, %v7909_v23  ;;  %v2880_v47 = vmul.f32 %v6324_v56, %v7909_v23 }
 0x17e   : > { %v7913_v7 = vpack.c.bf16 %v11795_v14, %v4168_v39  ;;  %v2877_v16 = vmul.f32 %v6328_v57, %v7909_v23  ;;  %v2879_v61 = vmul.f32 %v6332_v58, %v7909_v23  ;;  %v4483_v39 = vmax.f32 %v3971_v46, 0.0  ;;  %v11803_v14 = vld [vmem:[#allocation122_spill] sm:$0xff]  ;;  %v11804_v23 = vld [vmem:[#allocation81_spill] sm:$0xff]  ;;  %v11805_v46 = vld [vmem:[#allocation23_spill] sm:$0xff] }
 0x17f   : > { %v11798_v18 = vmax.f32 %v11757_v60, 0.0  ;;  %v4167_v34 = vmax.f32 %v3655_v53, 0.0  ;;  %v2594_v49 = vmul.f32 %v11749_v9, %v11800_v31  ;;  %v3390_v4 = vadd.f32 %v2878_v26, %v2152_v27  ;;  %v7938_v60 = vpop.permute.xlu1 %425 }
 0x180   : > { %11796 = vst [vmem:[#allocation80_spill] sm:$0xff] %v7913_v7  ;;  %v3392_v28 = vadd.f32 %v2880_v47, %v2154_v11  ;;  %v3389_v22 = vadd.f32 %v2877_v16, %v2151_v44  ;;  %v3391_v5 = vadd.f32 %v2879_v61, %v2153_v37  ;;  %v3090_v0 = vadd.f32 %v2578_v20, %v11802_v24  ;;  %v11822_v7 = vld [vmem:[#allocation98_spill] sm:$0xff] }
 0x181   : > { %v7928_v13 = vpack.c.bf16 %v11798_v18, %v4165_v38  ;;  %v7932_v29 = vpack.c.bf16 %v4183_v51, %v4167_v34  ;;  %v3106_v36 = vadd.f32 %v2594_v49, %v11803_v14  ;;  %v616_v33 = vmul.f32 %v11805_v46, %v11804_v23  ;;  %11806 = vst [vmem:[#allocation109_spill] sm:$0xff] %v7938_v60  ;;  %v11807_v49 = vld [vmem:[#allocation39_spill] sm:$0xff] }
 0x182   : > { %v3986_v38 = vadd.f32 %v6342_v62, %v3390_v4  ;;  %v3988_v53 = vadd.f32 %v6346_v63, %v3392_v28  ;;  %v3985_v27 = vadd.f32 %v6350_v2, %v3389_v22  ;;  %v3987_v11 = vadd.f32 %v6354_v3, %v3391_v5  ;;  %v11808_v28 = vld [vmem:[#allocation94_spill] sm:$0xff]  ;;  %v11809_v22 = vld [vmem:[#allocation24_spill] sm:$0xff] }
 0x183   : > { %11799 = vst [vmem:[#allocation101_spill] sm:$0xff] %v7928_v13  ;;  %11801 = vst [vmem:[#allocation103_spill] sm:$0xff] %v7932_v29  ;;  %v930_v51 = vmul.f32 %v6272_v42, %v7938_v60  ;;  %v932_v44 = vmul.f32 %v6285_v45, %v7938_v60  ;;  %v929_v37 = vmul.f32 %v6298_v48, %v7938_v60 }
 0x184   : > { %v931_v20 = vmul.f32 %v11655_v6, %v7938_v60  ;;  %v4498_v26 = vmax.f32 %v3986_v38, 0.0  ;;  %v4500_v47 = vmax.f32 %v3988_v53, 0.0  ;;  %v4497_v16 = vmax.f32 %v3985_v27, 0.0  ;;  %v7958_v29 = vpop.permute.xlu1 %1158  ;;  %v11811_v27 = vld [vmem:[#allocation11_spill] sm:$0xff] }
 0x185   : > { %v4499_v61 = vmax.f32 %v3987_v11, 0.0  ;;  %v3686_v18 = vadd.f32 %v11760_v25, %v3090_v0  ;;  %v3702_v34 = vadd.f32 %v11760_v25, %v3106_v36  ;;  %v632_v4 = vmul.f32 %v11805_v46, %v11807_v49  ;;  %11810 = vst [vmem:[#allocation120_spill] sm:$0xff] %v7958_v29 }
 0x186   : > { %v1342_v5 = vmul.f32 %v11809_v22, %v11808_v28  ;;  %v5514_v24 = vpack.c.bf16 %v4498_v26, %v4482_v19  ;;  %v5578_v14 = vpack.c.bf16 %v4500_v47, %v4484_v21  ;;  %v5516_v10 = vpack.c.bf16 %v4497_v16, %v4481_v40  ;;  %v11813_v16 = vld [vmem:[#allocation58_spill] sm:$0xff] }
 0x187   : > { %v5580_v8 = vpack.c.bf16 %v4499_v61, %v4483_v39  ;;  %v4198_v38 = vmax.f32 %v3686_v18, 0.0  ;;  %v4214_v53 = vmax.f32 %v3702_v34, 0.0  ;;  %v1358_v11 = vmul.f32 %v11809_v22, %v11811_v27 }
 0x188   : > { %v1854_v0 = vadd.f32 %v1342_v5, %v616_v33  ;;  %5515 = vmatprep.subr.bf16.mxu0 %v5514_v24  ;;  %5579 = vmatprep.subr.bf16.mxu1 %v5578_v14  ;;  %v1656_v36 = vmul.f32 %v6276_v43, %v7958_v29  ;;  %v1658_v60 = vmul.f32 %v11534_v50, %v7958_v29  ;;  %v7974_v18 = vpop.permute.xlu1 %1162 }
 0x189   : > { %v1655_v19 = vmul.f32 %v11652_v35, %v7958_v29  ;;  %5517 = vmatpush1.bf16.msra.mxu0 %v5516_v10  ;;  %5581 = vmatpush1.bf16.msra.mxu1 %v5580_v8  ;;  %v1657_v21 = vmul.f32 %v11656_v52, %v7958_v29  ;;  %v7970_v40 = vpack.c.bf16 %v4214_v53, %v4198_v38  ;;  %v11815_v10 = vld [vmem:[#allocation25_spill] sm:$0xff]  ;;  %v11818_v38 = vld [vmem:[#allocation70_spill] sm:$0xff] }
 0x18a   : > { %v1870_v39 = vadd.f32 %v1358_v11, %v632_v4  ;;  %v2168_v33 = vadd.f32 %v1656_v36, %v930_v51  ;;  %v2170_v26 = vadd.f32 %v1658_v60, %v932_v44  ;;  %v2580_v61 = vmul.f32 %v11813_v16, %v11797_v54  ;;  %11814 = vst [vmem:[#allocation114_spill] sm:$0xff] %v7974_v18  ;;  %v11816_v60 = vld [vmem:[#allocation95_spill] sm:$0xff]  ;;  %v11817_v4 = vld [vmem:[#allocation97_spill] sm:$0xff] }
 0x18b   : > { %11812 = vst [vmem:[#allocation113_spill] sm:$0xff] %v7970_v40  ;;  %v2167_v47 = vadd.f32 %v1655_v19, %v929_v37  ;;  %v2169_v34 = vadd.f32 %v1657_v21, %v931_v20  ;;  %v2596_v5 = vmul.f32 %v11813_v16, %v11800_v31  ;;  %v613_v8 = vmul.f32 %v11815_v10, %v11804_v23  ;;  %v11819_v36 = vld [vmem:[#allocation49_spill] sm:$0xff] }
 0x18c   : > { %v629_v24 = vmul.f32 %v11815_v10, %v11807_v49  ;;  %v1672_v51 = vmul.f32 %v6276_v43, %v7974_v18  ;;  %v3406_v44 = vadd.f32 %v11816_v60, %v2168_v33  ;;  %v1674_v37 = vmul.f32 %v11534_v50, %v7974_v18  ;;  %v11820_v21 = vld [vmem:[#allocation89_spill] sm:$0xff]  ;;  %v11821_v33 = vld [vmem:[#allocation96_spill] sm:$0xff] }
 0x18d   : > { %v3408_v14 = vadd.f32 %v11817_v4, %v2170_v26  ;;  %v1671_v20 = vmul.f32 %v11652_v35, %v7974_v18  ;;  %v3405_v53 = vadd.f32 %v11818_v38, %v2167_v47  ;;  %v1673_v11 = vmul.f32 %v11656_v52, %v7974_v18  ;;  %v8002_v38 = vpop.permute.xlu1 %2400 }
 0x18e   : > { %v3407_v19 = vadd.f32 %v11819_v36, %v2169_v34  ;;  %v2184_v29 = vadd.f32 %v1672_v51, %v11820_v21  ;;  %v4002_v40 = vadd.f32 %v6342_v62, %v3406_v44  ;;  %v2186_v60 = vadd.f32 %v1674_v37, %v11821_v33  ;;  %11824 = vst [vmem:[#allocation125_spill] sm:$0xff] %v8002_v38 }
 0x18f   : > { %v4004_v13 = vadd.f32 %v6346_v63, %v3408_v14  ;;  %v2183_v26 = vadd.f32 %v1671_v20, %v11822_v7  ;;  %v4001_v4 = vadd.f32 %v6350_v2, %v3405_v53  ;;  %v2185_v30 = vadd.f32 %v1673_v11, %v11823_v41 }
 0x190   : > { %v4003_v47 = vadd.f32 %v6354_v3, %v3407_v19  ;;  %v4514_v18 = vmax.f32 %v4002_v40, 0.0  ;;  %v3092_v36 = vadd.f32 %v2580_v61, %v1854_v0  ;;  %v3108_v51 = vadd.f32 %v2596_v5, %v1870_v39  ;;  %v11825_v61 = vld [vmem:[#allocation26_spill] sm:$0xff] }
 0x191   : > { %v4516_v34 = vmax.f32 %v4004_v13, 0.0  ;;  %v2910_v44 = vmul.f32 %v6320_v55, %v8002_v38  ;;  %v2912_v37 = vmul.f32 %v6324_v56, %v8002_v38  ;;  %v2909_v7 = vmul.f32 %v6328_v57, %v8002_v38 }
 0x192   : > { %v4513_v14 = vmax.f32 %v4001_v4, 0.0  ;;  %v2911_v41 = vmul.f32 %v6332_v58, %v8002_v38  ;;  %v4515_v20 = vmax.f32 %v4003_v47, 0.0  ;;  %v3688_v53 = vadd.f32 %v11761_v32, %v3092_v36  ;;  %v8018_v4 = vpop.permute.xlu1 %435 }
 0x193   : > { %v3704_v13 = vadd.f32 %v11761_v32, %v3108_v51  ;;  %v3422_v0 = vadd.f32 %v2910_v44, %v2184_v29  ;;  %v3424_v40 = vadd.f32 %v2912_v37, %v2186_v60  ;;  %v3421_v39 = vadd.f32 %v2909_v7, %v2183_v26  ;;  %11826 = vst [vmem:[#allocation128_spill] sm:$0xff] %v8018_v4 }
 0x194   : > { %v1339_v5 = vmul.f32 %v11825_v61, %v11808_v28  ;;  %v3423_v11 = vadd.f32 %v2911_v41, %v2185_v30  ;;  %v4200_v19 = vmax.f32 %v3688_v53, 0.0  ;;  %v1355_v33 = vmul.f32 %v11825_v61, %v11811_v27 }
 0x195   : > { %v4216_v21 = vmax.f32 %v3704_v13, 0.0  ;;  %v4018_v47 = vadd.f32 %v6342_v62, %v3422_v0  ;;  %v4020_v36 = vadd.f32 %v6346_v63, %v3424_v40  ;;  %v4017_v51 = vadd.f32 %v6350_v2, %v3421_v39 }
 0x196   : > { %v1851_v29 = vadd.f32 %v1339_v5, %v613_v8  ;;  %v4019_v60 = vadd.f32 %v6354_v3, %v3423_v11  ;;  %v962_v26 = vmul.f32 %v6272_v42, %v8018_v4  ;;  %v964_v30 = vmul.f32 %v6285_v45, %v8018_v4 }
 0x197   : > { %v961_v44 = vmul.f32 %v6298_v48, %v8018_v4  ;;  %v4530_v37 = vmax.f32 %v4018_v47, 0.0  ;;  %v4532_v7 = vmax.f32 %v4020_v36, 0.0  ;;  %v4529_v41 = vmax.f32 %v4017_v51, 0.0  ;;  %v8038_v17 = vpop.permute.xlu1 %1166  ;;  %v11829_v51 = vld [vmem:[#allocation32_spill] sm:$0xff] }
 0x198   : > { %v963_v53 = vmul.f32 %v11655_v6, %v8018_v4  ;;  %v4531_v13 = vmax.f32 %v4019_v60, 0.0  ;;  %v8032_v0 = vpack.c.bf16 %v4216_v21, %v4200_v19  ;;  %v1867_v8 = vadd.f32 %v1355_v33, %v629_v24  ;;  %11828 = vst [vmem:[#allocation130_spill] sm:$0xff] %v8038_v17 }
 0x199   : > { %v2577_v40 = vmul.f32 %v11752_v12, %v11797_v54  ;;  %v5518_v39 = vpack.c.bf16 %v4530_v37, %v4514_v18  ;;  %v5582_v5 = vpack.c.bf16 %v4532_v7, %v4516_v34  ;;  %v5520_v11 = vpack.c.bf16 %v4529_v41, %v4513_v14  ;;  %v11830_v37 = vld [vmem:[#allocation33_spill] sm:$0xff] }
 0x19a   : > { %11827 = vst [vmem:[#allocation129_spill] sm:$0xff] %v8032_v0  ;;  %v2593_v38 = vmul.f32 %v11752_v12, %v11800_v31  ;;  %v5584_v47 = vpack.c.bf16 %v4531_v13, %v4515_v20  ;;  %v615_v4 = vmul.f32 %v11829_v51, %v11804_v23  ;;  %v631_v19 = vmul.f32 %v11829_v51, %v11807_v49  ;;  %v11839_v49 = vld [vmem:[#allocation105_spill] sm:$0xff]  ;;  %v11848_v0 = vld [vmem:[#allocation115_spill] sm:$0xff] }
 0x19b   : > { %v3089_v36 = vadd.f32 %v2577_v40, %v1851_v29  ;;  %5519 = vmatprep.subr.bf16.mxu0 %v5518_v39  ;;  %5583 = vmatprep.subr.bf16.mxu1 %v5582_v5  ;;  %v1688_v18 = vmul.f32 %v6276_v43, %v8038_v17  ;;  %v1690_v24 = vmul.f32 %v11534_v50, %v8038_v17  ;;  %v8055_v41 = vpop.permute.xlu1 %1170 }
 0x19c   : > { %v1687_v34 = vmul.f32 %v11652_v35, %v8038_v17  ;;  %5521 = vmatpush1.bf16.msra.mxu0 %v5520_v11  ;;  %5585 = vmatpush1.bf16.msra.mxu1 %v5584_v47  ;;  %v1689_v14 = vmul.f32 %v11656_v52, %v8038_v17  ;;  %v3105_v20 = vadd.f32 %v2593_v38, %v1867_v8  ;;  %v11832_v8 = vld [vmem:[#allocation3_spill] sm:$0xff]  ;;  %v11844_v17 = vld [vmem:[#allocation46_spill] sm:$0xff] }
 0x19d   : > { %v3685_v21 = vadd.f32 %v11772_v1, %v3089_v36  ;;  %v2200_v33 = vadd.f32 %v1688_v18, %v962_v26  ;;  %v2202_v29 = vadd.f32 %v1690_v24, %v964_v30  ;;  %v1341_v7 = vmul.f32 %v11830_v37, %v11808_v28  ;;  %11831 = vst [vmem:[#allocation5_spill] sm:$0xff] %v8055_v41  ;;  %v11833_v30 = vld [vmem:[#allocation133_spill] sm:$0xff]  ;;  %v11835_v24 = vld [vmem:[#allocation136_spill] sm:$0xff]  ;;  %v11838_v28 = vld [vmem:[#allocation134_spill] sm:$0xff] }
 0x19e   : > { %v2199_v60 = vadd.f32 %v1687_v34, %v961_v44  ;;  %v2201_v13 = vadd.f32 %v1689_v14, %v963_v53  ;;  %v3701_v40 = vadd.f32 %v11772_v1, %v3105_v20  ;;  %v1357_v5 = vmul.f32 %v11830_v37, %v11811_v27  ;;  %v11834_v53 = vld [vmem:[#allocation135_spill] sm:$0xff]  ;;  %v11836_v14 = vld [vmem:[#allocation50_spill] sm:$0xff] }
 0x19f   : > { %v4197_v39 = vmax.f32 %v3685_v21, 0.0  ;;  %v1704_v38 = vmul.f32 %v6276_v43, %v8055_v41  ;;  %v3438_v11 = vadd.f32 %v11832_v8, %v2200_v33  ;;  %v1706_v26 = vmul.f32 %v11534_v50, %v8055_v41  ;;  %v11837_v33 = vld [vmem:[#allocation131_spill] sm:$0xff] }
 0x1a0   : > { %v3440_v44 = vadd.f32 %v11833_v30, %v2202_v29  ;;  %v1703_v47 = vmul.f32 %v11652_v35, %v8055_v41  ;;  %v3437_v36 = vadd.f32 %v11834_v53, %v2199_v60  ;;  %v1705_v18 = vmul.f32 %v11656_v52, %v8055_v41  ;;  %v8080_v53 = vpop.permute.xlu1 %2408 }
 0x1a1   : > { %v3439_v34 = vadd.f32 %v11835_v24, %v2201_v13  ;;  %v2216_v20 = vadd.f32 %v1704_v38, %v11836_v14  ;;  %v4034_v21 = vadd.f32 %v6342_v62, %v3438_v11  ;;  %v2218_v8 = vadd.f32 %v1706_v26, %v11837_v33  ;;  %11840 = vst [vmem:[#allocation121_spill] sm:$0xff] %v8080_v53  ;;  %v11843_v33 = vld [vmem:[#allocation20_spill] sm:$0xff] }
 0x1a2   : > { %v4036_v27 = vadd.f32 %v6346_v63, %v3440_v44  ;;  %v2215_v29 = vadd.f32 %v1703_v47, %v11838_v28  ;;  %v4033_v30 = vadd.f32 %v6350_v2, %v3437_v36  ;;  %v2217_v23 = vadd.f32 %v1705_v18, %v11839_v49 }
 0x1a3   : > { %v4035_v60 = vadd.f32 %v6354_v3, %v3439_v34  ;;  %v4546_v41 = vmax.f32 %v4034_v21, 0.0  ;;  %v4213_v24 = vmax.f32 %v3701_v40, 0.0  ;;  %v1853_v38 = vadd.f32 %v1341_v7, %v615_v4  ;;  %v11842_v21 = vld [vmem:[#allocation107_spill] sm:$0xff] }
 0x1a4   : > { %v4548_v13 = vmax.f32 %v4036_v27, 0.0  ;;  %v2942_v11 = vmul.f32 %v6320_v55, %v8080_v53  ;;  %v2944_v26 = vmul.f32 %v6324_v56, %v8080_v53  ;;  %v2941_v28 = vmul.f32 %v6328_v57, %v8080_v53 }
 0x1a5   : > { %v4545_v44 = vmax.f32 %v4033_v30, 0.0  ;;  %v2943_v49 = vmul.f32 %v6332_v58, %v8080_v53  ;;  %v4547_v47 = vmax.f32 %v4035_v60, 0.0  ;;  %v8090_v36 = vpack.c.bf16 %v4213_v24, %v4197_v39  ;;  %v8100_v60 = vpop.permute.xlu1 %445 }
 0x1a6   : > { %v1869_v18 = vadd.f32 %v1357_v5, %v631_v19  ;;  %v3454_v27 = vadd.f32 %v2942_v11, %v2216_v20  ;;  %v3456_v40 = vadd.f32 %v2944_v26, %v2218_v8  ;;  %v3453_v4 = vadd.f32 %v2941_v28, %v2215_v29  ;;  %11845 = vst [vmem:[#allocation23_spill] sm:$0xff] %v8100_v60 }
 0x1a7   : > { %11841 = vst [vmem:[#allocation122_spill] sm:$0xff] %v8090_v36  ;;  %v2579_v7 = vmul.f32 %v11753_v15, %v11797_v54  ;;  %v3455_v34 = vadd.f32 %v2943_v49, %v2217_v23  ;;  %v2595_v14 = vmul.f32 %v11753_v15, %v11800_v31  ;;  %v646_v30 = vmul.f32 %v11843_v33, %v11842_v21 }
 0x1a8   : > { %v662_v53 = vmul.f32 %v11843_v33, %v11844_v17  ;;  %v4050_v19 = vadd.f32 %v6342_v62, %v3454_v27  ;;  %v4052_v39 = vadd.f32 %v6346_v63, %v3456_v40  ;;  %v4049_v5 = vadd.f32 %v6350_v2, %v3453_v4  ;;  %v11846_v4 = vld [vmem:[#allocation111_spill] sm:$0xff] }
 0x1a9   : > { %v3091_v20 = vadd.f32 %v2579_v7, %v1853_v38  ;;  %v4051_v23 = vadd.f32 %v6354_v3, %v3455_v34  ;;  %v994_v8 = vmul.f32 %v6272_v42, %v8100_v60  ;;  %v996_v29 = vmul.f32 %v6285_v45, %v8100_v60  ;;  %v11847_v7 = vld [vmem:[#allocation21_spill] sm:$0xff] }
 0x1aa   : > { %v993_v24 = vmul.f32 %v6298_v48, %v8100_v60  ;;  %v4562_v11 = vmax.f32 %v4050_v19, 0.0  ;;  %v4564_v26 = vmax.f32 %v4052_v39, 0.0  ;;  %v4561_v28 = vmax.f32 %v4049_v5, 0.0  ;;  %v8119_v15 = vpop.permute.xlu1 %1174 }
 0x1ab   : > { %v995_v49 = vmul.f32 %v11655_v6, %v8100_v60  ;;  %v4563_v27 = vmax.f32 %v4051_v23, 0.0  ;;  %v3107_v40 = vadd.f32 %v2595_v14, %v1869_v18  ;;  %v3687_v38 = vadd.f32 %v11773_v59, %v3091_v20  ;;  %11849 = vst [vmem:[#allocation58_spill] sm:$0xff] %v8119_v15  ;;  %v11850_v20 = vld [vmem:[#allocation6_spill] sm:$0xff] }
 0x1ac   : > { %v1372_v34 = vmul.f32 %v11847_v7, %v11846_v4  ;;  %v5522_v31 = vpack.c.bf16 %v4562_v11, %v4546_v41  ;;  %v5586_v54 = vpack.c.bf16 %v4564_v26, %v4548_v13  ;;  %v5524_v36 = vpack.c.bf16 %v4561_v28, %v4545_v44  ;;  %v11851_v11 = vld [vmem:[#allocation55_spill] sm:$0xff] }
 0x1ad   : > { %v1388_v33 = vmul.f32 %v11847_v7, %v11848_v0  ;;  %v5588_v19 = vpack.c.bf16 %v4563_v27, %v4547_v47  ;;  %v3703_v39 = vadd.f32 %v11773_v59, %v3107_v40  ;;  %v4199_v5 = vmax.f32 %v3687_v38, 0.0 }
 0x1ae   : > { %v1884_v60 = vadd.f32 %v1372_v34, %v646_v30  ;;  %5523 = vmatprep.subr.bf16.mxu0 %v5522_v31  ;;  %5587 = vmatprep.subr.bf16.mxu1 %v5586_v54  ;;  %v1720_v18 = vmul.f32 %v6276_v43, %v8119_v15  ;;  %v1722_v41 = vmul.f32 %v11534_v50, %v8119_v15  ;;  %v8134_v28 = vpop.permute.xlu1 %1178 }
 0x1af   : > { %v1719_v13 = vmul.f32 %v11652_v35, %v8119_v15  ;;  %5525 = vmatpush1.bf16.msra.mxu0 %v5524_v36  ;;  %5589 = vmatpush1.bf16.msra.mxu1 %v5588_v19  ;;  %v1721_v44 = vmul.f32 %v11656_v52, %v8119_v15  ;;  %v4215_v47 = vmax.f32 %v3703_v39, 0.0  ;;  %v1900_v14 = vadd.f32 %v1388_v33, %v662_v53  ;;  %v11854_v33 = vld [vmem:[#allocation139_spill] sm:$0xff]  ;;  %v11861_v15 = vld [vmem:[#allocation142_spill] sm:$0xff] }
 0x1b0   : > { %v2610_v31 = vmul.f32 %v11749_v9, %v11850_v20  ;;  %v2232_v54 = vadd.f32 %v1720_v18, %v994_v8  ;;  %v2234_v30 = vadd.f32 %v1722_v41, %v996_v29  ;;  %v2626_v26 = vmul.f32 %v11749_v9, %v11851_v11  ;;  %11852 = vst [vmem:[#allocation25_spill] sm:$0xff] %v8134_v28  ;;  %v11855_v29 = vld [vmem:[#allocation141_spill] sm:$0xff] }
 0x1b1   : > { %v2231_v23 = vadd.f32 %v1719_v13, %v993_v24  ;;  %v2233_v27 = vadd.f32 %v1721_v44, %v995_v49  ;;  %v8136_v40 = vpack.c.bf16 %v4215_v47, %v4199_v5  ;;  %v648_v38 = vmul.f32 %v11805_v46, %v11842_v21  ;;  %v11856_v49 = vld [vmem:[#allocation119_spill] sm:$0xff]  ;;  %v11858_v41 = vld [vmem:[#allocation137_spill] sm:$0xff]  ;;  %v11859_v47 = vld [vmem:[#allocation140_spill] sm:$0xff] }
 0x1b2   : > { %v3122_v36 = vadd.f32 %v2610_v31, %v1884_v60  ;;  %v1736_v53 = vmul.f32 %v6276_v43, %v8134_v28  ;;  %v3470_v34 = vadd.f32 %v11854_v33, %v2232_v54  ;;  %v1738_v8 = vmul.f32 %v11534_v50, %v8134_v28  ;;  %v11857_v5 = vld [vmem:[#allocation143_spill] sm:$0xff]  ;;  %v11860_v33 = vld [vmem:[#allocation118_spill] sm:$0xff] }
 0x1b3   : > { %11853 = vst [vmem:[#allocation95_spill] sm:$0xff] %v8136_v40  ;;  %v3472_v24 = vadd.f32 %v11855_v29, %v2234_v30  ;;  %v1735_v19 = vmul.f32 %v11652_v35, %v8134_v28  ;;  %v3469_v39 = vadd.f32 %v11856_v49, %v2231_v23  ;;  %v1737_v60 = vmul.f32 %v11656_v52, %v8134_v28  ;;  %v8160_v49 = vpop.permute.xlu1 %2416 }
 0x1b4   : > { %v3471_v18 = vadd.f32 %v11857_v5, %v2233_v27  ;;  %v2248_v13 = vadd.f32 %v1736_v53, %v11858_v41  ;;  %v4066_v44 = vadd.f32 %v6342_v62, %v3470_v34  ;;  %v2250_v31 = vadd.f32 %v1738_v8, %v11859_v47  ;;  %11862 = vst [vmem:[#allocation97_spill] sm:$0xff] %v8160_v49 }
 0x1b5   : > { %v4068_v54 = vadd.f32 %v6346_v63, %v3472_v24  ;;  %v2247_v30 = vadd.f32 %v1735_v19, %v11860_v33  ;;  %v4065_v29 = vadd.f32 %v6350_v2, %v3469_v39  ;;  %v2249_v40 = vadd.f32 %v1737_v60, %v11861_v15 }
 0x1b6   : > { %v4067_v23 = vadd.f32 %v6354_v3, %v3471_v18  ;;  %v4578_v28 = vmax.f32 %v4066_v44, 0.0  ;;  %v3138_v5 = vadd.f32 %v2626_v26, %v1900_v14  ;;  %v3718_v53 = vadd.f32 %v11760_v25, %v3122_v36 }
 0x1b7   : > { %v4580_v27 = vmax.f32 %v4068_v54, 0.0  ;;  %v2974_v34 = vmul.f32 %v6320_v55, %v8160_v49  ;;  %v2976_v8 = vmul.f32 %v6324_v56, %v8160_v49  ;;  %v2973_v24 = vmul.f32 %v6328_v57, %v8160_v49 }
 0x1b8   : > { %v4577_v19 = vmax.f32 %v4065_v29, 0.0  ;;  %v2975_v15 = vmul.f32 %v6332_v58, %v8160_v49  ;;  %v4579_v39 = vmax.f32 %v4067_v23, 0.0  ;;  %v3734_v60 = vadd.f32 %v11760_v25, %v3138_v5  ;;  %v8178_v29 = vpop.permute.xlu1 %455 }
 0x1b9   : > { %v4230_v18 = vmax.f32 %v3718_v53, 0.0  ;;  %v3486_v14 = vadd.f32 %v2974_v34, %v2248_v13  ;;  %v3488_v26 = vadd.f32 %v2976_v8, %v2250_v31  ;;  %v3485_v36 = vadd.f32 %v2973_v24, %v2247_v30  ;;  %11863 = vst [vmem:[#allocation70_spill] sm:$0xff] %v8178_v29 }
 0x1ba   : > { %v664_v41 = vmul.f32 %v11805_v46, %v11844_v17  ;;  %v3487_v44 = vadd.f32 %v2975_v15, %v2249_v40  ;;  %v4246_v47 = vmax.f32 %v3734_v60, 0.0  ;;  %v1374_v54 = vmul.f32 %v11809_v22, %v11846_v4 }
 0x1bb   : > { %v1390_v33 = vmul.f32 %v11809_v22, %v11848_v0  ;;  %v4082_v23 = vadd.f32 %v6342_v62, %v3486_v14  ;;  %v4084_v5 = vadd.f32 %v6346_v63, %v3488_v26  ;;  %v4081_v13 = vadd.f32 %v6350_v2, %v3485_v36 }
 0x1bc   : > { %v2612_v31 = vmul.f32 %v11813_v16, %v11850_v20  ;;  %v4083_v40 = vadd.f32 %v6354_v3, %v3487_v44  ;;  %v1026_v30 = vmul.f32 %v6272_v42, %v8178_v29  ;;  %v1028_v53 = vmul.f32 %v6285_v45, %v8178_v29 }
 0x1bd   : > { %v1025_v34 = vmul.f32 %v6298_v48, %v8178_v29  ;;  %v4594_v8 = vmax.f32 %v4082_v23, 0.0  ;;  %v4596_v24 = vmax.f32 %v4084_v5, 0.0  ;;  %v4593_v15 = vmax.f32 %v4081_v13, 0.0  ;;  %v8198_v22 = vpop.permute.xlu1 %1182 }
 0x1be   : > { %v1027_v60 = vmul.f32 %v11655_v6, %v8178_v29  ;;  %v4595_v14 = vmax.f32 %v4083_v40, 0.0  ;;  %v8194_v26 = vpack.c.bf16 %v4246_v47, %v4230_v18  ;;  %v1886_v36 = vadd.f32 %v1374_v54, %v648_v38  ;;  %11864 = vst [vmem:[#allocation49_spill] sm:$0xff] %v8198_v22 }
 0x1bf   : > { %v1902_v44 = vadd.f32 %v1390_v33, %v664_v41  ;;  %v5526_v49 = vpack.c.bf16 %v4594_v8, %v4578_v28  ;;  %v5590_v25 = vpack.c.bf16 %v4596_v24, %v4580_v27  ;;  %v5528_v42 = vpack.c.bf16 %v4593_v15, %v4577_v19  ;;  %v11866_v24 = vld [vmem:[#allocation145_spill] sm:$0xff] }
 0x1c0   : > { %v2628_v45 = vmul.f32 %v11813_v16, %v11851_v11  ;;  %v5592_v48 = vpack.c.bf16 %v4595_v14, %v4579_v39  ;;  %v3124_v23 = vadd.f32 %v2612_v31, %v1886_v36  ;;  %v645_v5 = vmul.f32 %v11815_v10, %v11842_v21 }
 0x1c1   : > { %v661_v6 = vmul.f32 %v11815_v10, %v11844_v17  ;;  %5527 = vmatprep.subr.bf16.mxu0 %v5526_v49  ;;  %5591 = vmatprep.subr.bf16.mxu1 %v5590_v25  ;;  %v1752_v28 = vmul.f32 %v6276_v43, %v8198_v22  ;;  %v1754_v38 = vmul.f32 %v11534_v50, %v8198_v22  ;;  %v8215_v54 = vpop.permute.xlu1 %1186 }
 0x1c2   : > { %v1751_v27 = vmul.f32 %v11652_v35, %v8198_v22  ;;  %5529 = vmatpush1.bf16.msra.mxu0 %v5528_v42  ;;  %5593 = vmatpush1.bf16.msra.mxu1 %v5592_v48  ;;  %v1753_v19 = vmul.f32 %v11656_v52, %v8198_v22  ;;  %v3140_v39 = vadd.f32 %v2628_v45, %v1902_v44  ;;  %v11869_v42 = vld [vmem:[#allocation152_spill] sm:$0xff] }
 0x1c3   : > { %v3720_v18 = vadd.f32 %v11761_v32, %v3124_v23  ;;  %v2264_v41 = vadd.f32 %v1752_v28, %v1026_v30  ;;  %v2266_v49 = vadd.f32 %v1754_v38, %v1028_v53  ;;  %v1371_v47 = vmul.f32 %v11825_v61, %v11846_v4  ;;  %11865 = vst [vmem:[#allocation89_spill] sm:$0xff] %v8215_v54  ;;  %v11867_v53 = vld [vmem:[#allocation147_spill] sm:$0xff]  ;;  %v11870_v48 = vld [vmem:[#allocation144_spill] sm:$0xff]  ;;  %v11871_v28 = vld [vmem:[#allocation146_spill] sm:$0xff] }
 0x1c4   : > { %v2263_v25 = vadd.f32 %v1751_v27, %v1025_v34  ;;  %v2265_v33 = vadd.f32 %v1753_v19, %v1027_v60  ;;  %v3736_v13 = vadd.f32 %v11761_v32, %v3140_v39  ;;  %v1387_v40 = vmul.f32 %v11825_v61, %v11848_v0  ;;  %v11868_v60 = vld [vmem:[#allocation150_spill] sm:$0xff]  ;;  %v11872_v27 = vld [vmem:[#allocation149_spill] sm:$0xff] }
 0x1c5   : > { %v4232_v31 = vmax.f32 %v3720_v18, 0.0  ;;  %v1768_v8 = vmul.f32 %v6276_v43, %v8215_v54  ;;  %v3502_v15 = vadd.f32 %v11866_v24, %v2264_v41  ;;  %v1770_v30 = vmul.f32 %v11534_v50, %v8215_v54 }
 0x1c6   : > { %v3504_v34 = vadd.f32 %v11867_v53, %v2266_v49  ;;  %v1767_v14 = vmul.f32 %v11652_v35, %v8215_v54  ;;  %v3501_v36 = vadd.f32 %v11868_v60, %v2263_v25  ;;  %v1769_v44 = vmul.f32 %v11656_v52, %v8215_v54  ;;  %v11873_v35 = vld [vmem:[#allocation151_spill] sm:$0xff]  ;;  %v8240_v49 = vpop.permute.xlu1 %2424 }
 0x1c7   : > { %v3503_v45 = vadd.f32 %v11869_v42, %v2265_v33  ;;  %v2280_v23 = vadd.f32 %v1768_v8, %v11870_v48  ;;  %v4098_v43 = vadd.f32 %v6342_v62, %v3502_v15  ;;  %v2282_v38 = vadd.f32 %v1770_v30, %v11871_v28  ;;  %11874 = vst [vmem:[#allocation96_spill] sm:$0xff] %v8240_v49 }
 0x1c8   : > { %v4100_v50 = vadd.f32 %v6346_v63, %v3504_v34  ;;  %v2279_v19 = vadd.f32 %v1767_v14, %v11872_v27  ;;  %v4097_v39 = vadd.f32 %v6350_v2, %v3501_v36  ;;  %v2281_v18 = vadd.f32 %v1769_v44, %v11873_v35 }
 0x1c9   : > { %v4099_v41 = vadd.f32 %v6354_v3, %v3503_v45  ;;  %v4610_v52 = vmax.f32 %v4098_v43, 0.0  ;;  %v4248_v33 = vmax.f32 %v3736_v13, 0.0  ;;  %v1883_v8 = vadd.f32 %v1371_v47, %v645_v5 }
 0x1ca   : > { %v4612_v25 = vmax.f32 %v4100_v50, 0.0  ;;  %v3006_v24 = vmul.f32 %v6320_v55, %v8240_v49  ;;  %v3008_v15 = vmul.f32 %v6324_v56, %v8240_v49  ;;  %v3005_v30 = vmul.f32 %v6328_v57, %v8240_v49 }
 0x1cb   : > { %v4609_v53 = vmax.f32 %v4097_v39, 0.0  ;;  %v3007_v34 = vmul.f32 %v6332_v58, %v8240_v49  ;;  %v4611_v14 = vmax.f32 %v4099_v41, 0.0  ;;  %v8250_v60 = vpack.c.bf16 %v4248_v33, %v4232_v31 }
 0x1cc   : > { %v1899_v36 = vadd.f32 %v1387_v40, %v661_v6  ;;  %v3518_v44 = vadd.f32 %v3006_v24, %v2280_v23  ;;  %v3520_v13 = vadd.f32 %v3008_v15, %v2282_v38  ;;  %v3517_v5 = vadd.f32 %v3005_v30, %v2279_v19  ;;  %v11876_v30 = vld [vmem:[#allocation127_spill] sm:$0xff] }
 0x1cd   : > { %v2609_v55 = vmul.f32 %v11752_v12, %v11850_v20  ;;  %v3519_v47 = vadd.f32 %v3007_v34, %v2281_v18  ;;  %v2625_v56 = vmul.f32 %v11752_v12, %v11851_v11  ;;  %v647_v57 = vmul.f32 %v11829_v51, %v11842_v21  ;;  %v11877_v34 = vld [vmem:[#allocation20_spill] sm:$0xff] }
 0x1ce   : > { %v663_v58 = vmul.f32 %v11829_v51, %v11844_v17  ;;  %v4114_v31 = vadd.f32 %v6342_v62, %v3518_v44  ;;  %v4116_v6 = vadd.f32 %v6346_v63, %v3520_v13  ;;  %v4113_v40 = vadd.f32 %v6350_v2, %v3517_v5  ;;  %v11878_v44 = vld [vmem:[#allocation54_spill] sm:$0xff] }
 0x1cf   : > { %v3121_v42 = vadd.f32 %v2609_v55, %v1883_v8  ;;  %v4115_v45 = vadd.f32 %v6354_v3, %v3519_v47  ;;  %v3137_v48 = vadd.f32 %v2625_v56, %v1899_v36  ;;  %v1373_v23 = vmul.f32 %v11830_v37, %v11846_v4  ;;  %v11875_v8 = vld [vmem:[#allocation93_spill] sm:$0xff]  ;;  %v11881_v56 = vld [vmem:[#allocation116_spill] sm:$0xff] }
 0x1d0   : > { %v1389_v43 = vmul.f32 %v11830_v37, %v11848_v0  ;;  %v4626_v28 = vmax.f32 %v4114_v31, 0.0  ;;  %v4628_v38 = vmax.f32 %v4116_v6, 0.0  ;;  %v4625_v50 = vmax.f32 %v4113_v40, 0.0  ;;  %v11880_v47 = vld [vmem:[#allocation57_spill] sm:$0xff] }
 0x1d1   : > { %v3717_v27 = vadd.f32 %v11772_v1, %v3121_v42  ;;  %v4627_v62 = vmax.f32 %v4115_v45, 0.0  ;;  %v3733_v63 = vadd.f32 %v11772_v1, %v3137_v48  ;;  %v1885_v19 = vadd.f32 %v1373_v23, %v647_v57  ;;  %v11882_v57 = vld [vmem:[#allocation36_spill] sm:$0xff]  ;;  %v11883_v6 = vld [vmem:[#allocation65_spill] sm:$0xff] }
 0x1d2   : > { %v1901_v2 = vadd.f32 %v1389_v43, %v663_v58  ;;  %v5530_v39 = vpack.c.bf16 %v4626_v28, %v4610_v52  ;;  %v5594_v35 = vpack.c.bf16 %v4628_v38, %v4612_v25  ;;  %v5532_v3 = vpack.c.bf16 %v4625_v50, %v4609_v53  ;;  %v11879_v52 = vld [vmem:[#allocation31_spill] sm:$0xff]  ;;  %v11884_v48 = vld [vmem:[#allocation64_spill] sm:$0xff] }
 0x1d3   : > { %v4229_v18 = vmax.f32 %v3717_v27, 0.0  ;;  %v5596_v41 = vpack.c.bf16 %v4627_v62, %v4611_v14  ;;  %v4245_v33 = vmax.f32 %v3733_v63, 0.0  ;;  %v2611_v24 = vmul.f32 %v11875_v8, %v11850_v20  ;;  %v4657_v53 = vld [vmem:[%s11002_s3] sm:$0x3f]  ;;  %v11886_v62 = vld [vmem:[#allocation56_spill] sm:$0xff] }
 0x1d4   : > { %v2627_v15 = vmul.f32 %v11875_v8, %v11851_v11  ;;  %5531 = vmatprep.subr.bf16.mxu0 %v5530_v39  ;;  %5595 = vmatprep.subr.bf16.mxu1 %v5594_v35  ;;  %v678_v36 = vmul.f32 %v11877_v34, %v11876_v30  ;;  %v694_v13 = vmul.f32 %v11877_v34, %v11878_v44  ;;  %v11885_v27 = vld [vmem:[#allocation59_spill] sm:$0xff] }
 0x1d5   : > { %v1404_v25 = vmul.f32 %v11847_v7, %v11879_v52  ;;  %5533 = vmatpush1.bf16.msra.mxu0 %v5532_v3  ;;  %5597 = vmatpush1.bf16.msra.mxu1 %v5596_v41  ;;  %v8283_v14 = vpack.c.bf16 %v4245_v33, %v4229_v18  ;;  %v3123_v5 = vadd.f32 %v2611_v24, %v1885_v19  ;;  %v11888_v3 = vld [vmem:[#allocation4_spill] sm:$0xff]  ;;  %v11890_v33 = vld [vmem:[#allocation38_spill] sm:$0xff] }
 0x1d6   : > { %v3139_v55 = vadd.f32 %v2627_v15, %v1901_v2  ;;  %5599 = vmatprep.subr.bf16.mxu0 %v11880_v47  ;;  %5663 = vmatprep.subr.bf16.mxu1 %v11881_v56  ;;  %v1420_v58 = vmul.f32 %v11847_v7, %v11882_v57  ;;  %v2642_v40 = vmul.f32 %v11749_v9, %v11883_v6  ;;  %v11887_v2 = vld [vmem:[#allocation24_spill] sm:$0xff] }
 0x1d7   : > { %v1916_v31 = vadd.f32 %v1404_v25, %v678_v36  ;;  %v3719_v42 = vadd.f32 %v11773_v59, %v3123_v5  ;;  %v2658_v23 = vmul.f32 %v11749_v9, %v11884_v48  ;;  %v680_v43 = vmul.f32 %v11805_v46, %v11876_v30  ;;  %v11889_v18 = vld [vmem:[#allocation80_spill] sm:$0xff] }
 0x1d8   : > { %v3735_v45 = vadd.f32 %v11773_v59, %v3139_v55  ;;  %4724 = vmatmul.mubr.f32.vlgmr.msra.gmra.mrb[0].mxu0 %v4657_v53  ;;  %4795 = vmatmul.mubr.f32.vlgmr.msra.gmra.mrb[0].mxu1 %v4657_v53  ;;  %v1932_v28 = vadd.f32 %v1420_v58, %v694_v13  ;;  %v696_v50 = vmul.f32 %v11805_v46, %v11878_v44  ;;  %v6068_v5 = vld [vmem:[%s11002_s3 + $0x8] sm:$0x3f] }
 0x1d9   : > { %v3154_v38 = vadd.f32 %v2642_v40, %v1916_v31  ;;  %5601 = vmatpush1.bf16.msra.mxu0 %v11885_v27  ;;  %5665 = vmatpush1.bf16.msra.mxu1 %v11886_v62  ;;  %v4231_v63 = vmax.f32 %v3719_v42, 0.0  ;;  %v1406_v39 = vmul.f32 %v11887_v2, %v11879_v52  ;;  %v1422_v35 = vmul.f32 %v11887_v2, %v11882_v57  ;;  %v11891_v31 = vld [vmem:[#allocation101_spill] sm:$0xff]  ;;  %v11892_v40 = vld [vmem:[#allocation103_spill] sm:$0xff] }
 0x1da   : > { %v4247_v19 = vmax.f32 %v3735_v45, 0.0  ;;  %5603 = vmatprep.subr.bf16.mxu0 %v11888_v3  ;;  %5667 = vmatprep.subr.bf16.mxu1 %v11889_v18  ;;  %v3170_v41 = vadd.f32 %v2658_v23, %v1932_v28  ;;  %v2644_v15 = vmul.f32 %v11813_v16, %v11883_v6  ;;  %v2660_v53 = vmul.f32 %v11813_v16, %v11884_v48  ;;  %v11894_v28 = vld [vmem:[#allocation129_spill] sm:$0xff] }
 0x1db   : > { %v3750_v24 = vadd.f32 %v11890_v33, %v3154_v38  ;;  %v1918_v13 = vadd.f32 %v1406_v39, %v680_v43  ;;  %v1934_v25 = vadd.f32 %v1422_v35, %v696_v50  ;;  %4865 = vmatprep.mubr.f32.mxu0 %v6068_v5  ;;  %v677_v56 = vmul.f32 %v11815_v10, %v11876_v30  ;;  %v11893_v43 = vld [vmem:[#allocation113_spill] sm:$0xff] }
 0x1dc   : > { %v5676_v36 = vpack.c.bf16 %v4247_v19, %v4231_v63  ;;  %v3766_v55 = vadd.f32 %v11890_v33, %v3170_v41  ;;  %v693_v58 = vmul.f32 %v11815_v10, %v11878_v44  ;;  %4936 = vmatprep.mubr.f32.mxu1 %v6068_v5  ;;  %v1403_v23 = vmul.f32 %v11825_v61, %v11879_v52 }
 0x1dd   : > { %v4262_v47 = vmax.f32 %v3750_v24, 0.0  ;;  %5605 = vmatpush1.bf16.msra.mxu0 %v11891_v31  ;;  %5669 = vmatpush1.bf16.msra.mxu1 %v11892_v40  ;;  %v3156_v42 = vadd.f32 %v2644_v15, %v1918_v13  ;;  %v3172_v45 = vadd.f32 %v2660_v53, %v1934_v25  ;;  %v1419_v50 = vmul.f32 %v11825_v61, %v11882_v57  ;;  %v11895_v15 = vld [vmem:[#allocation122_spill] sm:$0xff]  ;;  %v11896_v13 = vld [vmem:[#allocation95_spill] sm:$0xff] }
 0x1de   : > { %5607 = vmatprep.subr.bf16.mxu0 %v11893_v43  ;;  %5671 = vmatprep.subr.bf16.mxu1 %v11894_v28  ;;  %v4278_v38 = vmax.f32 %v3766_v55, 0.0  ;;  %v2641_v27 = vmul.f32 %v11752_v12, %v11883_v6  ;;  %v2657_v62 = vmul.f32 %v11752_v12, %v11884_v48  ;;  %v1915_v39 = vadd.f32 %v1403_v23, %v677_v56  ;;  %v11897_v28 = vld [vmem:[#allocation68_spill] sm:$0xff] }
 0x1df   : > { %v3752_v63 = vadd.f32 %v11761_v32, %v3156_v42  ;;  %v3768_v19 = vadd.f32 %v11761_v32, %v3172_v45  ;;  %v679_v35 = vmul.f32 %v11829_v51, %v11876_v30  ;;  %v1931_v18 = vadd.f32 %v1419_v50, %v693_v58 }
 0x1e0   : > { %v5614_v3 = vpack.c.bf16 %v4278_v38, %v4262_v47  ;;  %v695_v41 = vmul.f32 %v11829_v51, %v11878_v44  ;;  %v1405_v24 = vmul.f32 %v11830_v37, %v11879_v52  ;;  %v3153_v5 = vadd.f32 %v2641_v27, %v1915_v39  ;;  %v11898_v38 = vld [vmem:[#allocation63_spill] sm:$0xff] }
 0x1e1   : > { %5609 = vmatpush1.bf16.msra.mxu0 %v11895_v15  ;;  %5673 = vmatpush1.bf16.msra.mxu1 %v11896_v13  ;;  %v4264_v25 = vmax.f32 %v3752_v63, 0.0  ;;  %v4280_v53 = vmax.f32 %v3768_v19, 0.0  ;;  %v1421_v55 = vmul.f32 %v11830_v37, %v11882_v57  ;;  %v3169_v47 = vadd.f32 %v2657_v62, %v1931_v18  ;;  %v11899_v62 = vld [vmem:[#allocation69_spill] sm:$0xff]  ;;  %v11900_v19 = vld [vmem:[#allocation42_spill] sm:$0xff]  ;;  %v11902_v15 = vld [vmem:[#allocation44_spill] sm:$0xff] }
 0x1e2   : > { %5611 = vmatprep.subr.bf16.mxu0 %v8194_v26  ;;  %5675 = vmatprep.subr.bf16.mxu1 %v8250_v60  ;;  %v1917_v56 = vadd.f32 %v1405_v24, %v679_v35  ;;  %v2643_v58 = vmul.f32 %v11875_v8, %v11883_v6  ;;  %v3749_v40 = vadd.f32 %v11772_v1, %v3153_v5 }
 0x1e3   : > { %v5678_v31 = vpack.c.bf16 %v4280_v53, %v4264_v25  ;;  %v1933_v42 = vadd.f32 %v1421_v55, %v695_v41  ;;  %v2659_v45 = vmul.f32 %v11875_v8, %v11884_v48  ;;  %v3765_v23 = vadd.f32 %v11772_v1, %v3169_v47  ;;  %v11901_v41 = vld [vmem:[#allocation43_spill] sm:$0xff] }
 0x1e4   : > { %v3155_v43 = vadd.f32 %v2643_v58, %v1917_v56  ;;  %v710_v26 = vmul.f32 %v11877_v34, %v11897_v28  ;;  %v726_v60 = vmul.f32 %v11877_v34, %v11898_v38  ;;  %v4261_v50 = vmax.f32 %v3749_v40, 0.0 }
 0x1e5   : > { %5613 = vmatpush1.bf16.msra.mxu0 %v8283_v14  ;;  %5677 = vmatpush1.bf16.msra.mxu1 %v5676_v36  ;;  %v3171_v27 = vadd.f32 %v2659_v45, %v1933_v42  ;;  %v1436_v63 = vmul.f32 %v11847_v7, %v11899_v62  ;;  %v1452_v39 = vmul.f32 %v11847_v7, %v11900_v19  ;;  %v4277_v35 = vmax.f32 %v3765_v23, 0.0 }
 0x1e6   : > { %5615 = vmatprep.subr.bf16.mxu0 %v5614_v3  ;;  %5679 = vmatprep.subr.bf16.mxu1 %v5678_v31  ;;  %v3751_v18 = vadd.f32 %v11773_v59, %v3155_v43  ;;  %v2674_v24 = vmul.f32 %v11749_v9, %v11901_v41  ;;  %v2690_v14 = vmul.f32 %v11749_v9, %v11902_v15 }
 0x1e7   : > { %v3767_v36 = vadd.f32 %v11773_v59, %v3171_v27  ;;  %v1948_v13 = vadd.f32 %v1436_v63, %v710_v26  ;;  %v1964_v25 = vadd.f32 %v1452_v39, %v726_v60  ;;  %v712_v53 = vmul.f32 %v11805_v46, %v11897_v28 }
 0x1e8   : > { %v5616_v5 = vpack.c.bf16 %v4277_v35, %v4261_v50  ;;  %v4263_v55 = vmax.f32 %v3751_v18, 0.0  ;;  %v728_v3 = vmul.f32 %v11805_v46, %v11898_v38  ;;  %v1438_v47 = vmul.f32 %v11887_v2, %v11899_v62 }
 0x1e9   : > { %v4279_v56 = vmax.f32 %v3767_v36, 0.0  ;;  %v3186_v58 = vadd.f32 %v2674_v24, %v1948_v13  ;;  %v3202_v31 = vadd.f32 %v2690_v14, %v1964_v25  ;;  %v1454_v40 = vmul.f32 %v11887_v2, %v11900_v19 }
 0x1ea   : > { %5617 = vmatpush1.bf16.msra.mxu0 %v5616_v5  ;;  %v1950_v42 = vadd.f32 %v1438_v47, %v712_v53  ;;  %v2676_v45 = vmul.f32 %v11813_v16, %v11901_v41  ;;  %v2692_v23 = vmul.f32 %v11813_v16, %v11902_v15  ;;  %v709_v43 = vmul.f32 %v11815_v10, %v11897_v28 }
 0x1eb   : > { %v5680_v26 = vpack.c.bf16 %v4279_v56, %v4263_v55  ;;  %v3782_v60 = vadd.f32 %v11890_v33, %v3186_v58  ;;  %v3798_v50 = vadd.f32 %v11890_v33, %v3202_v31  ;;  %v1966_v27 = vadd.f32 %v1454_v40, %v728_v3 }
 0x1ec   : > { %v3188_v63 = vadd.f32 %v2676_v45, %v1950_v42  ;;  %v725_v39 = vmul.f32 %v11815_v10, %v11898_v38  ;;  %v1435_v35 = vmul.f32 %v11825_v61, %v11899_v62  ;;  %v1451_v18 = vmul.f32 %v11825_v61, %v11900_v19 }
 0x1ed   : > { %5681 = vmatpush1.bf16.msra.mxu1 %v5680_v26  ;;  %v4294_v24 = vmax.f32 %v3782_v60, 0.0  ;;  %v4310_v14 = vmax.f32 %v3798_v50, 0.0  ;;  %v3204_v36 = vadd.f32 %v2692_v23, %v1966_v27  ;;  %v2673_v13 = vmul.f32 %v11752_v12, %v11901_v41 }
 0x1ee   : > { %v3784_v25 = vadd.f32 %v11761_v32, %v3188_v63  ;;  %v1947_v53 = vadd.f32 %v1435_v35, %v709_v43  ;;  %v1963_v5 = vadd.f32 %v1451_v18, %v725_v39  ;;  %v2689_v55 = vmul.f32 %v11752_v12, %v11902_v15  ;;  %v11903_v39 = vld [vmem:[#allocation45_spill] sm:$0xff] }
 0x1ef   : > { %v5618_v3 = vpack.c.bf16 %v4310_v14, %v4294_v24  ;;  %v3800_v47 = vadd.f32 %v11761_v32, %v3204_v36  ;;  %v711_v56 = vmul.f32 %v11829_v51, %v11897_v28  ;;  %v727_v58 = vmul.f32 %v11829_v51, %v11898_v38  ;;  %v11904_v14 = vld [vmem:[#allocation75_spill] sm:$0xff] }
 0x1f0   : > { %v4296_v31 = vmax.f32 %v3784_v25, 0.0  ;;  %v3185_v40 = vadd.f32 %v2673_v13, %v1947_v53  ;;  %v3201_v42 = vadd.f32 %v2689_v55, %v1963_v5  ;;  %v1437_v45 = vmul.f32 %v11830_v37, %v11899_v62  ;;  %v11905_v13 = vld [vmem:[#allocation82_spill] sm:$0xff] }
 0x1f1   : > { %5619 = vmatprep.subr.bf16.mxu0 %v5618_v3  ;;  %v4312_v23 = vmax.f32 %v3800_v47, 0.0  ;;  %v1453_v43 = vmul.f32 %v11830_v37, %v11900_v19  ;;  %v2675_v26 = vmul.f32 %v11875_v8, %v11901_v41  ;;  %v2691_v60 = vmul.f32 %v11875_v8, %v11902_v15  ;;  %v11906_v3 = vld [vmem:[#allocation85_spill] sm:$0xff] }
 0x1f2   : > { %v3781_v50 = vadd.f32 %v11772_v1, %v3185_v40  ;;  %v3797_v27 = vadd.f32 %v11772_v1, %v3201_v42  ;;  %v1949_v63 = vadd.f32 %v1437_v45, %v711_v56  ;;  %v742_v35 = vmul.f32 %v11877_v34, %v11903_v39  ;;  %v11907_v42 = vld [vmem:[#allocation83_spill] sm:$0xff] }
 0x1f3   : > { %v5682_v18 = vpack.c.bf16 %v4312_v23, %v4296_v31  ;;  %v1965_v24 = vadd.f32 %v1453_v43, %v727_v58  ;;  %v758_v36 = vmul.f32 %v11877_v34, %v11904_v14  ;;  %v1468_v25 = vmul.f32 %v11847_v7, %v11905_v13  ;;  %v11908_v31 = vld [vmem:[#allocation86_spill] sm:$0xff] }
 0x1f4   : > { %v4293_v53 = vmax.f32 %v3781_v50, 0.0  ;;  %v4309_v5 = vmax.f32 %v3797_v27, 0.0  ;;  %v3187_v55 = vadd.f32 %v2675_v26, %v1949_v63  ;;  %v1484_v47 = vmul.f32 %v11847_v7, %v11906_v3 }
 0x1f5   : > { %5683 = vmatprep.subr.bf16.mxu1 %v5682_v18  ;;  %v3203_v40 = vadd.f32 %v2691_v60, %v1965_v24  ;;  %v1980_v56 = vadd.f32 %v1468_v25, %v742_v35  ;;  %v2706_v45 = vmul.f32 %v11749_v9, %v11907_v42  ;;  %v2722_v58 = vmul.f32 %v11749_v9, %v11908_v31 }
 0x1f6   : > { %v5620_v23 = vpack.c.bf16 %v4309_v5, %v4293_v53  ;;  %v3783_v43 = vadd.f32 %v11773_v59, %v3187_v55  ;;  %v1996_v15 = vadd.f32 %v1484_v47, %v758_v36  ;;  %v744_v50 = vmul.f32 %v11805_v46, %v11903_v39 }
 0x1f7   : > { %v3799_v26 = vadd.f32 %v11773_v59, %v3203_v40  ;;  %v3218_v27 = vadd.f32 %v2706_v45, %v1980_v56  ;;  %v760_v60 = vmul.f32 %v11805_v46, %v11904_v14  ;;  %v1470_v63 = vmul.f32 %v11887_v2, %v11905_v13 }
 0x1f8   : > { %5621 = vmatpush1.bf16.msra.mxu0 %v5620_v23  ;;  %v4295_v35 = vmax.f32 %v3783_v43, 0.0  ;;  %v3234_v18 = vadd.f32 %v2722_v58, %v1996_v15  ;;  %v1486_v24 = vmul.f32 %v11887_v2, %v11906_v3  ;;  %v2708_v36 = vmul.f32 %v11813_v16, %v11907_v42 }
 0x1f9   : > { %v4311_v25 = vmax.f32 %v3799_v26, 0.0  ;;  %v3814_v53 = vadd.f32 %v11890_v33, %v3218_v27  ;;  %v1982_v5 = vadd.f32 %v1470_v63, %v744_v50  ;;  %v2724_v55 = vmul.f32 %v11813_v16, %v11908_v31 }
 0x1fa   : > { %v3830_v47 = vadd.f32 %v11890_v33, %v3234_v18  ;;  %v1998_v40 = vadd.f32 %v1486_v24, %v760_v60  ;;  %v741_v56 = vmul.f32 %v11815_v10, %v11903_v39  ;;  %v757_v15 = vmul.f32 %v11815_v10, %v11904_v14 }
 0x1fb   : > { %v5684_v45 = vpack.c.bf16 %v4311_v25, %v4295_v35  ;;  %v4326_v58 = vmax.f32 %v3814_v53, 0.0  ;;  %v3220_v23 = vadd.f32 %v2708_v36, %v1982_v5  ;;  %v1467_v43 = vmul.f32 %v11825_v61, %v11905_v13 }
 0x1fc   : > { %v4342_v26 = vmax.f32 %v3830_v47, 0.0  ;;  %v3236_v50 = vadd.f32 %v2724_v55, %v1998_v40  ;;  %v1483_v27 = vmul.f32 %v11825_v61, %v11906_v3  ;;  %v2705_v60 = vmul.f32 %v11752_v12, %v11907_v42 }
 0x1fd   : > { %5685 = vmatpush1.bf16.msra.mxu1 %v5684_v45  ;;  %v3816_v63 = vadd.f32 %v11761_v32, %v3220_v23  ;;  %v1979_v18 = vadd.f32 %v1467_v43, %v741_v56  ;;  %v2721_v35 = vmul.f32 %v11752_v12, %v11908_v31  ;;  %v743_v24 = vmul.f32 %v11829_v51, %v11903_v39 }
 0x1fe   : > { %v5622_v36 = vpack.c.bf16 %v4342_v26, %v4326_v58  ;;  %v3832_v25 = vadd.f32 %v11761_v32, %v3236_v50  ;;  %v1995_v53 = vadd.f32 %v1483_v27, %v757_v15  ;;  %v759_v5 = vmul.f32 %v11829_v51, %v11904_v14  ;;  %v11909_v27 = vld [vmem:[#allocation61_spill] sm:$0xff] }
 0x1ff   : > { %v4328_v55 = vmax.f32 %v3816_v63, 0.0  ;;  %v3217_v47 = vadd.f32 %v2705_v60, %v1979_v18  ;;  %v1469_v40 = vmul.f32 %v11830_v37, %v11905_v13  ;;  %v1485_v56 = vmul.f32 %v11830_v37, %v11906_v3  ;;  %v11910_v3 = vld [vmem:[#allocation79_spill] sm:$0xff] }
 0x200   : > { %5623 = vmatprep.subr.bf16.mxu0 %v5622_v36  ;;  %v4344_v45 = vmax.f32 %v3832_v25, 0.0  ;;  %v3233_v23 = vadd.f32 %v2721_v35, %v1995_v53  ;;  %v2707_v58 = vmul.f32 %v11875_v8, %v11907_v42  ;;  %v2723_v15 = vmul.f32 %v11875_v8, %v11908_v31  ;;  %v11911_v35 = vld [vmem:[#allocation14_spill] sm:$0xff] }
 0x201   : > { %v3813_v43 = vadd.f32 %v11772_v1, %v3217_v47  ;;  %v1981_v26 = vadd.f32 %v1469_v40, %v743_v24  ;;  %v1997_v50 = vadd.f32 %v1485_v56, %v759_v5  ;;  %v774_v60 = vmul.f32 %v11877_v34, %v11909_v27  ;;  %v11912_v31 = vld [vmem:[#allocation66_spill] sm:$0xff]  ;;  %v11914_v56 = vld [vmem:[#allocation16_spill] sm:$0xff] }
 0x202   : > { %v5686_v63 = vpack.c.bf16 %v4344_v45, %v4328_v55  ;;  %v3829_v18 = vadd.f32 %v11772_v1, %v3233_v23  ;;  %v790_v36 = vmul.f32 %v11877_v34, %v11910_v3  ;;  %v1500_v25 = vmul.f32 %v11847_v7, %v11911_v35  ;;  %v11913_v40 = vld [vmem:[#allocation62_spill] sm:$0xff] }
 0x203   : > { %v4325_v53 = vmax.f32 %v3813_v43, 0.0  ;;  %v3219_v42 = vadd.f32 %v2707_v58, %v1981_v26  ;;  %v3235_v13 = vadd.f32 %v2723_v15, %v1997_v50  ;;  %v1516_v47 = vmul.f32 %v11847_v7, %v11912_v31 }
 0x204   : > { %5687 = vmatprep.subr.bf16.mxu1 %v5686_v63  ;;  %v4341_v24 = vmax.f32 %v3829_v18, 0.0  ;;  %v2012_v5 = vadd.f32 %v1500_v25, %v774_v60  ;;  %v2738_v55 = vmul.f32 %v11749_v9, %v11913_v40  ;;  %v2754_v45 = vmul.f32 %v11749_v9, %v11914_v56 }
 0x205   : > { %v3815_v23 = vadd.f32 %v11773_v59, %v3219_v42  ;;  %v3831_v14 = vadd.f32 %v11773_v59, %v3235_v13  ;;  %v2028_v39 = vadd.f32 %v1516_v47, %v790_v36  ;;  %v776_v58 = vmul.f32 %v11805_v46, %v11909_v27 }
 0x206   : > { %v5624_v15 = vpack.c.bf16 %v4341_v24, %v4325_v53  ;;  %v3250_v43 = vadd.f32 %v2738_v55, %v2012_v5  ;;  %v792_v26 = vmul.f32 %v11805_v46, %v11910_v3  ;;  %v1502_v50 = vmul.f32 %v11887_v2, %v11911_v35 }
 0x207   : > { %v4327_v60 = vmax.f32 %v3815_v23, 0.0  ;;  %v4343_v63 = vmax.f32 %v3831_v14, 0.0  ;;  %v3266_v18 = vadd.f32 %v2754_v45, %v2028_v39  ;;  %v1518_v42 = vmul.f32 %v11887_v2, %v11912_v31 }
 0x208   : > { %5625 = vmatpush1.bf16.msra.mxu0 %v5624_v15  ;;  %v3846_v13 = vadd.f32 %v11890_v33, %v3250_v43  ;;  %v2014_v36 = vadd.f32 %v1502_v50, %v776_v58  ;;  %v2740_v25 = vmul.f32 %v11813_v16, %v11913_v40  ;;  %v2756_v53 = vmul.f32 %v11813_v16, %v11914_v56 }
 0x209   : > { %v5688_v47 = vpack.c.bf16 %v4343_v63, %v4327_v60  ;;  %v3862_v24 = vadd.f32 %v11890_v33, %v3266_v18  ;;  %v2030_v5 = vadd.f32 %v1518_v42, %v792_v26  ;;  %v773_v39 = vmul.f32 %v11815_v10, %v11909_v27 }
 0x20a   : > { %v4358_v14 = vmax.f32 %v3846_v13, 0.0  ;;  %v3252_v55 = vadd.f32 %v2740_v25, %v2014_v36  ;;  %v789_v45 = vmul.f32 %v11815_v10, %v11910_v3  ;;  %v1499_v23 = vmul.f32 %v11825_v61, %v11911_v35 }
 0x20b   : > { %5689 = vmatpush1.bf16.msra.mxu1 %v5688_v47  ;;  %v4374_v58 = vmax.f32 %v3862_v24, 0.0  ;;  %v3268_v15 = vadd.f32 %v2756_v53, %v2030_v5  ;;  %v1515_v43 = vmul.f32 %v11825_v61, %v11912_v31  ;;  %v2737_v26 = vmul.f32 %v11752_v12, %v11913_v40 }
 0x20c   : > { %v3848_v50 = vadd.f32 %v11761_v32, %v3252_v55  ;;  %v2011_v60 = vadd.f32 %v1499_v23, %v773_v39  ;;  %v2753_v63 = vmul.f32 %v11752_v12, %v11914_v56  ;;  %v775_v18 = vmul.f32 %v11829_v51, %v11909_v27 }
 0x20d   : > { %v5626_v42 = vpack.c.bf16 %v4374_v58, %v4358_v14  ;;  %v3864_v13 = vadd.f32 %v11761_v32, %v3268_v15  ;;  %v2027_v36 = vadd.f32 %v1515_v43, %v789_v45  ;;  %v791_v25 = vmul.f32 %v11829_v51, %v11910_v3  ;;  %v11915_v43 = vld [vmem:[#allocation71_spill] sm:$0xff] }
 0x20e   : > { %v4360_v53 = vmax.f32 %v3848_v50, 0.0  ;;  %v3249_v47 = vadd.f32 %v2737_v26, %v2011_v60  ;;  %v1501_v24 = vmul.f32 %v11830_v37, %v11911_v35  ;;  %v1517_v5 = vmul.f32 %v11830_v37, %v11912_v31  ;;  %v11916_v31 = vld [vmem:[#allocation91_spill] sm:$0xff] }
 0x20f   : > { %5627 = vmatprep.subr.bf16.mxu0 %v5626_v42  ;;  %v4376_v39 = vmax.f32 %v3864_v13, 0.0  ;;  %v3265_v55 = vadd.f32 %v2753_v63, %v2027_v36  ;;  %v2739_v14 = vmul.f32 %v11875_v8, %v11913_v40  ;;  %v2755_v45 = vmul.f32 %v11875_v8, %v11914_v56  ;;  %v11917_v63 = vld [vmem:[#allocation76_spill] sm:$0xff] }
 0x210   : > { %v3845_v23 = vadd.f32 %v11772_v1, %v3249_v47  ;;  %v2013_v58 = vadd.f32 %v1501_v24, %v775_v18  ;;  %v2029_v15 = vadd.f32 %v1517_v5, %v791_v25  ;;  %v806_v26 = vmul.f32 %v11877_v34, %v11915_v43  ;;  %v11918_v56 = vld [vmem:[#allocation84_spill] sm:$0xff]  ;;  %v11919_v24 = vld [vmem:[#allocation15_spill] sm:$0xff] }
 0x211   : > { %v5690_v50 = vpack.c.bf16 %v4376_v39, %v4360_v53  ;;  %v3861_v60 = vadd.f32 %v11772_v1, %v3265_v55  ;;  %v822_v42 = vmul.f32 %v11877_v34, %v11916_v31  ;;  %v1532_v13 = vmul.f32 %v11847_v7, %v11917_v63  ;;  %v11920_v5 = vld [vmem:[#allocation87_spill] sm:$0xff] }
 0x212   : > { %v4357_v36 = vmax.f32 %v3845_v23, 0.0  ;;  %v3251_v40 = vadd.f32 %v2739_v14, %v2013_v58  ;;  %v3267_v35 = vadd.f32 %v2755_v45, %v2029_v15  ;;  %v1548_v47 = vmul.f32 %v11847_v7, %v11918_v56 }
 0x213   : > { %5691 = vmatprep.subr.bf16.mxu1 %v5690_v50  ;;  %v4373_v18 = vmax.f32 %v3861_v60, 0.0  ;;  %v2044_v25 = vadd.f32 %v1532_v13, %v806_v26  ;;  %v2770_v53 = vmul.f32 %v11749_v9, %v11919_v24  ;;  %v2786_v39 = vmul.f32 %v11749_v9, %v11920_v5 }
 0x214   : > { %v3847_v55 = vadd.f32 %v11773_v59, %v3251_v40  ;;  %v3863_v3 = vadd.f32 %v11773_v59, %v3267_v35  ;;  %v2060_v27 = vadd.f32 %v1548_v47, %v822_v42  ;;  %v808_v14 = vmul.f32 %v11805_v46, %v11915_v43 }
 0x215   : > { %v5628_v45 = vpack.c.bf16 %v4373_v18, %v4357_v36  ;;  %v3282_v23 = vadd.f32 %v2770_v53, %v2044_v25  ;;  %v824_v58 = vmul.f32 %v11805_v46, %v11916_v31  ;;  %v1534_v15 = vmul.f32 %v11887_v2, %v11917_v63 }
 0x216   : > { %v4359_v26 = vmax.f32 %v3847_v55, 0.0  ;;  %v4375_v50 = vmax.f32 %v3863_v3, 0.0  ;;  %v3298_v60 = vadd.f32 %v2786_v39, %v2060_v27  ;;  %v1550_v40 = vmul.f32 %v11887_v2, %v11918_v56 }
 0x217   : > { %5629 = vmatpush1.bf16.msra.mxu0 %v5628_v45  ;;  %v3878_v35 = vadd.f32 %v11890_v33, %v3282_v23  ;;  %v2046_v42 = vadd.f32 %v1534_v15, %v808_v14  ;;  %v2772_v13 = vmul.f32 %v11813_v16, %v11919_v24  ;;  %v2788_v36 = vmul.f32 %v11813_v16, %v11920_v5 }
 0x218   : > { %v5692_v47 = vpack.c.bf16 %v4375_v50, %v4359_v26  ;;  %v3894_v18 = vadd.f32 %v11890_v33, %v3298_v60  ;;  %v2062_v25 = vadd.f32 %v1550_v40, %v824_v58  ;;  %v805_v3 = vmul.f32 %v11815_v10, %v11915_v43 }
 0x219   : > { %v4390_v27 = vmax.f32 %v3878_v35, 0.0  ;;  %v3284_v53 = vadd.f32 %v2772_v13, %v2046_v42  ;;  %v821_v39 = vmul.f32 %v11815_v10, %v11916_v31  ;;  %v1531_v55 = vmul.f32 %v11825_v61, %v11917_v63 }
 0x21a   : > { %5693 = vmatpush1.bf16.msra.mxu1 %v5692_v47  ;;  %v4406_v14 = vmax.f32 %v3894_v18, 0.0  ;;  %v3300_v45 = vadd.f32 %v2788_v36, %v2062_v25  ;;  %v1547_v23 = vmul.f32 %v11825_v61, %v11918_v56  ;;  %v2769_v58 = vmul.f32 %v11752_v12, %v11919_v24 }
 0x21b   : > { %v3880_v15 = vadd.f32 %v11761_v32, %v3284_v53  ;;  %v2043_v26 = vadd.f32 %v1531_v55, %v805_v3  ;;  %v2785_v50 = vmul.f32 %v11752_v12, %v11920_v5  ;;  %v807_v60 = vmul.f32 %v11829_v51, %v11915_v43 }
 0x21c   : > { %v5630_v40 = vpack.c.bf16 %v4406_v14, %v4390_v27  ;;  %v3896_v35 = vadd.f32 %v11761_v32, %v3300_v45  ;;  %v2059_v42 = vadd.f32 %v1547_v23, %v821_v39  ;;  %v823_v13 = vmul.f32 %v11829_v51, %v11916_v31  ;;  %v11921_v23 = vld [vmem:[#allocation90_spill] sm:$0xff] }
 0x21d   : > { %v4392_v36 = vmax.f32 %v3880_v15, 0.0  ;;  %v3281_v47 = vadd.f32 %v2769_v58, %v2043_v26  ;;  %v1533_v18 = vmul.f32 %v11830_v37, %v11917_v63  ;;  %v1549_v25 = vmul.f32 %v11830_v37, %v11918_v56  ;;  %v11922_v56 = vld [vmem:[#allocation99_spill] sm:$0xff] }
 0x21e   : > { %5631 = vmatprep.subr.bf16.mxu0 %v5630_v40  ;;  %v4408_v3 = vmax.f32 %v3896_v35, 0.0  ;;  %v3297_v53 = vadd.f32 %v2785_v50, %v2059_v42  ;;  %v2771_v27 = vmul.f32 %v11875_v8, %v11919_v24  ;;  %v2787_v39 = vmul.f32 %v11875_v8, %v11920_v5  ;;  %v11923_v50 = vld [vmem:[#allocation132_spill] sm:$0xff]  ;;  %v11924_v5 = vld [vmem:[#allocation138_spill] sm:$0xff] }
 0x21f   : > { %v3877_v55 = vadd.f32 %v11772_v1, %v3281_v47  ;;  %v2045_v14 = vadd.f32 %v1533_v18, %v807_v60  ;;  %v2061_v45 = vadd.f32 %v1549_v25, %v823_v13  ;;  %v838_v58 = vmul.f32 %v11877_v34, %v11921_v23  ;;  %v11925_v18 = vld [vmem:[#allocation67_spill] sm:$0xff]  ;;  %v11926_v25 = vld [vmem:[#allocation52_spill] sm:$0xff] }
 0x220   : > { %v5694_v15 = vpack.c.bf16 %v4408_v3, %v4392_v36  ;;  %v3893_v26 = vadd.f32 %v11772_v1, %v3297_v53  ;;  %v854_v40 = vmul.f32 %v11877_v34, %v11922_v56  ;;  %v1564_v35 = vmul.f32 %v11847_v7, %v11923_v50 }
 0x221   : > { %v4389_v42 = vmax.f32 %v3877_v55, 0.0  ;;  %v3283_v24 = vadd.f32 %v2771_v27, %v2045_v14  ;;  %v3299_v63 = vadd.f32 %v2787_v39, %v2061_v45  ;;  %v1580_v47 = vmul.f32 %v11847_v7, %v11924_v5 }
 0x222   : > { %5695 = vmatprep.subr.bf16.mxu1 %v5694_v15  ;;  %v4405_v60 = vmax.f32 %v3893_v26, 0.0  ;;  %v2076_v13 = vadd.f32 %v1564_v35, %v838_v58  ;;  %v2802_v36 = vmul.f32 %v11749_v9, %v11925_v18  ;;  %v2818_v3 = vmul.f32 %v11749_v9, %v11926_v25 }
 0x223   : > { %v3879_v53 = vadd.f32 %v11773_v59, %v3283_v24  ;;  %v3895_v31 = vadd.f32 %v11773_v59, %v3299_v63  ;;  %v2092_v43 = vadd.f32 %v1580_v47, %v854_v40  ;;  %v840_v27 = vmul.f32 %v11805_v46, %v11921_v23 }
 0x224   : > { %v5632_v39 = vpack.c.bf16 %v4405_v60, %v4389_v42  ;;  %v3314_v55 = vadd.f32 %v2802_v36, %v2076_v13  ;;  %v856_v14 = vmul.f32 %v11805_v46, %v11922_v56  ;;  %v1566_v45 = vmul.f32 %v11887_v2, %v11923_v50 }
 0x225   : > { %v4391_v58 = vmax.f32 %v3879_v53, 0.0  ;;  %v4407_v15 = vmax.f32 %v3895_v31, 0.0  ;;  %v3330_v26 = vadd.f32 %v2818_v3, %v2092_v43  ;;  %v1582_v24 = vmul.f32 %v11887_v2, %v11924_v5 }
 0x226   : > { %5633 = vmatpush1.bf16.msra.mxu0 %v5632_v39  ;;  %v3910_v63 = vadd.f32 %v11890_v33, %v3314_v55  ;;  %v2078_v40 = vadd.f32 %v1566_v45, %v840_v27  ;;  %v2804_v35 = vmul.f32 %v11813_v16, %v11925_v18  ;;  %v2820_v42 = vmul.f32 %v11813_v16, %v11926_v25 }
 0x227   : > { %v5696_v47 = vpack.c.bf16 %v4407_v15, %v4391_v58  ;;  %v3926_v60 = vadd.f32 %v11890_v33, %v3330_v26  ;;  %v2094_v13 = vadd.f32 %v1582_v24, %v856_v14  ;;  %v837_v31 = vmul.f32 %v11815_v10, %v11921_v23 }
 0x228   : > { %v4422_v43 = vmax.f32 %v3910_v63, 0.0  ;;  %v3316_v36 = vadd.f32 %v2804_v35, %v2078_v40  ;;  %v853_v3 = vmul.f32 %v11815_v10, %v11922_v56  ;;  %v1563_v53 = vmul.f32 %v11825_v61, %v11923_v50 }
 0x229   : > { %5697 = vmatpush1.bf16.msra.mxu1 %v5696_v47  ;;  %v4438_v27 = vmax.f32 %v3926_v60, 0.0  ;;  %v3332_v39 = vadd.f32 %v2820_v42, %v2094_v13  ;;  %v1579_v55 = vmul.f32 %v11825_v61, %v11924_v5  ;;  %v2801_v14 = vmul.f32 %v11752_v12, %v11925_v18 }
 0x22a   : > { %v3912_v45 = vadd.f32 %v11761_v32, %v3316_v36  ;;  %v2075_v58 = vadd.f32 %v1563_v53, %v837_v31  ;;  %v2817_v15 = vmul.f32 %v11752_v12, %v11926_v25  ;;  %v839_v26 = vmul.f32 %v11829_v51, %v11921_v23 }
 0x22b   : > { %v5634_v24 = vpack.c.bf16 %v4438_v27, %v4422_v43  ;;  %v3928_v63 = vadd.f32 %v11761_v32, %v3332_v39  ;;  %v2091_v40 = vadd.f32 %v1579_v55, %v853_v3  ;;  %v855_v35 = vmul.f32 %v11829_v51, %v11922_v56  ;;  %v11927_v55 = vld [vmem:[#allocation148_spill] sm:$0xff] }
 0x22c   : > { %v4424_v42 = vmax.f32 %v3912_v45, 0.0  ;;  %v3313_v47 = vadd.f32 %v2801_v14, %v2075_v58  ;;  %v1565_v60 = vmul.f32 %v11830_v37, %v11923_v50  ;;  %v1581_v13 = vmul.f32 %v11830_v37, %v11924_v5  ;;  %v11928_v5 = vld [vmem:[#allocation102_spill] sm:$0xff] }
 0x22d   : > { %5635 = vmatprep.subr.bf16.mxu0 %v5634_v24  ;;  %v4440_v31 = vmax.f32 %v3928_v63, 0.0  ;;  %v3329_v36 = vadd.f32 %v2817_v15, %v2091_v40  ;;  %v2803_v43 = vmul.f32 %v11875_v8, %v11925_v18  ;;  %v2819_v3 = vmul.f32 %v11875_v8, %v11926_v25  ;;  %v11929_v15 = vld [vmem:[#allocation22_spill] sm:$0xff] }
 0x22e   : > { %v3909_v53 = vadd.f32 %v11772_v1, %v3313_v47  ;;  %v2077_v27 = vadd.f32 %v1565_v60, %v839_v26  ;;  %v2093_v39 = vadd.f32 %v1581_v13, %v855_v35  ;;  %v870_v14 = vmul.f32 %v11877_v34, %v11927_v55  ;;  %v11930_v25 = vld [vmem:[#allocation78_spill] sm:$0xff]  ;;  %v11931_v60 = vld [vmem:[#allocation72_spill] sm:$0xff] }
 0x22f   : > { %v5698_v45 = vpack.c.bf16 %v4440_v31, %v4424_v42  ;;  %v3925_v58 = vadd.f32 %v11772_v1, %v3329_v36  ;;  %v886_v24 = vmul.f32 %v11877_v34, %v11928_v5  ;;  %v1596_v63 = vmul.f32 %v11847_v7, %v11929_v15  ;;  %v11932_v13 = vld [vmem:[#allocation40_spill] sm:$0xff] }
 0x230   : > { %v4421_v40 = vmax.f32 %v3909_v53, 0.0  ;;  %v3315_v18 = vadd.f32 %v2803_v43, %v2077_v27  ;;  %v3331_v50 = vadd.f32 %v2819_v3, %v2093_v39  ;;  %v1612_v47 = vmul.f32 %v11847_v7, %v11930_v25 }
 0x231   : > { %5699 = vmatprep.subr.bf16.mxu1 %v5698_v45  ;;  %v4437_v26 = vmax.f32 %v3925_v58, 0.0  ;;  %v2108_v35 = vadd.f32 %v1596_v63, %v870_v14  ;;  %v2834_v42 = vmul.f32 %v11749_v9, %v11931_v60  ;;  %v2850_v31 = vmul.f32 %v11749_v9, %v11932_v13 }
 0x232   : > { %v3911_v36 = vadd.f32 %v11773_v59, %v3315_v18  ;;  %v3927_v56 = vadd.f32 %v11773_v59, %v3331_v50  ;;  %v2124_v23 = vadd.f32 %v1612_v47, %v886_v24  ;;  %v872_v43 = vmul.f32 %v11805_v46, %v11927_v55 }
 0x233   : > { %v5636_v3 = vpack.c.bf16 %v4437_v26, %v4421_v40  ;;  %v3346_v53 = vadd.f32 %v2834_v42, %v2108_v35  ;;  %v888_v27 = vmul.f32 %v11805_v46, %v11928_v5  ;;  %v1598_v39 = vmul.f32 %v11887_v2, %v11929_v15 }
 0x234   : > { %v4423_v14 = vmax.f32 %v3911_v36, 0.0  ;;  %v4439_v45 = vmax.f32 %v3927_v56, 0.0  ;;  %v3362_v58 = vadd.f32 %v2850_v31, %v2124_v23  ;;  %v1614_v18 = vmul.f32 %v11887_v2, %v11930_v25 }
 0x235   : > { %5637 = vmatpush1.bf16.msra.mxu0 %v5636_v3  ;;  %v3942_v50 = vadd.f32 %v11890_v33, %v3346_v53  ;;  %v2110_v24 = vadd.f32 %v1598_v39, %v872_v43  ;;  %v2836_v63 = vmul.f32 %v11813_v16, %v11931_v60  ;;  %v2852_v40 = vmul.f32 %v11813_v16, %v11932_v13 }
 0x236   : > { %v5700_v47 = vpack.c.bf16 %v4439_v45, %v4423_v14  ;;  %v3958_v26 = vadd.f32 %v11890_v33, %v3362_v58  ;;  %v2126_v35 = vadd.f32 %v1614_v18, %v888_v27  ;;  %v869_v56 = vmul.f32 %v11815_v10, %v11927_v55 }
 0x237   : > { %v4454_v23 = vmax.f32 %v3942_v50, 0.0  ;;  %v3348_v42 = vadd.f32 %v2836_v63, %v2110_v24  ;;  %v885_v31 = vmul.f32 %v11815_v10, %v11928_v5  ;;  %v1595_v36 = vmul.f32 %v11825_v61, %v11929_v15 }
 0x238   : > { %5701 = vmatpush1.bf16.msra.mxu1 %v5700_v47  ;;  %v4470_v43 = vmax.f32 %v3958_v26, 0.0  ;;  %v3364_v3 = vadd.f32 %v2852_v40, %v2126_v35  ;;  %v1611_v53 = vmul.f32 %v11825_v61, %v11930_v25  ;;  %v2833_v27 = vmul.f32 %v11752_v12, %v11931_v60 }
 0x239   : > { %v3944_v39 = vadd.f32 %v11761_v32, %v3348_v42  ;;  %v2107_v14 = vadd.f32 %v1595_v36, %v869_v56  ;;  %v2849_v45 = vmul.f32 %v11752_v12, %v11932_v13  ;;  %v871_v58 = vmul.f32 %v11829_v51, %v11927_v55 }
 0x23a   : > { %v5638_v18 = vpack.c.bf16 %v4470_v43, %v4454_v23  ;;  %v3960_v50 = vadd.f32 %v11761_v32, %v3364_v3  ;;  %v2123_v24 = vadd.f32 %v1611_v53, %v885_v31  ;;  %v887_v63 = vmul.f32 %v11829_v51, %v11928_v5  ;;  %v11933_v53 = vld [vmem:[#allocation73_spill] sm:$0xff] }
 0x23b   : > { %v4456_v40 = vmax.f32 %v3944_v39, 0.0  ;;  %v3345_v47 = vadd.f32 %v2833_v27, %v2107_v14  ;;  %v1597_v26 = vmul.f32 %v11830_v37, %v11929_v15  ;;  %v1613_v35 = vmul.f32 %v11830_v37, %v11930_v25  ;;  %v11934_v25 = vld [vmem:[#allocation48_spill] sm:$0xff] }
 0x23c   : > { %5639 = vmatprep.subr.bf16.mxu0 %v5638_v18  ;;  %v4472_v56 = vmax.f32 %v3960_v50, 0.0  ;;  %v3361_v42 = vadd.f32 %v2849_v45, %v2123_v24  ;;  %v2835_v23 = vmul.f32 %v11875_v8, %v11931_v60  ;;  %v2851_v31 = vmul.f32 %v11875_v8, %v11932_v13  ;;  %v11935_v45 = vld [vmem:[#allocation92_spill] sm:$0xff]  ;;  %v11936_v13 = vld [vmem:[#allocation123_spill] sm:$0xff] }
 0x23d   : > { %v3941_v36 = vadd.f32 %v11772_v1, %v3345_v47  ;;  %v2109_v43 = vadd.f32 %v1597_v26, %v871_v58  ;;  %v2125_v3 = vadd.f32 %v1613_v35, %v887_v63  ;;  %v902_v27 = vmul.f32 %v11877_v34, %v11933_v53  ;;  %v11937_v26 = vld [vmem:[#allocation77_spill] sm:$0xff]  ;;  %v11938_v35 = vld [vmem:[#allocation124_spill] sm:$0xff] }
 0x23e   : > { %v5702_v39 = vpack.c.bf16 %v4472_v56, %v4456_v40  ;;  %v3957_v14 = vadd.f32 %v11772_v1, %v3361_v42  ;;  %v918_v18 = vmul.f32 %v11877_v34, %v11934_v25  ;;  %v1628_v50 = vmul.f32 %v11847_v7, %v11935_v45 }
 0x23f   : > { %v4453_v24 = vmax.f32 %v3941_v36, 0.0  ;;  %v3347_v60 = vadd.f32 %v2835_v23, %v2109_v43  ;;  %v3363_v15 = vadd.f32 %v2851_v31, %v2125_v3  ;;  %v1644_v47 = vmul.f32 %v11847_v7, %v11936_v13 }
 0x240   : > { %5703 = vmatprep.subr.bf16.mxu1 %v5702_v39  ;;  %v4469_v58 = vmax.f32 %v3957_v14, 0.0  ;;  %v2140_v63 = vadd.f32 %v1628_v50, %v902_v27  ;;  %v2866_v40 = vmul.f32 %v11749_v9, %v11937_v26  ;;  %v2882_v56 = vmul.f32 %v11749_v9, %v11938_v35 }
 0x241   : > { %v3943_v42 = vadd.f32 %v11773_v59, %v3347_v60  ;;  %v3959_v5 = vadd.f32 %v11773_v59, %v3363_v15  ;;  %v2156_v55 = vadd.f32 %v1644_v47, %v918_v18  ;;  %v904_v23 = vmul.f32 %v11805_v46, %v11933_v53 }
 0x242   : > { %v5640_v31 = vpack.c.bf16 %v4469_v58, %v4453_v24  ;;  %v3378_v36 = vadd.f32 %v2866_v40, %v2140_v63  ;;  %v920_v43 = vmul.f32 %v11805_v46, %v11934_v25  ;;  %v1630_v3 = vmul.f32 %v11887_v2, %v11935_v45 }
 0x243   : > { %v4455_v27 = vmax.f32 %v3943_v42, 0.0  ;;  %v4471_v39 = vmax.f32 %v3959_v5, 0.0  ;;  %v3394_v14 = vadd.f32 %v2882_v56, %v2156_v55  ;;  %v1646_v60 = vmul.f32 %v11887_v2, %v11936_v13 }
 0x244   : > { %5641 = vmatpush1.bf16.msra.mxu0 %v5640_v31  ;;  %v3974_v15 = vadd.f32 %v11890_v33, %v3378_v36  ;;  %v2142_v18 = vadd.f32 %v1630_v3, %v904_v23  ;;  %v2868_v50 = vmul.f32 %v11813_v16, %v11937_v26  ;;  %v2884_v24 = vmul.f32 %v11813_v16, %v11938_v35 }
 0x245   : > { %v5704_v47 = vpack.c.bf16 %v4471_v39, %v4455_v27  ;;  %v3990_v58 = vadd.f32 %v11890_v33, %v3394_v14  ;;  %v2158_v63 = vadd.f32 %v1646_v60, %v920_v43  ;;  %v901_v5 = vmul.f32 %v11815_v10, %v11933_v53 }
 0x246   : > { %v4486_v55 = vmax.f32 %v3974_v15, 0.0  ;;  %v3380_v40 = vadd.f32 %v2868_v50, %v2142_v18  ;;  %v917_v56 = vmul.f32 %v11815_v10, %v11934_v25  ;;  %v1627_v42 = vmul.f32 %v11825_v61, %v11935_v45 }
 0x247   : > { %5705 = vmatpush1.bf16.msra.mxu1 %v5704_v47  ;;  %v4502_v23 = vmax.f32 %v3990_v58, 0.0  ;;  %v3396_v31 = vadd.f32 %v2884_v24, %v2158_v63  ;;  %v1643_v36 = vmul.f32 %v11825_v61, %v11936_v13  ;;  %v2865_v43 = vmul.f32 %v11752_v12, %v11937_v26 }
 0x248   : > { %v3976_v3 = vadd.f32 %v11761_v32, %v3380_v40  ;;  %v2139_v27 = vadd.f32 %v1627_v42, %v901_v5  ;;  %v2881_v39 = vmul.f32 %v11752_v12, %v11938_v35  ;;  %v903_v14 = vmul.f32 %v11829_v51, %v11933_v53 }
 0x249   : > { %v5642_v60 = vpack.c.bf16 %v4502_v23, %v4486_v55  ;;  %v3992_v15 = vadd.f32 %v11761_v32, %v3396_v31  ;;  %v2155_v18 = vadd.f32 %v1643_v36, %v917_v56  ;;  %v919_v50 = vmul.f32 %v11829_v51, %v11934_v25  ;;  %v11939_v36 = vld [vmem:[#allocation109_spill] sm:$0xff] }
 0x24a   : > { %v4488_v24 = vmax.f32 %v3976_v3, 0.0  ;;  %v3377_v47 = vadd.f32 %v2865_v43, %v2139_v27  ;;  %v1629_v58 = vmul.f32 %v11830_v37, %v11935_v45  ;;  %v1645_v63 = vmul.f32 %v11830_v37, %v11936_v13  ;;  %v11940_v13 = vld [vmem:[#allocation108_spill] sm:$0xff] }
 0x24b   : > { %5643 = vmatprep.subr.bf16.mxu0 %v5642_v60  ;;  %v4504_v5 = vmax.f32 %v3992_v15, 0.0  ;;  %v3393_v40 = vadd.f32 %v2881_v39, %v2155_v18  ;;  %v2867_v55 = vmul.f32 %v11875_v8, %v11937_v26  ;;  %v2883_v56 = vmul.f32 %v11875_v8, %v11938_v35  ;;  %v11941_v39 = vld [vmem:[#allocation120_spill] sm:$0xff]  ;;  %v11942_v35 = vld [vmem:[#allocation114_spill] sm:$0xff] }
 0x24c   : > { %v3973_v42 = vadd.f32 %v11772_v1, %v3377_v47  ;;  %v2141_v23 = vadd.f32 %v1629_v58, %v903_v14  ;;  %v2157_v31 = vadd.f32 %v1645_v63, %v919_v50  ;;  %v934_v43 = vmul.f32 %v11877_v34, %v11939_v36  ;;  %v11943_v58 = vld [vmem:[#allocation88_spill] sm:$0xff]  ;;  %v11944_v63 = vld [vmem:[#allocation125_spill] sm:$0xff] }
 0x24d   : > { %v5706_v3 = vpack.c.bf16 %v4504_v5, %v4488_v24  ;;  %v3989_v27 = vadd.f32 %v11772_v1, %v3393_v40  ;;  %v950_v60 = vmul.f32 %v11877_v34, %v11940_v13  ;;  %v1660_v15 = vmul.f32 %v11847_v7, %v11941_v39 }
 0x24e   : > { %v4485_v18 = vmax.f32 %v3973_v42, 0.0  ;;  %v3379_v26 = vadd.f32 %v2867_v55, %v2141_v23  ;;  %v3395_v45 = vadd.f32 %v2883_v56, %v2157_v31  ;;  %v1676_v47 = vmul.f32 %v11847_v7, %v11942_v35 }
 0x24f   : > { %5707 = vmatprep.subr.bf16.mxu1 %v5706_v3  ;;  %v4501_v14 = vmax.f32 %v3989_v27, 0.0  ;;  %v2172_v50 = vadd.f32 %v1660_v15, %v934_v43  ;;  %v2898_v24 = vmul.f32 %v11749_v9, %v11943_v58  ;;  %v2914_v5 = vmul.f32 %v11749_v9, %v11944_v63 }
 0x250   : > { %v3975_v40 = vadd.f32 %v11773_v59, %v3379_v26  ;;  %v3991_v25 = vadd.f32 %v11773_v59, %v3395_v45  ;;  %v2188_v53 = vadd.f32 %v1676_v47, %v950_v60  ;;  %v936_v55 = vmul.f32 %v11805_v46, %v11939_v36 }
 0x251   : > { %v5644_v56 = vpack.c.bf16 %v4501_v14, %v4485_v18  ;;  %v3410_v42 = vadd.f32 %v2898_v24, %v2172_v50  ;;  %v952_v23 = vmul.f32 %v11805_v46, %v11940_v13  ;;  %v1662_v31 = vmul.f32 %v11887_v2, %v11941_v39 }
 0x252   : > { %v4487_v43 = vmax.f32 %v3975_v40, 0.0  ;;  %v4503_v3 = vmax.f32 %v3991_v25, 0.0  ;;  %v3426_v27 = vadd.f32 %v2914_v5, %v2188_v53  ;;  %v1678_v26 = vmul.f32 %v11887_v2, %v11942_v35 }
 0x253   : > { %5645 = vmatpush1.bf16.msra.mxu0 %v5644_v56  ;;  %v4006_v45 = vadd.f32 %v11890_v33, %v3410_v42  ;;  %v2174_v60 = vadd.f32 %v1662_v31, %v936_v55  ;;  %v2900_v15 = vmul.f32 %v11813_v16, %v11943_v58  ;;  %v2916_v18 = vmul.f32 %v11813_v16, %v11944_v63 }
 0x254   : > { %v5708_v47 = vpack.c.bf16 %v4503_v3, %v4487_v43  ;;  %v4022_v14 = vadd.f32 %v11890_v33, %v3426_v27  ;;  %v2190_v50 = vadd.f32 %v1678_v26, %v952_v23  ;;  %v933_v25 = vmul.f32 %v11815_v10, %v11939_v36 }
 0x255   : > { %v4518_v53 = vmax.f32 %v4006_v45, 0.0  ;;  %v3412_v24 = vadd.f32 %v2900_v15, %v2174_v60  ;;  %v949_v5 = vmul.f32 %v11815_v10, %v11940_v13  ;;  %v1659_v40 = vmul.f32 %v11825_v61, %v11941_v39 }
 0x256   : > { %5709 = vmatpush1.bf16.msra.mxu1 %v5708_v47  ;;  %v4534_v55 = vmax.f32 %v4022_v14, 0.0  ;;  %v3428_v56 = vadd.f32 %v2916_v18, %v2190_v50  ;;  %v1675_v42 = vmul.f32 %v11825_v61, %v11942_v35  ;;  %v2897_v23 = vmul.f32 %v11752_v12, %v11943_v58 }
 0x257   : > { %v4008_v31 = vadd.f32 %v11761_v32, %v3412_v24  ;;  %v2171_v43 = vadd.f32 %v1659_v40, %v933_v25  ;;  %v2913_v3 = vmul.f32 %v11752_v12, %v11944_v63  ;;  %v935_v27 = vmul.f32 %v11829_v51, %v11939_v36 }
 0x258   : > { %v5646_v26 = vpack.c.bf16 %v4534_v55, %v4518_v53  ;;  %v4024_v45 = vadd.f32 %v11761_v32, %v3428_v56  ;;  %v2187_v60 = vadd.f32 %v1675_v42, %v949_v5  ;;  %v951_v15 = vmul.f32 %v11829_v51, %v11940_v13  ;;  %v11945_v42 = vld [vmem:[#allocation128_spill] sm:$0xff] }
 0x259   : > { %v4520_v18 = vmax.f32 %v4008_v31, 0.0  ;;  %v3409_v47 = vadd.f32 %v2897_v23, %v2171_v43  ;;  %v1661_v14 = vmul.f32 %v11830_v37, %v11941_v39  ;;  %v1677_v50 = vmul.f32 %v11830_v37, %v11942_v35  ;;  %v11946_v35 = vld [vmem:[#allocation110_spill] sm:$0xff] }
 0x25a   : > { %5647 = vmatprep.subr.bf16.mxu0 %v5646_v26  ;;  %v4536_v25 = vmax.f32 %v4024_v45, 0.0  ;;  %v3425_v24 = vadd.f32 %v2913_v3, %v2187_v60  ;;  %v2899_v53 = vmul.f32 %v11875_v8, %v11943_v58  ;;  %v2915_v5 = vmul.f32 %v11875_v8, %v11944_v63  ;;  %v11947_v3 = vld [vmem:[#allocation130_spill] sm:$0xff]  ;;  %v11948_v63 = vld [vmem:[#allocation5_spill] sm:$0xff] }
 0x25b   : > { %v4005_v40 = vadd.f32 %v11772_v1, %v3409_v47  ;;  %v2173_v55 = vadd.f32 %v1661_v14, %v935_v27  ;;  %v2189_v56 = vadd.f32 %v1677_v50, %v951_v15  ;;  %v966_v23 = vmul.f32 %v11877_v34, %v11945_v42  ;;  %v11949_v14 = vld [vmem:[#allocation104_spill] sm:$0xff]  ;;  %v11950_v50 = vld [vmem:[#allocation121_spill] sm:$0xff] }
 0x25c   : > { %v5710_v31 = vpack.c.bf16 %v4536_v25, %v4520_v18  ;;  %v4021_v43 = vadd.f32 %v11772_v1, %v3425_v24  ;;  %v982_v26 = vmul.f32 %v11877_v34, %v11946_v35  ;;  %v1692_v45 = vmul.f32 %v11847_v7, %v11947_v3 }
 0x25d   : > { %v4517_v60 = vmax.f32 %v4005_v40, 0.0  ;;  %v3411_v58 = vadd.f32 %v2899_v53, %v2173_v55  ;;  %v3427_v39 = vadd.f32 %v2915_v5, %v2189_v56  ;;  %v1708_v47 = vmul.f32 %v11847_v7, %v11948_v63 }
 0x25e   : > { %5711 = vmatprep.subr.bf16.mxu1 %v5710_v31  ;;  %v4533_v27 = vmax.f32 %v4021_v43, 0.0  ;;  %v2204_v15 = vadd.f32 %v1692_v45, %v966_v23  ;;  %v2930_v18 = vmul.f32 %v11749_v9, %v11949_v14  ;;  %v2946_v25 = vmul.f32 %v11749_v9, %v11950_v50 }
 0x25f   : > { %v4007_v24 = vadd.f32 %v11773_v59, %v3411_v58  ;;  %v4023_v13 = vadd.f32 %v11773_v59, %v3427_v39  ;;  %v2220_v36 = vadd.f32 %v1708_v47, %v982_v26  ;;  %v968_v53 = vmul.f32 %v11805_v46, %v11945_v42 }
 0x260   : > { %v5648_v5 = vpack.c.bf16 %v4533_v27, %v4517_v60  ;;  %v3442_v40 = vadd.f32 %v2930_v18, %v2204_v15  ;;  %v984_v55 = vmul.f32 %v11805_v46, %v11946_v35  ;;  %v1694_v56 = vmul.f32 %v11887_v2, %v11947_v3 }
 0x261   : > { %v4519_v23 = vmax.f32 %v4007_v24, 0.0  ;;  %v4535_v31 = vmax.f32 %v4023_v13, 0.0  ;;  %v3458_v43 = vadd.f32 %v2946_v25, %v2220_v36  ;;  %v1710_v58 = vmul.f32 %v11887_v2, %v11948_v63 }
 0x262   : > { %5649 = vmatpush1.bf16.msra.mxu0 %v5648_v5  ;;  %v4038_v39 = vadd.f32 %v11890_v33, %v3442_v40  ;;  %v2206_v26 = vadd.f32 %v1694_v56, %v968_v53  ;;  %v2932_v45 = vmul.f32 %v11813_v16, %v11949_v14  ;;  %v2948_v60 = vmul.f32 %v11813_v16, %v11950_v50 }
 0x263   : > { %v5712_v47 = vpack.c.bf16 %v4535_v31, %v4519_v23  ;;  %v4054_v27 = vadd.f32 %v11890_v33, %v3458_v43  ;;  %v2222_v15 = vadd.f32 %v1710_v58, %v984_v55  ;;  %v965_v13 = vmul.f32 %v11815_v10, %v11945_v42 }
 0x264   : > { %v4550_v36 = vmax.f32 %v4038_v39, 0.0  ;;  %v3444_v18 = vadd.f32 %v2932_v45, %v2206_v26  ;;  %v981_v25 = vmul.f32 %v11815_v10, %v11946_v35  ;;  %v1691_v24 = vmul.f32 %v11825_v61, %v11947_v3 }
 0x265   : > { %5713 = vmatpush1.bf16.msra.mxu1 %v5712_v47  ;;  %v4566_v53 = vmax.f32 %v4054_v27, 0.0  ;;  %v3460_v5 = vadd.f32 %v2948_v60, %v2222_v15  ;;  %v1707_v40 = vmul.f32 %v11825_v61, %v11948_v63  ;;  %v2929_v55 = vmul.f32 %v11752_v12, %v11949_v14 }
 0x266   : > { %v4040_v56 = vadd.f32 %v11761_v32, %v3444_v18  ;;  %v2203_v23 = vadd.f32 %v1691_v24, %v965_v13  ;;  %v2945_v31 = vmul.f32 %v11752_v12, %v11950_v50  ;;  %v967_v43 = vmul.f32 %v11829_v51, %v11945_v42 }
 0x267   : > { %v5650_v58 = vpack.c.bf16 %v4566_v53, %v4550_v36  ;;  %v4056_v39 = vadd.f32 %v11761_v32, %v3460_v5  ;;  %v2219_v26 = vadd.f32 %v1707_v40, %v981_v25  ;;  %v983_v45 = vmul.f32 %v11829_v51, %v11946_v35  ;;  %v11951_v40 = vld [vmem:[#allocation23_spill] sm:$0xff] }
 0x268   : > { %v4552_v60 = vmax.f32 %v4040_v56, 0.0  ;;  %v3441_v47 = vadd.f32 %v2929_v55, %v2203_v23  ;;  %v1693_v27 = vmul.f32 %v11830_v37, %v11947_v3  ;;  %v1709_v15 = vmul.f32 %v11830_v37, %v11948_v63  ;;  %v11952_v63 = vld [vmem:[#allocation112_spill] sm:$0xff] }
 0x269   : > { %5651 = vmatprep.subr.bf16.mxu0 %v5650_v58  ;;  %v4568_v13 = vmax.f32 %v4056_v39, 0.0  ;;  %v3457_v18 = vadd.f32 %v2945_v31, %v2219_v26  ;;  %v2931_v36 = vmul.f32 %v11875_v8, %v11949_v14  ;;  %v2947_v25 = vmul.f32 %v11875_v8, %v11950_v50  ;;  %v11953_v31 = vld [vmem:[#allocation58_spill] sm:$0xff]  ;;  %v11954_v50 = vld [vmem:[#allocation25_spill] sm:$0xff] }
 0x26a   : > { %v4037_v24 = vadd.f32 %v11772_v1, %v3441_v47  ;;  %v2205_v53 = vadd.f32 %v1693_v27, %v967_v43  ;;  %v2221_v5 = vadd.f32 %v1709_v15, %v983_v45  ;;  %v998_v55 = vmul.f32 %v11877_v34, %v11951_v40  ;;  %v11955_v27 = vld [vmem:[#allocation106_spill] sm:$0xff]  ;;  %v11956_v15 = vld [vmem:[#allocation97_spill] sm:$0xff] }
 0x26b   : > { %v5714_v56 = vpack.c.bf16 %v4568_v13, %v4552_v60  ;;  %v4053_v23 = vadd.f32 %v11772_v1, %v3457_v18  ;;  %v1014_v58 = vmul.f32 %v11877_v34, %v11952_v63  ;;  %v1724_v39 = vmul.f32 %v11847_v7, %v11953_v31 }
 0x26c   : > { %v4549_v26 = vmax.f32 %v4037_v24, 0.0  ;;  %v3443_v14 = vadd.f32 %v2931_v36, %v2205_v53  ;;  %v3459_v3 = vadd.f32 %v2947_v25, %v2221_v5  ;;  %v1740_v47 = vmul.f32 %v11847_v7, %v11954_v50 }
 0x26d   : > { %5715 = vmatprep.subr.bf16.mxu1 %v5714_v56  ;;  %v4565_v43 = vmax.f32 %v4053_v23, 0.0  ;;  %v2236_v45 = vadd.f32 %v1724_v39, %v998_v55  ;;  %v2962_v60 = vmul.f32 %v11749_v9, %v11955_v27  ;;  %v2978_v13 = vmul.f32 %v11749_v9, %v11956_v15 }
 0x26e   : > { %v4039_v18 = vadd.f32 %v11773_v59, %v3443_v14  ;;  %v4055_v35 = vadd.f32 %v11773_v59, %v3459_v3  ;;  %v2252_v42 = vadd.f32 %v1740_v47, %v1014_v58  ;;  %v1000_v36 = vmul.f32 %v11805_v46, %v11951_v40 }
 0x26f   : > { %v5652_v25 = vpack.c.bf16 %v4565_v43, %v4549_v26  ;;  %v3474_v24 = vadd.f32 %v2962_v60, %v2236_v45  ;;  %v1016_v53 = vmul.f32 %v11805_v46, %v11952_v63  ;;  %v1726_v5 = vmul.f32 %v11887_v2, %v11953_v31 }
 0x270   : > { %v4551_v55 = vmax.f32 %v4039_v18, 0.0  ;;  %v4567_v56 = vmax.f32 %v4055_v35, 0.0  ;;  %v3490_v23 = vadd.f32 %v2978_v13, %v2252_v42  ;;  %v1742_v14 = vmul.f32 %v11887_v2, %v11954_v50 }
 0x271   : > { %5653 = vmatpush1.bf16.msra.mxu0 %v5652_v25  ;;  %v4070_v3 = vadd.f32 %v11890_v33, %v3474_v24  ;;  %v2238_v58 = vadd.f32 %v1726_v5, %v1000_v36  ;;  %v2964_v39 = vmul.f32 %v11813_v16, %v11955_v27  ;;  %v2980_v26 = vmul.f32 %v11813_v16, %v11956_v15 }
 0x272   : > { %v5716_v47 = vpack.c.bf16 %v4567_v56, %v4551_v55  ;;  %v4086_v43 = vadd.f32 %v11890_v33, %v3490_v23  ;;  %v2254_v45 = vadd.f32 %v1742_v14, %v1016_v53  ;;  %v997_v35 = vmul.f32 %v11815_v10, %v11951_v40 }
 0x273   : > { %v4582_v42 = vmax.f32 %v4070_v3, 0.0  ;;  %v3476_v60 = vadd.f32 %v2964_v39, %v2238_v58  ;;  %v1013_v13 = vmul.f32 %v11815_v10, %v11952_v63  ;;  %v1723_v18 = vmul.f32 %v11825_v61, %v11953_v31 }
 0x274   : > { %5717 = vmatpush1.bf16.msra.mxu1 %v5716_v47  ;;  %v4598_v36 = vmax.f32 %v4086_v43, 0.0  ;;  %v3492_v25 = vadd.f32 %v2980_v26, %v2254_v45  ;;  %v1739_v24 = vmul.f32 %v11825_v61, %v11954_v50  ;;  %v2961_v53 = vmul.f32 %v11752_v12, %v11955_v27 }
 0x275   : > { %v4072_v5 = vadd.f32 %v11761_v32, %v3476_v60  ;;  %v2235_v55 = vadd.f32 %v1723_v18, %v997_v35  ;;  %v2977_v56 = vmul.f32 %v11752_v12, %v11956_v15  ;;  %v999_v23 = vmul.f32 %v11829_v51, %v11951_v40 }
 0x276   : > { %v5654_v14 = vpack.c.bf16 %v4598_v36, %v4582_v42  ;;  %v4088_v3 = vadd.f32 %v11761_v32, %v3492_v25  ;;  %v2251_v58 = vadd.f32 %v1739_v24, %v1013_v13  ;;  %v1015_v39 = vmul.f32 %v11829_v51, %v11952_v63 }
 0x277   : > { %v4584_v26 = vmax.f32 %v4072_v5, 0.0  ;;  %v3473_v47 = vadd.f32 %v2961_v53, %v2235_v55  ;;  %v1725_v43 = vmul.f32 %v11830_v37, %v11953_v31  ;;  %v1741_v45 = vmul.f32 %v11830_v37, %v11954_v50  ;;  %v11957_v55 = vld [vmem:[#allocation117_spill] sm:$0xff] }
 0x278   : > { %5655 = vmatprep.subr.bf16.mxu0 %v5654_v14  ;;  %v4600_v35 = vmax.f32 %v4088_v3, 0.0  ;;  %v3489_v60 = vadd.f32 %v2977_v56, %v2251_v58  ;;  %v2963_v42 = vmul.f32 %v11875_v8, %v11955_v27  ;;  %v2979_v13 = vmul.f32 %v11875_v8, %v11956_v15 }
 0x279   : > { %v4069_v18 = vadd.f32 %v11772_v1, %v3473_v47  ;;  %v2237_v36 = vadd.f32 %v1725_v43, %v999_v23  ;;  %v2253_v25 = vadd.f32 %v1741_v45, %v1015_v39  ;;  %v1030_v24 = vmul.f32 %v11877_v34, %v8178_v29  ;;  %v11958_v43 = vld [vmem:[#allocation53_spill] sm:$0xff] }
 0x27a   : > { %v5718_v53 = vpack.c.bf16 %v4600_v35, %v4584_v26  ;;  %v4085_v5 = vadd.f32 %v11772_v1, %v3489_v60  ;;  %v1046_v14 = vmul.f32 %v11877_v34, %v11957_v55  ;;  %v1756_v56 = vmul.f32 %v11847_v7, %v8198_v22 }
 0x27b   : > { %v4581_v3 = vmax.f32 %v4069_v18, 0.0  ;;  %v3475_v58 = vadd.f32 %v2963_v42, %v2237_v36  ;;  %v3491_v27 = vadd.f32 %v2979_v13, %v2253_v25  ;;  %v1772_v47 = vmul.f32 %v11847_v7, %v8215_v54 }
 0x27c   : > { %5719 = vmatprep.subr.bf16.mxu1 %v5718_v53  ;;  %v4597_v23 = vmax.f32 %v4085_v5, 0.0  ;;  %v2268_v39 = vadd.f32 %v1756_v56, %v1030_v24  ;;  %v2994_v26 = vmul.f32 %v11749_v9, %v11958_v43  ;;  %v3010_v45 = vmul.f32 %v11749_v9, %v8240_v49 }
 0x27d   : > { %v4071_v34 = vadd.f32 %v11773_v59, %v3475_v58  ;;  %v4087_v35 = vadd.f32 %v11773_v59, %v3491_v27  ;;  %v2284_v60 = vadd.f32 %v1772_v47, %v1046_v14  ;;  %v1032_v42 = vmul.f32 %v11805_v46, %v8178_v29 }
 0x27e   : > { %v5656_v13 = vpack.c.bf16 %v4597_v23, %v4581_v3  ;;  %v3506_v18 = vadd.f32 %v2994_v26, %v2268_v39  ;;  %v1048_v7 = vmul.f32 %v11805_v46, %v11957_v55  ;;  %v1758_v36 = vmul.f32 %v11887_v2, %v8198_v22 }
 0x27f   : > { %v4583_v25 = vmax.f32 %v4071_v34, 0.0  ;;  %v4599_v24 = vmax.f32 %v4087_v35, 0.0  ;;  %v3522_v53 = vadd.f32 %v3010_v45, %v2284_v60  ;;  %v1774_v9 = vmul.f32 %v11887_v2, %v8215_v54 }
 0x280   : > { %5657 = vmatpush1.bf16.msra.mxu0 %v5656_v13  ;;  %v4102_v27 = vadd.f32 %v11890_v33, %v3506_v18  ;;  %v2270_v5 = vadd.f32 %v1758_v36, %v1032_v42  ;;  %v2996_v14 = vmul.f32 %v11813_v16, %v11958_v43  ;;  %v3012_v56 = vmul.f32 %v11813_v16, %v8240_v49 }
 0x281   : > { %v5720_v46 = vpack.c.bf16 %v4599_v24, %v4583_v25  ;;  %v4118_v3 = vadd.f32 %v11890_v33, %v3522_v53  ;;  %v2286_v58 = vadd.f32 %v1774_v9, %v1048_v7  ;;  %v1029_v47 = vmul.f32 %v11815_v10, %v8178_v29 }
 0x282   : > { %v4614_v23 = vmax.f32 %v4102_v27, 0.0  ;;  %v3508_v39 = vadd.f32 %v2996_v14, %v2270_v5  ;;  %v1045_v2 = vmul.f32 %v11815_v10, %v11957_v55  ;;  %v1755_v26 = vmul.f32 %v11825_v61, %v8198_v22 }
 0x283   : > { %5721 = vmatpush1.bf16.msra.mxu1 %v5720_v46  ;;  %v4630_v45 = vmax.f32 %v4118_v3, 0.0  ;;  %v3524_v34 = vadd.f32 %v3012_v56, %v2286_v58  ;;  %v1771_v16 = vmul.f32 %v11825_v61, %v8215_v54  ;;  %v2993_v33 = vmul.f32 %v11752_v12, %v11958_v43  ;;  %v8962_v61 = vld [vmem:[%s11000_s1 + $0x20] ss:$4 sm:$0xff] }
 0x284   : > { %v4104_v35 = vadd.f32 %v11761_v32, %v3508_v39  ;;  %v2267_v60 = vadd.f32 %v1755_v26, %v1029_v47  ;;  %v3009_v42 = vmul.f32 %v11752_v12, %v8240_v49  ;;  %v1031_v10 = vmul.f32 %v11829_v51, %v8178_v29  ;;  %v11959_v3 = vld [vmem:[#allocation7_spill] sm:$0xff] }
 0x285   : > { %v5658_v13 = vpack.c.bf16 %v4630_v45, %v4614_v23  ;;  %v4120_v18 = vadd.f32 %v11761_v32, %v3524_v34  ;;  %v2283_v7 = vadd.f32 %v1771_v16, %v1045_v2  ;;  %v1047_v36 = vmul.f32 %v11829_v51, %v11957_v55  ;;  %v8971_v32 = vld [vmem:[%s11000_s1 + $0x21] ss:$4 sm:$0xff]  ;;  %v8976_v51 = vld [vmem:[%s11000_s1 + $0x22] ss:$4 sm:$0xff] }
 0x286   : > { %v4616_v25 = vmax.f32 %v4104_v35, 0.0  ;;  %v3505_v24 = vadd.f32 %v2993_v33, %v2267_v60  ;;  %v1757_v12 = vmul.f32 %v11830_v37, %v8198_v22  ;;  %v1773_v53 = vmul.f32 %v11830_v37, %v8215_v54  ;;  %v11960_v34 = vld [vmem:[#allocation19_spill] sm:$0xff]  ;;  %v9001_v33 = vld [vmem:[%s11001_s2 + $0x8] sm:$0xff]  ;;  %v11961_v35 = vld [vmem:[#allocation29_spill] sm:$0xff] }
 0x287   : > { %5659 = vmatprep.subr.bf16.mxu0 %v5658_v13  ;;  %v4632_v9 = vmax.f32 %v4120_v18, 0.0  ;;  %v3521_v27 = vadd.f32 %v3009_v42, %v2283_v7  ;;  %v2995_v5 = vmul.f32 %v11875_v8, %v11958_v43  ;;  %v3011_v14 = vmul.f32 %v11875_v8, %v8240_v49  ;;  %v11962_v42 = vld [vmem:[#allocation18_spill] sm:$0xff]  ;;  %v11963_v13 = vld [vmem:[#allocation28_spill] sm:$0xff] }
 0x288   : > { %v4101_v37 = vadd.f32 %v11772_v1, %v3505_v24  ;;  %v2269_v56 = vadd.f32 %v1757_v12, %v1031_v10  ;;  %v2285_v46 = vadd.f32 %v1773_v53, %v1047_v36  ;;  %v8985_v58 = vrot.slane %v8962_v61, %v11959_v3  ;;  %v11965_v12 = vld [vmem:[#allocation37_spill] sm:$0xff] }
 0x289   : > { %v5722_v47 = vpack.c.bf16 %v4632_v9, %v4616_v25  ;;  %v4117_v23 = vadd.f32 %v11772_v1, %v3521_v27  ;;  %v8990_v39 = vrot.slane %v8971_v32, %v11959_v3  ;;  %v8994_v2 = vrot.slane %v8976_v51, %v11959_v3  ;;  %v11964_v25 = vld [vmem:[#allocation126_spill] sm:$0xff] }
 0x28a   : > { %v4613_v8 = vmax.f32 %v4101_v37, 0.0  ;;  %v3507_v26 = vadd.f32 %v2995_v5, %v2269_v56  ;;  %v3523_v45 = vadd.f32 %v3011_v14, %v2285_v46  ;;  %v554_v16 = vmul.f32 %v8985_v58, %v11960_v34  ;;  %v11966_v46 = vld [vmem:[#allocation8_spill] sm:$0xff] }
 0x28b   : > { %5723 = vmatprep.subr.bf16.mxu1 %v5722_v47  ;;  %v4629_v1 = vmax.f32 %v4117_v23, 0.0  ;;  %v570_v60 = vmul.f32 %v8985_v58, %v11961_v35  ;;  %v1280_v10 = vmul.f32 %v8990_v39, %v11962_v42  ;;  %v1296_v18 = vmul.f32 %v8990_v39, %v11963_v13 }
 0x28c   : > { %v4103_v7 = vadd.f32 %v11773_v59, %v3507_v26  ;;  %v4119_v36 = vadd.f32 %v11773_v59, %v3523_v45  ;;  %v2518_v24 = vmul.f32 %v8994_v2, %v11964_v25  ;;  %v2534_v53 = vmul.f32 %v8994_v2, %v11965_v12 }
 0x28d   : > { %v5660_v9 = vpack.c.bf16 %v4629_v1, %v4613_v8  ;;  %v1792_v27 = vadd.f32 %v1280_v10, %v554_v16  ;;  %v1808_v5 = vadd.f32 %v1296_v18, %v570_v60  ;;  %v9017_v14 = vrot.slane %v9001_v33, %v11959_v3 }
 0x28e   : > { %v4615_v37 = vmax.f32 %v4103_v7, 0.0  ;;  %v4631_v56 = vmax.f32 %v4119_v36, 0.0  ;;  %v9021_v47 = vrot.slane %v8962_v61, %v11966_v46  ;;  %v9025_v59 = vrot.slane %v8971_v32, %v11966_v46 }
 0x28f   : > { %5661 = vmatpush1.bf16.msra.mxu0 %v5660_v9  ;;  %v3030_v23 = vadd.f32 %v2518_v24, %v1792_v27  ;;  %v3046_v26 = vadd.f32 %v2534_v53, %v1808_v5  ;;  %v9029_v8 = vrot.slane %v8976_v51, %v11966_v46  ;;  %v9033_v3 = vrot.slane %v9001_v33, %v11966_v46  ;;  %v6069_v9 = vld [vmem:[%s11002_s3] sm:$0x3f]  ;;  %v11967_v27 = vld [vmem:[#allocation9_spill] sm:$0xff] }
 0x290   : > { %v5724_v45 = vpack.c.bf16 %v4631_v56, %v4615_v37  ;;  %v556_v16 = vmul.f32 %v9021_v47, %v11960_v34  ;;  %v572_v1 = vmul.f32 %v9021_v47, %v11961_v35  ;;  %v1282_v60 = vmul.f32 %v9025_v59, %v11962_v42 }
 0x291   : > { %v3626_v10 = vadd.f32 %v9017_v14, %v3030_v23  ;;  %v3642_v18 = vadd.f32 %v9017_v14, %v3046_v26  ;;  %v1298_v7 = vmul.f32 %v9025_v59, %v11963_v13  ;;  %v2520_v36 = vmul.f32 %v9029_v8, %v11964_v25  ;;  %v6070_v26 = vld [vmem:[%s11002_s3 + $0x8] sm:$0x3f] }
 0x292   : > { %5725 = vmatpush1.bf16.msra.mxu1 %v5724_v45  ;;  %v1794_v24 = vadd.f32 %v1282_v60, %v556_v16  ;;  %v2536_v53 = vmul.f32 %v9029_v8, %v11965_v12  ;;  %4866 = vmatmul.mubr.f32.vlgmr.msra.gmra.mrb[2].mxu0 %v6069_v9  ;;  %v9054_v5 = vrot.slane %v8962_v61, %v11967_v27 }
 0x293   : > { %v4138_v37 = vmax.f32 %v3626_v10, 0.0  ;;  %v4154_v56 = vmax.f32 %v3642_v18, 0.0  ;;  %v1810_v46 = vadd.f32 %v1298_v7, %v572_v1  ;;  %v9058_v23 = vrot.slane %v8971_v32, %v11967_v27  ;;  %5007 = vmatprep.mubr.f32.mxu0 %v6070_v26 }
 0x294   : > { %v3032_v45 = vadd.f32 %v2520_v36, %v1794_v24  ;;  %v553_v16 = vmul.f32 %v9054_v5, %v11960_v34  ;;  %v569_v60 = vmul.f32 %v9054_v5, %v11961_v35  ;;  %v9069_v10 = vrot.slane %v8976_v51, %v11967_v27 }
 0x295   : > { %v5726_v1 = vpack.c.bf16 %v4154_v56, %v4138_v37  ;;  %v3048_v18 = vadd.f32 %v2536_v53, %v1810_v46  ;;  %4937 = vmatmul.mubr.f32.vlgmr.msra.gmra.mrb[2].mxu1 %v6069_v9  ;;  %v1279_v7 = vmul.f32 %v9058_v23, %v11962_v42  ;;  %v1295_v49 = vmul.f32 %v9058_v23, %v11963_v13  ;;  %v11968_v56 = vld [vmem:[#allocation10_spill] sm:$0xff] }
 0x296   : > { %v3628_v36 = vadd.f32 %v9033_v3, %v3032_v45  ;;  %v2517_v24 = vmul.f32 %v9069_v10, %v11964_v25  ;;  %v2533_v43 = vmul.f32 %v9069_v10, %v11965_v12  ;;  %v9082_v54 = vrot.slane %v9001_v33, %v11967_v27  ;;  %5078 = vmatprep.mubr.f32.mxu1 %v6070_v26 }
 0x297   : > { %5727 = vmatprep.subr.bf16.mxu0 %v5726_v1  ;;  %v3644_v53 = vadd.f32 %v9033_v3, %v3048_v18  ;;  %v1791_v9 = vadd.f32 %v1279_v7, %v553_v16  ;;  %v1807_v37 = vadd.f32 %v1295_v49, %v569_v60  ;;  %v9087_v46 = vrot.slane %v8962_v61, %v11968_v56 }
 0x298   : > { %v4140_v45 = vmax.f32 %v3628_v36, 0.0  ;;  %v9091_v22 = vrot.slane %v8971_v32, %v11968_v56  ;;  %v9095_v55 = vrot.slane %v8976_v51, %v11968_v56  ;;  %v9099_v27 = vrot.slane %v9001_v33, %v11968_v56 }
 0x299   : > { %v4156_v26 = vmax.f32 %v3644_v53, 0.0  ;;  %v3029_v16 = vadd.f32 %v2517_v24, %v1791_v9  ;;  %v3045_v49 = vadd.f32 %v2533_v43, %v1807_v37  ;;  %v555_v61 = vmul.f32 %v9087_v46, %v11960_v34  ;;  %v11969_v53 = vld [vmem:[#allocation41_spill] sm:$0xff]  ;;  %v11970_v37 = vld [vmem:[#allocation34_spill] sm:$0xff] }
 0x29a   : > { %v571_v60 = vmul.f32 %v9087_v46, %v11961_v35  ;;  %v1281_v32 = vmul.f32 %v9091_v22, %v11962_v42  ;;  %v1297_v51 = vmul.f32 %v9091_v22, %v11963_v13  ;;  %v2519_v1 = vmul.f32 %v9095_v55, %v11964_v25  ;;  %v11971_v25 = vld [vmem:[#allocation51_spill] sm:$0xff] }
 0x29b   : > { %v5790_v33 = vpack.c.bf16 %v4156_v26, %v4140_v45  ;;  %v3625_v18 = vadd.f32 %v9082_v54, %v3029_v16  ;;  %v3641_v43 = vadd.f32 %v9082_v54, %v3045_v49  ;;  %v2535_v7 = vmul.f32 %v9095_v55, %v11965_v12  ;;  %v11972_v26 = vld [vmem:[#allocation60_spill] sm:$0xff]  ;;  %v11973_v12 = vld [vmem:[#allocation30_spill] sm:$0xff] }
 0x29c   : > { %v1793_v36 = vadd.f32 %v1281_v32, %v555_v61  ;;  %v1809_v24 = vadd.f32 %v1297_v51, %v571_v60  ;;  %v586_v9 = vmul.f32 %v8985_v58, %v11969_v53  ;;  %v602_v56 = vmul.f32 %v8985_v58, %v11970_v37  ;;  %v11974_v60 = vld [vmem:[#allocation74_spill] sm:$0xff] }
 0x29d   : > { %5791 = vmatprep.subr.bf16.mxu1 %v5790_v33  ;;  %v4137_v13 = vmax.f32 %v3625_v18, 0.0  ;;  %v4153_v42 = vmax.f32 %v3641_v43, 0.0  ;;  %v1312_v45 = vmul.f32 %v8990_v39, %v11971_v25  ;;  %v1328_v16 = vmul.f32 %v8990_v39, %v11972_v26 }
 0x29e   : > { %v3031_v49 = vadd.f32 %v2519_v1, %v1793_v36  ;;  %v3047_v35 = vadd.f32 %v2535_v7, %v1809_v24  ;;  %v2550_v61 = vmul.f32 %v8994_v2, %v11973_v12  ;;  %v2566_v32 = vmul.f32 %v8994_v2, %v11974_v60 }
 0x29f   : > { %v5728_v51 = vpack.c.bf16 %v4153_v42, %v4137_v13  ;;  %v1824_v34 = vadd.f32 %v1312_v45, %v586_v9  ;;  %v1840_v29 = vadd.f32 %v1328_v16, %v602_v56  ;;  %v588_v33 = vmul.f32 %v9021_v47, %v11969_v53 }
 0x2a0   : > { %v3627_v18 = vadd.f32 %v9099_v27, %v3031_v49  ;;  %v3643_v43 = vadd.f32 %v9099_v27, %v3047_v35  ;;  %v604_v1 = vmul.f32 %v9021_v47, %v11970_v37  ;;  %v1314_v7 = vmul.f32 %v9025_v59, %v11971_v25 }
 0x2a1   : > { %5729 = vmatpush1.bf16.msra.mxu0 %v5728_v51  ;;  %v3062_v36 = vadd.f32 %v2550_v61, %v1824_v34  ;;  %v3078_v24 = vadd.f32 %v2566_v32, %v1840_v29  ;;  %v1330_v42 = vmul.f32 %v9025_v59, %v11972_v26  ;;  %v2552_v13 = vmul.f32 %v9029_v8, %v11973_v12 }
 0x2a2   : > { %v4139_v9 = vmax.f32 %v3627_v18, 0.0  ;;  %v4155_v56 = vmax.f32 %v3643_v43, 0.0  ;;  %v1826_v45 = vadd.f32 %v1314_v7, %v588_v33  ;;  %v2568_v35 = vmul.f32 %v9029_v8, %v11974_v60 }
 0x2a3   : > { %v3658_v16 = vadd.f32 %v9017_v14, %v3062_v36  ;;  %v3674_v49 = vadd.f32 %v9017_v14, %v3078_v24  ;;  %v1842_v15 = vadd.f32 %v1330_v42, %v604_v1  ;;  %v585_v29 = vmul.f32 %v9054_v5, %v11969_v53 }
 0x2a4   : > { %v5792_v34 = vpack.c.bf16 %v4155_v56, %v4139_v9  ;;  %v3064_v61 = vadd.f32 %v2552_v13, %v1826_v45  ;;  %v601_v32 = vmul.f32 %v9054_v5, %v11970_v37  ;;  %v1311_v51 = vmul.f32 %v9058_v23, %v11971_v25 }
 0x2a5   : > { %v4170_v33 = vmax.f32 %v3658_v16, 0.0  ;;  %v4186_v18 = vmax.f32 %v3674_v49, 0.0  ;;  %v3080_v43 = vadd.f32 %v2568_v35, %v1842_v15  ;;  %v1327_v7 = vmul.f32 %v9058_v23, %v11972_v26 }
 0x2a6   : > { %5793 = vmatpush1.bf16.msra.mxu1 %v5792_v34  ;;  %v3660_v1 = vadd.f32 %v9033_v3, %v3064_v61  ;;  %v1823_v36 = vadd.f32 %v1311_v51, %v585_v29  ;;  %v2549_v24 = vmul.f32 %v9069_v10, %v11973_v12  ;;  %v2565_v42 = vmul.f32 %v9069_v10, %v11974_v60 }
 0x2a7   : > { %v5730_v13 = vpack.c.bf16 %v4186_v18, %v4170_v33  ;;  %v3676_v9 = vadd.f32 %v9033_v3, %v3080_v43  ;;  %v1839_v56 = vadd.f32 %v1327_v7, %v601_v32  ;;  %v587_v15 = vmul.f32 %v9087_v46, %v11969_v53  ;;  %v11975_v43 = vld [vmem:[#allocation81_spill] sm:$0xff] }
 0x2a8   : > { %v4172_v45 = vmax.f32 %v3660_v1, 0.0  ;;  %v3061_v35 = vadd.f32 %v2549_v24, %v1823_v36  ;;  %v603_v16 = vmul.f32 %v9087_v46, %v11970_v37  ;;  %v1313_v49 = vmul.f32 %v9091_v22, %v11971_v25  ;;  %v11979_v25 = vld [vmem:[#allocation35_spill] sm:$0xff] }
 0x2a9   : > { %5731 = vmatprep.subr.bf16.mxu0 %v5730_v13  ;;  %v4188_v29 = vmax.f32 %v3676_v9, 0.0  ;;  %v3077_v34 = vadd.f32 %v2565_v42, %v1839_v56  ;;  %v1329_v61 = vmul.f32 %v9091_v22, %v11972_v26  ;;  %v2551_v32 = vmul.f32 %v9095_v55, %v11973_v12  ;;  %v11976_v42 = vld [vmem:[#allocation39_spill] sm:$0xff]  ;;  %v11977_v26 = vld [vmem:[#allocation94_spill] sm:$0xff] }
 0x2aa   : > { %v3657_v51 = vadd.f32 %v9082_v54, %v3061_v35  ;;  %v1825_v33 = vadd.f32 %v1313_v49, %v587_v15  ;;  %v2567_v18 = vmul.f32 %v9095_v55, %v11974_v60  ;;  %v618_v7 = vmul.f32 %v8985_v58, %v11975_v43  ;;  %v11978_v35 = vld [vmem:[#allocation11_spill] sm:$0xff] }
 0x2ab   : > { %v5794_v1 = vpack.c.bf16 %v4188_v29, %v4172_v45  ;;  %v3673_v36 = vadd.f32 %v9082_v54, %v3077_v34  ;;  %v1841_v24 = vadd.f32 %v1329_v61, %v603_v16  ;;  %v634_v13 = vmul.f32 %v8985_v58, %v11976_v42  ;;  %v11980_v29 = vld [vmem:[#allocation47_spill] sm:$0xff] }
 0x2ac   : > { %v4169_v9 = vmax.f32 %v3657_v51, 0.0  ;;  %v3063_v56 = vadd.f32 %v2551_v32, %v1825_v33  ;;  %v1344_v12 = vmul.f32 %v8990_v39, %v11977_v26  ;;  %v1360_v15 = vmul.f32 %v8990_v39, %v11978_v35 }
 0x2ad   : > { %5795 = vmatprep.subr.bf16.mxu1 %v5794_v1  ;;  %v4185_v49 = vmax.f32 %v3673_v36, 0.0  ;;  %v3079_v60 = vadd.f32 %v2567_v18, %v1841_v24  ;;  %v2582_v45 = vmul.f32 %v8994_v2, %v11979_v25  ;;  %v2598_v16 = vmul.f32 %v8994_v2, %v11980_v29 }
 0x2ae   : > { %v3659_v34 = vadd.f32 %v9099_v27, %v3063_v56  ;;  %v1856_v61 = vadd.f32 %v1344_v12, %v618_v7  ;;  %v1872_v51 = vadd.f32 %v1360_v15, %v634_v13  ;;  %v620_v32 = vmul.f32 %v9021_v47, %v11975_v43 }
 0x2af   : > { %v5732_v33 = vpack.c.bf16 %v4185_v49, %v4169_v9  ;;  %v3675_v37 = vadd.f32 %v9099_v27, %v3079_v60  ;;  %v636_v1 = vmul.f32 %v9021_v47, %v11976_v42  ;;  %v1346_v18 = vmul.f32 %v9025_v59, %v11977_v26 }
 0x2b0   : > { %v4171_v36 = vmax.f32 %v3659_v34, 0.0  ;;  %v3094_v24 = vadd.f32 %v2582_v45, %v1856_v61  ;;  %v3110_v53 = vadd.f32 %v2598_v16, %v1872_v51  ;;  %v1362_v56 = vmul.f32 %v9025_v59, %v11978_v35 }
 0x2b1   : > { %5733 = vmatpush1.bf16.msra.mxu0 %v5732_v33  ;;  %v4187_v12 = vmax.f32 %v3675_v37, 0.0  ;;  %v1858_v7 = vadd.f32 %v1346_v18, %v620_v32  ;;  %v2584_v13 = vmul.f32 %v9029_v8, %v11979_v25  ;;  %v2600_v60 = vmul.f32 %v9029_v8, %v11980_v29 }
 0x2b2   : > { %v3690_v9 = vadd.f32 %v9017_v14, %v3094_v24  ;;  %v3706_v15 = vadd.f32 %v9017_v14, %v3110_v53  ;;  %v1874_v49 = vadd.f32 %v1362_v56, %v636_v1  ;;  %v617_v45 = vmul.f32 %v9054_v5, %v11975_v43 }
 0x2b3   : > { %v5796_v16 = vpack.c.bf16 %v4187_v12, %v4171_v36  ;;  %v3096_v34 = vadd.f32 %v2584_v13, %v1858_v7  ;;  %v633_v37 = vmul.f32 %v9054_v5, %v11976_v42  ;;  %v1343_v61 = vmul.f32 %v9058_v23, %v11977_v26 }
 0x2b4   : > { %v4202_v51 = vmax.f32 %v3690_v9, 0.0  ;;  %v4218_v32 = vmax.f32 %v3706_v15, 0.0  ;;  %v3112_v33 = vadd.f32 %v2600_v60, %v1874_v49  ;;  %v1359_v18 = vmul.f32 %v9058_v23, %v11978_v35 }
 0x2b5   : > { %5797 = vmatpush1.bf16.msra.mxu1 %v5796_v16  ;;  %v3692_v53 = vadd.f32 %v9033_v3, %v3096_v34  ;;  %v1855_v1 = vadd.f32 %v1343_v61, %v617_v45  ;;  %v2581_v36 = vmul.f32 %v9069_v10, %v11979_v25  ;;  %v2597_v24 = vmul.f32 %v9069_v10, %v11980_v29 }
 0x2b6   : > { %v5734_v56 = vpack.c.bf16 %v4218_v32, %v4202_v51  ;;  %v3708_v12 = vadd.f32 %v9033_v3, %v3112_v33  ;;  %v1871_v7 = vadd.f32 %v1359_v18, %v633_v37  ;;  %v619_v13 = vmul.f32 %v9087_v46, %v11975_v43 }
 0x2b7   : > { %v4204_v60 = vmax.f32 %v3692_v53, 0.0  ;;  %v3093_v9 = vadd.f32 %v2581_v36, %v1855_v1  ;;  %v635_v15 = vmul.f32 %v9087_v46, %v11976_v42  ;;  %v1345_v49 = vmul.f32 %v9091_v22, %v11977_v26 }
 0x2b8   : > { %5735 = vmatprep.subr.bf16.mxu0 %v5734_v56  ;;  %v4220_v45 = vmax.f32 %v3708_v12, 0.0  ;;  %v3109_v16 = vadd.f32 %v2597_v24, %v1871_v7  ;;  %v1361_v34 = vmul.f32 %v9091_v22, %v11978_v35  ;;  %v2583_v37 = vmul.f32 %v9095_v55, %v11979_v25 }
 0x2b9   : > { %v3689_v61 = vadd.f32 %v9082_v54, %v3093_v9  ;;  %v1857_v51 = vadd.f32 %v1345_v49, %v619_v13  ;;  %v2599_v32 = vmul.f32 %v9095_v55, %v11980_v29  ;;  %v650_v33 = vmul.f32 %v8985_v58, %v11842_v21 }
 0x2ba   : > { %v5798_v18 = vpack.c.bf16 %v4220_v45, %v4204_v60  ;;  %v3705_v53 = vadd.f32 %v9082_v54, %v3109_v16  ;;  %v1873_v1 = vadd.f32 %v1361_v34, %v635_v15  ;;  %v666_v36 = vmul.f32 %v8985_v58, %v11844_v17 }
 0x2bb   : > { %v4201_v24 = vmax.f32 %v3689_v61, 0.0  ;;  %v3095_v56 = vadd.f32 %v2583_v37, %v1857_v51  ;;  %v1376_v12 = vmul.f32 %v8990_v39, %v11846_v4  ;;  %v1392_v7 = vmul.f32 %v8990_v39, %v11848_v0 }
 0x2bc   : > { %5799 = vmatprep.subr.bf16.mxu1 %v5798_v18  ;;  %v4217_v13 = vmax.f32 %v3705_v53, 0.0  ;;  %v3111_v9 = vadd.f32 %v2599_v32, %v1873_v1  ;;  %v2614_v60 = vmul.f32 %v8994_v2, %v11850_v20  ;;  %v2630_v15 = vmul.f32 %v8994_v2, %v11851_v11 }
 0x2bd   : > { %v3691_v49 = vadd.f32 %v9099_v27, %v3095_v56  ;;  %v1888_v45 = vadd.f32 %v1376_v12, %v650_v33  ;;  %v1904_v16 = vadd.f32 %v1392_v7, %v666_v36  ;;  %v652_v34 = vmul.f32 %v9021_v47, %v11842_v21 }
 0x2be   : > { %v5736_v37 = vpack.c.bf16 %v4217_v13, %v4201_v24  ;;  %v3707_v61 = vadd.f32 %v9099_v27, %v3111_v9  ;;  %v668_v51 = vmul.f32 %v9021_v47, %v11844_v17  ;;  %v1378_v32 = vmul.f32 %v9025_v59, %v11846_v4 }
 0x2bf   : > { %v4203_v18 = vmax.f32 %v3691_v49, 0.0  ;;  %v3126_v53 = vadd.f32 %v2614_v60, %v1888_v45  ;;  %v3142_v1 = vadd.f32 %v2630_v15, %v1904_v16  ;;  %v1394_v56 = vmul.f32 %v9025_v59, %v11848_v0 }
 0x2c0   : > { %5737 = vmatpush1.bf16.msra.mxu0 %v5736_v37  ;;  %v4219_v33 = vmax.f32 %v3707_v61, 0.0  ;;  %v1890_v36 = vadd.f32 %v1378_v32, %v652_v34  ;;  %v2616_v24 = vmul.f32 %v9029_v8, %v11850_v20  ;;  %v2632_v12 = vmul.f32 %v9029_v8, %v11851_v11 }
 0x2c1   : > { %v3722_v7 = vadd.f32 %v9017_v14, %v3126_v53  ;;  %v3738_v13 = vadd.f32 %v9017_v14, %v3142_v1  ;;  %v1906_v9 = vadd.f32 %v1394_v56, %v668_v51  ;;  %v649_v60 = vmul.f32 %v9054_v5, %v11842_v21 }
 0x2c2   : > { %v5800_v15 = vpack.c.bf16 %v4219_v33, %v4203_v18  ;;  %v3128_v49 = vadd.f32 %v2616_v24, %v1890_v36  ;;  %v665_v45 = vmul.f32 %v9054_v5, %v11844_v17  ;;  %v1375_v16 = vmul.f32 %v9058_v23, %v11846_v4 }
 0x2c3   : > { %v4234_v34 = vmax.f32 %v3722_v7, 0.0  ;;  %v4250_v37 = vmax.f32 %v3738_v13, 0.0  ;;  %v3144_v61 = vadd.f32 %v2632_v12, %v1906_v9  ;;  %v1391_v32 = vmul.f32 %v9058_v23, %v11848_v0 }
 0x2c4   : > { %5801 = vmatpush1.bf16.msra.mxu1 %v5800_v15  ;;  %v3724_v51 = vadd.f32 %v9033_v3, %v3128_v49  ;;  %v1887_v53 = vadd.f32 %v1375_v16, %v649_v60  ;;  %v2613_v18 = vmul.f32 %v9069_v10, %v11850_v20  ;;  %v2629_v1 = vmul.f32 %v9069_v10, %v11851_v11 }
 0x2c5   : > { %v5738_v56 = vpack.c.bf16 %v4250_v37, %v4234_v34  ;;  %v3740_v33 = vadd.f32 %v9033_v3, %v3144_v61  ;;  %v1903_v36 = vadd.f32 %v1391_v32, %v665_v45  ;;  %v651_v24 = vmul.f32 %v9087_v46, %v11842_v21 }
 0x2c6   : > { %v4236_v12 = vmax.f32 %v3724_v51, 0.0  ;;  %v3125_v7 = vadd.f32 %v2613_v18, %v1887_v53  ;;  %v667_v13 = vmul.f32 %v9087_v46, %v11844_v17  ;;  %v1377_v9 = vmul.f32 %v9091_v22, %v11846_v4 }
 0x2c7   : > { %5739 = vmatprep.subr.bf16.mxu0 %v5738_v56  ;;  %v4252_v60 = vmax.f32 %v3740_v33, 0.0  ;;  %v3141_v15 = vadd.f32 %v2629_v1, %v1903_v36  ;;  %v1393_v49 = vmul.f32 %v9091_v22, %v11848_v0  ;;  %v2615_v45 = vmul.f32 %v9095_v55, %v11850_v20 }
 0x2c8   : > { %v3721_v16 = vadd.f32 %v9082_v54, %v3125_v7  ;;  %v1889_v34 = vadd.f32 %v1377_v9, %v651_v24  ;;  %v2631_v37 = vmul.f32 %v9095_v55, %v11851_v11  ;;  %v682_v61 = vmul.f32 %v8985_v58, %v11876_v30 }
 0x2c9   : > { %v5802_v32 = vpack.c.bf16 %v4252_v60, %v4236_v12  ;;  %v3737_v51 = vadd.f32 %v9082_v54, %v3141_v15  ;;  %v1905_v53 = vadd.f32 %v1393_v49, %v667_v13  ;;  %v698_v18 = vmul.f32 %v8985_v58, %v11878_v44 }
 0x2ca   : > { %v4233_v1 = vmax.f32 %v3721_v16, 0.0  ;;  %v3127_v56 = vadd.f32 %v2615_v45, %v1889_v34  ;;  %v1408_v33 = vmul.f32 %v8990_v39, %v11879_v52  ;;  %v1424_v36 = vmul.f32 %v8990_v39, %v11882_v57 }
 0x2cb   : > { %5803 = vmatprep.subr.bf16.mxu1 %v5802_v32  ;;  %v4249_v24 = vmax.f32 %v3737_v51, 0.0  ;;  %v3143_v7 = vadd.f32 %v2631_v37, %v1905_v53  ;;  %v2646_v12 = vmul.f32 %v8994_v2, %v11883_v6  ;;  %v2662_v13 = vmul.f32 %v8994_v2, %v11884_v48 }
 0x2cc   : > { %v3723_v9 = vadd.f32 %v9099_v27, %v3127_v56  ;;  %v1920_v60 = vadd.f32 %v1408_v33, %v682_v61  ;;  %v1936_v15 = vadd.f32 %v1424_v36, %v698_v18  ;;  %v684_v49 = vmul.f32 %v9021_v47, %v11876_v30 }
 0x2cd   : > { %v5740_v45 = vpack.c.bf16 %v4249_v24, %v4233_v1  ;;  %v3739_v16 = vadd.f32 %v9099_v27, %v3143_v7  ;;  %v700_v34 = vmul.f32 %v9021_v47, %v11878_v44  ;;  %v1410_v37 = vmul.f32 %v9025_v59, %v11879_v52 }
 0x2ce   : > { %v4235_v32 = vmax.f32 %v3723_v9, 0.0  ;;  %v3158_v51 = vadd.f32 %v2646_v12, %v1920_v60  ;;  %v3174_v53 = vadd.f32 %v2662_v13, %v1936_v15  ;;  %v1426_v56 = vmul.f32 %v9025_v59, %v11882_v57 }
 0x2cf   : > { %5741 = vmatpush1.bf16.msra.mxu0 %v5740_v45  ;;  %v4251_v61 = vmax.f32 %v3739_v16, 0.0  ;;  %v1922_v18 = vadd.f32 %v1410_v37, %v684_v49  ;;  %v2648_v1 = vmul.f32 %v9029_v8, %v11883_v6  ;;  %v2664_v33 = vmul.f32 %v9029_v8, %v11884_v48 }
 0x2d0   : > { %v3754_v36 = vadd.f32 %v9017_v14, %v3158_v51  ;;  %v3770_v24 = vadd.f32 %v9017_v14, %v3174_v53  ;;  %v1938_v7 = vadd.f32 %v1426_v56, %v700_v34  ;;  %v681_v12 = vmul.f32 %v9054_v5, %v11876_v30 }
 0x2d1   : > { %v5804_v13 = vpack.c.bf16 %v4251_v61, %v4235_v32  ;;  %v3160_v9 = vadd.f32 %v2648_v1, %v1922_v18  ;;  %v697_v60 = vmul.f32 %v9054_v5, %v11878_v44  ;;  %v1407_v15 = vmul.f32 %v9058_v23, %v11879_v52 }
 0x2d2   : > { %v4266_v49 = vmax.f32 %v3754_v36, 0.0  ;;  %v4282_v45 = vmax.f32 %v3770_v24, 0.0  ;;  %v3176_v16 = vadd.f32 %v2664_v33, %v1938_v7  ;;  %v1423_v37 = vmul.f32 %v9058_v23, %v11882_v57 }
 0x2d3   : > { %5805 = vmatpush1.bf16.msra.mxu1 %v5804_v13  ;;  %v3756_v34 = vadd.f32 %v9033_v3, %v3160_v9  ;;  %v1919_v51 = vadd.f32 %v1407_v15, %v681_v12  ;;  %v2645_v32 = vmul.f32 %v9069_v10, %v11883_v6  ;;  %v2661_v53 = vmul.f32 %v9069_v10, %v11884_v48 }
 0x2d4   : > { %v5742_v56 = vpack.c.bf16 %v4282_v45, %v4266_v49  ;;  %v3772_v61 = vadd.f32 %v9033_v3, %v3176_v16  ;;  %v1935_v18 = vadd.f32 %v1423_v37, %v697_v60  ;;  %v683_v1 = vmul.f32 %v9087_v46, %v11876_v30 }
 0x2d5   : > { %v4268_v33 = vmax.f32 %v3756_v34, 0.0  ;;  %v3157_v36 = vadd.f32 %v2645_v32, %v1919_v51  ;;  %v699_v24 = vmul.f32 %v9087_v46, %v11878_v44  ;;  %v1409_v7 = vmul.f32 %v9091_v22, %v11879_v52 }
 0x2d6   : > { %5743 = vmatprep.subr.bf16.mxu0 %v5742_v56  ;;  %v4284_v12 = vmax.f32 %v3772_v61, 0.0  ;;  %v3173_v13 = vadd.f32 %v2661_v53, %v1935_v18  ;;  %v1425_v9 = vmul.f32 %v9091_v22, %v11882_v57  ;;  %v2647_v60 = vmul.f32 %v9095_v55, %v11883_v6 }
 0x2d7   : > { %v3753_v15 = vadd.f32 %v9082_v54, %v3157_v36  ;;  %v1921_v49 = vadd.f32 %v1409_v7, %v683_v1  ;;  %v2663_v45 = vmul.f32 %v9095_v55, %v11884_v48  ;;  %v714_v16 = vmul.f32 %v8985_v58, %v11897_v28  ;;  %v11981_v7 = vld [vmem:[#allocation44_spill] sm:$0xff] }
 0x2d8   : > { %v5806_v37 = vpack.c.bf16 %v4284_v12, %v4268_v33  ;;  %v3769_v34 = vadd.f32 %v9082_v54, %v3173_v13  ;;  %v1937_v51 = vadd.f32 %v1425_v9, %v699_v24  ;;  %v730_v32 = vmul.f32 %v8985_v58, %v11898_v38 }
 0x2d9   : > { %v4265_v53 = vmax.f32 %v3753_v15, 0.0  ;;  %v3159_v56 = vadd.f32 %v2647_v60, %v1921_v49  ;;  %v1440_v61 = vmul.f32 %v8990_v39, %v11899_v62  ;;  %v1456_v18 = vmul.f32 %v8990_v39, %v11900_v19 }
 0x2da   : > { %5807 = vmatprep.subr.bf16.mxu1 %v5806_v37  ;;  %v4281_v1 = vmax.f32 %v3769_v34, 0.0  ;;  %v3175_v36 = vadd.f32 %v2663_v45, %v1937_v51  ;;  %v2678_v33 = vmul.f32 %v8994_v2, %v11901_v41  ;;  %v2694_v24 = vmul.f32 %v8994_v2, %v11981_v7 }
 0x2db   : > { %v3755_v12 = vadd.f32 %v9099_v27, %v3159_v56  ;;  %v1952_v13 = vadd.f32 %v1440_v61, %v714_v16  ;;  %v1968_v9 = vadd.f32 %v1456_v18, %v730_v32  ;;  %v716_v60 = vmul.f32 %v9021_v47, %v11897_v28 }
 0x2dc   : > { %v5744_v15 = vpack.c.bf16 %v4281_v1, %v4265_v53  ;;  %v3771_v49 = vadd.f32 %v9099_v27, %v3175_v36  ;;  %v732_v37 = vmul.f32 %v9021_v47, %v11898_v38  ;;  %v1442_v45 = vmul.f32 %v9025_v59, %v11899_v62 }
 0x2dd   : > { %v4267_v34 = vmax.f32 %v3755_v12, 0.0  ;;  %v3190_v51 = vadd.f32 %v2678_v33, %v1952_v13  ;;  %v3206_v48 = vadd.f32 %v2694_v24, %v1968_v9  ;;  %v1458_v56 = vmul.f32 %v9025_v59, %v11900_v19 }
 0x2de   : > { %5745 = vmatpush1.bf16.msra.mxu0 %v5744_v15  ;;  %v4283_v16 = vmax.f32 %v3771_v49, 0.0  ;;  %v1954_v32 = vadd.f32 %v1442_v45, %v716_v60  ;;  %v2680_v53 = vmul.f32 %v9029_v8, %v11901_v41  ;;  %v2696_v61 = vmul.f32 %v9029_v8, %v11981_v7 }
 0x2df   : > { %v3786_v18 = vadd.f32 %v9017_v14, %v3190_v51  ;;  %v3802_v1 = vadd.f32 %v9017_v14, %v3206_v48  ;;  %v1970_v36 = vadd.f32 %v1458_v56, %v732_v37  ;;  %v713_v33 = vmul.f32 %v9054_v5, %v11897_v28 }
 0x2e0   : > { %v5808_v24 = vpack.c.bf16 %v4283_v16, %v4267_v34  ;;  %v3192_v12 = vadd.f32 %v2680_v53, %v1954_v32  ;;  %v729_v13 = vmul.f32 %v9054_v5, %v11898_v38  ;;  %v1439_v9 = vmul.f32 %v9058_v23, %v11899_v62 }
 0x2e1   : > { %v4298_v60 = vmax.f32 %v3786_v18, 0.0  ;;  %v4314_v15 = vmax.f32 %v3802_v1, 0.0  ;;  %v3208_v49 = vadd.f32 %v2696_v61, %v1970_v36  ;;  %v1455_v45 = vmul.f32 %v9058_v23, %v11900_v19 }
 0x2e2   : > { %5809 = vmatpush1.bf16.msra.mxu1 %v5808_v24  ;;  %v3788_v48 = vadd.f32 %v9033_v3, %v3192_v12  ;;  %v1951_v37 = vadd.f32 %v1439_v9, %v713_v33  ;;  %v2677_v34 = vmul.f32 %v9069_v10, %v11901_v41  ;;  %v2693_v51 = vmul.f32 %v9069_v10, %v11981_v7 }
 0x2e3   : > { %v5746_v56 = vpack.c.bf16 %v4314_v15, %v4298_v60  ;;  %v3804_v16 = vadd.f32 %v9033_v3, %v3208_v49  ;;  %v1967_v32 = vadd.f32 %v1455_v45, %v729_v13  ;;  %v715_v53 = vmul.f32 %v9087_v46, %v11897_v28  ;;  %v11982_v49 = vld [vmem:[#allocation45_spill] sm:$0xff] }
 0x2e4   : > { %v4300_v61 = vmax.f32 %v3788_v48, 0.0  ;;  %v3189_v18 = vadd.f32 %v2677_v34, %v1951_v37  ;;  %v731_v1 = vmul.f32 %v9087_v46, %v11898_v38  ;;  %v1441_v36 = vmul.f32 %v9091_v22, %v11899_v62  ;;  %v11986_v62 = vld [vmem:[#allocation83_spill] sm:$0xff] }
 0x2e5   : > { %5747 = vmatprep.subr.bf16.mxu0 %v5746_v56  ;;  %v4316_v33 = vmax.f32 %v3804_v16, 0.0  ;;  %v3205_v24 = vadd.f32 %v2693_v51, %v1967_v32  ;;  %v1457_v12 = vmul.f32 %v9091_v22, %v11900_v19  ;;  %v2679_v13 = vmul.f32 %v9095_v55, %v11901_v41  ;;  %v11983_v51 = vld [vmem:[#allocation75_spill] sm:$0xff]  ;;  %v11984_v19 = vld [vmem:[#allocation82_spill] sm:$0xff] }
 0x2e6   : > { %v3785_v9 = vadd.f32 %v9082_v54, %v3189_v18  ;;  %v1953_v60 = vadd.f32 %v1441_v36, %v715_v53  ;;  %v2695_v15 = vmul.f32 %v9095_v55, %v11981_v7  ;;  %v746_v45 = vmul.f32 %v8985_v58, %v11982_v49  ;;  %v11985_v18 = vld [vmem:[#allocation85_spill] sm:$0xff] }
 0x2e7   : > { %v5810_v48 = vpack.c.bf16 %v4316_v33, %v4300_v61  ;;  %v3801_v37 = vadd.f32 %v9082_v54, %v3205_v24  ;;  %v1969_v34 = vadd.f32 %v1457_v12, %v731_v1  ;;  %v762_v56 = vmul.f32 %v8985_v58, %v11983_v51  ;;  %v11987_v33 = vld [vmem:[#allocation86_spill] sm:$0xff] }
 0x2e8   : > { %v4297_v16 = vmax.f32 %v3785_v9, 0.0  ;;  %v3191_v32 = vadd.f32 %v2679_v13, %v1953_v60  ;;  %v1472_v41 = vmul.f32 %v8990_v39, %v11984_v19  ;;  %v1488_v53 = vmul.f32 %v8990_v39, %v11985_v18 }
 0x2e9   : > { %5811 = vmatprep.subr.bf16.mxu1 %v5810_v48  ;;  %v4313_v36 = vmax.f32 %v3801_v37, 0.0  ;;  %v3207_v7 = vadd.f32 %v2695_v15, %v1969_v34  ;;  %v2710_v61 = vmul.f32 %v8994_v2, %v11986_v62  ;;  %v2726_v1 = vmul.f32 %v8994_v2, %v11987_v33 }
 0x2ea   : > { %v3787_v24 = vadd.f32 %v9099_v27, %v3191_v32  ;;  %v1984_v12 = vadd.f32 %v1472_v41, %v746_v45  ;;  %v2000_v9 = vadd.f32 %v1488_v53, %v762_v56  ;;  %v748_v13 = vmul.f32 %v9021_v47, %v11982_v49 }
 0x2eb   : > { %v5748_v60 = vpack.c.bf16 %v4313_v36, %v4297_v16  ;;  %v3803_v38 = vadd.f32 %v9099_v27, %v3207_v7  ;;  %v764_v48 = vmul.f32 %v9021_v47, %v11983_v51  ;;  %v1474_v15 = vmul.f32 %v9025_v59, %v11984_v19 }
 0x2ec   : > { %v4299_v37 = vmax.f32 %v3787_v24, 0.0  ;;  %v3222_v34 = vadd.f32 %v2710_v61, %v1984_v12  ;;  %v3238_v28 = vadd.f32 %v2726_v1, %v2000_v9  ;;  %v1490_v32 = vmul.f32 %v9025_v59, %v11985_v18 }
 0x2ed   : > { %5749 = vmatpush1.bf16.msra.mxu0 %v5748_v60  ;;  %v4315_v41 = vmax.f32 %v3803_v38, 0.0  ;;  %v1986_v45 = vadd.f32 %v1474_v15, %v748_v13  ;;  %v2712_v56 = vmul.f32 %v9029_v8, %v11986_v62  ;;  %v2728_v7 = vmul.f32 %v9029_v8, %v11987_v33 }
 0x2ee   : > { %v3818_v16 = vadd.f32 %v9017_v14, %v3222_v34  ;;  %v3834_v53 = vadd.f32 %v9017_v14, %v3238_v28  ;;  %v2002_v36 = vadd.f32 %v1490_v32, %v764_v48  ;;  %v745_v61 = vmul.f32 %v9054_v5, %v11982_v49 }
 0x2ef   : > { %v5812_v1 = vpack.c.bf16 %v4315_v41, %v4299_v37  ;;  %v3224_v24 = vadd.f32 %v2712_v56, %v1986_v45  ;;  %v761_v38 = vmul.f32 %v9054_v5, %v11983_v51  ;;  %v1471_v12 = vmul.f32 %v9058_v23, %v11984_v19 }
 0x2f0   : > { %v4330_v9 = vmax.f32 %v3818_v16, 0.0  ;;  %v4346_v13 = vmax.f32 %v3834_v53, 0.0  ;;  %v3240_v60 = vadd.f32 %v2728_v7, %v2002_v36  ;;  %v1487_v15 = vmul.f32 %v9058_v23, %v11985_v18 }
 0x2f1   : > { %5813 = vmatpush1.bf16.msra.mxu1 %v5812_v1  ;;  %v3820_v28 = vadd.f32 %v9033_v3, %v3224_v24  ;;  %v1983_v48 = vadd.f32 %v1471_v12, %v745_v61  ;;  %v2709_v37 = vmul.f32 %v9069_v10, %v11986_v62  ;;  %v2725_v34 = vmul.f32 %v9069_v10, %v11987_v33 }
 0x2f2   : > { %v5750_v32 = vpack.c.bf16 %v4346_v13, %v4330_v9  ;;  %v3836_v41 = vadd.f32 %v9033_v3, %v3240_v60  ;;  %v1999_v45 = vadd.f32 %v1487_v15, %v761_v38  ;;  %v747_v56 = vmul.f32 %v9087_v46, %v11982_v49  ;;  %v11988_v60 = vld [vmem:[#allocation61_spill] sm:$0xff] }
 0x2f3   : > { %v4332_v7 = vmax.f32 %v3820_v28, 0.0  ;;  %v3221_v16 = vadd.f32 %v2709_v37, %v1983_v48  ;;  %v763_v53 = vmul.f32 %v9087_v46, %v11983_v51  ;;  %v1473_v36 = vmul.f32 %v9091_v22, %v11984_v19  ;;  %v11992_v19 = vld [vmem:[#allocation62_spill] sm:$0xff] }
 0x2f4   : > { %5751 = vmatprep.subr.bf16.mxu0 %v5750_v32  ;;  %v4348_v61 = vmax.f32 %v3836_v41, 0.0  ;;  %v3237_v1 = vadd.f32 %v2725_v34, %v1999_v45  ;;  %v1489_v24 = vmul.f32 %v9091_v22, %v11985_v18  ;;  %v2711_v38 = vmul.f32 %v9095_v55, %v11986_v62  ;;  %v11989_v34 = vld [vmem:[#allocation79_spill] sm:$0xff]  ;;  %v11990_v18 = vld [vmem:[#allocation14_spill] sm:$0xff] }
 0x2f5   : > { %v3817_v12 = vadd.f32 %v9082_v54, %v3221_v16  ;;  %v1985_v9 = vadd.f32 %v1473_v36, %v747_v56  ;;  %v2727_v13 = vmul.f32 %v9095_v55, %v11987_v33  ;;  %v778_v15 = vmul.f32 %v8985_v58, %v11988_v60  ;;  %v11991_v16 = vld [vmem:[#allocation66_spill] sm:$0xff] }
 0x2f6   : > { %v5814_v28 = vpack.c.bf16 %v4348_v61, %v4332_v7  ;;  %v3833_v48 = vadd.f32 %v9082_v54, %v3237_v1  ;;  %v2001_v37 = vadd.f32 %v1489_v24, %v763_v53  ;;  %v794_v32 = vmul.f32 %v8985_v58, %v11989_v34  ;;  %v11993_v61 = vld [vmem:[#allocation16_spill] sm:$0xff] }
 0x2f7   : > { %v4329_v41 = vmax.f32 %v3817_v12, 0.0  ;;  %v3223_v45 = vadd.f32 %v2711_v38, %v1985_v9  ;;  %v1504_v62 = vmul.f32 %v8990_v39, %v11990_v18  ;;  %v1520_v56 = vmul.f32 %v8990_v39, %v11991_v16 }
 0x2f8   : > { %5815 = vmatprep.subr.bf16.mxu1 %v5814_v28  ;;  %v4345_v36 = vmax.f32 %v3833_v48, 0.0  ;;  %v3239_v33 = vadd.f32 %v2727_v13, %v2001_v37  ;;  %v2742_v7 = vmul.f32 %v8994_v2, %v11992_v19  ;;  %v2758_v53 = vmul.f32 %v8994_v2, %v11993_v61 }
 0x2f9   : > { %v3819_v1 = vadd.f32 %v9099_v27, %v3223_v45  ;;  %v2016_v24 = vadd.f32 %v1504_v62, %v778_v15  ;;  %v2032_v12 = vadd.f32 %v1520_v56, %v794_v32  ;;  %v780_v38 = vmul.f32 %v9021_v47, %v11988_v60 }
 0x2fa   : > { %v5752_v9 = vpack.c.bf16 %v4345_v36, %v4329_v41  ;;  %v3835_v51 = vadd.f32 %v9099_v27, %v3239_v33  ;;  %v796_v28 = vmul.f32 %v9021_v47, %v11989_v34  ;;  %v1506_v13 = vmul.f32 %v9025_v59, %v11990_v18 }
 0x2fb   : > { %v4331_v48 = vmax.f32 %v3819_v1, 0.0  ;;  %v3254_v37 = vadd.f32 %v2742_v7, %v2016_v24  ;;  %v3270_v49 = vadd.f32 %v2758_v53, %v2032_v12  ;;  %v1522_v45 = vmul.f32 %v9025_v59, %v11991_v16 }
 0x2fc   : > { %5753 = vmatpush1.bf16.msra.mxu0 %v5752_v9  ;;  %v4347_v62 = vmax.f32 %v3835_v51, 0.0  ;;  %v2018_v15 = vadd.f32 %v1506_v13, %v780_v38  ;;  %v2744_v32 = vmul.f32 %v9029_v8, %v11992_v19  ;;  %v2760_v33 = vmul.f32 %v9029_v8, %v11993_v61 }
 0x2fd   : > { %v3850_v41 = vadd.f32 %v9017_v14, %v3254_v37  ;;  %v3866_v56 = vadd.f32 %v9017_v14, %v3270_v49  ;;  %v2034_v36 = vadd.f32 %v1522_v45, %v796_v28  ;;  %v777_v7 = vmul.f32 %v9054_v5, %v11988_v60 }
 0x2fe   : > { %v5816_v53 = vpack.c.bf16 %v4347_v62, %v4331_v48  ;;  %v3256_v1 = vadd.f32 %v2744_v32, %v2018_v15  ;;  %v793_v51 = vmul.f32 %v9054_v5, %v11989_v34  ;;  %v1503_v24 = vmul.f32 %v9058_v23, %v11990_v18 }
 0x2ff   : > { %v4362_v12 = vmax.f32 %v3850_v41, 0.0  ;;  %v4378_v38 = vmax.f32 %v3866_v56, 0.0  ;;  %v3272_v9 = vadd.f32 %v2760_v33, %v2034_v36  ;;  %v1519_v13 = vmul.f32 %v9058_v23, %v11991_v16 }
 0x300   : > { %5817 = vmatpush1.bf16.msra.mxu1 %v5816_v53  ;;  %v3852_v49 = vadd.f32 %v9033_v3, %v3256_v1  ;;  %v2015_v28 = vadd.f32 %v1503_v24, %v777_v7  ;;  %v2741_v48 = vmul.f32 %v9069_v10, %v11992_v19  ;;  %v2757_v37 = vmul.f32 %v9069_v10, %v11993_v61 }
 0x301   : > { %v5754_v45 = vpack.c.bf16 %v4378_v38, %v4362_v12  ;;  %v3868_v62 = vadd.f32 %v9033_v3, %v3272_v9  ;;  %v2031_v15 = vadd.f32 %v1519_v13, %v793_v51  ;;  %v779_v32 = vmul.f32 %v9087_v46, %v11988_v60  ;;  %v11994_v9 = vld [vmem:[#allocation71_spill] sm:$0xff] }
 0x302   : > { %v4364_v33 = vmax.f32 %v3852_v49, 0.0  ;;  %v3253_v41 = vadd.f32 %v2741_v48, %v2015_v28  ;;  %v795_v56 = vmul.f32 %v9087_v46, %v11989_v34  ;;  %v1505_v36 = vmul.f32 %v9091_v22, %v11990_v18  ;;  %v11998_v18 = vld [vmem:[#allocation15_spill] sm:$0xff] }
 0x303   : > { %5755 = vmatprep.subr.bf16.mxu0 %v5754_v45  ;;  %v4380_v7 = vmax.f32 %v3868_v62, 0.0  ;;  %v3269_v53 = vadd.f32 %v2757_v37, %v2031_v15  ;;  %v1521_v1 = vmul.f32 %v9091_v22, %v11991_v16  ;;  %v2743_v51 = vmul.f32 %v9095_v55, %v11992_v19  ;;  %v11995_v37 = vld [vmem:[#allocation91_spill] sm:$0xff]  ;;  %v11996_v16 = vld [vmem:[#allocation76_spill] sm:$0xff] }
 0x304   : > { %v3849_v24 = vadd.f32 %v9082_v54, %v3253_v41  ;;  %v2017_v12 = vadd.f32 %v1505_v36, %v779_v32  ;;  %v2759_v38 = vmul.f32 %v9095_v55, %v11993_v61  ;;  %v810_v13 = vmul.f32 %v8985_v58, %v11994_v9  ;;  %v11997_v41 = vld [vmem:[#allocation84_spill] sm:$0xff] }
 0x305   : > { %v5818_v49 = vpack.c.bf16 %v4380_v7, %v4364_v33  ;;  %v3865_v28 = vadd.f32 %v9082_v54, %v3269_v53  ;;  %v2033_v48 = vadd.f32 %v1521_v1, %v795_v56  ;;  %v826_v45 = vmul.f32 %v8985_v58, %v11995_v37  ;;  %v11999_v7 = vld [vmem:[#allocation87_spill] sm:$0xff] }
 0x306   : > { %v4361_v62 = vmax.f32 %v3849_v24, 0.0  ;;  %v3255_v15 = vadd.f32 %v2743_v51, %v2017_v12  ;;  %v1536_v19 = vmul.f32 %v8990_v39, %v11996_v16  ;;  %v1552_v32 = vmul.f32 %v8990_v39, %v11997_v41 }
 0x307   : > { %5819 = vmatprep.subr.bf16.mxu1 %v5818_v49  ;;  %v4377_v36 = vmax.f32 %v3865_v28, 0.0  ;;  %v3271_v61 = vadd.f32 %v2759_v38, %v2033_v48  ;;  %v2774_v33 = vmul.f32 %v8994_v2, %v11998_v18  ;;  %v2790_v56 = vmul.f32 %v8994_v2, %v11999_v7 }
 0x308   : > { %v3851_v53 = vadd.f32 %v9099_v27, %v3255_v15  ;;  %v2048_v1 = vadd.f32 %v1536_v19, %v810_v13  ;;  %v2064_v24 = vadd.f32 %v1552_v32, %v826_v45  ;;  %v812_v51 = vmul.f32 %v9021_v47, %v11994_v9 }
 0x309   : > { %v5756_v12 = vpack.c.bf16 %v4377_v36, %v4361_v62  ;;  %v3867_v34 = vadd.f32 %v9099_v27, %v3271_v61  ;;  %v828_v49 = vmul.f32 %v9021_v47, %v11995_v37  ;;  %v1538_v38 = vmul.f32 %v9025_v59, %v11996_v16 }
 0x30a   : > { %v4363_v28 = vmax.f32 %v3851_v53, 0.0  ;;  %v3286_v48 = vadd.f32 %v2774_v33, %v2048_v1  ;;  %v3302_v60 = vadd.f32 %v2790_v56, %v2064_v24  ;;  %v1554_v15 = vmul.f32 %v9025_v59, %v11997_v41 }
 0x30b   : > { %5757 = vmatpush1.bf16.msra.mxu0 %v5756_v12  ;;  %v4379_v19 = vmax.f32 %v3867_v34, 0.0  ;;  %v2050_v13 = vadd.f32 %v1538_v38, %v812_v51  ;;  %v2776_v45 = vmul.f32 %v9029_v8, %v11998_v18  ;;  %v2792_v61 = vmul.f32 %v9029_v8, %v11999_v7 }
 0x30c   : > { %v3882_v62 = vadd.f32 %v9017_v14, %v3286_v48  ;;  %v3898_v32 = vadd.f32 %v9017_v14, %v3302_v60  ;;  %v2066_v36 = vadd.f32 %v1554_v15, %v828_v49  ;;  %v809_v33 = vmul.f32 %v9054_v5, %v11994_v9 }
 0x30d   : > { %v5820_v56 = vpack.c.bf16 %v4379_v19, %v4363_v28  ;;  %v3288_v53 = vadd.f32 %v2776_v45, %v2050_v13  ;;  %v825_v34 = vmul.f32 %v9054_v5, %v11995_v37  ;;  %v1535_v1 = vmul.f32 %v9058_v23, %v11996_v16 }
 0x30e   : > { %v4394_v24 = vmax.f32 %v3882_v62, 0.0  ;;  %v4410_v51 = vmax.f32 %v3898_v32, 0.0  ;;  %v3304_v12 = vadd.f32 %v2792_v61, %v2066_v36  ;;  %v1551_v38 = vmul.f32 %v9058_v23, %v11997_v41 }
 0x30f   : > { %5821 = vmatpush1.bf16.msra.mxu1 %v5820_v56  ;;  %v3884_v60 = vadd.f32 %v9033_v3, %v3288_v53  ;;  %v2047_v49 = vadd.f32 %v1535_v1, %v809_v33  ;;  %v2773_v28 = vmul.f32 %v9069_v10, %v11998_v18  ;;  %v2789_v48 = vmul.f32 %v9069_v10, %v11999_v7 }
 0x310   : > { %v5758_v15 = vpack.c.bf16 %v4410_v51, %v4394_v24  ;;  %v3900_v19 = vadd.f32 %v9033_v3, %v3304_v12  ;;  %v2063_v13 = vadd.f32 %v1551_v38, %v825_v34  ;;  %v811_v45 = vmul.f32 %v9087_v46, %v11994_v9  ;;  %v12000_v12 = vld [vmem:[#allocation90_spill] sm:$0xff] }
 0x311   : > { %v4396_v61 = vmax.f32 %v3884_v60, 0.0  ;;  %v3285_v62 = vadd.f32 %v2773_v28, %v2047_v49  ;;  %v827_v32 = vmul.f32 %v9087_v46, %v11995_v37  ;;  %v1537_v36 = vmul.f32 %v9091_v22, %v11996_v16  ;;  %v12004_v16 = vld [vmem:[#allocation67_spill] sm:$0xff] }
 0x312   : > { %5759 = vmatprep.subr.bf16.mxu0 %v5758_v15  ;;  %v4412_v33 = vmax.f32 %v3900_v19, 0.0  ;;  %v3301_v56 = vadd.f32 %v2789_v48, %v2063_v13  ;;  %v1553_v53 = vmul.f32 %v9091_v22, %v11997_v41  ;;  %v2775_v34 = vmul.f32 %v9095_v55, %v11998_v18  ;;  %v12001_v48 = vld [vmem:[#allocation99_spill] sm:$0xff]  ;;  %v12002_v41 = vld [vmem:[#allocation132_spill] sm:$0xff] }
 0x313   : > { %v3881_v1 = vadd.f32 %v9082_v54, %v3285_v62  ;;  %v2049_v24 = vadd.f32 %v1537_v36, %v811_v45  ;;  %v2791_v51 = vmul.f32 %v9095_v55, %v11999_v7  ;;  %v842_v38 = vmul.f32 %v8985_v58, %v12000_v12  ;;  %v12003_v62 = vld [vmem:[#allocation138_spill] sm:$0xff] }
 0x314   : > { %v5822_v60 = vpack.c.bf16 %v4412_v33, %v4396_v61  ;;  %v3897_v49 = vadd.f32 %v9082_v54, %v3301_v56  ;;  %v2065_v28 = vadd.f32 %v1553_v53, %v827_v32  ;;  %v858_v15 = vmul.f32 %v8985_v58, %v12001_v48  ;;  %v12005_v33 = vld [vmem:[#allocation52_spill] sm:$0xff] }
 0x315   : > { %v4393_v19 = vmax.f32 %v3881_v1, 0.0  ;;  %v3287_v13 = vadd.f32 %v2775_v34, %v2049_v24  ;;  %v1568_v18 = vmul.f32 %v8990_v39, %v12002_v41  ;;  %v1584_v45 = vmul.f32 %v8990_v39, %v12003_v62 }
 0x316   : > { %5823 = vmatprep.subr.bf16.mxu1 %v5822_v60  ;;  %v4409_v36 = vmax.f32 %v3897_v49, 0.0  ;;  %v3303_v7 = vadd.f32 %v2791_v51, %v2065_v28  ;;  %v2806_v61 = vmul.f32 %v8994_v2, %v12004_v16  ;;  %v2822_v32 = vmul.f32 %v8994_v2, %v12005_v33 }
 0x317   : > { %v3883_v56 = vadd.f32 %v9099_v27, %v3287_v13  ;;  %v2080_v53 = vadd.f32 %v1568_v18, %v842_v38  ;;  %v2096_v1 = vadd.f32 %v1584_v45, %v858_v15  ;;  %v844_v34 = vmul.f32 %v9021_v47, %v12000_v12 }
 0x318   : > { %v5760_v24 = vpack.c.bf16 %v4409_v36, %v4393_v19  ;;  %v3899_v37 = vadd.f32 %v9099_v27, %v3303_v7  ;;  %v860_v60 = vmul.f32 %v9021_v47, %v12001_v48  ;;  %v1570_v51 = vmul.f32 %v9025_v59, %v12002_v41 }
 0x319   : > { %v4395_v49 = vmax.f32 %v3883_v56, 0.0  ;;  %v3318_v28 = vadd.f32 %v2806_v61, %v2080_v53  ;;  %v3334_v9 = vadd.f32 %v2822_v32, %v2096_v1  ;;  %v1586_v13 = vmul.f32 %v9025_v59, %v12003_v62 }
 0x31a   : > { %5761 = vmatpush1.bf16.msra.mxu0 %v5760_v24  ;;  %v4411_v18 = vmax.f32 %v3899_v37, 0.0  ;;  %v2082_v38 = vadd.f32 %v1570_v51, %v844_v34  ;;  %v2808_v15 = vmul.f32 %v9029_v8, %v12004_v16  ;;  %v2824_v7 = vmul.f32 %v9029_v8, %v12005_v33 }
 0x31b   : > { %v3914_v19 = vadd.f32 %v9017_v14, %v3318_v28  ;;  %v3930_v45 = vadd.f32 %v9017_v14, %v3334_v9  ;;  %v2098_v36 = vadd.f32 %v1586_v13, %v860_v60  ;;  %v841_v61 = vmul.f32 %v9054_v5, %v12000_v12 }
 0x31c   : > { %v5824_v32 = vpack.c.bf16 %v4411_v18, %v4395_v49  ;;  %v3320_v56 = vadd.f32 %v2808_v15, %v2082_v38  ;;  %v857_v37 = vmul.f32 %v9054_v5, %v12001_v48  ;;  %v1567_v53 = vmul.f32 %v9058_v23, %v12002_v41 }
 0x31d   : > { %v4426_v1 = vmax.f32 %v3914_v19, 0.0  ;;  %v4442_v34 = vmax.f32 %v3930_v45, 0.0  ;;  %v3336_v24 = vadd.f32 %v2824_v7, %v2098_v36  ;;  %v1583_v51 = vmul.f32 %v9058_v23, %v12003_v62 }
 0x31e   : > { %5825 = vmatpush1.bf16.msra.mxu1 %v5824_v32  ;;  %v3916_v9 = vadd.f32 %v9033_v3, %v3320_v56  ;;  %v2079_v60 = vadd.f32 %v1567_v53, %v841_v61  ;;  %v2805_v49 = vmul.f32 %v9069_v10, %v12004_v16  ;;  %v2821_v28 = vmul.f32 %v9069_v10, %v12005_v33 }
 0x31f   : > { %v5762_v13 = vpack.c.bf16 %v4442_v34, %v4426_v1  ;;  %v3932_v18 = vadd.f32 %v9033_v3, %v3336_v24  ;;  %v2095_v38 = vadd.f32 %v1583_v51, %v857_v37  ;;  %v843_v15 = vmul.f32 %v9087_v46, %v12000_v12  ;;  %v12006_v24 = vld [vmem:[#allocation148_spill] sm:$0xff] }
 0x320   : > { %v4428_v7 = vmax.f32 %v3916_v9, 0.0  ;;  %v3317_v19 = vadd.f32 %v2805_v49, %v2079_v60  ;;  %v859_v45 = vmul.f32 %v9087_v46, %v12001_v48  ;;  %v1569_v36 = vmul.f32 %v9091_v22, %v12002_v41  ;;  %v12010_v41 = vld [vmem:[#allocation72_spill] sm:$0xff] }
 0x321   : > { %5763 = vmatprep.subr.bf16.mxu0 %v5762_v13  ;;  %v4444_v61 = vmax.f32 %v3932_v18, 0.0  ;;  %v3333_v32 = vadd.f32 %v2821_v28, %v2095_v38  ;;  %v1585_v56 = vmul.f32 %v9091_v22, %v12003_v62  ;;  %v2807_v37 = vmul.f32 %v9095_v55, %v12004_v16  ;;  %v12007_v28 = vld [vmem:[#allocation102_spill] sm:$0xff] }
 0x322   : > { %v3913_v53 = vadd.f32 %v9082_v54, %v3317_v19  ;;  %v2081_v1 = vadd.f32 %v1569_v36, %v843_v15  ;;  %v2823_v34 = vmul.f32 %v9095_v55, %v12005_v33  ;;  %v874_v51 = vmul.f32 %v8985_v58, %v12006_v24  ;;  %v12008_v62 = vld [vmem:[#allocation22_spill] sm:$0xff] }
 0x323   : > { %v5826_v9 = vpack.c.bf16 %v4444_v61, %v4428_v7  ;;  %v3929_v60 = vadd.f32 %v9082_v54, %v3333_v32  ;;  %v2097_v49 = vadd.f32 %v1585_v56, %v859_v45  ;;  %v890_v13 = vmul.f32 %v8985_v58, %v12007_v28  ;;  %v12009_v19 = vld [vmem:[#allocation78_spill] sm:$0xff]  ;;  %v12011_v61 = vld [vmem:[#allocation40_spill] sm:$0xff] }
 0x324   : > { %v4425_v18 = vmax.f32 %v3913_v53, 0.0  ;;  %v3319_v38 = vadd.f32 %v2807_v37, %v2081_v1  ;;  %v1600_v16 = vmul.f32 %v8990_v39, %v12008_v62  ;;  %v1616_v15 = vmul.f32 %v8990_v39, %v12009_v19 }
 0x325   : > { %5827 = vmatprep.subr.bf16.mxu1 %v5826_v9  ;;  %v4441_v36 = vmax.f32 %v3929_v60, 0.0  ;;  %v3335_v33 = vadd.f32 %v2823_v34, %v2097_v49  ;;  %v2838_v7 = vmul.f32 %v8994_v2, %v12010_v41  ;;  %v2854_v45 = vmul.f32 %v8994_v2, %v12011_v61 }
 0x326   : > { %v3915_v32 = vadd.f32 %v9099_v27, %v3319_v38  ;;  %v2112_v56 = vadd.f32 %v1600_v16, %v874_v51  ;;  %v2128_v53 = vadd.f32 %v1616_v15, %v890_v13  ;;  %v876_v37 = vmul.f32 %v9021_v47, %v12006_v24 }
 0x327   : > { %v5764_v1 = vpack.c.bf16 %v4441_v36, %v4425_v18  ;;  %v3931_v48 = vadd.f32 %v9099_v27, %v3335_v33  ;;  %v892_v9 = vmul.f32 %v9021_v47, %v12007_v28  ;;  %v1602_v34 = vmul.f32 %v9025_v59, %v12008_v62 }
 0x328   : > { %v4427_v60 = vmax.f32 %v3915_v32, 0.0  ;;  %v3350_v49 = vadd.f32 %v2838_v7, %v2112_v56  ;;  %v3366_v12 = vadd.f32 %v2854_v45, %v2128_v53  ;;  %v1618_v38 = vmul.f32 %v9025_v59, %v12009_v19 }
 0x329   : > { %5765 = vmatpush1.bf16.msra.mxu0 %v5764_v1  ;;  %v4443_v16 = vmax.f32 %v3931_v48, 0.0  ;;  %v2114_v51 = vadd.f32 %v1602_v34, %v876_v37  ;;  %v2840_v13 = vmul.f32 %v9029_v8, %v12010_v41  ;;  %v2856_v33 = vmul.f32 %v9029_v8, %v12011_v61 }
 0x32a   : > { %v3946_v18 = vadd.f32 %v9017_v14, %v3350_v49  ;;  %v3962_v15 = vadd.f32 %v9017_v14, %v3366_v12  ;;  %v2130_v36 = vadd.f32 %v1618_v38, %v892_v9  ;;  %v873_v7 = vmul.f32 %v9054_v5, %v12006_v24 }
 0x32b   : > { %v5828_v45 = vpack.c.bf16 %v4443_v16, %v4427_v60  ;;  %v3352_v32 = vadd.f32 %v2840_v13, %v2114_v51  ;;  %v889_v48 = vmul.f32 %v9054_v5, %v12007_v28  ;;  %v1599_v56 = vmul.f32 %v9058_v23, %v12008_v62 }
 0x32c   : > { %v4458_v53 = vmax.f32 %v3946_v18, 0.0  ;;  %v4474_v37 = vmax.f32 %v3962_v15, 0.0  ;;  %v3368_v1 = vadd.f32 %v2856_v33, %v2130_v36  ;;  %v1615_v34 = vmul.f32 %v9058_v23, %v12009_v19 }
 0x32d   : > { %5829 = vmatpush1.bf16.msra.mxu1 %v5828_v45  ;;  %v3948_v12 = vadd.f32 %v9033_v3, %v3352_v32  ;;  %v2111_v9 = vadd.f32 %v1599_v56, %v873_v7  ;;  %v2837_v60 = vmul.f32 %v9069_v10, %v12010_v41  ;;  %v2853_v49 = vmul.f32 %v9069_v10, %v12011_v61 }
 0x32e   : > { %v5766_v38 = vpack.c.bf16 %v4474_v37, %v4458_v53  ;;  %v3964_v16 = vadd.f32 %v9033_v3, %v3368_v1  ;;  %v2127_v51 = vadd.f32 %v1615_v34, %v889_v48  ;;  %v875_v13 = vmul.f32 %v9087_v46, %v12006_v24  ;;  %v12012_v1 = vld [vmem:[#allocation73_spill] sm:$0xff] }
 0x32f   : > { %v4460_v33 = vmax.f32 %v3948_v12, 0.0  ;;  %v3349_v18 = vadd.f32 %v2837_v60, %v2111_v9  ;;  %v891_v15 = vmul.f32 %v9087_v46, %v12007_v28  ;;  %v1601_v36 = vmul.f32 %v9091_v22, %v12008_v62  ;;  %v12016_v62 = vld [vmem:[#allocation77_spill] sm:$0xff] }
 0x330   : > { %5767 = vmatprep.subr.bf16.mxu0 %v5766_v38  ;;  %v4476_v7 = vmax.f32 %v3964_v16, 0.0  ;;  %v3365_v45 = vadd.f32 %v2853_v49, %v2127_v51  ;;  %v1617_v32 = vmul.f32 %v9091_v22, %v12009_v19  ;;  %v2839_v48 = vmul.f32 %v9095_v55, %v12010_v41  ;;  %v12013_v49 = vld [vmem:[#allocation48_spill] sm:$0xff] }
 0x331   : > { %v3945_v56 = vadd.f32 %v9082_v54, %v3349_v18  ;;  %v2113_v53 = vadd.f32 %v1601_v36, %v875_v13  ;;  %v2855_v37 = vmul.f32 %v9095_v55, %v12011_v61  ;;  %v906_v34 = vmul.f32 %v8985_v58, %v12012_v1  ;;  %v12014_v19 = vld [vmem:[#allocation92_spill] sm:$0xff]  ;;  %v12015_v18 = vld [vmem:[#allocation123_spill] sm:$0xff] }
 0x332   : > { %v5830_v12 = vpack.c.bf16 %v4476_v7, %v4460_v33  ;;  %v3961_v9 = vadd.f32 %v9082_v54, %v3365_v45  ;;  %v2129_v60 = vadd.f32 %v1617_v32, %v891_v15  ;;  %v922_v38 = vmul.f32 %v8985_v58, %v12013_v49  ;;  %v12017_v7 = vld [vmem:[#allocation124_spill] sm:$0xff] }
 0x333   : > { %v4457_v16 = vmax.f32 %v3945_v56, 0.0  ;;  %v3351_v51 = vadd.f32 %v2839_v48, %v2113_v53  ;;  %v1632_v41 = vmul.f32 %v8990_v39, %v12014_v19  ;;  %v1648_v13 = vmul.f32 %v8990_v39, %v12015_v18 }
 0x334   : > { %5831 = vmatprep.subr.bf16.mxu1 %v5830_v12  ;;  %v4473_v36 = vmax.f32 %v3961_v9, 0.0  ;;  %v3367_v61 = vadd.f32 %v2855_v37, %v2129_v60  ;;  %v2870_v33 = vmul.f32 %v8994_v2, %v12016_v62  ;;  %v2886_v15 = vmul.f32 %v8994_v2, %v12017_v7 }
 0x335   : > { %v3947_v45 = vadd.f32 %v9099_v27, %v3351_v51  ;;  %v2144_v32 = vadd.f32 %v1632_v41, %v906_v34  ;;  %v2160_v56 = vadd.f32 %v1648_v13, %v922_v38  ;;  %v908_v48 = vmul.f32 %v9021_v47, %v12012_v1 }
 0x336   : > { %v5768_v53 = vpack.c.bf16 %v4473_v36, %v4457_v16  ;;  %v3963_v28 = vadd.f32 %v9099_v27, %v3367_v61  ;;  %v924_v12 = vmul.f32 %v9021_v47, %v12013_v49  ;;  %v1634_v37 = vmul.f32 %v9025_v59, %v12014_v19 }
 0x337   : > { %v4459_v9 = vmax.f32 %v3947_v45, 0.0  ;;  %v3382_v60 = vadd.f32 %v2870_v33, %v2144_v32  ;;  %v3398_v24 = vadd.f32 %v2886_v15, %v2160_v56  ;;  %v1650_v51 = vmul.f32 %v9025_v59, %v12015_v18 }
 0x338   : > { %5769 = vmatpush1.bf16.msra.mxu0 %v5768_v53  ;;  %v4475_v41 = vmax.f32 %v3963_v28, 0.0  ;;  %v2146_v34 = vadd.f32 %v1634_v37, %v908_v48  ;;  %v2872_v38 = vmul.f32 %v9029_v8, %v12016_v62  ;;  %v2888_v61 = vmul.f32 %v9029_v8, %v12017_v7 }
 0x339   : > { %v3978_v16 = vadd.f32 %v9017_v14, %v3382_v60  ;;  %v3994_v13 = vadd.f32 %v9017_v14, %v3398_v24  ;;  %v2162_v36 = vadd.f32 %v1650_v51, %v924_v12  ;;  %v905_v33 = vmul.f32 %v9054_v5, %v12012_v1 }
 0x33a   : > { %v5832_v15 = vpack.c.bf16 %v4475_v41, %v4459_v9  ;;  %v3384_v45 = vadd.f32 %v2872_v38, %v2146_v34  ;;  %v921_v28 = vmul.f32 %v9054_v5, %v12013_v49  ;;  %v1631_v32 = vmul.f32 %v9058_v23, %v12014_v19 }
 0x33b   : > { %v4490_v56 = vmax.f32 %v3978_v16, 0.0  ;;  %v4506_v48 = vmax.f32 %v3994_v13, 0.0  ;;  %v3400_v53 = vadd.f32 %v2888_v61, %v2162_v36  ;;  %v1647_v37 = vmul.f32 %v9058_v23, %v12015_v18 }
 0x33c   : > { %5833 = vmatpush1.bf16.msra.mxu1 %v5832_v15  ;;  %v3980_v24 = vadd.f32 %v9033_v3, %v3384_v45  ;;  %v2143_v12 = vadd.f32 %v1631_v32, %v905_v33  ;;  %v2869_v9 = vmul.f32 %v9069_v10, %v12016_v62  ;;  %v2885_v60 = vmul.f32 %v9069_v10, %v12017_v7 }
 0x33d   : > { %v5770_v51 = vpack.c.bf16 %v4506_v48, %v4490_v56  ;;  %v3996_v41 = vadd.f32 %v9033_v3, %v3400_v53  ;;  %v2159_v34 = vadd.f32 %v1647_v37, %v921_v28  ;;  %v907_v38 = vmul.f32 %v9087_v46, %v12012_v1  ;;  %v12018_v53 = vld [vmem:[#allocation109_spill] sm:$0xff] }
 0x33e   : > { %v4492_v61 = vmax.f32 %v3980_v24, 0.0  ;;  %v3381_v16 = vadd.f32 %v2869_v9, %v2143_v12  ;;  %v923_v13 = vmul.f32 %v9087_v46, %v12013_v49  ;;  %v1633_v36 = vmul.f32 %v9091_v22, %v12014_v19  ;;  %v12022_v19 = vld [vmem:[#allocation88_spill] sm:$0xff] }
 0x33f   : > { %5771 = vmatprep.subr.bf16.mxu0 %v5770_v51  ;;  %v4508_v33 = vmax.f32 %v3996_v41, 0.0  ;;  %v3397_v15 = vadd.f32 %v2885_v60, %v2159_v34  ;;  %v1649_v45 = vmul.f32 %v9091_v22, %v12015_v18  ;;  %v2871_v28 = vmul.f32 %v9095_v55, %v12016_v62  ;;  %v12019_v60 = vld [vmem:[#allocation108_spill] sm:$0xff] }
 0x340   : > { %v3977_v32 = vadd.f32 %v9082_v54, %v3381_v16  ;;  %v2145_v56 = vadd.f32 %v1633_v36, %v907_v38  ;;  %v2887_v48 = vmul.f32 %v9095_v55, %v12017_v7  ;;  %v938_v37 = vmul.f32 %v8985_v58, %v12018_v53  ;;  %v12020_v18 = vld [vmem:[#allocation120_spill] sm:$0xff]  ;;  %v12021_v16 = vld [vmem:[#allocation114_spill] sm:$0xff] }
 0x341   : > { %v5834_v24 = vpack.c.bf16 %v4508_v33, %v4492_v61  ;;  %v3993_v12 = vadd.f32 %v9082_v54, %v3397_v15  ;;  %v2161_v9 = vadd.f32 %v1649_v45, %v923_v13  ;;  %v954_v51 = vmul.f32 %v8985_v58, %v12019_v60  ;;  %v12023_v33 = vld [vmem:[#allocation125_spill] sm:$0xff] }
 0x342   : > { %v4489_v41 = vmax.f32 %v3977_v32, 0.0  ;;  %v3383_v34 = vadd.f32 %v2871_v28, %v2145_v56  ;;  %v1664_v62 = vmul.f32 %v8990_v39, %v12020_v18  ;;  %v1680_v38 = vmul.f32 %v8990_v39, %v12021_v16 }
 0x343   : > { %5835 = vmatprep.subr.bf16.mxu1 %v5834_v24  ;;  %v4505_v36 = vmax.f32 %v3993_v12, 0.0  ;;  %v3399_v7 = vadd.f32 %v2887_v48, %v2161_v9  ;;  %v2902_v61 = vmul.f32 %v8994_v2, %v12022_v19  ;;  %v2918_v13 = vmul.f32 %v8994_v2, %v12023_v33 }
 0x344   : > { %v3979_v15 = vadd.f32 %v9099_v27, %v3383_v34  ;;  %v2176_v45 = vadd.f32 %v1664_v62, %v938_v37  ;;  %v2192_v32 = vadd.f32 %v1680_v38, %v954_v51  ;;  %v940_v28 = vmul.f32 %v9021_v47, %v12018_v53 }
 0x345   : > { %v5772_v56 = vpack.c.bf16 %v4505_v36, %v4489_v41  ;;  %v3995_v49 = vadd.f32 %v9099_v27, %v3399_v7  ;;  %v956_v24 = vmul.f32 %v9021_v47, %v12019_v60  ;;  %v1666_v48 = vmul.f32 %v9025_v59, %v12020_v18 }
 0x346   : > { %v4491_v12 = vmax.f32 %v3979_v15, 0.0  ;;  %v3414_v9 = vadd.f32 %v2902_v61, %v2176_v45  ;;  %v3430_v1 = vadd.f32 %v2918_v13, %v2192_v32  ;;  %v1682_v34 = vmul.f32 %v9025_v59, %v12021_v16 }
 0x347   : > { %5773 = vmatpush1.bf16.msra.mxu0 %v5772_v56  ;;  %v4507_v62 = vmax.f32 %v3995_v49, 0.0  ;;  %v2178_v37 = vadd.f32 %v1666_v48, %v940_v28  ;;  %v2904_v51 = vmul.f32 %v9029_v8, %v12022_v19  ;;  %v2920_v7 = vmul.f32 %v9029_v8, %v12023_v33 }
 0x348   : > { %v4010_v41 = vadd.f32 %v9017_v14, %v3414_v9  ;;  %v4026_v38 = vadd.f32 %v9017_v14, %v3430_v1  ;;  %v2194_v36 = vadd.f32 %v1682_v34, %v956_v24  ;;  %v937_v61 = vmul.f32 %v9054_v5, %v12018_v53 }
 0x349   : > { %v5836_v13 = vpack.c.bf16 %v4507_v62, %v4491_v12  ;;  %v3416_v15 = vadd.f32 %v2904_v51, %v2178_v37  ;;  %v953_v49 = vmul.f32 %v9054_v5, %v12019_v60  ;;  %v1663_v45 = vmul.f32 %v9058_v23, %v12020_v18 }
 0x34a   : > { %v4522_v32 = vmax.f32 %v4010_v41, 0.0  ;;  %v4538_v28 = vmax.f32 %v4026_v38, 0.0  ;;  %v3432_v56 = vadd.f32 %v2920_v7, %v2194_v36  ;;  %v1679_v48 = vmul.f32 %v9058_v23, %v12021_v16 }
 0x34b   : > { %5837 = vmatpush1.bf16.msra.mxu1 %v5836_v13  ;;  %v4012_v1 = vadd.f32 %v9033_v3, %v3416_v15  ;;  %v2175_v24 = vadd.f32 %v1663_v45, %v937_v61  ;;  %v2901_v12 = vmul.f32 %v9069_v10, %v12022_v19  ;;  %v2917_v9 = vmul.f32 %v9069_v10, %v12023_v33 }
 0x34c   : > { %v5774_v34 = vpack.c.bf16 %v4538_v28, %v4522_v32  ;;  %v4028_v62 = vadd.f32 %v9033_v3, %v3432_v56  ;;  %v2191_v37 = vadd.f32 %v1679_v48, %v953_v49  ;;  %v939_v51 = vmul.f32 %v9087_v46, %v12018_v53  ;;  %v12024_v56 = vld [vmem:[#allocation128_spill] sm:$0xff] }
 0x34d   : > { %v4524_v7 = vmax.f32 %v4012_v1, 0.0  ;;  %v3413_v41 = vadd.f32 %v2901_v12, %v2175_v24  ;;  %v955_v38 = vmul.f32 %v9087_v46, %v12019_v60  ;;  %v1665_v36 = vmul.f32 %v9091_v22, %v12020_v18  ;;  %v12028_v18 = vld [vmem:[#allocation104_spill] sm:$0xff] }
 0x34e   : > { %5775 = vmatprep.subr.bf16.mxu0 %v5774_v34  ;;  %v4540_v61 = vmax.f32 %v4028_v62, 0.0  ;;  %v3429_v13 = vadd.f32 %v2917_v9, %v2191_v37  ;;  %v1681_v15 = vmul.f32 %v9091_v22, %v12021_v16  ;;  %v2903_v49 = vmul.f32 %v9095_v55, %v12022_v19  ;;  %v12025_v9 = vld [vmem:[#allocation110_spill] sm:$0xff] }
 0x34f   : > { %v4009_v45 = vadd.f32 %v9082_v54, %v3413_v41  ;;  %v2177_v32 = vadd.f32 %v1665_v36, %v939_v51  ;;  %v2919_v28 = vmul.f32 %v9095_v55, %v12023_v33  ;;  %v970_v48 = vmul.f32 %v8985_v58, %v12024_v56  ;;  %v12026_v16 = vld [vmem:[#allocation130_spill] sm:$0xff]  ;;  %v12027_v41 = vld [vmem:[#allocation5_spill] sm:$0xff] }
 0x350   : > { %v5838_v1 = vpack.c.bf16 %v4540_v61, %v4524_v7  ;;  %v4025_v24 = vadd.f32 %v9082_v54, %v3429_v13  ;;  %v2193_v12 = vadd.f32 %v1681_v15, %v955_v38  ;;  %v986_v34 = vmul.f32 %v8985_v58, %v12025_v9  ;;  %v12029_v61 = vld [vmem:[#allocation121_spill] sm:$0xff] }
 0x351   : > { %v4521_v62 = vmax.f32 %v4009_v45, 0.0  ;;  %v3415_v37 = vadd.f32 %v2903_v49, %v2177_v32  ;;  %v1696_v19 = vmul.f32 %v8990_v39, %v12026_v16  ;;  %v1712_v51 = vmul.f32 %v8990_v39, %v12027_v41 }
 0x352   : > { %5839 = vmatprep.subr.bf16.mxu1 %v5838_v1  ;;  %v4537_v36 = vmax.f32 %v4025_v24, 0.0  ;;  %v3431_v33 = vadd.f32 %v2919_v28, %v2193_v12  ;;  %v2934_v7 = vmul.f32 %v8994_v2, %v12028_v18  ;;  %v2950_v38 = vmul.f32 %v8994_v2, %v12029_v61 }
 0x353   : > { %v4011_v13 = vadd.f32 %v9099_v27, %v3415_v37  ;;  %v2208_v15 = vadd.f32 %v1696_v19, %v970_v48  ;;  %v2224_v45 = vadd.f32 %v1712_v51, %v986_v34  ;;  %v972_v49 = vmul.f32 %v9021_v47, %v12024_v56 }
 0x354   : > { %v5776_v32 = vpack.c.bf16 %v4537_v36, %v4521_v62  ;;  %v4027_v60 = vadd.f32 %v9099_v27, %v3431_v33  ;;  %v988_v1 = vmul.f32 %v9021_v47, %v12025_v9  ;;  %v1698_v28 = vmul.f32 %v9025_v59, %v12026_v16 }
 0x355   : > { %v4523_v24 = vmax.f32 %v4011_v13, 0.0  ;;  %v3446_v12 = vadd.f32 %v2934_v7, %v2208_v15  ;;  %v3462_v53 = vadd.f32 %v2950_v38, %v2224_v45  ;;  %v1714_v37 = vmul.f32 %v9025_v59, %v12027_v41 }
 0x356   : > { %5777 = vmatpush1.bf16.msra.mxu0 %v5776_v32  ;;  %v4539_v19 = vmax.f32 %v4027_v60, 0.0  ;;  %v2210_v48 = vadd.f32 %v1698_v28, %v972_v49  ;;  %v2936_v34 = vmul.f32 %v9029_v8, %v12028_v18  ;;  %v2952_v33 = vmul.f32 %v9029_v8, %v12029_v61 }
 0x357   : > { %v4042_v62 = vadd.f32 %v9017_v14, %v3446_v12  ;;  %v4058_v51 = vadd.f32 %v9017_v14, %v3462_v53  ;;  %v2226_v36 = vadd.f32 %v1714_v37, %v988_v1  ;;  %v969_v7 = vmul.f32 %v9054_v5, %v12024_v56 }
 0x358   : > { %v5840_v38 = vpack.c.bf16 %v4539_v19, %v4523_v24  ;;  %v3448_v13 = vadd.f32 %v2936_v34, %v2210_v48  ;;  %v985_v60 = vmul.f32 %v9054_v5, %v12025_v9  ;;  %v1695_v15 = vmul.f32 %v9058_v23, %v12026_v16 }
 0x359   : > { %v4554_v45 = vmax.f32 %v4042_v62, 0.0  ;;  %v4570_v49 = vmax.f32 %v4058_v51, 0.0  ;;  %v3464_v32 = vadd.f32 %v2952_v33, %v2226_v36  ;;  %v1711_v28 = vmul.f32 %v9058_v23, %v12027_v41 }
 0x35a   : > { %5841 = vmatpush1.bf16.msra.mxu1 %v5840_v38  ;;  %v4044_v53 = vadd.f32 %v9033_v3, %v3448_v13  ;;  %v2207_v1 = vadd.f32 %v1695_v15, %v969_v7  ;;  %v2933_v24 = vmul.f32 %v9069_v10, %v12028_v18  ;;  %v2949_v12 = vmul.f32 %v9069_v10, %v12029_v61 }
 0x35b   : > { %v5778_v37 = vpack.c.bf16 %v4570_v49, %v4554_v45  ;;  %v4060_v19 = vadd.f32 %v9033_v3, %v3464_v32  ;;  %v2223_v48 = vadd.f32 %v1711_v28, %v985_v60  ;;  %v971_v34 = vmul.f32 %v9087_v46, %v12024_v56 }
 0x35c   : > { %v4556_v33 = vmax.f32 %v4044_v53, 0.0  ;;  %v3445_v62 = vadd.f32 %v2933_v24, %v2207_v1  ;;  %v987_v51 = vmul.f32 %v9087_v46, %v12025_v9  ;;  %v1697_v36 = vmul.f32 %v9091_v22, %v12026_v16 }
 0x35d   : > { %5779 = vmatprep.subr.bf16.mxu0 %v5778_v37  ;;  %v4572_v7 = vmax.f32 %v4060_v19, 0.0  ;;  %v3461_v38 = vadd.f32 %v2949_v12, %v2223_v48  ;;  %v1713_v13 = vmul.f32 %v9091_v22, %v12027_v41  ;;  %v2935_v60 = vmul.f32 %v9095_v55, %v12028_v18 }
 0x35e   : > { %v4041_v15 = vadd.f32 %v9082_v54, %v3445_v62  ;;  %v2209_v45 = vadd.f32 %v1697_v36, %v971_v34  ;;  %v2951_v49 = vmul.f32 %v9095_v55, %v12029_v61  ;;  %v1002_v32 = vmul.f32 %v8985_v58, %v11951_v40  ;;  %v12030_v36 = vld [vmem:[#allocation106_spill] sm:$0xff] }
 0x35f   : > { %v5842_v28 = vpack.c.bf16 %v4572_v7, %v4556_v33  ;;  %v4057_v53 = vadd.f32 %v9082_v54, %v3461_v38  ;;  %v2225_v1 = vadd.f32 %v1713_v13, %v987_v51  ;;  %v1018_v24 = vmul.f32 %v8985_v58, %v11952_v63  ;;  %v12031_v7 = vld [vmem:[#allocation97_spill] sm:$0xff] }
 0x360   : > { %v4553_v12 = vmax.f32 %v4041_v15, 0.0  ;;  %v3447_v37 = vadd.f32 %v2935_v60, %v2209_v45  ;;  %v1728_v19 = vmul.f32 %v8990_v39, %v11953_v31  ;;  %v1744_v48 = vmul.f32 %v8990_v39, %v11954_v50 }
 0x361   : > { %5843 = vmatprep.subr.bf16.mxu1 %v5842_v28  ;;  %v4569_v34 = vmax.f32 %v4057_v53, 0.0  ;;  %v3463_v62 = vadd.f32 %v2951_v49, %v2225_v1  ;;  %v2966_v33 = vmul.f32 %v8994_v2, %v12030_v36  ;;  %v2982_v51 = vmul.f32 %v8994_v2, %v12031_v7 }
 0x362   : > { %v4043_v38 = vadd.f32 %v9099_v27, %v3447_v37  ;;  %v2240_v13 = vadd.f32 %v1728_v19, %v1002_v32  ;;  %v2256_v15 = vadd.f32 %v1744_v48, %v1018_v24  ;;  %v1004_v60 = vmul.f32 %v9021_v47, %v11951_v40 }
 0x363   : > { %v5780_v45 = vpack.c.bf16 %v4569_v34, %v4553_v12  ;;  %v4059_v61 = vadd.f32 %v9099_v27, %v3463_v62  ;;  %v1020_v28 = vmul.f32 %v9021_v47, %v11952_v63  ;;  %v1730_v49 = vmul.f32 %v9025_v59, %v11953_v31 }
 0x364   : > { %v4555_v53 = vmax.f32 %v4043_v38, 0.0  ;;  %v3478_v1 = vadd.f32 %v2966_v33, %v2240_v13  ;;  %v3494_v18 = vadd.f32 %v2982_v51, %v2256_v15  ;;  %v1746_v37 = vmul.f32 %v9025_v59, %v11954_v50 }
 0x365   : > { %5781 = vmatpush1.bf16.msra.mxu0 %v5780_v45  ;;  %v4571_v32 = vmax.f32 %v4059_v61, 0.0  ;;  %v2242_v24 = vadd.f32 %v1730_v49, %v1004_v60  ;;  %v2968_v12 = vmul.f32 %v9029_v8, %v12030_v36  ;;  %v2984_v19 = vmul.f32 %v9029_v8, %v12031_v7 }
 0x366   : > { %v4074_v48 = vadd.f32 %v9017_v14, %v3478_v1  ;;  %v4090_v34 = vadd.f32 %v9017_v14, %v3494_v18  ;;  %v2258_v62 = vadd.f32 %v1746_v37, %v1020_v28  ;;  %v1001_v33 = vmul.f32 %v9054_v5, %v11951_v40 }
 0x367   : > { %v5844_v51 = vpack.c.bf16 %v4571_v32, %v4555_v53  ;;  %v3480_v38 = vadd.f32 %v2968_v12, %v2242_v24  ;;  %v1017_v61 = vmul.f32 %v9054_v5, %v11952_v63  ;;  %v1727_v13 = vmul.f32 %v9058_v23, %v11953_v31 }
 0x368   : > { %v4586_v15 = vmax.f32 %v4074_v48, 0.0  ;;  %v4602_v60 = vmax.f32 %v4090_v34, 0.0  ;;  %v3496_v45 = vadd.f32 %v2984_v19, %v2258_v62  ;;  %v1743_v49 = vmul.f32 %v9058_v23, %v11954_v50 }
 0x369   : > { %5845 = vmatpush1.bf16.msra.mxu1 %v5844_v51  ;;  %v4076_v18 = vadd.f32 %v9033_v3, %v3480_v38  ;;  %v2239_v28 = vadd.f32 %v1727_v13, %v1001_v33  ;;  %v2965_v53 = vmul.f32 %v9069_v10, %v12030_v36  ;;  %v2981_v1 = vmul.f32 %v9069_v10, %v12031_v7 }
 0x36a   : > { %v5782_v37 = vpack.c.bf16 %v4602_v60, %v4586_v15  ;;  %v4092_v32 = vadd.f32 %v9033_v3, %v3496_v45  ;;  %v2255_v24 = vadd.f32 %v1743_v49, %v1017_v61  ;;  %v1003_v12 = vmul.f32 %v9087_v46, %v11951_v40  ;;  %v12032_v45 = vld [vmem:[#allocation70_spill] sm:$0xff] }
 0x36b   : > { %v4588_v19 = vmax.f32 %v4076_v18, 0.0  ;;  %v3477_v48 = vadd.f32 %v2965_v53, %v2239_v28  ;;  %v1019_v34 = vmul.f32 %v9087_v46, %v11952_v63  ;;  %v1729_v62 = vmul.f32 %v9091_v22, %v11953_v31  ;;  %v12036_v31 = vld [vmem:[#allocation53_spill] sm:$0xff] }
 0x36c   : > { %5783 = vmatprep.subr.bf16.mxu0 %v5782_v37  ;;  %v4604_v33 = vmax.f32 %v4092_v32, 0.0  ;;  %v3493_v51 = vadd.f32 %v2981_v1, %v2255_v24  ;;  %v1745_v38 = vmul.f32 %v9091_v22, %v11954_v50  ;;  %v2967_v61 = vmul.f32 %v9095_v55, %v12030_v36  ;;  %v12033_v1 = vld [vmem:[#allocation117_spill] sm:$0xff] }
 0x36d   : > { %v4073_v13 = vadd.f32 %v9082_v54, %v3477_v48  ;;  %v2241_v15 = vadd.f32 %v1729_v62, %v1003_v12  ;;  %v2983_v60 = vmul.f32 %v9095_v55, %v12031_v7  ;;  %v1034_v49 = vmul.f32 %v8985_v58, %v12032_v45  ;;  %v12034_v50 = vld [vmem:[#allocation49_spill] sm:$0xff] }
 0x36e   : > { %v5846_v18 = vpack.c.bf16 %v4604_v33, %v4588_v19  ;;  %v4089_v28 = vadd.f32 %v9082_v54, %v3493_v51  ;;  %v2257_v53 = vadd.f32 %v1745_v38, %v1019_v34  ;;  %v1050_v37 = vmul.f32 %v8985_v58, %v12033_v1  ;;  %v12035_v48 = vld [vmem:[#allocation89_spill] sm:$0xff]  ;;  %v12037_v33 = vld [vmem:[#allocation96_spill] sm:$0xff] }
 0x36f   : > { %v4585_v32 = vmax.f32 %v4073_v13, 0.0  ;;  %v3479_v24 = vadd.f32 %v2967_v61, %v2241_v15  ;;  %v1760_v36 = vmul.f32 %v8990_v39, %v12034_v50  ;;  %v1776_v12 = vmul.f32 %v8990_v39, %v12035_v48 }
 0x370   : > { %5847 = vmatprep.subr.bf16.mxu1 %v5846_v18  ;;  %v4601_v62 = vmax.f32 %v4089_v28, 0.0  ;;  %v3495_v7 = vadd.f32 %v2983_v60, %v2257_v53  ;;  %v2998_v19 = vmul.f32 %v8994_v2, %v12036_v31  ;;  %v3014_v34 = vmul.f32 %v8994_v2, %v12037_v33 }
 0x371   : > { %v4075_v51 = vadd.f32 %v9099_v27, %v3479_v24  ;;  %v2272_v58 = vadd.f32 %v1760_v36, %v1034_v49  ;;  %v2288_v38 = vadd.f32 %v1776_v12, %v1050_v37  ;;  %v1036_v61 = vmul.f32 %v9021_v47, %v12032_v45 }
 0x372   : > { %v5784_v13 = vpack.c.bf16 %v4601_v62, %v4585_v32  ;;  %v4091_v15 = vadd.f32 %v9099_v27, %v3495_v7  ;;  %v1052_v39 = vmul.f32 %v9021_v47, %v12033_v1  ;;  %v1762_v60 = vmul.f32 %v9025_v59, %v12034_v50 }
 0x373   : > { %v4587_v18 = vmax.f32 %v4075_v51, 0.0  ;;  %v3510_v28 = vadd.f32 %v2998_v19, %v2272_v58  ;;  %v3526_v53 = vadd.f32 %v3014_v34, %v2288_v38  ;;  %v1778_v2 = vmul.f32 %v9025_v59, %v12035_v48 }
 0x374   : > { %5785 = vmatpush1.bf16.msra.mxu0 %v5784_v13  ;;  %v4603_v36 = vmax.f32 %v4091_v15, 0.0  ;;  %v2274_v49 = vadd.f32 %v1762_v60, %v1036_v61  ;;  %v3000_v37 = vmul.f32 %v9029_v8, %v12036_v31  ;;  %v3016_v7 = vmul.f32 %v9029_v8, %v12037_v33 }
 0x375   : > { %v4106_v47 = vadd.f32 %v9017_v14, %v3510_v28  ;;  %v4122_v32 = vadd.f32 %v9017_v14, %v3526_v53  ;;  %v2290_v24 = vadd.f32 %v1778_v2, %v1052_v39  ;;  %v1033_v12 = vmul.f32 %v9054_v5, %v12032_v45 }
 0x376   : > { %v5848_v62 = vpack.c.bf16 %v4603_v36, %v4587_v18  ;;  %v3512_v19 = vadd.f32 %v3000_v37, %v2274_v49  ;;  %v1049_v59 = vmul.f32 %v9054_v5, %v12033_v1  ;;  %v1759_v34 = vmul.f32 %v9058_v23, %v12034_v50 }
 0x377   : > { %v4618_v51 = vmax.f32 %v4106_v47, 0.0  ;;  %v4634_v58 = vmax.f32 %v4122_v32, 0.0  ;;  %v3528_v38 = vadd.f32 %v3016_v7, %v2290_v24  ;;  %v1775_v8 = vmul.f32 %v9058_v23, %v12035_v48  ;;  %v12038_v32 = vld [vmem:[#allocation12_spill] sm:$0xff] }
 0x378   : > { %5849 = vmatpush1.bf16.msra.mxu1 %v5848_v62  ;;  %v4108_v14 = vadd.f32 %v9033_v3, %v3512_v19  ;;  %v2271_v61 = vadd.f32 %v1759_v34, %v1033_v12  ;;  %v2997_v13 = vmul.f32 %v9069_v10, %v12036_v31  ;;  %v3013_v15 = vmul.f32 %v9069_v10, %v12037_v33  ;;  %v9967_v19 = vld [vmem:[%s11000_s1 + $0x21] ss:$4 sm:$0xff] }
 0x379   : > { %v5786_v5 = vpack.c.bf16 %v4634_v58, %v4618_v51  ;;  %v4124_v39 = vadd.f32 %v9033_v3, %v3528_v38  ;;  %v2287_v60 = vadd.f32 %v1775_v8, %v1049_v59  ;;  %v1035_v18 = vmul.f32 %v9087_v46, %v12032_v45  ;;  %v12039_v51 = vld [vmem:[#allocation19_spill] sm:$0xff]  ;;  %v12040_v38 = vld [vmem:[#allocation29_spill] sm:$0xff] }
 0x37a   : > { %v4620_v28 = vmax.f32 %v4108_v14, 0.0  ;;  %v3509_v53 = vadd.f32 %v2997_v13, %v2271_v61  ;;  %v1051_v23 = vmul.f32 %v9087_v46, %v12033_v1  ;;  %v1761_v2 = vmul.f32 %v9091_v22, %v12034_v50  ;;  %v9957_v46 = vld [vmem:[%s11000_s1 + $0x20] ss:$4 sm:$0xff] }
 0x37b   : > { %5787 = vmatprep.subr.bf16.mxu0 %v5786_v5  ;;  %v4636_v36 = vmax.f32 %v4124_v39, 0.0  ;;  %v3525_v49 = vadd.f32 %v3013_v15, %v2287_v60  ;;  %v1777_v10 = vmul.f32 %v9091_v22, %v12035_v48  ;;  %v2999_v3 = vmul.f32 %v9095_v55, %v12036_v31  ;;  %v12041_v61 = vld [vmem:[#allocation18_spill] sm:$0xff]  ;;  %v12042_v15 = vld [vmem:[#allocation28_spill] sm:$0xff]  ;;  %v12047_v1 = vld [vmem:[#allocation27_spill] sm:$0xff] }
 0x37c   : > { %v4105_v37 = vadd.f32 %v9082_v54, %v3509_v53  ;;  %v2273_v7 = vadd.f32 %v1761_v2, %v1035_v18  ;;  %v3015_v47 = vmul.f32 %v9095_v55, %v12037_v33  ;;  %v9961_v24 = vrot.slane %v9957_v46, %v12038_v32  ;;  %v6073_v60 = vld [vmem:[%s11000_s1 + $0x22] ss:$4 sm:$0xff] }
 0x37d   : > { %v5850_v12 = vpack.c.bf16 %v4636_v36, %v4620_v28  ;;  %v4121_v22 = vadd.f32 %v9082_v54, %v3525_v49  ;;  %v2289_v62 = vadd.f32 %v1777_v10, %v1051_v23  ;;  %v9971_v55 = vrot.slane %v9967_v19, %v12038_v32  ;;  %v9991_v28 = vld [vmem:[%s11001_s2 + $0x8] sm:$0xff]  ;;  %v12043_v23 = vld [vmem:[#allocation13_spill] sm:$0xff] }
 0x37e   : > { %v4617_v59 = vmax.f32 %v4105_v37, 0.0  ;;  %v3511_v34 = vadd.f32 %v2999_v3, %v2273_v7  ;;  %v558_v58 = vmul.f32 %v9961_v24, %v12039_v51  ;;  %v574_v8 = vmul.f32 %v9961_v24, %v12040_v38  ;;  %v12044_v7 = vld [vmem:[#allocation126_spill] sm:$0xff] }
 0x37f   : > { %5851 = vmatprep.subr.bf16.mxu1 %v5850_v12  ;;  %v4633_v54 = vmax.f32 %v4121_v22, 0.0  ;;  %v3527_v14 = vadd.f32 %v3015_v47, %v2289_v62  ;;  %v1284_v13 = vmul.f32 %v9971_v55, %v12041_v61  ;;  %v1300_v5 = vmul.f32 %v9971_v55, %v12042_v15  ;;  %v12045_v12 = vld [vmem:[#allocation37_spill] sm:$0xff] }
 0x380   : > { %v4107_v39 = vadd.f32 %v9099_v27, %v3511_v34  ;;  %v9986_v18 = vrot.slane %v6073_v60, %v12038_v32  ;;  %v9995_v53 = vrot.slane %v9991_v28, %v12038_v32  ;;  %v9999_v2 = vrot.slane %v9957_v46, %v12043_v23 }
 0x381   : > { %v5788_v36 = vpack.c.bf16 %v4633_v54, %v4617_v59  ;;  %v4123_v49 = vadd.f32 %v9099_v27, %v3527_v14  ;;  %v1796_v10 = vadd.f32 %v1284_v13, %v558_v58  ;;  %v1812_v3 = vadd.f32 %v1300_v5, %v574_v8  ;;  %v12046_v14 = vld [vmem:[#allocation17_spill] sm:$0xff] }
 0x382   : > { %v4619_v37 = vmax.f32 %v4107_v39, 0.0  ;;  %v2522_v47 = vmul.f32 %v9986_v18, %v12044_v7  ;;  %v2538_v22 = vmul.f32 %v9986_v18, %v12045_v12  ;;  %v560_v32 = vmul.f32 %v9999_v2, %v12039_v51 }
 0x383   : > { %5789 = vmatpush1.bf16.msra.mxu0 %v5788_v36  ;;  %v4635_v62 = vmax.f32 %v4123_v49, 0.0  ;;  %v576_v34 = vmul.f32 %v9999_v2, %v12040_v38  ;;  %v10012_v27 = vrot.slane %v9967_v19, %v12043_v23  ;;  %v10015_v59 = vrot.slane %v6073_v60, %v12043_v23 }
 0x384   : > { %v3034_v58 = vadd.f32 %v2522_v47, %v1796_v10  ;;  %v3050_v8 = vadd.f32 %v2538_v22, %v1812_v3  ;;  %v10019_v54 = vrot.slane %v9991_v28, %v12043_v23  ;;  %v10023_v13 = vrot.slane %v9957_v46, %v12046_v14 }
 0x385   : > { %v5852_v5 = vpack.c.bf16 %v4635_v62, %v4619_v37  ;;  %v1286_v39 = vmul.f32 %v10012_v27, %v12041_v61  ;;  %v1302_v36 = vmul.f32 %v10012_v27, %v12042_v15  ;;  %v2524_v49 = vmul.f32 %v10015_v59, %v12044_v7  ;;  %v6075_v37 = vld [vmem:[%s11002_s3] sm:$0x3f] }
 0x386   : > { %v3630_v10 = vadd.f32 %v9995_v53, %v3034_v58  ;;  %v3646_v3 = vadd.f32 %v9995_v53, %v3050_v8  ;;  %v2540_v23 = vmul.f32 %v10015_v59, %v12045_v12  ;;  %5008 = vmatmul.mubr.f32.vlgmr.msra.gmra.mrb[4].mxu0 %v6075_v37  ;;  %v557_v47 = vmul.f32 %v10023_v13, %v12039_v51 }
 0x387   : > { %5853 = vmatpush1.bf16.msra.mxu1 %v5852_v5  ;;  %v1798_v22 = vadd.f32 %v1286_v39, %v560_v32  ;;  %v1814_v62 = vadd.f32 %v1302_v36, %v576_v34  ;;  %v573_v33 = vmul.f32 %v10023_v13, %v12040_v38  ;;  %v10044_v58 = vrot.slane %v9967_v19, %v12046_v14  ;;  %v6076_v32 = vld [vmem:[%s11002_s3 + $0x8] sm:$0x3f] }
 0x388   : > { %v4142_v8 = vmax.f32 %v3630_v10, 0.0  ;;  %v4158_v31 = vmax.f32 %v3646_v3, 0.0  ;;  %v10047_v48 = vrot.slane %v6073_v60, %v12046_v14  ;;  %v10051_v50 = vrot.slane %v9991_v28, %v12046_v14  ;;  %5149 = vmatprep.mubr.f32.mxu0 %v6076_v32 }
 0x389   : > { %v3036_v34 = vadd.f32 %v2524_v49, %v1798_v22  ;;  %v3052_v5 = vadd.f32 %v2540_v23, %v1814_v62  ;;  %v1283_v39 = vmul.f32 %v10044_v58, %v12041_v61  ;;  %v1299_v36 = vmul.f32 %v10044_v58, %v12042_v15 }
 0x38a   : > { %v5854_v10 = vpack.c.bf16 %v4158_v31, %v4142_v8  ;;  %5079 = vmatmul.mubr.f32.vlgmr.msra.gmra.mrb[4].mxu1 %v6075_v37  ;;  %v2521_v3 = vmul.f32 %v10047_v48, %v12044_v7  ;;  %v2537_v14 = vmul.f32 %v10047_v48, %v12045_v12  ;;  %v10066_v45 = vrot.slane %v9957_v46, %v12047_v1 }
 0x38b   : > { %v3632_v49 = vadd.f32 %v10019_v54, %v3036_v34  ;;  %v3648_v23 = vadd.f32 %v10019_v54, %v3052_v5  ;;  %v1795_v22 = vadd.f32 %v1283_v39, %v557_v47  ;;  %v1811_v62 = vadd.f32 %v1299_v36, %v573_v33  ;;  %5220 = vmatprep.mubr.f32.mxu1 %v6076_v32 }
 0x38c   : > { %5855 = vmatprep.subr.bf16.mxu0 %v5854_v10  ;;  %v559_v31 = vmul.f32 %v10066_v45, %v12039_v51  ;;  %v575_v37 = vmul.f32 %v10066_v45, %v12040_v38  ;;  %v10076_v8 = vrot.slane %v9967_v19, %v12047_v1  ;;  %v10079_v46 = vrot.slane %v6073_v60, %v12047_v1 }
 0x38d   : > { %v4144_v34 = vmax.f32 %v3632_v49, 0.0  ;;  %v4160_v63 = vmax.f32 %v3648_v23, 0.0  ;;  %v3033_v5 = vadd.f32 %v2521_v3, %v1795_v22  ;;  %v3049_v47 = vadd.f32 %v2537_v14, %v1811_v62  ;;  %v12048_v3 = vld [vmem:[#allocation41_spill] sm:$0xff]  ;;  %v12049_v14 = vld [vmem:[#allocation34_spill] sm:$0xff]  ;;  %v12051_v22 = vld [vmem:[#allocation60_spill] sm:$0xff] }
 0x38e   : > { %v1285_v33 = vmul.f32 %v10076_v8, %v12041_v61  ;;  %v1301_v51 = vmul.f32 %v10076_v8, %v12042_v15  ;;  %v2523_v38 = vmul.f32 %v10079_v46, %v12044_v7  ;;  %v2539_v19 = vmul.f32 %v10079_v46, %v12045_v12 }
 0x38f   : > { %v5918_v32 = vpack.c.bf16 %v4160_v63, %v4144_v34  ;;  %v3629_v60 = vadd.f32 %v10051_v50, %v3033_v5  ;;  %v3645_v39 = vadd.f32 %v10051_v50, %v3049_v47  ;;  %v10093_v36 = vrot.slane %v9991_v28, %v12047_v1  ;;  %v12050_v63 = vld [vmem:[#allocation51_spill] sm:$0xff]  ;;  %v12052_v28 = vld [vmem:[#allocation30_spill] sm:$0xff] }
 0x390   : > { %v1797_v10 = vadd.f32 %v1285_v33, %v559_v31  ;;  %v1813_v61 = vadd.f32 %v1301_v51, %v575_v37  ;;  %v590_v15 = vmul.f32 %v9961_v24, %v12048_v3  ;;  %v606_v7 = vmul.f32 %v9961_v24, %v12049_v14  ;;  %v12053_v37 = vld [vmem:[#allocation74_spill] sm:$0xff] }
 0x391   : > { %5919 = vmatprep.subr.bf16.mxu1 %v5918_v32  ;;  %v4141_v49 = vmax.f32 %v3629_v60, 0.0  ;;  %v4157_v12 = vmax.f32 %v3645_v39, 0.0  ;;  %v1316_v23 = vmul.f32 %v9971_v55, %v12050_v63  ;;  %v1332_v62 = vmul.f32 %v9971_v55, %v12051_v22 }
 0x392   : > { %v3035_v34 = vadd.f32 %v2523_v38, %v1797_v10  ;;  %v3051_v1 = vadd.f32 %v2539_v19, %v1813_v61  ;;  %v2554_v31 = vmul.f32 %v9986_v18, %v12052_v28  ;;  %v2570_v5 = vmul.f32 %v9986_v18, %v12053_v37 }
 0x393   : > { %v5856_v47 = vpack.c.bf16 %v4157_v12, %v4141_v49  ;;  %v1828_v33 = vadd.f32 %v1316_v23, %v590_v15  ;;  %v1844_v51 = vadd.f32 %v1332_v62, %v606_v7  ;;  %v592_v32 = vmul.f32 %v9999_v2, %v12048_v3 }
 0x394   : > { %v3631_v60 = vadd.f32 %v10093_v36, %v3035_v34  ;;  %v3647_v39 = vadd.f32 %v10093_v36, %v3051_v1  ;;  %v608_v38 = vmul.f32 %v9999_v2, %v12049_v14  ;;  %v1318_v19 = vmul.f32 %v10012_v27, %v12050_v63 }
 0x395   : > { %5857 = vmatpush1.bf16.msra.mxu0 %v5856_v47  ;;  %v3066_v10 = vadd.f32 %v2554_v31, %v1828_v33  ;;  %v3082_v61 = vadd.f32 %v2570_v5, %v1844_v51  ;;  %v1334_v15 = vmul.f32 %v10012_v27, %v12051_v22  ;;  %v2556_v7 = vmul.f32 %v10015_v59, %v12052_v28 }
 0x396   : > { %v4143_v49 = vmax.f32 %v3631_v60, 0.0  ;;  %v4159_v12 = vmax.f32 %v3647_v39, 0.0  ;;  %v1830_v23 = vadd.f32 %v1318_v19, %v592_v32  ;;  %v2572_v62 = vmul.f32 %v10015_v59, %v12053_v37 }
 0x397   : > { %v3662_v34 = vadd.f32 %v9995_v53, %v3066_v10  ;;  %v3678_v1 = vadd.f32 %v9995_v53, %v3082_v61  ;;  %v1846_v40 = vadd.f32 %v1334_v15, %v608_v38  ;;  %v589_v31 = vmul.f32 %v10023_v13, %v12048_v3 }
 0x398   : > { %v5920_v5 = vpack.c.bf16 %v4159_v12, %v4143_v49  ;;  %v3068_v47 = vadd.f32 %v2556_v7, %v1830_v23  ;;  %v605_v33 = vmul.f32 %v10023_v13, %v12049_v14  ;;  %v1315_v51 = vmul.f32 %v10044_v58, %v12050_v63 }
 0x399   : > { %v4174_v32 = vmax.f32 %v3662_v34, 0.0  ;;  %v4190_v60 = vmax.f32 %v3678_v1, 0.0  ;;  %v3084_v39 = vadd.f32 %v2572_v62, %v1846_v40  ;;  %v1331_v19 = vmul.f32 %v10044_v58, %v12051_v22 }
 0x39a   : > { %5921 = vmatpush1.bf16.msra.mxu1 %v5920_v5  ;;  %v3664_v38 = vadd.f32 %v10019_v54, %v3068_v47  ;;  %v1827_v10 = vadd.f32 %v1315_v51, %v589_v31  ;;  %v2553_v61 = vmul.f32 %v10047_v48, %v12052_v28  ;;  %v2569_v15 = vmul.f32 %v10047_v48, %v12053_v37 }
 0x39b   : > { %v5858_v7 = vpack.c.bf16 %v4190_v60, %v4174_v32  ;;  %v3680_v49 = vadd.f32 %v10019_v54, %v3084_v39  ;;  %v1843_v12 = vadd.f32 %v1331_v19, %v605_v33  ;;  %v591_v40 = vmul.f32 %v10066_v45, %v12048_v3 }
 0x39c   : > { %v4176_v23 = vmax.f32 %v3664_v38, 0.0  ;;  %v3065_v62 = vadd.f32 %v2553_v61, %v1827_v10  ;;  %v607_v34 = vmul.f32 %v10066_v45, %v12049_v14  ;;  %v1317_v1 = vmul.f32 %v10076_v8, %v12050_v63 }
 0x39d   : > { %5859 = vmatprep.subr.bf16.mxu0 %v5858_v7  ;;  %v4192_v31 = vmax.f32 %v3680_v49, 0.0  ;;  %v3081_v5 = vadd.f32 %v2569_v15, %v1843_v12  ;;  %v1333_v47 = vmul.f32 %v10076_v8, %v12051_v22  ;;  %v2555_v33 = vmul.f32 %v10079_v46, %v12052_v28 }
 0x39e   : > { %v3661_v51 = vadd.f32 %v10051_v50, %v3065_v62  ;;  %v1829_v3 = vadd.f32 %v1317_v1, %v591_v40  ;;  %v2571_v32 = vmul.f32 %v10079_v46, %v12053_v37  ;;  %v622_v14 = vmul.f32 %v9961_v24, %v11975_v43 }
 0x39f   : > { %v5922_v60 = vpack.c.bf16 %v4192_v31, %v4176_v23  ;;  %v3677_v63 = vadd.f32 %v10051_v50, %v3081_v5  ;;  %v1845_v39 = vadd.f32 %v1333_v47, %v607_v34  ;;  %v638_v19 = vmul.f32 %v9961_v24, %v11976_v42 }
 0x3a0   : > { %v4173_v22 = vmax.f32 %v3661_v51, 0.0  ;;  %v3067_v38 = vadd.f32 %v2555_v33, %v1829_v3  ;;  %v1348_v28 = vmul.f32 %v9971_v55, %v11977_v26  ;;  %v1364_v10 = vmul.f32 %v9971_v55, %v11978_v35 }
 0x3a1   : > { %5923 = vmatprep.subr.bf16.mxu1 %v5922_v60  ;;  %v4189_v37 = vmax.f32 %v3677_v63, 0.0  ;;  %v3083_v61 = vadd.f32 %v2571_v32, %v1845_v39  ;;  %v2586_v15 = vmul.f32 %v9986_v18, %v11979_v25  ;;  %v2602_v7 = vmul.f32 %v9986_v18, %v11980_v29 }
 0x3a2   : > { %v3663_v49 = vadd.f32 %v10093_v36, %v3067_v38  ;;  %v1860_v12 = vadd.f32 %v1348_v28, %v622_v14  ;;  %v1876_v40 = vadd.f32 %v1364_v10, %v638_v19  ;;  %v624_v23 = vmul.f32 %v9999_v2, %v11975_v43 }
 0x3a3   : > { %v5860_v62 = vpack.c.bf16 %v4189_v37, %v4173_v22  ;;  %v3679_v34 = vadd.f32 %v10093_v36, %v3083_v61  ;;  %v640_v1 = vmul.f32 %v9999_v2, %v11976_v42  ;;  %v1350_v31 = vmul.f32 %v10012_v27, %v11977_v26 }
 0x3a4   : > { %v4175_v5 = vmax.f32 %v3663_v49, 0.0  ;;  %v3098_v47 = vadd.f32 %v2586_v15, %v1860_v12  ;;  %v3114_v33 = vadd.f32 %v2602_v7, %v1876_v40  ;;  %v1366_v51 = vmul.f32 %v10012_v27, %v11978_v35 }
 0x3a5   : > { %5861 = vmatpush1.bf16.msra.mxu0 %v5860_v62  ;;  %v4191_v3 = vmax.f32 %v3679_v34, 0.0  ;;  %v1862_v32 = vadd.f32 %v1350_v31, %v624_v23  ;;  %v2588_v14 = vmul.f32 %v10015_v59, %v11979_v25  ;;  %v2604_v60 = vmul.f32 %v10015_v59, %v11980_v29 }
 0x3a6   : > { %v3694_v63 = vadd.f32 %v9995_v53, %v3098_v47  ;;  %v3710_v39 = vadd.f32 %v9995_v53, %v3114_v33  ;;  %v1878_v19 = vadd.f32 %v1366_v51, %v640_v1  ;;  %v621_v22 = vmul.f32 %v10023_v13, %v11975_v43 }
 0x3a7   : > { %v5924_v38 = vpack.c.bf16 %v4191_v3, %v4175_v5  ;;  %v3100_v28 = vadd.f32 %v2588_v14, %v1862_v32  ;;  %v637_v10 = vmul.f32 %v10023_v13, %v11976_v42  ;;  %v1347_v37 = vmul.f32 %v10044_v58, %v11977_v26 }
 0x3a8   : > { %v4206_v61 = vmax.f32 %v3694_v63, 0.0  ;;  %v4222_v15 = vmax.f32 %v3710_v39, 0.0  ;;  %v3116_v7 = vadd.f32 %v2604_v60, %v1878_v19  ;;  %v1363_v49 = vmul.f32 %v10044_v58, %v11978_v35 }
 0x3a9   : > { %5925 = vmatpush1.bf16.msra.mxu1 %v5924_v38  ;;  %v3696_v12 = vadd.f32 %v10019_v54, %v3100_v28  ;;  %v1859_v40 = vadd.f32 %v1347_v37, %v621_v22  ;;  %v2585_v23 = vmul.f32 %v10047_v48, %v11979_v25  ;;  %v2601_v62 = vmul.f32 %v10047_v48, %v11980_v29 }
 0x3aa   : > { %v5862_v34 = vpack.c.bf16 %v4222_v15, %v4206_v61  ;;  %v3712_v1 = vadd.f32 %v10019_v54, %v3116_v7  ;;  %v1875_v31 = vadd.f32 %v1363_v49, %v637_v10  ;;  %v623_v5 = vmul.f32 %v10066_v45, %v11975_v43 }
 0x3ab   : > { %v4208_v47 = vmax.f32 %v3696_v12, 0.0  ;;  %v3097_v33 = vadd.f32 %v2585_v23, %v1859_v40  ;;  %v639_v51 = vmul.f32 %v10066_v45, %v11976_v42  ;;  %v1349_v3 = vmul.f32 %v10076_v8, %v11977_v26 }
 0x3ac   : > { %5863 = vmatprep.subr.bf16.mxu0 %v5862_v34  ;;  %v4224_v32 = vmax.f32 %v3712_v1, 0.0  ;;  %v3113_v14 = vadd.f32 %v2601_v62, %v1875_v31  ;;  %v1365_v60 = vmul.f32 %v10076_v8, %v11978_v35  ;;  %v2587_v63 = vmul.f32 %v10079_v46, %v11979_v25 }
 0x3ad   : > { %v3693_v39 = vadd.f32 %v10051_v50, %v3097_v33  ;;  %v1861_v43 = vadd.f32 %v1349_v3, %v623_v5  ;;  %v2603_v19 = vmul.f32 %v10079_v46, %v11980_v29  ;;  %v654_v42 = vmul.f32 %v9961_v24, %v11842_v21 }
 0x3ae   : > { %v5926_v22 = vpack.c.bf16 %v4224_v32, %v4208_v47  ;;  %v3709_v26 = vadd.f32 %v10051_v50, %v3113_v14  ;;  %v1877_v38 = vadd.f32 %v1365_v60, %v639_v51  ;;  %v670_v28 = vmul.f32 %v9961_v24, %v11844_v17 }
 0x3af   : > { %v4205_v35 = vmax.f32 %v3693_v39, 0.0  ;;  %v3099_v10 = vadd.f32 %v2587_v63, %v1861_v43  ;;  %v1380_v25 = vmul.f32 %v9971_v55, %v11846_v4  ;;  %v1396_v37 = vmul.f32 %v9971_v55, %v11848_v0 }
 0x3b0   : > { %5927 = vmatprep.subr.bf16.mxu1 %v5926_v22  ;;  %v4221_v29 = vmax.f32 %v3709_v26, 0.0  ;;  %v3115_v61 = vadd.f32 %v2603_v19, %v1877_v38  ;;  %v2618_v15 = vmul.f32 %v9986_v18, %v11850_v20  ;;  %v2634_v7 = vmul.f32 %v9986_v18, %v11851_v11 }
 0x3b1   : > { %v3695_v49 = vadd.f32 %v10093_v36, %v3099_v10  ;;  %v1892_v12 = vadd.f32 %v1380_v25, %v654_v42  ;;  %v1908_v40 = vadd.f32 %v1396_v37, %v670_v28  ;;  %v656_v23 = vmul.f32 %v9999_v2, %v11842_v21 }
 0x3b2   : > { %v5864_v62 = vpack.c.bf16 %v4221_v29, %v4205_v35  ;;  %v3711_v34 = vadd.f32 %v10093_v36, %v3115_v61  ;;  %v672_v1 = vmul.f32 %v9999_v2, %v11844_v17  ;;  %v1382_v31 = vmul.f32 %v10012_v27, %v11846_v4 }
 0x3b3   : > { %v4207_v5 = vmax.f32 %v3695_v49, 0.0  ;;  %v3130_v47 = vadd.f32 %v2618_v15, %v1892_v12  ;;  %v3146_v33 = vadd.f32 %v2634_v7, %v1908_v40  ;;  %v1398_v51 = vmul.f32 %v10012_v27, %v11848_v0 }
 0x3b4   : > { %5865 = vmatpush1.bf16.msra.mxu0 %v5864_v62  ;;  %v4223_v3 = vmax.f32 %v3711_v34, 0.0  ;;  %v1894_v32 = vadd.f32 %v1382_v31, %v656_v23  ;;  %v2620_v14 = vmul.f32 %v10015_v59, %v11850_v20  ;;  %v2636_v60 = vmul.f32 %v10015_v59, %v11851_v11 }
 0x3b5   : > { %v3726_v63 = vadd.f32 %v9995_v53, %v3130_v47  ;;  %v3742_v39 = vadd.f32 %v9995_v53, %v3146_v33  ;;  %v1910_v43 = vadd.f32 %v1398_v51, %v672_v1  ;;  %v653_v19 = vmul.f32 %v10023_v13, %v11842_v21 }
 0x3b6   : > { %v5928_v42 = vpack.c.bf16 %v4223_v3, %v4207_v5  ;;  %v3132_v22 = vadd.f32 %v2620_v14, %v1894_v32  ;;  %v669_v26 = vmul.f32 %v10023_v13, %v11844_v17  ;;  %v1379_v38 = vmul.f32 %v10044_v58, %v11846_v4 }
 0x3b7   : > { %v4238_v28 = vmax.f32 %v3726_v63, 0.0  ;;  %v4254_v35 = vmax.f32 %v3742_v39, 0.0  ;;  %v3148_v10 = vadd.f32 %v2636_v60, %v1910_v43  ;;  %v1395_v25 = vmul.f32 %v10044_v58, %v11848_v0 }
 0x3b8   : > { %5929 = vmatpush1.bf16.msra.mxu1 %v5928_v42  ;;  %v3728_v37 = vadd.f32 %v10019_v54, %v3132_v22  ;;  %v1891_v29 = vadd.f32 %v1379_v38, %v653_v19  ;;  %v2617_v61 = vmul.f32 %v10047_v48, %v11850_v20  ;;  %v2633_v15 = vmul.f32 %v10047_v48, %v11851_v11  ;;  %v12054_v42 = vld [vmem:[#allocation64_spill] sm:$0xff] }
 0x3b9   : > { %v5866_v7 = vpack.c.bf16 %v4254_v35, %v4238_v28  ;;  %v3744_v49 = vadd.f32 %v10019_v54, %v3148_v10  ;;  %v1907_v12 = vadd.f32 %v1395_v25, %v669_v26  ;;  %v655_v40 = vmul.f32 %v10066_v45, %v11842_v21 }
 0x3ba   : > { %v4240_v23 = vmax.f32 %v3728_v37, 0.0  ;;  %v3129_v62 = vadd.f32 %v2617_v61, %v1891_v29  ;;  %v671_v34 = vmul.f32 %v10066_v45, %v11844_v17  ;;  %v1381_v1 = vmul.f32 %v10076_v8, %v11846_v4 }
 0x3bb   : > { %5867 = vmatprep.subr.bf16.mxu0 %v5866_v7  ;;  %v4256_v31 = vmax.f32 %v3744_v49, 0.0  ;;  %v3145_v5 = vadd.f32 %v2633_v15, %v1907_v12  ;;  %v1397_v47 = vmul.f32 %v10076_v8, %v11848_v0  ;;  %v2619_v33 = vmul.f32 %v10079_v46, %v11850_v20 }
 0x3bc   : > { %v3725_v51 = vadd.f32 %v10051_v50, %v3129_v62  ;;  %v1893_v21 = vadd.f32 %v1381_v1, %v655_v40  ;;  %v2635_v3 = vmul.f32 %v10079_v46, %v11851_v11  ;;  %v686_v17 = vmul.f32 %v9961_v24, %v11876_v30 }
 0x3bd   : > { %v5930_v32 = vpack.c.bf16 %v4256_v31, %v4240_v23  ;;  %v3741_v4 = vadd.f32 %v10051_v50, %v3145_v5  ;;  %v1909_v14 = vadd.f32 %v1397_v47, %v671_v34  ;;  %v702_v60 = vmul.f32 %v9961_v24, %v11878_v44 }
 0x3be   : > { %v4237_v0 = vmax.f32 %v3725_v51, 0.0  ;;  %v3131_v63 = vadd.f32 %v2619_v33, %v1893_v21  ;;  %v1412_v20 = vmul.f32 %v9971_v55, %v11879_v52  ;;  %v1428_v39 = vmul.f32 %v9971_v55, %v11882_v57 }
 0x3bf   : > { %5931 = vmatprep.subr.bf16.mxu1 %v5930_v32  ;;  %v4253_v11 = vmax.f32 %v3741_v4, 0.0  ;;  %v3147_v43 = vadd.f32 %v2635_v3, %v1909_v14  ;;  %v2650_v19 = vmul.f32 %v9986_v18, %v11883_v6  ;;  %v2666_v22 = vmul.f32 %v9986_v18, %v12054_v42 }
 0x3c0   : > { %v3727_v26 = vadd.f32 %v10093_v36, %v3131_v63  ;;  %v1924_v38 = vadd.f32 %v1412_v20, %v686_v17  ;;  %v1940_v28 = vadd.f32 %v1428_v39, %v702_v60  ;;  %v688_v35 = vmul.f32 %v9999_v2, %v11876_v30 }
 0x3c1   : > { %v5868_v10 = vpack.c.bf16 %v4253_v11, %v4237_v0  ;;  %v3743_v25 = vadd.f32 %v10093_v36, %v3147_v43  ;;  %v704_v37 = vmul.f32 %v9999_v2, %v11878_v44  ;;  %v1414_v29 = vmul.f32 %v10012_v27, %v11879_v52 }
 0x3c2   : > { %v4239_v61 = vmax.f32 %v3727_v26, 0.0  ;;  %v3162_v15 = vadd.f32 %v2650_v19, %v1924_v38  ;;  %v3178_v7 = vadd.f32 %v2666_v22, %v1940_v28  ;;  %v1430_v49 = vmul.f32 %v10012_v27, %v11882_v57 }
 0x3c3   : > { %5869 = vmatpush1.bf16.msra.mxu0 %v5868_v10  ;;  %v4255_v12 = vmax.f32 %v3743_v25, 0.0  ;;  %v1926_v40 = vadd.f32 %v1414_v29, %v688_v35  ;;  %v2652_v23 = vmul.f32 %v10015_v59, %v11883_v6  ;;  %v2668_v62 = vmul.f32 %v10015_v59, %v12054_v42 }
 0x3c4   : > { %v3758_v34 = vadd.f32 %v9995_v53, %v3162_v15  ;;  %v3774_v1 = vadd.f32 %v9995_v53, %v3178_v7  ;;  %v1942_v31 = vadd.f32 %v1430_v49, %v704_v37  ;;  %v685_v5 = vmul.f32 %v10023_v13, %v11876_v30  ;;  %v12056_v49 = vld [vmem:[#allocation63_spill] sm:$0xff] }
 0x3c5   : > { %v5932_v47 = vpack.c.bf16 %v4255_v12, %v4239_v61  ;;  %v3164_v33 = vadd.f32 %v2652_v23, %v1926_v40  ;;  %v701_v51 = vmul.f32 %v10023_v13, %v11878_v44  ;;  %v1411_v21 = vmul.f32 %v10044_v58, %v11879_v52  ;;  %v12055_v61 = vld [vmem:[#allocation68_spill] sm:$0xff]  ;;  %v12057_v23 = vld [vmem:[#allocation69_spill] sm:$0xff] }
 0x3c6   : > { %v4270_v3 = vmax.f32 %v3758_v34, 0.0  ;;  %v4286_v17 = vmax.f32 %v3774_v1, 0.0  ;;  %v3180_v32 = vadd.f32 %v2668_v62, %v1942_v31  ;;  %v1427_v4 = vmul.f32 %v10044_v58, %v11882_v57  ;;  %v12058_v62 = vld [vmem:[#allocation42_spill] sm:$0xff]  ;;  %v12059_v31 = vld [vmem:[#allocation43_spill] sm:$0xff] }
 0x3c7   : > { %5933 = vmatpush1.bf16.msra.mxu1 %v5932_v47  ;;  %v3760_v14 = vadd.f32 %v10019_v54, %v3164_v33  ;;  %v1923_v60 = vadd.f32 %v1411_v21, %v685_v5  ;;  %v2649_v0 = vmul.f32 %v10047_v48, %v11883_v6  ;;  %v2665_v63 = vmul.f32 %v10047_v48, %v12054_v42  ;;  %v12060_v47 = vld [vmem:[#allocation44_spill] sm:$0xff] }
 0x3c8   : > { %v5870_v20 = vpack.c.bf16 %v4286_v17, %v4270_v3  ;;  %v3776_v39 = vadd.f32 %v10019_v54, %v3180_v32  ;;  %v1939_v11 = vadd.f32 %v1427_v4, %v701_v51  ;;  %v687_v43 = vmul.f32 %v10066_v45, %v11876_v30 }
 0x3c9   : > { %v4272_v19 = vmax.f32 %v3760_v14, 0.0  ;;  %v3161_v22 = vadd.f32 %v2649_v0, %v1923_v60  ;;  %v703_v26 = vmul.f32 %v10066_v45, %v11878_v44  ;;  %v1413_v38 = vmul.f32 %v10076_v8, %v11879_v52 }
 0x3ca   : > { %5871 = vmatprep.subr.bf16.mxu0 %v5870_v20  ;;  %v4288_v28 = vmax.f32 %v3776_v39, 0.0  ;;  %v3177_v35 = vadd.f32 %v2665_v63, %v1939_v11  ;;  %v1429_v10 = vmul.f32 %v10076_v8, %v11882_v57  ;;  %v2651_v25 = vmul.f32 %v10079_v46, %v11883_v6 }
 0x3cb   : > { %v3757_v37 = vadd.f32 %v10051_v50, %v3161_v22  ;;  %v1925_v30 = vadd.f32 %v1413_v38, %v687_v43  ;;  %v2667_v29 = vmul.f32 %v10079_v46, %v12054_v42  ;;  %v718_v44 = vmul.f32 %v9961_v24, %v12055_v61 }
 0x3cc   : > { %v5934_v15 = vpack.c.bf16 %v4288_v28, %v4272_v19  ;;  %v3773_v52 = vadd.f32 %v10051_v50, %v3177_v35  ;;  %v1941_v7 = vadd.f32 %v1429_v10, %v703_v26  ;;  %v734_v12 = vmul.f32 %v9961_v24, %v12056_v49 }
 0x3cd   : > { %v4269_v57 = vmax.f32 %v3757_v37, 0.0  ;;  %v3163_v40 = vadd.f32 %v2651_v25, %v1925_v30  ;;  %v1444_v6 = vmul.f32 %v9971_v55, %v12057_v23  ;;  %v1460_v34 = vmul.f32 %v9971_v55, %v12058_v62 }
 0x3ce   : > { %5935 = vmatprep.subr.bf16.mxu1 %v5934_v15  ;;  %v4285_v42 = vmax.f32 %v3773_v52, 0.0  ;;  %v3179_v1 = vadd.f32 %v2667_v29, %v1941_v7  ;;  %v2682_v5 = vmul.f32 %v9986_v18, %v12059_v31  ;;  %v2698_v33 = vmul.f32 %v9986_v18, %v12060_v47 }
 0x3cf   : > { %v3759_v51 = vadd.f32 %v10093_v36, %v3163_v40  ;;  %v1956_v21 = vadd.f32 %v1444_v6, %v718_v44  ;;  %v1972_v3 = vadd.f32 %v1460_v34, %v734_v12  ;;  %v720_v17 = vmul.f32 %v9999_v2, %v12055_v61 }
 0x3d0   : > { %v5872_v32 = vpack.c.bf16 %v4285_v42, %v4269_v57  ;;  %v3775_v4 = vadd.f32 %v10093_v36, %v3179_v1  ;;  %v736_v14 = vmul.f32 %v9999_v2, %v12056_v49  ;;  %v1446_v60 = vmul.f32 %v10012_v27, %v12057_v23 }
 0x3d1   : > { %v4271_v0 = vmax.f32 %v3759_v51, 0.0  ;;  %v3194_v63 = vadd.f32 %v2682_v5, %v1956_v21  ;;  %v3210_v20 = vadd.f32 %v2698_v33, %v1972_v3  ;;  %v1462_v39 = vmul.f32 %v10012_v27, %v12058_v62 }
 0x3d2   : > { %5873 = vmatpush1.bf16.msra.mxu0 %v5872_v32  ;;  %v4287_v11 = vmax.f32 %v3775_v4, 0.0  ;;  %v1958_v43 = vadd.f32 %v1446_v60, %v720_v17  ;;  %v2684_v19 = vmul.f32 %v10015_v59, %v12059_v31  ;;  %v2700_v22 = vmul.f32 %v10015_v59, %v12060_v47 }
 0x3d3   : > { %v3790_v26 = vadd.f32 %v9995_v53, %v3194_v63  ;;  %v3806_v38 = vadd.f32 %v9995_v53, %v3210_v20  ;;  %v1974_v28 = vadd.f32 %v1462_v39, %v736_v14  ;;  %v717_v35 = vmul.f32 %v10023_v13, %v12055_v61  ;;  %v12062_v39 = vld [vmem:[#allocation75_spill] sm:$0xff] }
 0x3d4   : > { %v5936_v10 = vpack.c.bf16 %v4287_v11, %v4271_v0  ;;  %v3196_v25 = vadd.f32 %v2684_v19, %v1958_v43  ;;  %v733_v37 = vmul.f32 %v10023_v13, %v12056_v49  ;;  %v1443_v30 = vmul.f32 %v10044_v58, %v12057_v23  ;;  %v12061_v0 = vld [vmem:[#allocation45_spill] sm:$0xff]  ;;  %v12063_v19 = vld [vmem:[#allocation82_spill] sm:$0xff] }
 0x3d5   : > { %v4302_v29 = vmax.f32 %v3790_v26, 0.0  ;;  %v4318_v44 = vmax.f32 %v3806_v38, 0.0  ;;  %v3212_v15 = vadd.f32 %v2700_v22, %v1974_v28  ;;  %v1459_v52 = vmul.f32 %v10044_v58, %v12058_v62  ;;  %v12064_v22 = vld [vmem:[#allocation85_spill] sm:$0xff]  ;;  %v12065_v28 = vld [vmem:[#allocation83_spill] sm:$0xff] }
 0x3d6   : > { %5937 = vmatpush1.bf16.msra.mxu1 %v5936_v10  ;;  %v3792_v7 = vadd.f32 %v10019_v54, %v3196_v25  ;;  %v1955_v12 = vadd.f32 %v1443_v30, %v717_v35  ;;  %v2681_v57 = vmul.f32 %v10047_v48, %v12059_v31  ;;  %v2697_v40 = vmul.f32 %v10047_v48, %v12060_v47  ;;  %v12066_v10 = vld [vmem:[#allocation86_spill] sm:$0xff] }
 0x3d7   : > { %v5874_v6 = vpack.c.bf16 %v4318_v44, %v4302_v29  ;;  %v3808_v34 = vadd.f32 %v10019_v54, %v3212_v15  ;;  %v1971_v42 = vadd.f32 %v1459_v52, %v733_v37  ;;  %v719_v1 = vmul.f32 %v10066_v45, %v12055_v61 }
 0x3d8   : > { %v4304_v5 = vmax.f32 %v3792_v7, 0.0  ;;  %v3193_v33 = vadd.f32 %v2681_v57, %v1955_v12  ;;  %v735_v51 = vmul.f32 %v10066_v45, %v12056_v49  ;;  %v1445_v21 = vmul.f32 %v10076_v8, %v12057_v23 }
 0x3d9   : > { %5875 = vmatprep.subr.bf16.mxu0 %v5874_v6  ;;  %v4320_v3 = vmax.f32 %v3808_v34, 0.0  ;;  %v3209_v17 = vadd.f32 %v2697_v40, %v1971_v42  ;;  %v1461_v32 = vmul.f32 %v10076_v8, %v12058_v62  ;;  %v2683_v4 = vmul.f32 %v10079_v46, %v12059_v31 }
 0x3da   : > { %v3789_v14 = vadd.f32 %v10051_v50, %v3193_v33  ;;  %v1957_v61 = vadd.f32 %v1445_v21, %v719_v1  ;;  %v2699_v60 = vmul.f32 %v10079_v46, %v12060_v47  ;;  %v750_v49 = vmul.f32 %v9961_v24, %v12061_v0 }
 0x3db   : > { %v5938_v63 = vpack.c.bf16 %v4320_v3, %v4304_v5  ;;  %v3805_v23 = vadd.f32 %v10051_v50, %v3209_v17  ;;  %v1973_v20 = vadd.f32 %v1461_v32, %v735_v51  ;;  %v766_v11 = vmul.f32 %v9961_v24, %v12062_v39 }
 0x3dc   : > { %v4301_v62 = vmax.f32 %v3789_v14, 0.0  ;;  %v3195_v43 = vadd.f32 %v2683_v4, %v1957_v61  ;;  %v1476_v31 = vmul.f32 %v9971_v55, %v12063_v19  ;;  %v1492_v26 = vmul.f32 %v9971_v55, %v12064_v22 }
 0x3dd   : > { %5939 = vmatprep.subr.bf16.mxu1 %v5938_v63  ;;  %v4317_v47 = vmax.f32 %v3805_v23, 0.0  ;;  %v3211_v38 = vadd.f32 %v2699_v60, %v1973_v20  ;;  %v2714_v35 = vmul.f32 %v9986_v18, %v12065_v28  ;;  %v2730_v25 = vmul.f32 %v9986_v18, %v12066_v10 }
 0x3de   : > { %v3791_v37 = vadd.f32 %v10093_v36, %v3195_v43  ;;  %v1988_v30 = vadd.f32 %v1476_v31, %v750_v49  ;;  %v2004_v29 = vadd.f32 %v1492_v26, %v766_v11  ;;  %v752_v44 = vmul.f32 %v9999_v2, %v12061_v0 }
 0x3df   : > { %v5876_v15 = vpack.c.bf16 %v4317_v47, %v4301_v62  ;;  %v3807_v52 = vadd.f32 %v10093_v36, %v3211_v38  ;;  %v768_v7 = vmul.f32 %v9999_v2, %v12062_v39  ;;  %v1478_v12 = vmul.f32 %v10012_v27, %v12063_v19 }
 0x3e0   : > { %v4303_v57 = vmax.f32 %v3791_v37, 0.0  ;;  %v3226_v40 = vadd.f32 %v2714_v35, %v1988_v30  ;;  %v3242_v6 = vadd.f32 %v2730_v25, %v2004_v29  ;;  %v1494_v34 = vmul.f32 %v10012_v27, %v12064_v22 }
 0x3e1   : > { %5877 = vmatpush1.bf16.msra.mxu0 %v5876_v15  ;;  %v4319_v42 = vmax.f32 %v3807_v52, 0.0  ;;  %v1990_v1 = vadd.f32 %v1478_v12, %v752_v44  ;;  %v2716_v5 = vmul.f32 %v10015_v59, %v12065_v28  ;;  %v2732_v33 = vmul.f32 %v10015_v59, %v12066_v10 }
 0x3e2   : > { %v3822_v51 = vadd.f32 %v9995_v53, %v3226_v40  ;;  %v3838_v21 = vadd.f32 %v9995_v53, %v3242_v6  ;;  %v2006_v3 = vadd.f32 %v1494_v34, %v768_v7  ;;  %v749_v17 = vmul.f32 %v10023_v13, %v12061_v0  ;;  %v12068_v34 = vld [vmem:[#allocation79_spill] sm:$0xff] }
 0x3e3   : > { %v5940_v32 = vpack.c.bf16 %v4319_v42, %v4303_v57  ;;  %v3228_v4 = vadd.f32 %v2716_v5, %v1990_v1  ;;  %v765_v14 = vmul.f32 %v10023_v13, %v12062_v39  ;;  %v1475_v61 = vmul.f32 %v10044_v58, %v12063_v19  ;;  %v12067_v57 = vld [vmem:[#allocation61_spill] sm:$0xff]  ;;  %v12069_v5 = vld [vmem:[#allocation14_spill] sm:$0xff] }
 0x3e4   : > { %v4334_v60 = vmax.f32 %v3822_v51, 0.0  ;;  %v4350_v49 = vmax.f32 %v3838_v21, 0.0  ;;  %v3244_v63 = vadd.f32 %v2732_v33, %v2006_v3  ;;  %v1491_v23 = vmul.f32 %v10044_v58, %v12064_v22  ;;  %v12070_v33 = vld [vmem:[#allocation66_spill] sm:$0xff] }
 0x3e5   : > { %5941 = vmatpush1.bf16.msra.mxu1 %v5940_v32  ;;  %v3824_v20 = vadd.f32 %v10019_v54, %v3228_v4  ;;  %v1987_v11 = vadd.f32 %v1475_v61, %v749_v17  ;;  %v2713_v62 = vmul.f32 %v10047_v48, %v12065_v28  ;;  %v2729_v43 = vmul.f32 %v10047_v48, %v12066_v10  ;;  %v12071_v3 = vld [vmem:[#allocation62_spill] sm:$0xff]  ;;  %v12072_v32 = vld [vmem:[#allocation16_spill] sm:$0xff] }
 0x3e6   : > { %v5878_v31 = vpack.c.bf16 %v4350_v49, %v4334_v60  ;;  %v3840_v26 = vadd.f32 %v10019_v54, %v3244_v63  ;;  %v2003_v47 = vadd.f32 %v1491_v23, %v765_v14  ;;  %v751_v38 = vmul.f32 %v10066_v45, %v12061_v0 }
 0x3e7   : > { %v4336_v35 = vmax.f32 %v3824_v20, 0.0  ;;  %v3225_v25 = vadd.f32 %v2713_v62, %v1987_v11  ;;  %v767_v37 = vmul.f32 %v10066_v45, %v12062_v39  ;;  %v1477_v30 = vmul.f32 %v10076_v8, %v12063_v19 }
 0x3e8   : > { %5879 = vmatprep.subr.bf16.mxu0 %v5878_v31  ;;  %v4352_v29 = vmax.f32 %v3840_v26, 0.0  ;;  %v3241_v44 = vadd.f32 %v2729_v43, %v2003_v47  ;;  %v1493_v15 = vmul.f32 %v10076_v8, %v12064_v22  ;;  %v2715_v52 = vmul.f32 %v10079_v46, %v12065_v28 }
 0x3e9   : > { %v3821_v7 = vadd.f32 %v10051_v50, %v3225_v25  ;;  %v1989_v0 = vadd.f32 %v1477_v30, %v751_v38  ;;  %v2731_v12 = vmul.f32 %v10079_v46, %v12066_v10  ;;  %v782_v39 = vmul.f32 %v9961_v24, %v12067_v57 }
 0x3ea   : > { %v5942_v40 = vpack.c.bf16 %v4352_v29, %v4336_v35  ;;  %v3837_v19 = vadd.f32 %v10051_v50, %v3241_v44  ;;  %v2005_v6 = vadd.f32 %v1493_v15, %v767_v37  ;;  %v798_v42 = vmul.f32 %v9961_v24, %v12068_v34 }
 0x3eb   : > { %v4333_v22 = vmax.f32 %v3821_v7, 0.0  ;;  %v3227_v1 = vadd.f32 %v2715_v52, %v1989_v0  ;;  %v1508_v28 = vmul.f32 %v9971_v55, %v12069_v5  ;;  %v1524_v51 = vmul.f32 %v9971_v55, %v12070_v33 }
 0x3ec   : > { %5943 = vmatprep.subr.bf16.mxu1 %v5942_v40  ;;  %v4349_v10 = vmax.f32 %v3837_v19, 0.0  ;;  %v3243_v21 = vadd.f32 %v2731_v12, %v2005_v6  ;;  %v2746_v17 = vmul.f32 %v9986_v18, %v12071_v3  ;;  %v2762_v4 = vmul.f32 %v9986_v18, %v12072_v32 }
 0x3ed   : > { %v3823_v14 = vadd.f32 %v10093_v36, %v3227_v1  ;;  %v2020_v61 = vadd.f32 %v1508_v28, %v782_v39  ;;  %v2036_v60 = vadd.f32 %v1524_v51, %v798_v42  ;;  %v784_v49 = vmul.f32 %v9999_v2, %v12067_v57 }
 0x3ee   : > { %v5880_v63 = vpack.c.bf16 %v4349_v10, %v4333_v22  ;;  %v3839_v23 = vadd.f32 %v10093_v36, %v3243_v21  ;;  %v800_v20 = vmul.f32 %v9999_v2, %v12068_v34  ;;  %v1510_v11 = vmul.f32 %v10012_v27, %v12069_v5 }
 0x3ef   : > { %v4335_v62 = vmax.f32 %v3823_v14, 0.0  ;;  %v3258_v43 = vadd.f32 %v2746_v17, %v2020_v61  ;;  %v3274_v31 = vadd.f32 %v2762_v4, %v2036_v60  ;;  %v1526_v26 = vmul.f32 %v10012_v27, %v12070_v33 }
 0x3f0   : > { %5881 = vmatpush1.bf16.msra.mxu0 %v5880_v63  ;;  %v4351_v47 = vmax.f32 %v3839_v23, 0.0  ;;  %v2022_v38 = vadd.f32 %v1510_v11, %v784_v49  ;;  %v2748_v35 = vmul.f32 %v10015_v59, %v12071_v3  ;;  %v2764_v25 = vmul.f32 %v10015_v59, %v12072_v32 }
 0x3f1   : > { %v3854_v37 = vadd.f32 %v9995_v53, %v3258_v43  ;;  %v3870_v30 = vadd.f32 %v9995_v53, %v3274_v31  ;;  %v2038_v29 = vadd.f32 %v1526_v26, %v800_v20  ;;  %v781_v44 = vmul.f32 %v10023_v13, %v12067_v57  ;;  %v12074_v26 = vld [vmem:[#allocation91_spill] sm:$0xff] }
 0x3f2   : > { %v5944_v15 = vpack.c.bf16 %v4351_v47, %v4335_v62  ;;  %v3260_v52 = vadd.f32 %v2748_v35, %v2022_v38  ;;  %v797_v7 = vmul.f32 %v10023_v13, %v12068_v34  ;;  %v1507_v0 = vmul.f32 %v10044_v58, %v12069_v5  ;;  %v12073_v62 = vld [vmem:[#allocation71_spill] sm:$0xff]  ;;  %v12075_v35 = vld [vmem:[#allocation76_spill] sm:$0xff] }
 0x3f3   : > { %v4366_v12 = vmax.f32 %v3854_v37, 0.0  ;;  %v4382_v39 = vmax.f32 %v3870_v30, 0.0  ;;  %v3276_v40 = vadd.f32 %v2764_v25, %v2038_v29  ;;  %v1523_v19 = vmul.f32 %v10044_v58, %v12070_v33  ;;  %v12076_v25 = vld [vmem:[#allocation84_spill] sm:$0xff]  ;;  %v12077_v29 = vld [vmem:[#allocation15_spill] sm:$0xff] }
 0x3f4   : > { %5945 = vmatpush1.bf16.msra.mxu1 %v5944_v15  ;;  %v3856_v6 = vadd.f32 %v10019_v54, %v3260_v52  ;;  %v2019_v42 = vadd.f32 %v1507_v0, %v781_v44  ;;  %v2745_v22 = vmul.f32 %v10047_v48, %v12071_v3  ;;  %v2761_v1 = vmul.f32 %v10047_v48, %v12072_v32  ;;  %v12078_v15 = vld [vmem:[#allocation87_spill] sm:$0xff] }
 0x3f5   : > { %v5882_v28 = vpack.c.bf16 %v4382_v39, %v4366_v12  ;;  %v3872_v51 = vadd.f32 %v10019_v54, %v3276_v40  ;;  %v2035_v10 = vadd.f32 %v1523_v19, %v797_v7  ;;  %v783_v21 = vmul.f32 %v10066_v45, %v12067_v57 }
 0x3f6   : > { %v4368_v17 = vmax.f32 %v3856_v6, 0.0  ;;  %v3257_v4 = vadd.f32 %v2745_v22, %v2019_v42  ;;  %v799_v14 = vmul.f32 %v10066_v45, %v12068_v34  ;;  %v1509_v61 = vmul.f32 %v10076_v8, %v12069_v5 }
 0x3f7   : > { %5883 = vmatprep.subr.bf16.mxu0 %v5882_v28  ;;  %v4384_v60 = vmax.f32 %v3872_v51, 0.0  ;;  %v3273_v49 = vadd.f32 %v2761_v1, %v2035_v10  ;;  %v1525_v63 = vmul.f32 %v10076_v8, %v12070_v33  ;;  %v2747_v23 = vmul.f32 %v10079_v46, %v12071_v3  ;;  %v10509_v10 = vpop.f32.mrb[0].mxu0 }
 0x3f8   : > { %v3853_v20 = vadd.f32 %v10051_v50, %v3257_v4  ;;  %v2021_v57 = vadd.f32 %v1509_v61, %v783_v21  ;;  %v2763_v11 = vmul.f32 %v10079_v46, %v12072_v32  ;;  %v814_v34 = vmul.f32 %v9961_v24, %v12073_v62 }
 0x3f9   : > { %v5946_v43 = vpack.c.bf16 %v4384_v60, %v4368_v17  ;;  %v3869_v5 = vadd.f32 %v10051_v50, %v3273_v49  ;;  %v2037_v31 = vadd.f32 %v1525_v63, %v799_v14  ;;  %v830_v47 = vmul.f32 %v9961_v24, %v12074_v26 }
 0x3fa   : > { %v4365_v33 = vmax.f32 %v3853_v20, 0.0  ;;  %v3259_v38 = vadd.f32 %v2747_v23, %v2021_v57  ;;  %v1540_v3 = vmul.f32 %v9971_v55, %v12075_v35  ;;  %v1556_v37 = vmul.f32 %v9971_v55, %v12076_v25 }
 0x3fb   : > { %5947 = vmatprep.subr.bf16.mxu1 %v5946_v43  ;;  %v4381_v32 = vmax.f32 %v3869_v5, 0.0  ;;  %v3275_v30 = vadd.f32 %v2763_v11, %v2037_v31  ;;  %v2778_v44 = vmul.f32 %v9986_v18, %v12077_v29  ;;  %v2794_v52 = vmul.f32 %v9986_v18, %v12078_v15 }
 0x3fc   : > { %v3855_v7 = vadd.f32 %v10093_v36, %v3259_v38  ;;  %v2052_v0 = vadd.f32 %v1540_v3, %v814_v34  ;;  %v2068_v12 = vadd.f32 %v1556_v37, %v830_v47  ;;  %v816_v39 = vmul.f32 %v9999_v2, %v12073_v62  ;;  %v10525_v47 = vpop.f32.mrb[0].mxu1 }
 0x3fd   : > { %v5884_v40 = vpack.c.bf16 %v4381_v32, %v4365_v33  ;;  %v3871_v19 = vadd.f32 %v10093_v36, %v3275_v30  ;;  %v832_v6 = vmul.f32 %v9999_v2, %v12074_v26  ;;  %v1542_v42 = vmul.f32 %v10012_v27, %v12075_v35  ;;  %v10527_v33 = vpop.f32.mrb[1].mxu0 }
 0x3fe   : > { %v4367_v22 = vmax.f32 %v3855_v7, 0.0  ;;  %v3290_v1 = vadd.f32 %v2778_v44, %v2052_v0  ;;  %v3306_v28 = vadd.f32 %v2794_v52, %v2068_v12  ;;  %v1558_v51 = vmul.f32 %v10012_v27, %v12076_v25 }
 0x3ff   : > { %5885 = vmatpush1.bf16.msra.mxu0 %v5884_v40  ;;  %v4383_v21 = vmax.f32 %v3871_v19, 0.0  ;;  %v2054_v17 = vadd.f32 %v1542_v42, %v816_v39  ;;  %v2780_v4 = vmul.f32 %v10015_v59, %v12077_v29  ;;  %v2796_v14 = vmul.f32 %v10015_v59, %v12078_v15  ;;  %v10541_v19 = vpop.f32.mrb[1].mxu1 }
 0x400   : > { %v3886_v61 = vadd.f32 %v9995_v53, %v3290_v1  ;;  %v3902_v60 = vadd.f32 %v9995_v53, %v3306_v28  ;;  %v2070_v49 = vadd.f32 %v1558_v51, %v832_v6  ;;  %v813_v63 = vmul.f32 %v10023_v13, %v12073_v62  ;;  %v10549_v28 = vpop.f32.mrb[2].mxu1 }
 0x401   : > { %v5948_v23 = vpack.c.bf16 %v4383_v21, %v4367_v22  ;;  %v3292_v20 = vadd.f32 %v2780_v4, %v2054_v17  ;;  %v829_v57 = vmul.f32 %v10023_v13, %v12074_v26  ;;  %v1539_v11 = vmul.f32 %v10044_v58, %v12075_v35  ;;  %v12079_v21 = vld [vmem:[#allocation90_spill] sm:$0xff] }
 0x402   : > { %v4398_v34 = vmax.f32 %v3886_v61, 0.0  ;;  %v4414_v43 = vmax.f32 %v3902_v60, 0.0  ;;  %v3308_v5 = vadd.f32 %v2796_v14, %v2070_v49  ;;  %v1555_v31 = vmul.f32 %v10044_v58, %v12076_v25  ;;  %v10558_v14 = vpop.f32.mrb[3].mxu1  ;;  %v12080_v60 = vld [vmem:[#allocation99_spill] sm:$0xff] }
 0x403   : > { %5949 = vmatpush1.bf16.msra.mxu1 %v5948_v23  ;;  %v3888_v38 = vadd.f32 %v10019_v54, %v3292_v20  ;;  %v2051_v3 = vadd.f32 %v1539_v11, %v813_v63  ;;  %v2777_v37 = vmul.f32 %v10047_v48, %v12077_v29  ;;  %v2793_v32 = vmul.f32 %v10047_v48, %v12078_v15  ;;  %v12081_v20 = vld [vmem:[#allocation132_spill] sm:$0xff] }
 0x404   : > { %v5886_v30 = vpack.c.bf16 %v4414_v43, %v4398_v34  ;;  %v3904_v44 = vadd.f32 %v10019_v54, %v3308_v5  ;;  %v2067_v52 = vadd.f32 %v1555_v31, %v829_v57  ;;  %v815_v7 = vmul.f32 %v10066_v45, %v12073_v62  ;;  %v10547_v62 = vpop.f32.mrb[2].mxu0  ;;  %v12083_v5 = vld [vmem:[#allocation67_spill] sm:$0xff] }
 0x405   : > { %v4400_v0 = vmax.f32 %v3888_v38, 0.0  ;;  %v3289_v12 = vadd.f32 %v2777_v37, %v2051_v3  ;;  %v831_v39 = vmul.f32 %v10066_v45, %v12074_v26  ;;  %v1541_v40 = vmul.f32 %v10076_v8, %v12075_v35  ;;  %v10556_v4 = vpop.f32.mrb[3].mxu0  ;;  %v12084_v38 = vld [vmem:[#allocation52_spill] sm:$0xff] }
 0x406   : > { %5887 = vmatprep.subr.bf16.mxu0 %v5886_v30  ;;  %v4416_v6 = vmax.f32 %v3904_v44, 0.0  ;;  %v3305_v42 = vadd.f32 %v2793_v32, %v2067_v52  ;;  %v1557_v22 = vmul.f32 %v10076_v8, %v12076_v25  ;;  %v2779_v1 = vmul.f32 %v10079_v46, %v12077_v29 }
 0x407   : > { %v3885_v26 = vadd.f32 %v10051_v50, %v3289_v12  ;;  %v2053_v51 = vadd.f32 %v1541_v40, %v815_v7  ;;  %v2795_v35 = vmul.f32 %v10079_v46, %v12078_v15  ;;  %v846_v17 = vmul.f32 %v9961_v24, %v12079_v21  ;;  %v12082_v15 = vld [vmem:[#allocation138_spill] sm:$0xff] }
 0x408   : > { %v5950_v25 = vpack.c.bf16 %v4416_v6, %v4400_v0  ;;  %v3901_v29 = vadd.f32 %v10051_v50, %v3305_v42  ;;  %v2069_v61 = vadd.f32 %v1557_v22, %v831_v39  ;;  %v862_v49 = vmul.f32 %v9961_v24, %v12080_v60 }
 0x409   : > { %v4397_v63 = vmax.f32 %v3885_v26, 0.0  ;;  %v3291_v23 = vadd.f32 %v2779_v1, %v2053_v51  ;;  %v1572_v57 = vmul.f32 %v9971_v55, %v12081_v20  ;;  %v1588_v11 = vmul.f32 %v9971_v55, %v12082_v15 }
 0x40a   : > { %5951 = vmatprep.subr.bf16.mxu1 %v5950_v25  ;;  %v4413_v34 = vmax.f32 %v3901_v29, 0.0  ;;  %v3307_v43 = vadd.f32 %v2795_v35, %v2069_v61  ;;  %v2810_v31 = vmul.f32 %v9986_v18, %v12083_v5  ;;  %v2826_v3 = vmul.f32 %v9986_v18, %v12084_v38 }
 0x40b   : > { %v3887_v37 = vadd.f32 %v10093_v36, %v3291_v23  ;;  %v2084_v32 = vadd.f32 %v1572_v57, %v846_v17  ;;  %v2100_v30 = vadd.f32 %v1588_v11, %v862_v49  ;;  %v848_v44 = vmul.f32 %v9999_v2, %v12079_v21 }
 0x40c   : > { %v5888_v52 = vpack.c.bf16 %v4413_v34, %v4397_v63  ;;  %v3903_v7 = vadd.f32 %v10093_v36, %v3307_v43  ;;  %v864_v0 = vmul.f32 %v9999_v2, %v12080_v60  ;;  %v1574_v12 = vmul.f32 %v10012_v27, %v12081_v20 }
 0x40d   : > { %v4399_v39 = vmax.f32 %v3887_v37, 0.0  ;;  %v3322_v40 = vadd.f32 %v2810_v31, %v2084_v32  ;;  %v3338_v6 = vadd.f32 %v2826_v3, %v2100_v30  ;;  %v1590_v42 = vmul.f32 %v10012_v27, %v12082_v15 }
 0x40e   : > { %5889 = vmatpush1.bf16.msra.mxu0 %v5888_v52  ;;  %v4415_v22 = vmax.f32 %v3903_v7, 0.0  ;;  %v2086_v1 = vadd.f32 %v1574_v12, %v848_v44  ;;  %v2812_v26 = vmul.f32 %v10015_v59, %v12083_v5  ;;  %v2828_v51 = vmul.f32 %v10015_v59, %v12084_v38 }
 0x40f   : > { %v3918_v35 = vadd.f32 %v9995_v53, %v3322_v40  ;;  %v3934_v17 = vadd.f32 %v9995_v53, %v3338_v6  ;;  %v2102_v25 = vadd.f32 %v1590_v42, %v864_v0  ;;  %v845_v29 = vmul.f32 %v10023_v13, %v12079_v21 }
 0x410   : > { %v5952_v61 = vpack.c.bf16 %v4415_v22, %v4399_v39  ;;  %v3324_v49 = vadd.f32 %v2812_v26, %v2086_v1  ;;  %v861_v63 = vmul.f32 %v10023_v13, %v12080_v60  ;;  %v1571_v23 = vmul.f32 %v10044_v58, %v12081_v20 }
 0x411   : > { %v4430_v57 = vmax.f32 %v3918_v35, 0.0  ;;  %v4446_v11 = vmax.f32 %v3934_v17, 0.0  ;;  %v3340_v34 = vadd.f32 %v2828_v51, %v2102_v25  ;;  %v1587_v43 = vmul.f32 %v10044_v58, %v12082_v15  ;;  %v12085_v35 = vld [vmem:[#allocation148_spill] sm:$0xff] }
 0x412   : > { %5953 = vmatpush1.bf16.msra.mxu1 %v5952_v61  ;;  %v3920_v31 = vadd.f32 %v10019_v54, %v3324_v49  ;;  %v2083_v3 = vadd.f32 %v1571_v23, %v845_v29  ;;  %v2809_v37 = vmul.f32 %v10047_v48, %v12083_v5  ;;  %v2825_v32 = vmul.f32 %v10047_v48, %v12084_v38  ;;  %v12086_v29 = vld [vmem:[#allocation102_spill] sm:$0xff] }
 0x413   : > { %v5890_v30 = vpack.c.bf16 %v4446_v11, %v4430_v57  ;;  %v3936_v44 = vadd.f32 %v10019_v54, %v3340_v34  ;;  %v2099_v52 = vadd.f32 %v1587_v43, %v861_v63  ;;  %v847_v7 = vmul.f32 %v10066_v45, %v12079_v21  ;;  %v12087_v63 = vld [vmem:[#allocation22_spill] sm:$0xff]  ;;  %v12089_v34 = vld [vmem:[#allocation72_spill] sm:$0xff] }
 0x414   : > { %v4432_v0 = vmax.f32 %v3920_v31, 0.0  ;;  %v3321_v12 = vadd.f32 %v2809_v37, %v2083_v3  ;;  %v863_v39 = vmul.f32 %v10066_v45, %v12080_v60  ;;  %v1573_v40 = vmul.f32 %v10076_v8, %v12081_v20  ;;  %v12088_v23 = vld [vmem:[#allocation78_spill] sm:$0xff]  ;;  %v12090_v31 = vld [vmem:[#allocation40_spill] sm:$0xff] }
 0x415   : > { %5891 = vmatprep.subr.bf16.mxu0 %v5890_v30  ;;  %v4448_v6 = vmax.f32 %v3936_v44, 0.0  ;;  %v3337_v42 = vadd.f32 %v2825_v32, %v2099_v52  ;;  %v1589_v22 = vmul.f32 %v10076_v8, %v12082_v15  ;;  %v2811_v1 = vmul.f32 %v10079_v46, %v12083_v5 }
 0x416   : > { %v3917_v26 = vadd.f32 %v10051_v50, %v3321_v12  ;;  %v2085_v21 = vadd.f32 %v1573_v40, %v847_v7  ;;  %v2827_v51 = vmul.f32 %v10079_v46, %v12084_v38  ;;  %v878_v60 = vmul.f32 %v9961_v24, %v12085_v35 }
 0x417   : > { %v5954_v17 = vpack.c.bf16 %v4448_v6, %v4432_v0  ;;  %v3933_v20 = vadd.f32 %v10051_v50, %v3337_v42  ;;  %v2101_v25 = vadd.f32 %v1589_v22, %v863_v39  ;;  %v894_v61 = vmul.f32 %v9961_v24, %v12086_v29 }
 0x418   : > { %v4429_v15 = vmax.f32 %v3917_v26, 0.0  ;;  %v3323_v49 = vadd.f32 %v2811_v1, %v2085_v21  ;;  %v1604_v5 = vmul.f32 %v9971_v55, %v12087_v63  ;;  %v1620_v57 = vmul.f32 %v9971_v55, %v12088_v23 }
 0x419   : > { %5955 = vmatprep.subr.bf16.mxu1 %v5954_v17  ;;  %v4445_v38 = vmax.f32 %v3933_v20, 0.0  ;;  %v3339_v11 = vadd.f32 %v2827_v51, %v2101_v25  ;;  %v2842_v43 = vmul.f32 %v9986_v18, %v12089_v34  ;;  %v2858_v3 = vmul.f32 %v9986_v18, %v12090_v31 }
 0x41a   : > { %v3919_v37 = vadd.f32 %v10093_v36, %v3323_v49  ;;  %v2116_v32 = vadd.f32 %v1604_v5, %v878_v60  ;;  %v2132_v30 = vadd.f32 %v1620_v57, %v894_v61  ;;  %v880_v44 = vmul.f32 %v9999_v2, %v12085_v35 }
 0x41b   : > { %v5892_v52 = vpack.c.bf16 %v4445_v38, %v4429_v15  ;;  %v3935_v7 = vadd.f32 %v10093_v36, %v3339_v11  ;;  %v896_v0 = vmul.f32 %v9999_v2, %v12086_v29  ;;  %v1606_v12 = vmul.f32 %v10012_v27, %v12087_v63 }
 0x41c   : > { %v4431_v39 = vmax.f32 %v3919_v37, 0.0  ;;  %v3354_v40 = vadd.f32 %v2842_v43, %v2116_v32  ;;  %v3370_v6 = vadd.f32 %v2858_v3, %v2132_v30  ;;  %v1622_v42 = vmul.f32 %v10012_v27, %v12088_v23 }
 0x41d   : > { %5893 = vmatpush1.bf16.msra.mxu0 %v5892_v52  ;;  %v4447_v22 = vmax.f32 %v3935_v7, 0.0  ;;  %v2118_v1 = vadd.f32 %v1606_v12, %v880_v44  ;;  %v2844_v26 = vmul.f32 %v10015_v59, %v12089_v34  ;;  %v2860_v21 = vmul.f32 %v10015_v59, %v12090_v31 }
 0x41e   : > { %v3950_v51 = vadd.f32 %v9995_v53, %v3354_v40  ;;  %v3966_v60 = vadd.f32 %v9995_v53, %v3370_v6  ;;  %v2134_v17 = vadd.f32 %v1622_v42, %v896_v0  ;;  %v877_v20 = vmul.f32 %v10023_v13, %v12085_v35 }
 0x41f   : > { %v5956_v25 = vpack.c.bf16 %v4447_v22, %v4431_v39  ;;  %v3356_v61 = vadd.f32 %v2844_v26, %v2118_v1  ;;  %v893_v15 = vmul.f32 %v10023_v13, %v12086_v29  ;;  %v1603_v49 = vmul.f32 %v10044_v58, %v12087_v63 }
 0x420   : > { %v4462_v5 = vmax.f32 %v3950_v51, 0.0  ;;  %v4478_v57 = vmax.f32 %v3966_v60, 0.0  ;;  %v3372_v38 = vadd.f32 %v2860_v21, %v2134_v17  ;;  %v1619_v11 = vmul.f32 %v10044_v58, %v12088_v23  ;;  %v12091_v51 = vld [vmem:[#allocation73_spill] sm:$0xff] }
 0x421   : > { %5957 = vmatpush1.bf16.msra.mxu1 %v5956_v25  ;;  %v3952_v43 = vadd.f32 %v10019_v54, %v3356_v61  ;;  %v2115_v3 = vadd.f32 %v1603_v49, %v877_v20  ;;  %v2841_v37 = vmul.f32 %v10047_v48, %v12089_v34  ;;  %v2857_v32 = vmul.f32 %v10047_v48, %v12090_v31  ;;  %v12092_v20 = vld [vmem:[#allocation48_spill] sm:$0xff]  ;;  %v12094_v49 = vld [vmem:[#allocation123_spill] sm:$0xff] }
 0x422   : > { %v5894_v30 = vpack.c.bf16 %v4478_v57, %v4462_v5  ;;  %v3968_v44 = vadd.f32 %v10019_v54, %v3372_v38  ;;  %v2131_v52 = vadd.f32 %v1619_v11, %v893_v15  ;;  %v879_v7 = vmul.f32 %v10066_v45, %v12085_v35  ;;  %v12093_v15 = vld [vmem:[#allocation92_spill] sm:$0xff]  ;;  %v12095_v38 = vld [vmem:[#allocation77_spill] sm:$0xff] }
 0x423   : > { %v4464_v0 = vmax.f32 %v3952_v43, 0.0  ;;  %v3353_v12 = vadd.f32 %v2841_v37, %v2115_v3  ;;  %v895_v39 = vmul.f32 %v10066_v45, %v12086_v29  ;;  %v1605_v40 = vmul.f32 %v10076_v8, %v12087_v63  ;;  %v12096_v43 = vld [vmem:[#allocation124_spill] sm:$0xff] }
 0x424   : > { %5895 = vmatprep.subr.bf16.mxu0 %v5894_v30  ;;  %v4480_v6 = vmax.f32 %v3968_v44, 0.0  ;;  %v3369_v42 = vadd.f32 %v2857_v32, %v2131_v52  ;;  %v1621_v22 = vmul.f32 %v10076_v8, %v12088_v23  ;;  %v2843_v1 = vmul.f32 %v10079_v46, %v12089_v34 }
 0x425   : > { %v3949_v26 = vadd.f32 %v10051_v50, %v3353_v12  ;;  %v2117_v35 = vadd.f32 %v1605_v40, %v879_v7  ;;  %v2859_v21 = vmul.f32 %v10079_v46, %v12090_v31  ;;  %v910_v29 = vmul.f32 %v9961_v24, %v12091_v51 }
 0x426   : > { %v5958_v60 = vpack.c.bf16 %v4480_v6, %v4464_v0  ;;  %v3965_v63 = vadd.f32 %v10051_v50, %v3369_v42  ;;  %v2133_v17 = vadd.f32 %v1621_v22, %v895_v39  ;;  %v926_v25 = vmul.f32 %v9961_v24, %v12092_v20 }
 0x427   : > { %v4461_v23 = vmax.f32 %v3949_v26, 0.0  ;;  %v3355_v61 = vadd.f32 %v2843_v1, %v2117_v35  ;;  %v1636_v34 = vmul.f32 %v9971_v55, %v12093_v15  ;;  %v1652_v5 = vmul.f32 %v9971_v55, %v12094_v49 }
 0x428   : > { %5959 = vmatprep.subr.bf16.mxu1 %v5958_v60  ;;  %v4477_v31 = vmax.f32 %v3965_v63, 0.0  ;;  %v3371_v57 = vadd.f32 %v2859_v21, %v2133_v17  ;;  %v2874_v11 = vmul.f32 %v9986_v18, %v12095_v38  ;;  %v2890_v3 = vmul.f32 %v9986_v18, %v12096_v43 }
 0x429   : > { %v3951_v37 = vadd.f32 %v10093_v36, %v3355_v61  ;;  %v2148_v32 = vadd.f32 %v1636_v34, %v910_v29  ;;  %v2164_v30 = vadd.f32 %v1652_v5, %v926_v25  ;;  %v912_v44 = vmul.f32 %v9999_v2, %v12091_v51 }
 0x42a   : > { %v5896_v52 = vpack.c.bf16 %v4477_v31, %v4461_v23  ;;  %v3967_v7 = vadd.f32 %v10093_v36, %v3371_v57  ;;  %v928_v0 = vmul.f32 %v9999_v2, %v12092_v20  ;;  %v1638_v12 = vmul.f32 %v10012_v27, %v12093_v15 }
 0x42b   : > { %v4463_v39 = vmax.f32 %v3951_v37, 0.0  ;;  %v3386_v40 = vadd.f32 %v2874_v11, %v2148_v32  ;;  %v3402_v6 = vadd.f32 %v2890_v3, %v2164_v30  ;;  %v1654_v42 = vmul.f32 %v10012_v27, %v12094_v49 }
 0x42c   : > { %5897 = vmatpush1.bf16.msra.mxu0 %v5896_v52  ;;  %v4479_v22 = vmax.f32 %v3967_v7, 0.0  ;;  %v2150_v1 = vadd.f32 %v1638_v12, %v912_v44  ;;  %v2876_v26 = vmul.f32 %v10015_v59, %v12095_v38  ;;  %v2892_v35 = vmul.f32 %v10015_v59, %v12096_v43 }
 0x42d   : > { %v3982_v21 = vadd.f32 %v9995_v53, %v3386_v40  ;;  %v3998_v29 = vadd.f32 %v9995_v53, %v3402_v6  ;;  %v2166_v60 = vadd.f32 %v1654_v42, %v928_v0  ;;  %v909_v63 = vmul.f32 %v10023_v13, %v12091_v51 }
 0x42e   : > { %v5960_v17 = vpack.c.bf16 %v4479_v22, %v4463_v39  ;;  %v3388_v25 = vadd.f32 %v2876_v26, %v2150_v1  ;;  %v925_v23 = vmul.f32 %v10023_v13, %v12092_v20  ;;  %v1635_v61 = vmul.f32 %v10044_v58, %v12093_v15 }
 0x42f   : > { %v4494_v34 = vmax.f32 %v3982_v21, 0.0  ;;  %v4510_v5 = vmax.f32 %v3998_v29, 0.0  ;;  %v3404_v31 = vadd.f32 %v2892_v35, %v2166_v60  ;;  %v1651_v57 = vmul.f32 %v10044_v58, %v12094_v49  ;;  %v12097_v21 = vld [vmem:[#allocation109_spill] sm:$0xff] }
 0x430   : > { %5961 = vmatpush1.bf16.msra.mxu1 %v5960_v17  ;;  %v3984_v11 = vadd.f32 %v10019_v54, %v3388_v25  ;;  %v2147_v3 = vadd.f32 %v1635_v61, %v909_v63  ;;  %v2873_v37 = vmul.f32 %v10047_v48, %v12095_v38  ;;  %v2889_v32 = vmul.f32 %v10047_v48, %v12096_v43  ;;  %v12098_v63 = vld [vmem:[#allocation108_spill] sm:$0xff]  ;;  %v12100_v61 = vld [vmem:[#allocation114_spill] sm:$0xff] }
 0x431   : > { %v5898_v30 = vpack.c.bf16 %v4510_v5, %v4494_v34  ;;  %v4000_v44 = vadd.f32 %v10019_v54, %v3404_v31  ;;  %v2163_v52 = vadd.f32 %v1651_v57, %v925_v23  ;;  %v911_v7 = vmul.f32 %v10066_v45, %v12091_v51  ;;  %v12099_v23 = vld [vmem:[#allocation120_spill] sm:$0xff] }
 0x432   : > { %v4496_v0 = vmax.f32 %v3984_v11, 0.0  ;;  %v3385_v12 = vadd.f32 %v2873_v37, %v2147_v3  ;;  %v927_v39 = vmul.f32 %v10066_v45, %v12092_v20  ;;  %v1637_v40 = vmul.f32 %v10076_v8, %v12093_v15  ;;  %v12101_v31 = vld [vmem:[#allocation88_spill] sm:$0xff]  ;;  %v12102_v11 = vld [vmem:[#allocation125_spill] sm:$0xff] }
 0x433   : > { %5899 = vmatprep.subr.bf16.mxu0 %v5898_v30  ;;  %v4512_v6 = vmax.f32 %v4000_v44, 0.0  ;;  %v3401_v42 = vadd.f32 %v2889_v32, %v2163_v52  ;;  %v1653_v22 = vmul.f32 %v10076_v8, %v12094_v49  ;;  %v2875_v1 = vmul.f32 %v10079_v46, %v12095_v38 }
 0x434   : > { %v3981_v26 = vadd.f32 %v10051_v50, %v3385_v12  ;;  %v2149_v51 = vadd.f32 %v1637_v40, %v911_v7  ;;  %v2891_v35 = vmul.f32 %v10079_v46, %v12096_v43  ;;  %v942_v20 = vmul.f32 %v9961_v24, %v12097_v21 }
 0x435   : > { %v5962_v29 = vpack.c.bf16 %v4512_v6, %v4496_v0  ;;  %v3997_v15 = vadd.f32 %v10051_v50, %v3401_v42  ;;  %v2165_v60 = vadd.f32 %v1653_v22, %v927_v39  ;;  %v958_v17 = vmul.f32 %v9961_v24, %v12098_v63 }
 0x436   : > { %v4493_v49 = vmax.f32 %v3981_v26, 0.0  ;;  %v3387_v25 = vadd.f32 %v2875_v1, %v2149_v51  ;;  %v1668_v38 = vmul.f32 %v9971_v55, %v12099_v23  ;;  %v1684_v34 = vmul.f32 %v9971_v55, %v12100_v61 }
 0x437   : > { %5963 = vmatprep.subr.bf16.mxu1 %v5962_v29  ;;  %v4509_v43 = vmax.f32 %v3997_v15, 0.0  ;;  %v3403_v5 = vadd.f32 %v2891_v35, %v2165_v60  ;;  %v2906_v57 = vmul.f32 %v9986_v18, %v12101_v31  ;;  %v2922_v3 = vmul.f32 %v9986_v18, %v12102_v11 }
 0x438   : > { %v3983_v37 = vadd.f32 %v10093_v36, %v3387_v25  ;;  %v2180_v32 = vadd.f32 %v1668_v38, %v942_v20  ;;  %v2196_v30 = vadd.f32 %v1684_v34, %v958_v17  ;;  %v944_v44 = vmul.f32 %v9999_v2, %v12097_v21 }
 0x439   : > { %v5900_v52 = vpack.c.bf16 %v4509_v43, %v4493_v49  ;;  %v3999_v7 = vadd.f32 %v10093_v36, %v3403_v5  ;;  %v960_v0 = vmul.f32 %v9999_v2, %v12098_v63  ;;  %v1670_v12 = vmul.f32 %v10012_v27, %v12099_v23 }
 0x43a   : > { %v4495_v39 = vmax.f32 %v3983_v37, 0.0  ;;  %v3418_v40 = vadd.f32 %v2906_v57, %v2180_v32  ;;  %v3434_v6 = vadd.f32 %v2922_v3, %v2196_v30  ;;  %v1686_v42 = vmul.f32 %v10012_v27, %v12100_v61 }
 0x43b   : > { %5901 = vmatpush1.bf16.msra.mxu0 %v5900_v52  ;;  %v4511_v22 = vmax.f32 %v3999_v7, 0.0  ;;  %v2182_v1 = vadd.f32 %v1670_v12, %v944_v44  ;;  %v2908_v26 = vmul.f32 %v10015_v59, %v12101_v31  ;;  %v2924_v51 = vmul.f32 %v10015_v59, %v12102_v11 }
 0x43c   : > { %v4014_v35 = vadd.f32 %v9995_v53, %v3418_v40  ;;  %v4030_v20 = vadd.f32 %v9995_v53, %v3434_v6  ;;  %v2198_v29 = vadd.f32 %v1686_v42, %v960_v0  ;;  %v941_v15 = vmul.f32 %v10023_v13, %v12097_v21 }
 0x43d   : > { %v5964_v60 = vpack.c.bf16 %v4511_v22, %v4495_v39  ;;  %v3420_v17 = vadd.f32 %v2908_v26, %v2182_v1  ;;  %v957_v49 = vmul.f32 %v10023_v13, %v12098_v63  ;;  %v1667_v25 = vmul.f32 %v10044_v58, %v12099_v23 }
 0x43e   : > { %v4526_v38 = vmax.f32 %v4014_v35, 0.0  ;;  %v4542_v34 = vmax.f32 %v4030_v20, 0.0  ;;  %v3436_v43 = vadd.f32 %v2924_v51, %v2198_v29  ;;  %v1683_v5 = vmul.f32 %v10044_v58, %v12100_v61 }
 0x43f   : > { %5965 = vmatpush1.bf16.msra.mxu1 %v5964_v60  ;;  %v4016_v57 = vadd.f32 %v10019_v54, %v3420_v17  ;;  %v2179_v3 = vadd.f32 %v1667_v25, %v941_v15  ;;  %v2905_v37 = vmul.f32 %v10047_v48, %v12101_v31  ;;  %v2921_v32 = vmul.f32 %v10047_v48, %v12102_v11 }
 0x440   : > { %v5902_v30 = vpack.c.bf16 %v4542_v34, %v4526_v38  ;;  %v4032_v44 = vadd.f32 %v10019_v54, %v3436_v43  ;;  %v2195_v52 = vadd.f32 %v1683_v5, %v957_v49  ;;  %v943_v7 = vmul.f32 %v10066_v45, %v12097_v21  ;;  %v12103_v49 = vld [vmem:[#allocation104_spill] sm:$0xff]  ;;  %v12104_v38 = vld [vmem:[#allocation121_spill] sm:$0xff] }
 0x441   : > { %v4528_v0 = vmax.f32 %v4016_v57, 0.0  ;;  %v3417_v12 = vadd.f32 %v2905_v37, %v2179_v3  ;;  %v959_v39 = vmul.f32 %v10066_v45, %v12098_v63  ;;  %v1669_v40 = vmul.f32 %v10076_v8, %v12099_v23 }
 0x442   : > { %5903 = vmatprep.subr.bf16.mxu0 %v5902_v30  ;;  %v4544_v6 = vmax.f32 %v4032_v44, 0.0  ;;  %v3433_v42 = vadd.f32 %v2921_v32, %v2195_v52  ;;  %v1685_v22 = vmul.f32 %v10076_v8, %v12100_v61  ;;  %v2907_v1 = vmul.f32 %v10079_v46, %v12101_v31 }
 0x443   : > { %v4013_v26 = vadd.f32 %v10051_v50, %v3417_v12  ;;  %v2181_v21 = vadd.f32 %v1669_v40, %v943_v7  ;;  %v2923_v51 = vmul.f32 %v10079_v46, %v12102_v11  ;;  %v974_v63 = vmul.f32 %v9961_v24, %v12024_v56 }
 0x444   : > { %v5966_v35 = vpack.c.bf16 %v4544_v6, %v4528_v0  ;;  %v4029_v23 = vadd.f32 %v10051_v50, %v3433_v42  ;;  %v2197_v20 = vadd.f32 %v1685_v22, %v959_v39  ;;  %v990_v29 = vmul.f32 %v9961_v24, %v12025_v9 }
 0x445   : > { %v4525_v61 = vmax.f32 %v4013_v26, 0.0  ;;  %v3419_v15 = vadd.f32 %v2907_v1, %v2181_v21  ;;  %v1700_v31 = vmul.f32 %v9971_v55, %v12026_v16  ;;  %v1716_v60 = vmul.f32 %v9971_v55, %v12027_v41 }
 0x446   : > { %5967 = vmatprep.subr.bf16.mxu1 %v5966_v35  ;;  %v4541_v11 = vmax.f32 %v4029_v23, 0.0  ;;  %v3435_v17 = vadd.f32 %v2923_v51, %v2197_v20  ;;  %v2938_v25 = vmul.f32 %v9986_v18, %v12103_v49  ;;  %v2954_v34 = vmul.f32 %v9986_v18, %v12104_v38 }
 0x447   : > { %v4015_v43 = vadd.f32 %v10093_v36, %v3419_v15  ;;  %v2212_v5 = vadd.f32 %v1700_v31, %v974_v63  ;;  %v2228_v57 = vadd.f32 %v1716_v60, %v990_v29  ;;  %v976_v3 = vmul.f32 %v9999_v2, %v12024_v56 }
 0x448   : > { %v5904_v37 = vpack.c.bf16 %v4541_v11, %v4525_v61  ;;  %v4031_v32 = vadd.f32 %v10093_v36, %v3435_v17  ;;  %v992_v30 = vmul.f32 %v9999_v2, %v12025_v9  ;;  %v1702_v44 = vmul.f32 %v10012_v27, %v12026_v16 }
 0x449   : > { %v4527_v52 = vmax.f32 %v4015_v43, 0.0  ;;  %v3450_v7 = vadd.f32 %v2938_v25, %v2212_v5  ;;  %v3466_v0 = vadd.f32 %v2954_v34, %v2228_v57  ;;  %v1718_v12 = vmul.f32 %v10012_v27, %v12027_v41 }
 0x44a   : > { %5905 = vmatpush1.bf16.msra.mxu0 %v5904_v37  ;;  %v4543_v39 = vmax.f32 %v4031_v32, 0.0  ;;  %v2214_v40 = vadd.f32 %v1702_v44, %v976_v3  ;;  %v2940_v6 = vmul.f32 %v10015_v59, %v12103_v49  ;;  %v2956_v42 = vmul.f32 %v10015_v59, %v12104_v38 }
 0x44b   : > { %v4046_v22 = vadd.f32 %v9995_v53, %v3450_v7  ;;  %v4062_v1 = vadd.f32 %v9995_v53, %v3466_v0  ;;  %v2230_v26 = vadd.f32 %v1718_v12, %v992_v30  ;;  %v973_v21 = vmul.f32 %v10023_v13, %v12024_v56 }
 0x44c   : > { %v5968_v51 = vpack.c.bf16 %v4543_v39, %v4527_v52  ;;  %v3452_v63 = vadd.f32 %v2940_v6, %v2214_v40  ;;  %v989_v35 = vmul.f32 %v10023_v13, %v12025_v9  ;;  %v1699_v23 = vmul.f32 %v10044_v58, %v12026_v16  ;;  %v12105_v39 = vld [vmem:[#allocation23_spill] sm:$0xff] }
 0x44d   : > { %v4558_v20 = vmax.f32 %v4046_v22, 0.0  ;;  %v4574_v29 = vmax.f32 %v4062_v1, 0.0  ;;  %v3468_v61 = vadd.f32 %v2956_v42, %v2230_v26  ;;  %v1715_v15 = vmul.f32 %v10044_v58, %v12027_v41  ;;  %v12106_v42 = vld [vmem:[#allocation112_spill] sm:$0xff]  ;;  %v12107_v26 = vld [vmem:[#allocation58_spill] sm:$0xff] }
 0x44e   : > { %5969 = vmatpush1.bf16.msra.mxu1 %v5968_v51  ;;  %v4048_v31 = vadd.f32 %v10019_v54, %v3452_v63  ;;  %v2211_v60 = vadd.f32 %v1699_v23, %v973_v21  ;;  %v2937_v11 = vmul.f32 %v10047_v48, %v12103_v49  ;;  %v2953_v17 = vmul.f32 %v10047_v48, %v12104_v38  ;;  %v12108_v21 = vld [vmem:[#allocation25_spill] sm:$0xff] }
 0x44f   : > { %v5906_v25 = vpack.c.bf16 %v4574_v29, %v4558_v20  ;;  %v4064_v34 = vadd.f32 %v10019_v54, %v3468_v61  ;;  %v2227_v43 = vadd.f32 %v1715_v15, %v989_v35  ;;  %v975_v5 = vmul.f32 %v10066_v45, %v12024_v56  ;;  %v12109_v35 = vld [vmem:[#allocation106_spill] sm:$0xff]  ;;  %v12110_v20 = vld [vmem:[#allocation97_spill] sm:$0xff] }
 0x450   : > { %v4560_v57 = vmax.f32 %v4048_v31, 0.0  ;;  %v3449_v3 = vadd.f32 %v2937_v11, %v2211_v60  ;;  %v991_v37 = vmul.f32 %v10066_v45, %v12025_v9  ;;  %v1701_v32 = vmul.f32 %v10076_v8, %v12026_v16 }
 0x451   : > { %5907 = vmatprep.subr.bf16.mxu0 %v5906_v25  ;;  %v4576_v30 = vmax.f32 %v4064_v34, 0.0  ;;  %v3465_v44 = vadd.f32 %v2953_v17, %v2227_v43  ;;  %v1717_v52 = vmul.f32 %v10076_v8, %v12027_v41  ;;  %v2939_v7 = vmul.f32 %v10079_v46, %v12103_v49 }
 0x452   : > { %v4045_v0 = vadd.f32 %v10051_v50, %v3449_v3  ;;  %v2213_v56 = vadd.f32 %v1701_v32, %v975_v5  ;;  %v2955_v12 = vmul.f32 %v10079_v46, %v12104_v38  ;;  %v1006_v9 = vmul.f32 %v9961_v24, %v12105_v39 }
 0x453   : > { %v5970_v40 = vpack.c.bf16 %v4576_v30, %v4560_v57  ;;  %v4061_v16 = vadd.f32 %v10051_v50, %v3465_v44  ;;  %v2229_v6 = vadd.f32 %v1717_v52, %v991_v37  ;;  %v1022_v22 = vmul.f32 %v9961_v24, %v12106_v42 }
 0x454   : > { %v4557_v41 = vmax.f32 %v4045_v0, 0.0  ;;  %v3451_v1 = vadd.f32 %v2939_v7, %v2213_v56  ;;  %v1732_v49 = vmul.f32 %v9971_v55, %v12107_v26  ;;  %v1748_v51 = vmul.f32 %v9971_v55, %v12108_v21 }
 0x455   : > { %5971 = vmatprep.subr.bf16.mxu1 %v5970_v40  ;;  %v4573_v38 = vmax.f32 %v4061_v16, 0.0  ;;  %v3467_v63 = vadd.f32 %v2955_v12, %v2229_v6  ;;  %v2970_v23 = vmul.f32 %v9986_v18, %v12109_v35  ;;  %v2986_v29 = vmul.f32 %v9986_v18, %v12110_v20 }
 0x456   : > { %v4047_v61 = vadd.f32 %v10093_v36, %v3451_v1  ;;  %v2244_v15 = vadd.f32 %v1732_v49, %v1006_v9  ;;  %v2260_v31 = vadd.f32 %v1748_v51, %v1022_v22  ;;  %v1008_v60 = vmul.f32 %v9999_v2, %v12105_v39 }
 0x457   : > { %v5908_v11 = vpack.c.bf16 %v4573_v38, %v4557_v41  ;;  %v4063_v17 = vadd.f32 %v10093_v36, %v3467_v63  ;;  %v1024_v25 = vmul.f32 %v9999_v2, %v12106_v42  ;;  %v1734_v34 = vmul.f32 %v10012_v27, %v12107_v26 }
 0x458   : > { %v4559_v43 = vmax.f32 %v4047_v61, 0.0  ;;  %v3482_v5 = vadd.f32 %v2970_v23, %v2244_v15  ;;  %v3498_v57 = vadd.f32 %v2986_v29, %v2260_v31  ;;  %v1750_v3 = vmul.f32 %v10012_v27, %v12108_v21 }
 0x459   : > { %5909 = vmatpush1.bf16.msra.mxu0 %v5908_v11  ;;  %v4575_v37 = vmax.f32 %v4063_v17, 0.0  ;;  %v2246_v32 = vadd.f32 %v1734_v34, %v1008_v60  ;;  %v2972_v30 = vmul.f32 %v10015_v59, %v12109_v35  ;;  %v2988_v44 = vmul.f32 %v10015_v59, %v12110_v20  ;;  %v10865_v52 = vpop.f32.mrb[4].mxu0 }
 0x45a   : > { %v4078_v7 = vadd.f32 %v9995_v53, %v3482_v5  ;;  %v4094_v0 = vadd.f32 %v9995_v53, %v3498_v57  ;;  %v2262_v56 = vadd.f32 %v1750_v3, %v1024_v25  ;;  %v1005_v12 = vmul.f32 %v10023_v13, %v12105_v39  ;;  %v10871_v9 = vpop.f32.mrb[5].mxu0 }
 0x45b   : > { %v5972_v40 = vpack.c.bf16 %v4575_v37, %v4559_v43  ;;  %v3484_v16 = vadd.f32 %v2972_v30, %v2246_v32  ;;  %v1021_v6 = vmul.f32 %v10023_v13, %v12106_v42  ;;  %v1731_v22 = vmul.f32 %v10044_v58, %v12107_v26 }
 0x45c   : > { %v4590_v41 = vmax.f32 %v4078_v7, 0.0  ;;  %v4606_v1 = vmax.f32 %v4094_v0, 0.0  ;;  %v3500_v49 = vadd.f32 %v2988_v44, %v2262_v56  ;;  %v1747_v51 = vmul.f32 %v10044_v58, %v12108_v21  ;;  %v12111_v7 = vld [vmem:[#allocation70_spill] sm:$0xff] }
 0x45d   : > { %5973 = vmatpush1.bf16.msra.mxu1 %v5972_v40  ;;  %v4080_v38 = vadd.f32 %v10019_v54, %v3484_v16  ;;  %v2243_v63 = vadd.f32 %v1731_v22, %v1005_v12  ;;  %v2969_v23 = vmul.f32 %v10047_v48, %v12109_v35  ;;  %v2985_v29 = vmul.f32 %v10047_v48, %v12110_v20  ;;  %v10884_v61 = vpop.f32.mrb[4].mxu1  ;;  %v12112_v12 = vld [vmem:[#allocation117_spill] sm:$0xff] }
 0x45e   : > { %v5910_v15 = vpack.c.bf16 %v4606_v1, %v4590_v41  ;;  %v4096_v31 = vadd.f32 %v10019_v54, %v3500_v49  ;;  %v2259_v60 = vadd.f32 %v1747_v51, %v1021_v6  ;;  %v1007_v11 = vmul.f32 %v10066_v45, %v12105_v39  ;;  %v10889_v17 = vpop.f32.mrb[5].mxu1  ;;  %v12113_v6 = vld [vmem:[#allocation49_spill] sm:$0xff] }
 0x45f   : > { %v4592_v25 = vmax.f32 %v4080_v38, 0.0  ;;  %v3481_v34 = vadd.f32 %v2969_v23, %v2243_v63  ;;  %v1023_v43 = vmul.f32 %v10066_v45, %v12106_v42  ;;  %v1733_v5 = vmul.f32 %v10076_v8, %v12107_v26  ;;  %v12114_v22 = vld [vmem:[#allocation89_spill] sm:$0xff]  ;;  %v12116_v38 = vld [vmem:[#allocation96_spill] sm:$0xff] }
 0x460   : > { %5911 = vmatprep.subr.bf16.mxu0 %v5910_v15  ;;  %v4608_v57 = vmax.f32 %v4096_v31, 0.0  ;;  %v3497_v3 = vadd.f32 %v2985_v29, %v2259_v60  ;;  %v1749_v37 = vmul.f32 %v10076_v8, %v12108_v21  ;;  %v2971_v32 = vmul.f32 %v10079_v46, %v12109_v35  ;;  %v12115_v49 = vld [vmem:[#allocation53_spill] sm:$0xff] }
 0x461   : > { %v4077_v39 = vadd.f32 %v10051_v50, %v3481_v34  ;;  %v2245_v30 = vadd.f32 %v1733_v5, %v1007_v11  ;;  %v2987_v44 = vmul.f32 %v10079_v46, %v12110_v20  ;;  %v1038_v42 = vmul.f32 %v9961_v24, %v12111_v7 }
 0x462   : > { %v5974_v0 = vpack.c.bf16 %v4608_v57, %v4592_v25  ;;  %v4093_v26 = vadd.f32 %v10051_v50, %v3497_v3  ;;  %v2261_v56 = vadd.f32 %v1749_v37, %v1023_v43  ;;  %v1054_v40 = vmul.f32 %v9961_v24, %v12112_v12 }
 0x463   : > { %v4589_v21 = vmax.f32 %v4077_v39, 0.0  ;;  %v3483_v16 = vadd.f32 %v2971_v32, %v2245_v30  ;;  %v1764_v35 = vmul.f32 %v9971_v55, %v12113_v6  ;;  %v1780_v41 = vmul.f32 %v9971_v55, %v12114_v22 }
 0x464   : > { %5975 = vmatprep.subr.bf16.mxu1 %v5974_v0  ;;  %v4605_v20 = vmax.f32 %v4093_v26, 0.0  ;;  %v3499_v1 = vadd.f32 %v2987_v44, %v2261_v56  ;;  %v3002_v51 = vmul.f32 %v9986_v18, %v12115_v49  ;;  %v3018_v63 = vmul.f32 %v9986_v18, %v12116_v38 }
 0x465   : > { %v4079_v23 = vadd.f32 %v10093_v36, %v3483_v16  ;;  %v2276_v24 = vadd.f32 %v1764_v35, %v1038_v42  ;;  %v2292_v29 = vadd.f32 %v1780_v41, %v1054_v40  ;;  %v1040_v15 = vmul.f32 %v9999_v2, %v12111_v7 }
 0x466   : > { %v5912_v31 = vpack.c.bf16 %v4605_v20, %v4589_v21  ;;  %v4095_v60 = vadd.f32 %v10093_v36, %v3499_v1  ;;  %v1056_v55 = vmul.f32 %v9999_v2, %v12112_v12  ;;  %v1766_v11 = vmul.f32 %v10012_v27, %v12113_v6 }
 0x467   : > { %v4591_v25 = vmax.f32 %v4079_v23, 0.0  ;;  %v3514_v34 = vadd.f32 %v3002_v51, %v2276_v24  ;;  %v3530_v43 = vadd.f32 %v3018_v63, %v2292_v29  ;;  %v1782_v18 = vmul.f32 %v10012_v27, %v12114_v22 }
 0x468   : > { %5913 = vmatpush1.bf16.msra.mxu0 %v5912_v31  ;;  %v4607_v5 = vmax.f32 %v4095_v60, 0.0  ;;  %v2278_v57 = vadd.f32 %v1766_v11, %v1040_v15  ;;  %v3004_v3 = vmul.f32 %v10015_v59, %v12115_v49  ;;  %v3020_v37 = vmul.f32 %v10015_v59, %v12116_v38 }
 0x469   : > { %v4110_v2 = vadd.f32 %v9995_v53, %v3514_v34  ;;  %v4126_v32 = vadd.f32 %v9995_v53, %v3530_v43  ;;  %v2294_v39 = vadd.f32 %v1782_v18, %v1056_v55  ;;  %v1037_v30 = vmul.f32 %v10023_v13, %v12111_v7 }
 0x46a   : > { %v5976_v44 = vpack.c.bf16 %v4607_v5, %v4591_v25  ;;  %v3516_v42 = vadd.f32 %v3004_v3, %v2278_v57  ;;  %v1053_v27 = vmul.f32 %v10023_v13, %v12112_v12  ;;  %v1763_v0 = vmul.f32 %v10044_v58, %v12113_v6 }
 0x46b   : > { %v4622_v26 = vmax.f32 %v4110_v2, 0.0  ;;  %v4638_v56 = vmax.f32 %v4126_v32, 0.0  ;;  %v3532_v40 = vadd.f32 %v3020_v37, %v2294_v39  ;;  %v1779_v59 = vmul.f32 %v10044_v58, %v12114_v22 }
 0x46c   : > { %5977 = vmatpush1.bf16.msra.mxu1 %v5976_v44  ;;  %v4112_v53 = vadd.f32 %v10019_v54, %v3516_v42  ;;  %v2275_v21 = vadd.f32 %v1763_v0, %v1037_v30  ;;  %v3001_v16 = vmul.f32 %v10047_v48, %v12115_v49  ;;  %v3017_v35 = vmul.f32 %v10047_v48, %v12116_v38 }
 0x46d   : > { %v5914_v13 = vpack.c.bf16 %v4638_v56, %v4622_v26  ;;  %v4128_v41 = vadd.f32 %v10019_v54, %v3532_v40  ;;  %v2291_v20 = vadd.f32 %v1779_v59, %v1053_v27  ;;  %v1039_v1 = vmul.f32 %v10066_v45, %v12111_v7 }
 0x46e   : > { %v4624_v51 = vmax.f32 %v4112_v53, 0.0  ;;  %v3513_v63 = vadd.f32 %v3001_v16, %v2275_v21  ;;  %v1055_v58 = vmul.f32 %v10066_v45, %v12112_v12  ;;  %v1765_v23 = vmul.f32 %v10076_v8, %v12113_v6 }
 0x46f   : > { %5915 = vmatprep.subr.bf16.mxu0 %v5914_v13  ;;  %v4640_v24 = vmax.f32 %v4128_v41, 0.0  ;;  %v3529_v29 = vadd.f32 %v3017_v35, %v2291_v20  ;;  %v1781_v48 = vmul.f32 %v10076_v8, %v12114_v22  ;;  %v3003_v54 = vmul.f32 %v10079_v46, %v12115_v49 }
 0x470   : > { %v4109_v15 = vadd.f32 %v10051_v50, %v3513_v63  ;;  %v2277_v7 = vadd.f32 %v1765_v23, %v1039_v1  ;;  %v3019_v31 = vmul.f32 %v10079_v46, %v12116_v38  ;;  %v6105_v6 = vmov 0.0  }
 0x471   : > { %v5978_v60 = vpack.c.bf16 %v4640_v24, %v4624_v51  ;;  %v4125_v45 = vadd.f32 %v10051_v50, %v3529_v29  ;;  %v2293_v12 = vadd.f32 %v1781_v48, %v1055_v58  ;;  %252 = vst [vmem:[#allocation2] sm:$0x3f] %v6105_v6  ;;  %253 = vst [vmem:[#allocation2 + $0x8] sm:$0x3f] %v6105_v6 }
 0x472   : > { %254 = vst [vmem:[#allocation2 + $0x10] sm:$0x3f] %v6105_v6  ;;  %255 = vst [vmem:[#allocation2 + $0x18] sm:$0x3f] %v6105_v6  ;;  %v3515_v8 = vadd.f32 %v3003_v54, %v2277_v7  ;;  %v4621_v50 = vmax.f32 %v4109_v15, 0.0 }
 0x473   : > { %256 = vst [vmem:[#allocation2 + $0x20] sm:$0x3f] %v6105_v6  ;;  %257 = vst [vmem:[#allocation2 + $0x28] sm:$0x3f] %v6105_v6  ;;  %5979 = vmatprep.subr.bf16.mxu1 %v5978_v60  ;;  %v4637_v46 = vmax.f32 %v4125_v45, 0.0  ;;  %v3531_v22 = vadd.f32 %v3019_v31, %v2293_v12 }
 0x474   : > { %258 = vst [vmem:[#allocation2 + $0x30] sm:$0x3f] %v6105_v6  ;;  %259 = vst [vmem:[#allocation2 + $0x38] sm:$0x3f] %v6105_v6  ;;  %v4111_v49 = vadd.f32 %v10093_v36, %v3515_v8 }
 0x475   : > { %260 = vst [vmem:[#allocation2 + $0x40] sm:$0x3f] %v6105_v6  ;;  %261 = vst [vmem:[#allocation2 + $0x48] sm:$0x3f] %v6105_v6  ;;  %v5916_v38 = vpack.c.bf16 %v4637_v46, %v4621_v50  ;;  %v4127_v55 = vadd.f32 %v10093_v36, %v3531_v22  ;;  %v6077_v36 = vld [vmem:[%s11002_s3] sm:$0x3f] }
 0x476   : > { %262 = vst [vmem:[#allocation2 + $0x50] sm:$0x3f] %v6105_v6  ;;  %263 = vst [vmem:[#allocation2 + $0x58] sm:$0x3f] %v6105_v6  ;;  %v4623_v11 = vmax.f32 %v4111_v49, 0.0 }
 0x477   : > { %264 = vst [vmem:[#allocation2 + $0x60] sm:$0x3f] %v6105_v6  ;;  %265 = vst [vmem:[#allocation2 + $0x68] sm:$0x3f] %v6105_v6  ;;  %5917 = vmatpush1.bf16.msra.mxu0 %v5916_v38  ;;  %v4639_v25 = vmax.f32 %v4127_v55, 0.0 }
 0x478   : > { %266 = vst [vmem:[#allocation2 + $0x70] sm:$0x3f] %v6105_v6  ;;  %267 = vst [vmem:[#allocation2 + $0x78] sm:$0x3f] %v6105_v6  ;;  %v4641_v34 = vld [vmem:[#allocation2] sm:$0x3f] }
 0x479   : > { %v4643_v43 = vld [vmem:[#allocation2 + $0x10] sm:$0x3f]  ;;  %v4642_v18 = vld [vmem:[#allocation2 + $0x8] sm:$0x3f]  ;;  %v5980_v5 = vpack.c.bf16 %v4639_v25, %v4623_v11  ;;  %v5227_v57 = vadd.f32 %v10509_v10, %v4641_v34  ;;  %v4644_v2 = vld [vmem:[#allocation2 + $0x18] sm:$0x3f] }
 0x47a   : > { %v5229_v3 = vadd.f32 %v10525_v47, %v4643_v43  ;;  %v5228_v37 = vadd.f32 %v10527_v33, %v4642_v18  ;;  %v4645_v32 = vld [vmem:[#allocation2 + $0x20] sm:$0x3f]  ;;  %5150 = vmatmul.mubr.f32.vlgmr.msra.gmra.mrb[6].mxu0 %v6077_v36  ;;  %v5230_v30 = vadd.f32 %v10541_v19, %v4644_v2  ;;  %v4646_v27 = vld [vmem:[#allocation2 + $0x28] sm:$0x3f] }
 0x47b   : > { %v4647_v39 = vld [vmem:[#allocation2 + $0x30] sm:$0x3f]  ;;  %v5231_v44 = vadd.f32 %v10547_v62, %v4645_v32  ;;  %v4648_v10 = vld [vmem:[#allocation2 + $0x38] sm:$0x3f]  ;;  %5981 = vmatpush1.bf16.msra.mxu1 %v5980_v5  ;;  %5243 = vst [vmem:[#allocation2] sm:$0x3f] %v5227_v57  ;;  %v5232_v47 = vadd.f32 %v10556_v4, %v4646_v27 }
 0x47c   : > { %v5233_v42 = vadd.f32 %v10549_v28, %v4647_v39  ;;  %v4649_v0 = vld [vmem:[#allocation2 + $0x40] sm:$0x3f]  ;;  %5245 = vst [vmem:[#allocation2 + $0x10] sm:$0x3f] %v5229_v3  ;;  %5244 = vst [vmem:[#allocation2 + $0x8] sm:$0x3f] %v5228_v37  ;;  %v5234_v33 = vadd.f32 %v10558_v14, %v4648_v10 }
 0x47d   : > { %v5235_v26 = vadd.f32 %v10865_v52, %v4649_v0  ;;  %v4651_v56 = vld [vmem:[#allocation2 + $0x50] sm:$0x3f]  ;;  %v4650_v19 = vld [vmem:[#allocation2 + $0x48] sm:$0x3f]  ;;  %v4652_v40 = vld [vmem:[#allocation2 + $0x58] sm:$0x3f] }
 0x47e   : > { %5246 = vst [vmem:[#allocation2 + $0x18] sm:$0x3f] %v5230_v30  ;;  %5247 = vst [vmem:[#allocation2 + $0x20] sm:$0x3f] %v5231_v44  ;;  %v5237_v62 = vadd.f32 %v10884_v61, %v4651_v56  ;;  %v5236_v28 = vadd.f32 %v10871_v9, %v4650_v19  ;;  %v5238_v59 = vadd.f32 %v10889_v17, %v4652_v40  ;;  %5221 = vmatmul.mubr.f32.vlgmr.msra.gmra.mrb[6].mxu1 %v6077_v36  ;;  %v4653_v24 = vld [vmem:[#allocation2 + $0x60] sm:$0x3f] }
 0x47f   : > { %5249 = vst [vmem:[#allocation2 + $0x30] sm:$0x3f] %v5233_v42  ;;  %5248 = vst [vmem:[#allocation2 + $0x28] sm:$0x3f] %v5232_v47  ;;  %v4654_v29 = vld [vmem:[#allocation2 + $0x68] sm:$0x3f] }
 0x480   : > { %5250 = vst [vmem:[#allocation2 + $0x38] sm:$0x3f] %v5234_v33  ;;  %5251 = vst [vmem:[#allocation2 + $0x40] sm:$0x3f] %v5235_v26  ;;  %v4655_v7 = vld [vmem:[#allocation2 + $0x70] sm:$0x3f] }
 0x481   : > { %5253 = vst [vmem:[#allocation2 + $0x50] sm:$0x3f] %v5237_v62  ;;  %5252 = vst [vmem:[#allocation2 + $0x48] sm:$0x3f] %v5236_v28  ;;  %v4656_v60 = vld [vmem:[#allocation2 + $0x78] sm:$0x3f] }
 0x482   : > { %5254 = vst [vmem:[#allocation2 + $0x58] sm:$0x3f] %v5238_v59  ;;  %v5262_v4 = vld [vmem:[#allocation2] sm:$0x3f] }
 0x483   : > { %v5264_v14 = vld [vmem:[#allocation2 + $0x10] sm:$0x3f]  ;;  %v5263_v52 = vld [vmem:[#allocation2 + $0x8] sm:$0x3f] }
 0x484   : > { %v5462_v9 = vpack.c.bf16 %v5263_v52, %v5262_v4 }
 0x485   : > { %v5265_v61 = vld [vmem:[#allocation2 + $0x18] sm:$0x3f]  ;;  %v5266_v17 = vld [vmem:[#allocation2 + $0x20] sm:$0x3f] }
 0x486   : > { %v5268_v53 = vld [vmem:[#allocation2 + $0x30] sm:$0x3f]  ;;  %v5463_v21 = vpack.c.bf16 %v5265_v61, %v5264_v14  ;;  %v5267_v16 = vld [vmem:[#allocation2 + $0x28] sm:$0x3f]  ;;  %5342 = vst [vmem:[%s10980_s22] sm:$0x77] %v5462_v9 }
 0x487   : > { %v5269_v35 = vld [vmem:[#allocation2 + $0x38] sm:$0x3f]  ;;  %v5270_v13 = vld [vmem:[#allocation2 + $0x40] sm:$0x3f]  ;;  %v5464_v41 = vpack.c.bf16 %v5267_v16, %v5266_v17 }
 0x488   : > { %v5465_v20 = vpack.c.bf16 %v5269_v35, %v5268_v53  ;;  %v5272_v1 = vld [vmem:[#allocation2 + $0x50] sm:$0x3f]  ;;  %v5271_v51 = vld [vmem:[#allocation2 + $0x48] sm:$0x3f]  ;;  %5343 = vst [vmem:[%s10980_s22 + $0x8] sm:$0x77] %v5463_v21 }
 0x489   : > { %v5273_v63 = vld [vmem:[#allocation2 + $0x58] sm:$0x3f]  ;;  %v5466_v58 = vpack.c.bf16 %v5271_v51, %v5270_v13  ;;  %5344 = vst [vmem:[%s10980_s22 + $0x10] sm:$0x77] %v5464_v41 }
 0x48a   : > { %v5467_v23 = vpack.c.bf16 %v5273_v63, %v5272_v1  ;;  %5345 = vst [vmem:[%s10980_s22 + $0x18] sm:$0x77] %v5465_v20 }
 0x48b   : > { %5346 = vst [vmem:[%s10980_s22 + $0x20] sm:$0x77] %v5466_v58 }
 0x48c   : > { %5347 = vst [vmem:[%s10980_s22 + $0x28] sm:$0x77] %v5467_v23 }
 0x54d   : > { %v5151_v48 = vpop.f32.mrb[6].mxu0 }
 0x54e   : > { %v5239_v54 = vadd.f32 %v5151_v48, %v4653_v24  ;;  %v5153_v15 = vpop.f32.mrb[7].mxu0 }
 0x54f   : > { %v5240_v31 = vadd.f32 %v5153_v15, %v4654_v29 }
 0x550   : > { %5255 = vst [vmem:[#allocation2 + $0x60] sm:$0x3f] %v5239_v54 }
 0x551   : > { %v5222_v45 = vpop.f32.mrb[6].mxu1  ;;  %5256 = vst [vmem:[#allocation2 + $0x68] sm:$0x3f] %v5240_v31 }
 0x552   : > { %v5241_v12 = vadd.f32 %v5222_v45, %v4655_v7  ;;  %v5224_v6 = vpop.f32.mrb[7].mxu1 }
 0x553   : > { %v5242_v8 = vadd.f32 %v5224_v6, %v4656_v60 }
 0x554   : > { %5257 = vst [vmem:[#allocation2 + $0x70] sm:$0x3f] %v5241_v12 }
 0x555   : > { %5258 = vst [vmem:[#allocation2 + $0x78] sm:$0x3f] %v5242_v8 }
 0x557   : > { %v5274_v50 = vld [vmem:[#allocation2 + $0x60] sm:$0x3f] }
 0x558   : > { %v5275_v46 = vld [vmem:[#allocation2 + $0x68] sm:$0x3f] }
 0x559   : > { %v5468_v22 = vpack.c.bf16 %v5275_v46, %v5274_v50 }
 0x55b   : > { %v5276_v49 = vld [vmem:[#allocation2 + $0x70] sm:$0x3f]  ;;  %5348 = vst [vmem:[%s10980_s22 + $0x30] sm:$0x77] %v5468_v22 }
 0x55c   : > { %v5277_v38 = vld [vmem:[#allocation2 + $0x78] sm:$0x3f] }
 0x55d   : > { %v5469_v55 = vpack.c.bf16 %v5277_v38, %v5276_v49 }
 0x55f   : > { %5349 = vst [vmem:[%s10980_s22 + $0x38] sm:$0x77] %v5469_v55 }
 0x560 PF: > { %s14_s17 = sadd.s32 1, %s6100_s17   ;;  %s12117_s15 = smov %s6096_s16 }
 0x561   : > { %p11_p5 = scmp.ge.s32.totalorder %s14_s17, 4   ;;  %s12118_s16 = smov %s12120_s18 }
 0x563   :  { %13 = sbr.rel (!%p11_p5) target bundleno = 2 (0x2), region = 82 }

</bundles_post_ra>
